<compile_context>
chip_gen: v5e
topology: v5e:2x2
jax: 0.10.0
libtpu: 0.0.40
codegen_flags: <defaults>
</compile_context>

<pallas_src>
import functools

import jax
import jax.numpy as jnp
from jax.experimental import pallas as pl
from jax.experimental.pallas import tpu as pltpu

EPS = 1e-5


# ----------------------------------------------------------------------------
# In-kernel helpers
# ----------------------------------------------------------------------------
def _win(off, size, s):
    """Static window along one spatial dim: indices off, off+s, ..., off+(size-1)*s."""
    return pl.ds(off, size, s) if s > 1 else pl.ds(off, size)


def _im2col_3x3(ref, oh, ow, s):
    """Gather the 9 taps of a 3x3/stride-s conv from a zero-padded VMEM ref.

    ref: (N, H+2, W+2, C).  Returns a single (N*oh*ow, 9*C) bf16 im2col operand
    (taps concatenated along the channel/lane axis, (dy, dx) row-major)."""
    n = ref.shape[0]
    c = ref.shape[-1]
    taps = []
    for dy in range(3):
        ih = _win(dy, oh, s)
        for dx in range(3):
            iw = _win(dx, ow, s)
            t = ref[:, ih, iw, :]                      # (N, oh, ow, C)
            taps.append(t.reshape(n * oh * ow, c))
    return jnp.concatenate(taps, axis=-1).astype(jnp.bfloat16)


def _bn(y, g, b, relu):
    """Training-mode BatchNorm (biased batch stats), two-pass (no cancellation)."""
    inv_m = 1.0 / y.shape[0]
    mean = jnp.sum(y, axis=0, keepdims=True) * inv_m
    d = y - mean
    var = jnp.sum(d * d, axis=0, keepdims=True) * inv_m
    out = d * jax.lax.rsqrt(var + EPS) * g + b
    return jnp.maximum(out, 0.0) if relu else out


def _store_padded(pad_ref, val_4d):
    """Write val (N,H,W,C) into the interior of (N,H+2,W+2,C) scratch; zero only
    the 1-element border instead of zero-filling the whole buffer."""
    n, h, w, c = val_4d.shape
    dt = pad_ref.dtype
    zrow = jnp.zeros((n, 1, w + 2, c), dt)
    zcol = jnp.zeros((n, h, 1, c), dt)
    pad_ref[:, 0:1, :, :] = zrow
    pad_ref[:, h + 1:h + 2, :, :] = zrow
    pad_ref[:, 1:h + 1, 0:1, :] = zcol
    pad_ref[:, 1:h + 1, w + 1:w + 2, :] = zcol
    pad_ref[:, 1:h + 1, 1:w + 1, :] = val_4d.astype(dt)


# ----------------------------------------------------------------------------
# Fused Bottleneck kernel
# ----------------------------------------------------------------------------
def _bottleneck_kernel(x_ref, w1_ref, w2_ref, w3_ref, wd_ref, wdn_ref, wup_ref,
                       g1_ref, b1_ref, g2_ref, b2_ref, g3_ref, b3_ref,
                       gd_ref, bd_ref,
                       out_ref, o1_pad_ref, o2_pad_ref, *, stride):
    f32 = jnp.float32
    n, hp, wp, cin = x_ref.shape
    hh, ww = hp - 2, wp - 2                                    # input spatial dims
    oh, ow = o2_pad_ref.shape[1] - 2, o2_pad_ref.shape[2] - 2  # output spatial dims
    planes = g1_ref.shape[-1]
    m2 = n * oh * ow

    # ---- conv1 (3x3, s=1) + bn1 + relu : one im2col matmul, K = 9*cin ------
    p1 = _im2col_3x3(x_ref, hh, ww, 1)                          # (M1, 9*cin) bf16
    o1 = _bn(jnp.dot(p1, w1_ref[...], preferred_element_type=f32),
             g1_ref[...], b1_ref[...], relu=True)               # (M1, planes) f32
    _store_padded(o1_pad_ref, o1.reshape(n, hh, ww, planes))    # stays in VMEM

    # ---- conv2 (3x3, stride s) + bn2 + relu --------------------------------
    # Taps gathered directly at strided output positions (no dense conv, no
    # one-hot selection matmul): only m2 positions are ever computed.
    p2 = _im2col_3x3(o1_pad_ref, oh, ow, stride)                # (M2, 9*planes) bf16
    o2 = _bn(jnp.dot(p2, w2_ref[...], preferred_element_type=f32),
             g2_ref[...], b2_ref[...], relu=True)               # (M2, planes)
    _store_padded(o2_pad_ref, o2.reshape(n, oh, ow, planes))

    # ---- conv3 (3x3, s=1) + bn3 (no relu) ----------------------------------
    p3 = _im2col_3x3(o2_pad_ref, oh, ow, 1)                     # (M2, 9*planes) bf16
    o3 = _bn(jnp.dot(p3, w3_ref[...], preferred_element_type=f32),
             g3_ref[...], b3_ref[...], relu=False)              # (M2, planes)

    # ---- downsample residual: 1x1 stride-s conv + bn -----------------------
    # x at strided positions, read straight from the padded input (offset 1).
    xs = x_ref[:, _win(1, oh, stride), _win(1, ow, stride), :]
    xs = xs.reshape(m2, cin).astype(jnp.bfloat16)
    res = _bn(jnp.dot(xs, wd_ref[...], preferred_element_type=f32),
              gd_ref[...], bd_ref[...], relu=False)             # (M2, planes)

    # ---- SE branch (on VMEM-resident o3) + final combine -------------------
    o3_3d = o3.reshape(n, oh * ow, planes)
    pooled = jnp.mean(o3_3d, axis=1)                            # (N, planes)
    z = jnp.maximum(jnp.dot(pooled, wdn_ref[...], preferred_element_type=f32), 0.0)
    s_se = jax.nn.sigmoid(jnp.dot(z, wup_ref[...], preferred_element_type=f32))

    y = s_se[:, None, :] * o3_3d + res.reshape(n, oh * ow, planes)
    out_ref[...] = y.reshape(m2, planes)
    # TODO(synk): lane-dense (planes, M2) output slab and a v7x megacore grid
    #             (with cross-tile BN partial sums) are the next perf steps.


# ----------------------------------------------------------------------------
# Wrapper
# ----------------------------------------------------------------------------
def _vmem():
    return pl.BlockSpec(memory_space=pltpu.MemorySpace.VMEM)


def _derive_vmem_limit(needed_bytes):
    cap = 64 * 1024 * 1024
    try:
        cap = getattr(pltpu.get_tpu_info(), "vmem_capacity_bytes", cap)
    except Exception:
        pass
    # generous floor (cheap at toy shapes), leave headroom under physical VMEM.
    return int(min(int(0.75 * cap), max(32 * 1024 * 1024, 2 * needed_bytes)))


def bottleneck_forward(x_nchw, params, stride):
    f32, bf16 = jnp.float32, jnp.bfloat16
    x = jnp.transpose(x_nchw, (0, 2, 3, 1)).astype(f32)        # NCHW -> NHWC
    n, hh, ww, cin = x.shape
    planes = params["g1"].shape[-1]
    oh, ow = (hh - 1) // stride + 1, (ww - 1) // stride + 1
    m1, m2 = n * hh * ww, n * oh * ow

    x_pad = jnp.pad(x, ((0, 0), (1, 1), (1, 1), (0, 0)))       # wrapper-side prep only

    args = [x_pad,
            params["w1"].reshape(9 * cin, planes).astype(bf16),     # im2col weights
            params["w2"].reshape(9 * planes, planes).astype(bf16),
            params["w3"].reshape(9 * planes, planes).astype(bf16),
            params["wd"].astype(bf16),
            params["w_down"], params["w_up"],
            params["g1"], params["b1"], params["g2"], params["b2"],
            params["g3"], params["b3"], params["gd"], params["bd"]]

    flops = int(2 * m1 * (9 * cin) * planes                    # conv1
                + 2 * m2 * (9 * planes) * planes               # conv2 (strided positions only)
                + 2 * m2 * (9 * planes) * planes               # conv3
                + 2 * m2 * cin * planes                        # 1x1 downsample
                + 4 * n * planes * (planes // 4))              # SE
    out_bytes = m2 * planes * 4
    bytes_accessed = int(sum(a.size * a.dtype.itemsize for a in args) + out_bytes)

    scratch_bytes = 4 * (n * (hh + 2) * (ww + 2) * planes
                         + n * (oh + 2) * (ow + 2) * planes)
    vmem_limit = _derive_vmem_limit(bytes_accessed + scratch_bytes)

    kernel = functools.partial(_bottleneck_kernel, stride=stride)
    out = pl.pallas_call(
        kernel,
        out_shape=jax.ShapeDtypeStruct((m2, planes), f32),
        in_specs=[_vmem()] * len(args),
        out_specs=_vmem(),
        scratch_shapes=[pltpu.VMEM((n, hh + 2, ww + 2, planes), f32),   # padded o1
                        pltpu.VMEM((n, oh + 2, ow + 2, planes), f32)],  # padded o2
        compiler_params=pltpu.CompilerParams(vmem_limit_bytes=vmem_limit),
        cost_estimate=pl.CostEstimate(flops=flops,
                                      transcendentals=int(n * planes),
                                      bytes_accessed=bytes_accessed),
    )(*args)

    y = out.reshape(n, oh, ow, planes)
    return jnp.transpose(y, (0, 3, 1, 2))                       # NHWC -> NCHW


# ----------------------------------------------------------------------------
# Pure-JAX reference (for verification).
# Same mixed-precision policy as the kernel (bf16 conv operands, f32
# accumulation, f32 BatchNorm / SE epilogues), so the comparison isolates
# implementation errors from the intentional bf16 policy.
# ----------------------------------------------------------------------------
def _conv_ref(x, w_hwio, stride, padding):
    return jax.lax.conv_general_dilated(
        x.astype(jnp.bfloat16), w_hwio.astype(jnp.bfloat16),
        (stride, stride), ((padding, padding), (padding, padding)),
        dimension_numbers=("NHWC", "HWIO", "NHWC"),
        preferred_element_type=jnp.float32)


def _bn_ref(x, g, b):
    mean = jnp.mean(x, axis=(0, 1, 2), keepdims=True)
    var = jnp.mean((x - mean) ** 2, axis=(0, 1, 2), keepdims=True)
    return (x - mean) * jax.lax.rsqrt(var + EPS) * g.reshape(1, 1, 1, -1) \
        + b.reshape(1, 1, 1, -1)


def bottleneck_reference(x_nchw, params, stride):
    x = jnp.transpose(x_nchw, (0, 2, 3, 1)).astype(jnp.float32)
    cin = x.shape[-1]
    planes = params["g1"].shape[-1]

    w1 = params["w1"].reshape(3, 3, cin, planes)
    w2 = params["w2"].reshape(3, 3, planes, planes)
    w3 = params["w3"].reshape(3, 3, planes, planes)

    out = jnp.maximum(_bn_ref(_conv_ref(x, w1, 1, 1), params["g1"], params["b1"]), 0.0)
    out = jnp.maximum(_bn_ref(_conv_ref(out, w2, stride, 1), params["g2"], params["b2"]), 0.0)
    out = _bn_ref(_conv_ref(out, w3, 1, 1), params["g3"], params["b3"])

    pooled = jnp.mean(out, axis=(1, 2))                            # (N, C)
    z = jnp.maximum(pooled @ params["w_down"], 0.0)
    s = jax.nn.sigmoid(z @ params["w_up"])                         # (N, C)

    wd = params["wd"].reshape(1, 1, cin, planes)
    residual = _bn_ref(_conv_ref(x, wd, stride, 0), params["gd"], params["bd"])

    y = s[:, None, None, :] * out + residual
    return jnp.transpose(y, (0, 3, 1, 2))


# ----------------------------------------------------------------------------
# Deterministic parameter construction (shapes per Bottleneck.__init__)
# ----------------------------------------------------------------------------
def make_params(key, inplanes, planes):
    ks = jax.random.split(key, 12)
    f32 = jnp.float32

    def conv_w(k, taps, cin, cout):
        return (jax.random.normal(k, (taps, cin, cout), f32)
                * jnp.sqrt(2.0 / (taps * cin)))

    def bn_pair(kg, kb, c):
        g = 1.0 + 0.1 * jax.random.normal(kg, (1, c), f32)
        b = 0.1 * jax.random.normal(kb, (1, c), f32)
        return g, b

    g1, b1 = bn_pair(ks[3], ks[4], planes)
    g2, b2 = bn_pair(ks[5], ks[6], planes)
    g3, b3 = bn_pair(ks[7], ks[8], planes)
    gd, bd = bn_pair(ks[9], ks[10], planes)
    return {
        "w1": conv_w(ks[0], 9, inplanes, planes),
        "w2": conv_w(ks[1], 9, planes, planes),
        "w3": conv_w(ks[2], 9, planes, planes),
        "g1": g1, "b1": b1, "g2": g2, "b2": b2, "g3": g3, "b3": b3,
        "wd": (jax.random.normal(ks[11], (inplanes, planes), f32)
               * jnp.sqrt(2.0 / inplanes)),
        "gd": gd, "bd": bd,
        "w_down": (jax.random.normal(jax.random.fold_in(key, 100),
                                     (planes, planes // 4), f32)
                   * jnp.sqrt(2.0 / planes)),
        "w_up": (jax.random.normal(jax.random.fold_in(key, 101),
                                   (planes // 4, planes), f32)
                 * jnp.sqrt(2.0 / (planes // 4))),
    }


# ----------------------------------------------------------------------------
if __name__ == "__main__":
    key = jax.random.PRNGKey(0)
    k_x, k_p = jax.random.split(key)

    N, INPLANES, PLANES, H, W, STRIDE = 2, 8, 16, 16, 16, 2
    x = jax.random.normal(k_x, (N, INPLANES, H, W), jnp.float32)   # NCHW input
    params = make_params(k_p, INPLANES, PLANES)

    out = bottleneck_forward(x, params, STRIDE)
    out = jax.block_until_ready(out)

    ref = jax.block_until_ready(bottleneck_reference(x, params, STRIDE))

    assert out.shape == (N, PLANES, H // STRIDE, W // STRIDE), out.shape
    assert jnp.allclose(out, ref, rtol=2e-2, atol=2e-2), \
        f"max abs diff {jnp.max(jnp.abs(out - ref))}"

    print("KERNEL_OK")
</pallas_src>

<mosaic_0001>
module attributes {stable_mosaic.version = 11 : i64} {
  func.func @_bottleneck_kernel(%arg0: memref<2x18x18x8xf32, #tpu.memory_space<vmem>>, %arg1: memref<72x16xbf16, #tpu.memory_space<vmem>>, %arg2: memref<144x16xbf16, #tpu.memory_space<vmem>>, %arg3: memref<144x16xbf16, #tpu.memory_space<vmem>>, %arg4: memref<8x16xbf16, #tpu.memory_space<vmem>>, %arg5: memref<16x4xf32, #tpu.memory_space<vmem>>, %arg6: memref<4x16xf32, #tpu.memory_space<vmem>>, %arg7: memref<1x16xf32, #tpu.memory_space<vmem>>, %arg8: memref<1x16xf32, #tpu.memory_space<vmem>>, %arg9: memref<1x16xf32, #tpu.memory_space<vmem>>, %arg10: memref<1x16xf32, #tpu.memory_space<vmem>>, %arg11: memref<1x16xf32, #tpu.memory_space<vmem>>, %arg12: memref<1x16xf32, #tpu.memory_space<vmem>>, %arg13: memref<1x16xf32, #tpu.memory_space<vmem>>, %arg14: memref<1x16xf32, #tpu.memory_space<vmem>>, %arg15: memref<128x16xf32, #tpu.memory_space<vmem>>, %arg16: memref<2x18x18x16xf32, #tpu.memory_space<vmem>>, %arg17: memref<2x10x10x16xf32, #tpu.memory_space<vmem>>) attributes {dimension_semantics = [], scalar_prefetch = 0 : i64, scratch_operands = 2 : i64, tpu.core_type = #tpu.core_type<tc>} {
    %c0 = arith.constant 0 : index
    %c0_0 = arith.constant 0 : index
    %c0_1 = arith.constant 0 : index
    %c0_2 = arith.constant 0 : index
    %0 = vector.load %arg0[%c0, %c0_0, %c0_1, %c0_2] : memref<2x18x18x8xf32, #tpu.memory_space<vmem>>, vector<2x16x16x8xf32>
    %1 = vector.shape_cast %0 : vector<2x16x16x8xf32> to vector<512x8xf32>
    %c0_3 = arith.constant 0 : index
    %c0_4 = arith.constant 0 : index
    %c1 = arith.constant 1 : index
    %c0_5 = arith.constant 0 : index
    %2 = vector.load %arg0[%c0_3, %c0_4, %c1, %c0_5] : memref<2x18x18x8xf32, #tpu.memory_space<vmem>>, vector<2x16x16x8xf32>
    %3 = vector.shape_cast %2 : vector<2x16x16x8xf32> to vector<512x8xf32>
    %c0_6 = arith.constant 0 : index
    %c0_7 = arith.constant 0 : index
    %c2 = arith.constant 2 : index
    %c0_8 = arith.constant 0 : index
    %4 = vector.load %arg0[%c0_6, %c0_7, %c2, %c0_8] : memref<2x18x18x8xf32, #tpu.memory_space<vmem>>, vector<2x16x16x8xf32>
    %5 = vector.shape_cast %4 : vector<2x16x16x8xf32> to vector<512x8xf32>
    %c0_9 = arith.constant 0 : index
    %c1_10 = arith.constant 1 : index
    %c0_11 = arith.constant 0 : index
    %c0_12 = arith.constant 0 : index
    %6 = vector.load %arg0[%c0_9, %c1_10, %c0_11, %c0_12] : memref<2x18x18x8xf32, #tpu.memory_space<vmem>>, vector<2x16x16x8xf32>
    %7 = vector.shape_cast %6 : vector<2x16x16x8xf32> to vector<512x8xf32>
    %c0_13 = arith.constant 0 : index
    %c1_14 = arith.constant 1 : index
    %c1_15 = arith.constant 1 : index
    %c0_16 = arith.constant 0 : index
    %8 = vector.load %arg0[%c0_13, %c1_14, %c1_15, %c0_16] : memref<2x18x18x8xf32, #tpu.memory_space<vmem>>, vector<2x16x16x8xf32>
    %9 = vector.shape_cast %8 : vector<2x16x16x8xf32> to vector<512x8xf32>
    %c0_17 = arith.constant 0 : index
    %c1_18 = arith.constant 1 : index
    %c2_19 = arith.constant 2 : index
    %c0_20 = arith.constant 0 : index
    %10 = vector.load %arg0[%c0_17, %c1_18, %c2_19, %c0_20] : memref<2x18x18x8xf32, #tpu.memory_space<vmem>>, vector<2x16x16x8xf32>
    %11 = vector.shape_cast %10 : vector<2x16x16x8xf32> to vector<512x8xf32>
    %c0_21 = arith.constant 0 : index
    %c2_22 = arith.constant 2 : index
    %c0_23 = arith.constant 0 : index
    %c0_24 = arith.constant 0 : index
    %12 = vector.load %arg0[%c0_21, %c2_22, %c0_23, %c0_24] : memref<2x18x18x8xf32, #tpu.memory_space<vmem>>, vector<2x16x16x8xf32>
    %13 = vector.shape_cast %12 : vector<2x16x16x8xf32> to vector<512x8xf32>
    %c0_25 = arith.constant 0 : index
    %c2_26 = arith.constant 2 : index
    %c1_27 = arith.constant 1 : index
    %c0_28 = arith.constant 0 : index
    %14 = vector.load %arg0[%c0_25, %c2_26, %c1_27, %c0_28] : memref<2x18x18x8xf32, #tpu.memory_space<vmem>>, vector<2x16x16x8xf32>
    %15 = vector.shape_cast %14 : vector<2x16x16x8xf32> to vector<512x8xf32>
    %c0_29 = arith.constant 0 : index
    %c2_30 = arith.constant 2 : index
    %c2_31 = arith.constant 2 : index
    %c0_32 = arith.constant 0 : index
    %16 = vector.load %arg0[%c0_29, %c2_30, %c2_31, %c0_32] : memref<2x18x18x8xf32, #tpu.memory_space<vmem>>, vector<2x16x16x8xf32>
    %17 = vector.shape_cast %16 : vector<2x16x16x8xf32> to vector<512x8xf32>
    %18 = tpu.concatenate %1, %3, %5, %7, %9, %11, %13, %15, %17 in 1 : vector<512x8xf32>, vector<512x8xf32>, vector<512x8xf32>, vector<512x8xf32>, vector<512x8xf32>, vector<512x8xf32>, vector<512x8xf32>, vector<512x8xf32>, vector<512x8xf32> -> vector<512x72xf32>
    %19 = arith.truncf %18 : vector<512x72xf32> to vector<512x72xbf16>
    %c0_33 = arith.constant 0 : index
    %c0_34 = arith.constant 0 : index
    %20 = vector.load %arg1[%c0_33, %c0_34] : memref<72x16xbf16, #tpu.memory_space<vmem>>, vector<72x16xbf16>
    %cst = arith.constant dense<0.000000e+00> : vector<512x16xf32>
    %21 = tpu.matmul %19, %20, %cst {dimension_numbers = #tpu.dot_dimension_numbers<[1], [0], [0], [1], [0, 0, 1, 1], [], []>} : vector<512x72xbf16>, vector<72x16xbf16>, vector<512x16xf32> -> vector<512x16xf32>
    %c0_35 = arith.constant 0 : index
    %c0_36 = arith.constant 0 : index
    %22 = vector.load %arg7[%c0_35, %c0_36] : memref<1x16xf32, #tpu.memory_space<vmem>>, vector<1x16xf32>
    %c0_37 = arith.constant 0 : index
    %c0_38 = arith.constant 0 : index
    %23 = vector.load %arg8[%c0_37, %c0_38] : memref<1x16xf32, #tpu.memory_space<vmem>>, vector<1x16xf32>
    %cst_39 = arith.constant dense<0.000000e+00> : vector<16xf32>
    %24 = vector.multi_reduction <add>, %21, %cst_39 [0] : vector<512x16xf32> to vector<16xf32>
    %25 = vector.shape_cast %24 : vector<16xf32> to vector<1x16xf32>
    %cst_40 = arith.constant 0.001953125 : f32
    %26 = vector.broadcast %cst_40 : f32 to vector<1x16xf32>
    %27 = arith.mulf %25, %26 : vector<1x16xf32>
    %28 = vector.broadcast %27 : vector<1x16xf32> to vector<512x16xf32>
    %29 = arith.subf %21, %28 : vector<512x16xf32>
    %30 = arith.mulf %29, %29 : vector<512x16xf32>
    %cst_41 = arith.constant dense<0.000000e+00> : vector<16xf32>
    %31 = vector.multi_reduction <add>, %30, %cst_41 [0] : vector<512x16xf32> to vector<16xf32>
    %32 = vector.shape_cast %31 : vector<16xf32> to vector<1x16xf32>
    %cst_42 = arith.constant 0.001953125 : f32
    %33 = vector.broadcast %cst_42 : f32 to vector<1x16xf32>
    %34 = arith.mulf %32, %33 : vector<1x16xf32>
    %cst_43 = arith.constant 9.99999974E-6 : f32
    %35 = vector.broadcast %cst_43 : f32 to vector<1x16xf32>
    %36 = arith.addf %34, %35 : vector<1x16xf32>
    %37 = math.rsqrt %36 : vector<1x16xf32>
    %38 = vector.broadcast %37 : vector<1x16xf32> to vector<512x16xf32>
    %39 = arith.mulf %29, %38 : vector<512x16xf32>
    %40 = vector.broadcast %22 : vector<1x16xf32> to vector<512x16xf32>
    %41 = arith.mulf %39, %40 : vector<512x16xf32>
    %42 = vector.broadcast %23 : vector<1x16xf32> to vector<512x16xf32>
    %43 = arith.addf %41, %42 : vector<512x16xf32>
    %cst_44 = arith.constant 0.000000e+00 : f32
    %44 = vector.broadcast %cst_44 : f32 to vector<512x16xf32>
    %45 = arith.maximumf %43, %44 : vector<512x16xf32>
    %46 = vector.shape_cast %45 : vector<512x16xf32> to vector<2x16x16x16xf32>
    %cst_45 = arith.constant 0.000000e+00 : f32
    %47 = vector.broadcast %cst_45 : f32 to vector<2x1x18x16xf32>
    %cst_46 = arith.constant 0.000000e+00 : f32
    %48 = vector.broadcast %cst_46 : f32 to vector<2x16x1x16xf32>
    %c0_47 = arith.constant 0 : index
    %c0_48 = arith.constant 0 : index
    %c0_49 = arith.constant 0 : index
    %c0_50 = arith.constant 0 : index
    %49 = vector.load %arg16[%c0_47, %c0_48, %c0_49, %c0_50] : memref<2x18x18x16xf32, #tpu.memory_space<vmem>>, vector<2x1x18x16xf32>
    tpu.vector_store %arg16[%c0_47, %c0_48, %c0_49, %c0_50], %47 {strides = array<i32>} : memref<2x18x18x16xf32, #tpu.memory_space<vmem>>, vector<2x1x18x16xf32>,
    %c0_51 = arith.constant 0 : index
    %c17 = arith.constant 17 : index
    %c0_52 = arith.constant 0 : index
    %c0_53 = arith.constant 0 : index
    %50 = vector.load %arg16[%c0_51, %c17, %c0_52, %c0_53] : memref<2x18x18x16xf32, #tpu.memory_space<vmem>>, vector<2x1x18x16xf32>
    tpu.vector_store %arg16[%c0_51, %c17, %c0_52, %c0_53], %47 {strides = array<i32>} : memref<2x18x18x16xf32, #tpu.memory_space<vmem>>, vector<2x1x18x16xf32>,
    %c0_54 = arith.constant 0 : index
    %c1_55 = arith.constant 1 : index
    %c0_56 = arith.constant 0 : index
    %c0_57 = arith.constant 0 : index
    %51 = vector.load %arg16[%c0_54, %c1_55, %c0_56, %c0_57] : memref<2x18x18x16xf32, #tpu.memory_space<vmem>>, vector<2x16x1x16xf32>
    tpu.vector_store %arg16[%c0_54, %c1_55, %c0_56, %c0_57], %48 {strides = array<i32>} : memref<2x18x18x16xf32, #tpu.memory_space<vmem>>, vector<2x16x1x16xf32>,
    %c0_58 = arith.constant 0 : index
    %c1_59 = arith.constant 1 : index
    %c17_60 = arith.constant 17 : index
    %c0_61 = arith.constant 0 : index
    %52 = vector.load %arg16[%c0_58, %c1_59, %c17_60, %c0_61] : memref<2x18x18x16xf32, #tpu.memory_space<vmem>>, vector<2x16x1x16xf32>
    tpu.vector_store %arg16[%c0_58, %c1_59, %c17_60, %c0_61], %48 {strides = array<i32>} : memref<2x18x18x16xf32, #tpu.memory_space<vmem>>, vector<2x16x1x16xf32>,
    %c0_62 = arith.constant 0 : index
    %c1_63 = arith.constant 1 : index
    %c1_64 = arith.constant 1 : index
    %c0_65 = arith.constant 0 : index
    %53 = vector.load %arg16[%c0_62, %c1_63, %c1_64, %c0_65] : memref<2x18x18x16xf32, #tpu.memory_space<vmem>>, vector<2x16x16x16xf32>
    tpu.vector_store %arg16[%c0_62, %c1_63, %c1_64, %c0_65], %46 {strides = array<i32>} : memref<2x18x18x16xf32, #tpu.memory_space<vmem>>, vector<2x16x16x16xf32>,
    %c0_66 = arith.constant 0 : index
    %c0_67 = arith.constant 0 : index
    %c0_68 = arith.constant 0 : index
    %c0_69 = arith.constant 0 : index
    %54 = tpu.strided_load %arg16[%c0_66, %c0_67, %c0_68, %c0_69] {strides = array<i32: 1, 2, 2, 1>} : memref<2x18x18x16xf32, #tpu.memory_space<vmem>>, vector<2x8x8x16xf32>
    %55 = vector.shape_cast %54 : vector<2x8x8x16xf32> to vector<128x16xf32>
    %c0_70 = arith.constant 0 : index
    %c0_71 = arith.constant 0 : index
    %c1_72 = arith.constant 1 : index
    %c0_73 = arith.constant 0 : index
    %56 = tpu.strided_load %arg16[%c0_70, %c0_71, %c1_72, %c0_73] {strides = array<i32: 1, 2, 2, 1>} : memref<2x18x18x16xf32, #tpu.memory_space<vmem>>, vector<2x8x8x16xf32>
    %57 = vector.shape_cast %56 : vector<2x8x8x16xf32> to vector<128x16xf32>
    %c0_74 = arith.constant 0 : index
    %c0_75 = arith.constant 0 : index
    %c2_76 = arith.constant 2 : index
    %c0_77 = arith.constant 0 : index
    %58 = tpu.strided_load %arg16[%c0_74, %c0_75, %c2_76, %c0_77] {strides = array<i32: 1, 2, 2, 1>} : memref<2x18x18x16xf32, #tpu.memory_space<vmem>>, vector<2x8x8x16xf32>
    %59 = vector.shape_cast %58 : vector<2x8x8x16xf32> to vector<128x16xf32>
    %c0_78 = arith.constant 0 : index
    %c1_79 = arith.constant 1 : index
    %c0_80 = arith.constant 0 : index
    %c0_81 = arith.constant 0 : index
    %60 = tpu.strided_load %arg16[%c0_78, %c1_79, %c0_80, %c0_81] {strides = array<i32: 1, 2, 2, 1>} : memref<2x18x18x16xf32, #tpu.memory_space<vmem>>, vector<2x8x8x16xf32>
    %61 = vector.shape_cast %60 : vector<2x8x8x16xf32> to vector<128x16xf32>
    %c0_82 = arith.constant 0 : index
    %c1_83 = arith.constant 1 : index
    %c1_84 = arith.constant 1 : index
    %c0_85 = arith.constant 0 : index
    %62 = tpu.strided_load %arg16[%c0_82, %c1_83, %c1_84, %c0_85] {strides = array<i32: 1, 2, 2, 1>} : memref<2x18x18x16xf32, #tpu.memory_space<vmem>>, vector<2x8x8x16xf32>
    %63 = vector.shape_cast %62 : vector<2x8x8x16xf32> to vector<128x16xf32>
    %c0_86 = arith.constant 0 : index
    %c1_87 = arith.constant 1 : index
    %c2_88 = arith.constant 2 : index
    %c0_89 = arith.constant 0 : index
    %64 = tpu.strided_load %arg16[%c0_86, %c1_87, %c2_88, %c0_89] {strides = array<i32: 1, 2, 2, 1>} : memref<2x18x18x16xf32, #tpu.memory_space<vmem>>, vector<2x8x8x16xf32>
    %65 = vector.shape_cast %64 : vector<2x8x8x16xf32> to vector<128x16xf32>
    %c0_90 = arith.constant 0 : index
    %c2_91 = arith.constant 2 : index
    %c0_92 = arith.constant 0 : index
    %c0_93 = arith.constant 0 : index
    %66 = tpu.strided_load %arg16[%c0_90, %c2_91, %c0_92, %c0_93] {strides = array<i32: 1, 2, 2, 1>} : memref<2x18x18x16xf32, #tpu.memory_space<vmem>>, vector<2x8x8x16xf32>
    %67 = vector.shape_cast %66 : vector<2x8x8x16xf32> to vector<128x16xf32>
    %c0_94 = arith.constant 0 : index
    %c2_95 = arith.constant 2 : index
    %c1_96 = arith.constant 1 : index
    %c0_97 = arith.constant 0 : index
    %68 = tpu.strided_load %arg16[%c0_94, %c2_95, %c1_96, %c0_97] {strides = array<i32: 1, 2, 2, 1>} : memref<2x18x18x16xf32, #tpu.memory_space<vmem>>, vector<2x8x8x16xf32>
    %69 = vector.shape_cast %68 : vector<2x8x8x16xf32> to vector<128x16xf32>
    %c0_98 = arith.constant 0 : index
    %c2_99 = arith.constant 2 : index
    %c2_100 = arith.constant 2 : index
    %c0_101 = arith.constant 0 : index
    %70 = tpu.strided_load %arg16[%c0_98, %c2_99, %c2_100, %c0_101] {strides = array<i32: 1, 2, 2, 1>} : memref<2x18x18x16xf32, #tpu.memory_space<vmem>>, vector<2x8x8x16xf32>
    %71 = vector.shape_cast %70 : vector<2x8x8x16xf32> to vector<128x16xf32>
    %72 = tpu.concatenate %55, %57, %59, %61, %63, %65, %67, %69, %71 in 1 : vector<128x16xf32>, vector<128x16xf32>, vector<128x16xf32>, vector<128x16xf32>, vector<128x16xf32>, vector<128x16xf32>, vector<128x16xf32>, vector<128x16xf32>, vector<128x16xf32> -> vector<128x144xf32>
    %73 = arith.truncf %72 : vector<128x144xf32> to vector<128x144xbf16>
    %c0_102 = arith.constant 0 : index
    %c0_103 = arith.constant 0 : index
    %74 = vector.load %arg2[%c0_102, %c0_103] : memref<144x16xbf16, #tpu.memory_space<vmem>>, vector<144x16xbf16>
    %cst_104 = arith.constant dense<0.000000e+00> : vector<128x16xf32>
    %75 = tpu.matmul %73, %74, %cst_104 {dimension_numbers = #tpu.dot_dimension_numbers<[1], [0], [0], [1], [0, 0, 1, 1], [], []>} : vector<128x144xbf16>, vector<144x16xbf16>, vector<128x16xf32> -> vector<128x16xf32>
    %c0_105 = arith.constant 0 : index
    %c0_106 = arith.constant 0 : index
    %76 = vector.load %arg9[%c0_105, %c0_106] : memref<1x16xf32, #tpu.memory_space<vmem>>, vector<1x16xf32>
    %c0_107 = arith.constant 0 : index
    %c0_108 = arith.constant 0 : index
    %77 = vector.load %arg10[%c0_107, %c0_108] : memref<1x16xf32, #tpu.memory_space<vmem>>, vector<1x16xf32>
    %cst_109 = arith.constant dense<0.000000e+00> : vector<16xf32>
    %78 = vector.multi_reduction <add>, %75, %cst_109 [0] : vector<128x16xf32> to vector<16xf32>
    %79 = vector.shape_cast %78 : vector<16xf32> to vector<1x16xf32>
    %cst_110 = arith.constant 7.812500e-03 : f32
    %80 = vector.broadcast %cst_110 : f32 to vector<1x16xf32>
    %81 = arith.mulf %79, %80 : vector<1x16xf32>
    %82 = vector.broadcast %81 : vector<1x16xf32> to vector<128x16xf32>
    %83 = arith.subf %75, %82 : vector<128x16xf32>
    %84 = arith.mulf %83, %83 : vector<128x16xf32>
    %cst_111 = arith.constant dense<0.000000e+00> : vector<16xf32>
    %85 = vector.multi_reduction <add>, %84, %cst_111 [0] : vector<128x16xf32> to vector<16xf32>
    %86 = vector.shape_cast %85 : vector<16xf32> to vector<1x16xf32>
    %cst_112 = arith.constant 7.812500e-03 : f32
    %87 = vector.broadcast %cst_112 : f32 to vector<1x16xf32>
    %88 = arith.mulf %86, %87 : vector<1x16xf32>
    %cst_113 = arith.constant 9.99999974E-6 : f32
    %89 = vector.broadcast %cst_113 : f32 to vector<1x16xf32>
    %90 = arith.addf %88, %89 : vector<1x16xf32>
    %91 = math.rsqrt %90 : vector<1x16xf32>
    %92 = vector.broadcast %91 : vector<1x16xf32> to vector<128x16xf32>
    %93 = arith.mulf %83, %92 : vector<128x16xf32>
    %94 = vector.broadcast %76 : vector<1x16xf32> to vector<128x16xf32>
    %95 = arith.mulf %93, %94 : vector<128x16xf32>
    %96 = vector.broadcast %77 : vector<1x16xf32> to vector<128x16xf32>
    %97 = arith.addf %95, %96 : vector<128x16xf32>
    %cst_114 = arith.constant 0.000000e+00 : f32
    %98 = vector.broadcast %cst_114 : f32 to vector<128x16xf32>
    %99 = arith.maximumf %97, %98 : vector<128x16xf32>
    %100 = vector.shape_cast %99 : vector<128x16xf32> to vector<2x8x8x16xf32>
    %cst_115 = arith.constant 0.000000e+00 : f32
    %101 = vector.broadcast %cst_115 : f32 to vector<2x1x10x16xf32>
    %cst_116 = arith.constant 0.000000e+00 : f32
    %102 = vector.broadcast %cst_116 : f32 to vector<2x8x1x16xf32>
    %c0_117 = arith.constant 0 : index
    %c0_118 = arith.constant 0 : index
    %c0_119 = arith.constant 0 : index
    %c0_120 = arith.constant 0 : index
    %103 = vector.load %arg17[%c0_117, %c0_118, %c0_119, %c0_120] : memref<2x10x10x16xf32, #tpu.memory_space<vmem>>, vector<2x1x10x16xf32>
    tpu.vector_store %arg17[%c0_117, %c0_118, %c0_119, %c0_120], %101 {strides = array<i32>} : memref<2x10x10x16xf32, #tpu.memory_space<vmem>>, vector<2x1x10x16xf32>,
    %c0_121 = arith.constant 0 : index
    %c9 = arith.constant 9 : index
    %c0_122 = arith.constant 0 : index
    %c0_123 = arith.constant 0 : index
    %104 = vector.load %arg17[%c0_121, %c9, %c0_122, %c0_123] : memref<2x10x10x16xf32, #tpu.memory_space<vmem>>, vector<2x1x10x16xf32>
    tpu.vector_store %arg17[%c0_121, %c9, %c0_122, %c0_123], %101 {strides = array<i32>} : memref<2x10x10x16xf32, #tpu.memory_space<vmem>>, vector<2x1x10x16xf32>,
    %c0_124 = arith.constant 0 : index
    %c1_125 = arith.constant 1 : index
    %c0_126 = arith.constant 0 : index
    %c0_127 = arith.constant 0 : index
    %105 = vector.load %arg17[%c0_124, %c1_125, %c0_126, %c0_127] : memref<2x10x10x16xf32, #tpu.memory_space<vmem>>, vector<2x8x1x16xf32>
    tpu.vector_store %arg17[%c0_124, %c1_125, %c0_126, %c0_127], %102 {strides = array<i32>} : memref<2x10x10x16xf32, #tpu.memory_space<vmem>>, vector<2x8x1x16xf32>,
    %c0_128 = arith.constant 0 : index
    %c1_129 = arith.constant 1 : index
    %c9_130 = arith.constant 9 : index
    %c0_131 = arith.constant 0 : index
    %106 = vector.load %arg17[%c0_128, %c1_129, %c9_130, %c0_131] : memref<2x10x10x16xf32, #tpu.memory_space<vmem>>, vector<2x8x1x16xf32>
    tpu.vector_store %arg17[%c0_128, %c1_129, %c9_130, %c0_131], %102 {strides = array<i32>} : memref<2x10x10x16xf32, #tpu.memory_space<vmem>>, vector<2x8x1x16xf32>,
    %c0_132 = arith.constant 0 : index
    %c1_133 = arith.constant 1 : index
    %c1_134 = arith.constant 1 : index
    %c0_135 = arith.constant 0 : index
    %107 = vector.load %arg17[%c0_132, %c1_133, %c1_134, %c0_135] : memref<2x10x10x16xf32, #tpu.memory_space<vmem>>, vector<2x8x8x16xf32>
    tpu.vector_store %arg17[%c0_132, %c1_133, %c1_134, %c0_135], %100 {strides = array<i32>} : memref<2x10x10x16xf32, #tpu.memory_space<vmem>>, vector<2x8x8x16xf32>,
    %c0_136 = arith.constant 0 : index
    %c0_137 = arith.constant 0 : index
    %c0_138 = arith.constant 0 : index
    %c0_139 = arith.constant 0 : index
    %108 = vector.load %arg17[%c0_136, %c0_137, %c0_138, %c0_139] : memref<2x10x10x16xf32, #tpu.memory_space<vmem>>, vector<2x8x8x16xf32>
    %109 = vector.shape_cast %108 : vector<2x8x8x16xf32> to vector<128x16xf32>
    %c0_140 = arith.constant 0 : index
    %c0_141 = arith.constant 0 : index
    %c1_142 = arith.constant 1 : index
    %c0_143 = arith.constant 0 : index
    %110 = vector.load %arg17[%c0_140, %c0_141, %c1_142, %c0_143] : memref<2x10x10x16xf32, #tpu.memory_space<vmem>>, vector<2x8x8x16xf32>
    %111 = vector.shape_cast %110 : vector<2x8x8x16xf32> to vector<128x16xf32>
    %c0_144 = arith.constant 0 : index
    %c0_145 = arith.constant 0 : index
    %c2_146 = arith.constant 2 : index
    %c0_147 = arith.constant 0 : index
    %112 = vector.load %arg17[%c0_144, %c0_145, %c2_146, %c0_147] : memref<2x10x10x16xf32, #tpu.memory_space<vmem>>, vector<2x8x8x16xf32>
    %113 = vector.shape_cast %112 : vector<2x8x8x16xf32> to vector<128x16xf32>
    %c0_148 = arith.constant 0 : index
    %c1_149 = arith.constant 1 : index
    %c0_150 = arith.constant 0 : index
    %c0_151 = arith.constant 0 : index
    %114 = vector.load %arg17[%c0_148, %c1_149, %c0_150, %c0_151] : memref<2x10x10x16xf32, #tpu.memory_space<vmem>>, vector<2x8x8x16xf32>
    %115 = vector.shape_cast %114 : vector<2x8x8x16xf32> to vector<128x16xf32>
    %c0_152 = arith.constant 0 : index
    %c1_153 = arith.constant 1 : index
    %c1_154 = arith.constant 1 : index
    %c0_155 = arith.constant 0 : index
    %116 = vector.load %arg17[%c0_152, %c1_153, %c1_154, %c0_155] : memref<2x10x10x16xf32, #tpu.memory_space<vmem>>, vector<2x8x8x16xf32>
    %117 = vector.shape_cast %116 : vector<2x8x8x16xf32> to vector<128x16xf32>
    %c0_156 = arith.constant 0 : index
    %c1_157 = arith.constant 1 : index
    %c2_158 = arith.constant 2 : index
    %c0_159 = arith.constant 0 : index
    %118 = vector.load %arg17[%c0_156, %c1_157, %c2_158, %c0_159] : memref<2x10x10x16xf32, #tpu.memory_space<vmem>>, vector<2x8x8x16xf32>
    %119 = vector.shape_cast %118 : vector<2x8x8x16xf32> to vector<128x16xf32>
    %c0_160 = arith.constant 0 : index
    %c2_161 = arith.constant 2 : index
    %c0_162 = arith.constant 0 : index
    %c0_163 = arith.constant 0 : index
    %120 = vector.load %arg17[%c0_160, %c2_161, %c0_162, %c0_163] : memref<2x10x10x16xf32, #tpu.memory_space<vmem>>, vector<2x8x8x16xf32>
    %121 = vector.shape_cast %120 : vector<2x8x8x16xf32> to vector<128x16xf32>
    %c0_164 = arith.constant 0 : index
    %c2_165 = arith.constant 2 : index
    %c1_166 = arith.constant 1 : index
    %c0_167 = arith.constant 0 : index
    %122 = vector.load %arg17[%c0_164, %c2_165, %c1_166, %c0_167] : memref<2x10x10x16xf32, #tpu.memory_space<vmem>>, vector<2x8x8x16xf32>
    %123 = vector.shape_cast %122 : vector<2x8x8x16xf32> to vector<128x16xf32>
    %c0_168 = arith.constant 0 : index
    %c2_169 = arith.constant 2 : index
    %c2_170 = arith.constant 2 : index
    %c0_171 = arith.constant 0 : index
    %124 = vector.load %arg17[%c0_168, %c2_169, %c2_170, %c0_171] : memref<2x10x10x16xf32, #tpu.memory_space<vmem>>, vector<2x8x8x16xf32>
    %125 = vector.shape_cast %124 : vector<2x8x8x16xf32> to vector<128x16xf32>
    %126 = tpu.concatenate %109, %111, %113, %115, %117, %119, %121, %123, %125 in 1 : vector<128x16xf32>, vector<128x16xf32>, vector<128x16xf32>, vector<128x16xf32>, vector<128x16xf32>, vector<128x16xf32>, vector<128x16xf32>, vector<128x16xf32>, vector<128x16xf32> -> vector<128x144xf32>
    %127 = arith.truncf %126 : vector<128x144xf32> to vector<128x144xbf16>
    %c0_172 = arith.constant 0 : index
    %c0_173 = arith.constant 0 : index
    %128 = vector.load %arg3[%c0_172, %c0_173] : memref<144x16xbf16, #tpu.memory_space<vmem>>, vector<144x16xbf16>
    %cst_174 = arith.constant dense<0.000000e+00> : vector<128x16xf32>
    %129 = tpu.matmul %127, %128, %cst_174 {dimension_numbers = #tpu.dot_dimension_numbers<[1], [0], [0], [1], [0, 0, 1, 1], [], []>} : vector<128x144xbf16>, vector<144x16xbf16>, vector<128x16xf32> -> vector<128x16xf32>
    %c0_175 = arith.constant 0 : index
    %c0_176 = arith.constant 0 : index
    %130 = vector.load %arg11[%c0_175, %c0_176] : memref<1x16xf32, #tpu.memory_space<vmem>>, vector<1x16xf32>
    %c0_177 = arith.constant 0 : index
    %c0_178 = arith.constant 0 : index
    %131 = vector.load %arg12[%c0_177, %c0_178] : memref<1x16xf32, #tpu.memory_space<vmem>>, vector<1x16xf32>
    %cst_179 = arith.constant dense<0.000000e+00> : vector<16xf32>
    %132 = vector.multi_reduction <add>, %129, %cst_179 [0] : vector<128x16xf32> to vector<16xf32>
    %133 = vector.shape_cast %132 : vector<16xf32> to vector<1x16xf32>
    %cst_180 = arith.constant 7.812500e-03 : f32
    %134 = vector.broadcast %cst_180 : f32 to vector<1x16xf32>
    %135 = arith.mulf %133, %134 : vector<1x16xf32>
    %136 = vector.broadcast %135 : vector<1x16xf32> to vector<128x16xf32>
    %137 = arith.subf %129, %136 : vector<128x16xf32>
    %138 = arith.mulf %137, %137 : vector<128x16xf32>
    %cst_181 = arith.constant dense<0.000000e+00> : vector<16xf32>
    %139 = vector.multi_reduction <add>, %138, %cst_181 [0] : vector<128x16xf32> to vector<16xf32>
    %140 = vector.shape_cast %139 : vector<16xf32> to vector<1x16xf32>
    %cst_182 = arith.constant 7.812500e-03 : f32
    %141 = vector.broadcast %cst_182 : f32 to vector<1x16xf32>
    %142 = arith.mulf %140, %141 : vector<1x16xf32>
    %cst_183 = arith.constant 9.99999974E-6 : f32
    %143 = vector.broadcast %cst_183 : f32 to vector<1x16xf32>
    %144 = arith.addf %142, %143 : vector<1x16xf32>
    %145 = math.rsqrt %144 : vector<1x16xf32>
    %146 = vector.broadcast %145 : vector<1x16xf32> to vector<128x16xf32>
    %147 = arith.mulf %137, %146 : vector<128x16xf32>
    %148 = vector.broadcast %130 : vector<1x16xf32> to vector<128x16xf32>
    %149 = arith.mulf %147, %148 : vector<128x16xf32>
    %150 = vector.broadcast %131 : vector<1x16xf32> to vector<128x16xf32>
    %151 = arith.addf %149, %150 : vector<128x16xf32>
    %c0_184 = arith.constant 0 : index
    %c1_185 = arith.constant 1 : index
    %c1_186 = arith.constant 1 : index
    %c0_187 = arith.constant 0 : index
    %152 = tpu.strided_load %arg0[%c0_184, %c1_185, %c1_186, %c0_187] {strides = array<i32: 1, 2, 2, 1>} : memref<2x18x18x8xf32, #tpu.memory_space<vmem>>, vector<2x8x8x8xf32>
    %153 = vector.shape_cast %152 : vector<2x8x8x8xf32> to vector<128x8xf32>
    %154 = arith.truncf %153 : vector<128x8xf32> to vector<128x8xbf16>
    %c0_188 = arith.constant 0 : index
    %c0_189 = arith.constant 0 : index
    %155 = vector.load %arg4[%c0_188, %c0_189] : memref<8x16xbf16, #tpu.memory_space<vmem>>, vector<8x16xbf16>
    %cst_190 = arith.constant dense<0.000000e+00> : vector<128x16xf32>
    %156 = tpu.matmul %154, %155, %cst_190 {dimension_numbers = #tpu.dot_dimension_numbers<[1], [0], [0], [1], [0, 0, 1, 1], [], []>} : vector<128x8xbf16>, vector<8x16xbf16>, vector<128x16xf32> -> vector<128x16xf32>
    %c0_191 = arith.constant 0 : index
    %c0_192 = arith.constant 0 : index
    %157 = vector.load %arg13[%c0_191, %c0_192] : memref<1x16xf32, #tpu.memory_space<vmem>>, vector<1x16xf32>
    %c0_193 = arith.constant 0 : index
    %c0_194 = arith.constant 0 : index
    %158 = vector.load %arg14[%c0_193, %c0_194] : memref<1x16xf32, #tpu.memory_space<vmem>>, vector<1x16xf32>
    %cst_195 = arith.constant dense<0.000000e+00> : vector<16xf32>
    %159 = vector.multi_reduction <add>, %156, %cst_195 [0] : vector<128x16xf32> to vector<16xf32>
    %160 = vector.shape_cast %159 : vector<16xf32> to vector<1x16xf32>
    %cst_196 = arith.constant 7.812500e-03 : f32
    %161 = vector.broadcast %cst_196 : f32 to vector<1x16xf32>
    %162 = arith.mulf %160, %161 : vector<1x16xf32>
    %163 = vector.broadcast %162 : vector<1x16xf32> to vector<128x16xf32>
    %164 = arith.subf %156, %163 : vector<128x16xf32>
    %165 = arith.mulf %164, %164 : vector<128x16xf32>
    %cst_197 = arith.constant dense<0.000000e+00> : vector<16xf32>
    %166 = vector.multi_reduction <add>, %165, %cst_197 [0] : vector<128x16xf32> to vector<16xf32>
    %167 = vector.shape_cast %166 : vector<16xf32> to vector<1x16xf32>
    %cst_198 = arith.constant 7.812500e-03 : f32
    %168 = vector.broadcast %cst_198 : f32 to vector<1x16xf32>
    %169 = arith.mulf %167, %168 : vector<1x16xf32>
    %cst_199 = arith.constant 9.99999974E-6 : f32
    %170 = vector.broadcast %cst_199 : f32 to vector<1x16xf32>
    %171 = arith.addf %169, %170 : vector<1x16xf32>
    %172 = math.rsqrt %171 : vector<1x16xf32>
    %173 = vector.broadcast %172 : vector<1x16xf32> to vector<128x16xf32>
    %174 = arith.mulf %164, %173 : vector<128x16xf32>
    %175 = vector.broadcast %157 : vector<1x16xf32> to vector<128x16xf32>
    %176 = arith.mulf %174, %175 : vector<128x16xf32>
    %177 = vector.broadcast %158 : vector<1x16xf32> to vector<128x16xf32>
    %178 = arith.addf %176, %177 : vector<128x16xf32>
    %179 = vector.shape_cast %151 : vector<128x16xf32> to vector<2x64x16xf32>
    %cst_200 = arith.constant dense<0.000000e+00> : vector<2x16xf32>
    %180 = vector.multi_reduction <add>, %179, %cst_200 [1] : vector<2x64x16xf32> to vector<2x16xf32>
    %cst_201 = arith.constant 6.400000e+01 : f32
    %181 = vector.broadcast %cst_201 : f32 to vector<2x16xf32>
    %182 = arith.divf %180, %181 : vector<2x16xf32>
    %c0_202 = arith.constant 0 : index
    %c0_203 = arith.constant 0 : index
    %183 = vector.load %arg5[%c0_202, %c0_203] : memref<16x4xf32, #tpu.memory_space<vmem>>, vector<16x4xf32>
    %cst_204 = arith.constant dense<0.000000e+00> : vector<2x4xf32>
    %184 = tpu.matmul %182, %183, %cst_204 {dimension_numbers = #tpu.dot_dimension_numbers<[1], [0], [0], [1], [0, 0, 1, 1], [], []>} : vector<2x16xf32>, vector<16x4xf32>, vector<2x4xf32> -> vector<2x4xf32>
    %cst_205 = arith.constant 0.000000e+00 : f32
    %185 = vector.broadcast %cst_205 : f32 to vector<2x4xf32>
    %186 = arith.maximumf %184, %185 : vector<2x4xf32>
    %c0_206 = arith.constant 0 : index
    %c0_207 = arith.constant 0 : index
    %187 = vector.load %arg6[%c0_206, %c0_207] : memref<4x16xf32, #tpu.memory_space<vmem>>, vector<4x16xf32>
    %cst_208 = arith.constant dense<0.000000e+00> : vector<2x16xf32>
    %188 = tpu.matmul %186, %187, %cst_208 {dimension_numbers = #tpu.dot_dimension_numbers<[1], [0], [0], [1], [0, 0, 1, 1], [], []>} : vector<2x4xf32>, vector<4x16xf32>, vector<2x16xf32> -> vector<2x16xf32>
    %189 = arith.negf %188 : vector<2x16xf32>
    %190 = math.exp %189 : vector<2x16xf32>
    %cst_209 = arith.constant 1.000000e+00 : f32
    %191 = vector.broadcast %cst_209 : f32 to vector<2x16xf32>
    %192 = arith.addf %191, %190 : vector<2x16xf32>
    %193 = arith.divf %191, %192 : vector<2x16xf32>
    %194 = vector.shape_cast %193 : vector<2x16xf32> to vector<2x1x16xf32>
    %195 = vector.broadcast %194 : vector<2x1x16xf32> to vector<2x64x16xf32>
    %196 = arith.mulf %195, %179 : vector<2x64x16xf32>
    %197 = vector.shape_cast %178 : vector<128x16xf32> to vector<2x64x16xf32>
    %198 = arith.addf %196, %197 : vector<2x64x16xf32>
    %199 = vector.shape_cast %198 : vector<2x64x16xf32> to vector<128x16xf32>
    %c0_210 = arith.constant 0 : index
    %c0_211 = arith.constant 0 : index
    %200 = vector.load %arg15[%c0_210, %c0_211] : memref<128x16xf32, #tpu.memory_space<vmem>>, vector<128x16xf32>
    tpu.vector_store %arg15[%c0_210, %c0_211], %199 {strides = array<i32>} : memref<128x16xf32, #tpu.memory_space<vmem>>, vector<128x16xf32>,
    return
  }
}

</mosaic_0001>

<bundles_post_ra>
// kernel: tpu_custom_call.1
= control target key start
LH: loop header
LB: loop body
LE: loop exit
PB: predicated region body
PF: predicated region fallthrough
CT: control target
= control target key end

     0   :  { %s9792_s30 = smov 8   ;;  %s15730_s24 = smov 16   ;;  %vm3362_vm0 = vcmask 1043456   ;;  %vm2677_vm1 = vcmask 64512   ;;  %vm2742_vm2 = vcmask 130048   ;;  %vm2807_vm3 = vcmask 195584   ;;  %s15675_s0 = inlined_call_operand.vmem [shape: f32[2,18,18,8], index: 0, kind: input, shape index: {}]   ;;  %s15676_s1 = inlined_call_operand.vmem [shape: bf16[72,16], index: 1, kind: input, shape index: {}]   ;;  %s15677_s7 = inlined_call_operand.vmem [shape: f32[1,16], index: 7, kind: input, shape index: {}]   ;;  %s15678_s8 = inlined_call_operand.vmem [shape: f32[1,16], index: 8, kind: input, shape index: {}]   ;;  %s15679_s2 = inlined_call_operand.vmem [shape: bf16[144,16], index: 2, kind: input, shape index: {}]   ;;  %s15680_s9 = inlined_call_operand.vmem [shape: f32[1,16], index: 9, kind: input, shape index: {}]   ;;  %s15681_s10 = inlined_call_operand.vmem [shape: f32[1,16], index: 10, kind: input, shape index: {}]   ;;  %s15682_s3 = inlined_call_operand.vmem [shape: bf16[144,16], index: 3, kind: input, shape index: {}]   ;;  %s15683_s4 = inlined_call_operand.vmem [shape: bf16[8,16], index: 4, kind: input, shape index: {}]   ;;  %s15684_s11 = inlined_call_operand.vmem [shape: f32[1,16], index: 11, kind: input, shape index: {}]   ;;  %s15685_s12 = inlined_call_operand.vmem [shape: f32[1,16], index: 12, kind: input, shape index: {}]   ;;  %s15686_s5 = inlined_call_operand.vmem [shape: f32[16,4], index: 5, kind: input, shape index: {}]   ;;  %s15687_s13 = inlined_call_operand.vmem [shape: f32[1,16], index: 13, kind: input, shape index: {}]   ;;  %s15688_s14 = inlined_call_operand.vmem [shape: f32[1,16], index: 14, kind: input, shape index: {}]   ;;  %s15689_s6 = inlined_call_operand.vmem [shape: f32[4,16], index: 6, kind: input, shape index: {}]   ;;  %s15690_s15 = inlined_call_operand.vmem [shape: f32[128,16], index: 15, kind: output, shape index: {}]  }
   0x1   :  { %v123_v0 = vld [vmem:[%s15675_s0 + $0x61] sm:$0xff]  ;;  %v124_v1 = vld [vmem:[%s15675_s0 + $0x69] sm:$0xff]  ;;  %v119_v2 = vld [vmem:[%s15675_s0 + $0x31] sm:$0xff]  ;;  %s9794_s29 = smov 32   ;;  %s9795_s16 = smov 24   ;;  %vm2872_vm4 = vcmask 261120  }
   0x2   :  { %v7948_v3 = vpack.i.bf16 %v124_v1, %v123_v0  ;;  %v120_v4 = vld [vmem:[%s15675_s0 + $0x39] sm:$0xff]  ;;  %v115_v5 = vld [vmem:[%s15675_s0 + $0x1] sm:$0xff]  ;;  %v116_v6 = vld [vmem:[%s15675_s0 + $0x9] sm:$0xff]  ;;  %s9796_s21 = smov 56   ;;  %s9797_s22 = smov 48   ;;  %vm2937_vm5 = vcmask 326656  }
   0x3   :  { %v9903_v7 = vpack.i.bf16 %v120_v4, %v119_v2  ;;  %v7928_v8 = vpack.i.bf16 %v116_v6, %v115_v5  ;;  %v125_v9 = vld [vmem:[%s15675_s0 + $0x79] sm:$0xff]  ;;  %v126_v10 = vld [vmem:[%s15675_s0 + $0x81] sm:$0xff]  ;;  %v121_v11 = vld [vmem:[%s15675_s0 + $0x49] sm:$0xff]  ;;  %s9799_s23 = smov 64   ;;  %vm3002_vm6 = vcmask 392192   ;;  %vm3067_vm7 = vcmask 457728  }
   0x4   :  { %7949 = vrot.lane.b32.xlu2 %v7948_v3, %s9792_s30  ;;  %v122_v12 = vld [vmem:[%s15675_s0 + $0x51] sm:$0xff]  ;;  %v117_v13 = vld [vmem:[%s15675_s0 + $0x19] sm:$0xff]  ;;  %v118_v14 = vld [vmem:[%s15675_s0 + $0x21] sm:$0xff]  ;;  %v7953_v15 = vpack.i.bf16 %v126_v10, %v125_v9  ;;  %vm3132_vm8 = vcmask 523264   ;;  %vm3265_vm9 = vcmask 588800   ;;  %s15833_s27 = smov 16  }
   0x5   :  { %7939 = vrot.lane.b32.xlu1 %v9903_v7, %s9792_s30  ;;  %7929 = vrot.lane.b32.xlu0 %v7928_v8, %s9792_s30  ;;  %v9927_v16 = vpack.i.bf16 %v122_v12, %v121_v11  ;;  %v9929_v17 = vpack.i.bf16 %v118_v14, %v117_v13  ;;  %v131_v18 = vld [vmem:[%s15675_s0 + $0xc1] sm:$0xff]  ;;  %v132_v19 = vld [vmem:[%s15675_s0 + $0xc9] sm:$0xff]  ;;  %vm4208_vm13 = vcmask 123904   ;;  %vm4221_vm14 = vcmask 122880   ;;  %s9803_s26 = smov 112  }
   0x6   :  { %v129_v20 = vld [vmem:[%s15675_s0 + $0xa9] sm:$0xff]  ;;  %v130_v21 = vld [vmem:[%s15675_s0 + $0xb1] sm:$0xff]  ;;  %v128_v23 = vld [vmem:[%s15675_s0 + $0x99] sm:$0xff]  ;;  %v7968_v24 = vpack.i.bf16 %v132_v19, %v131_v18  ;;  %vm5148_vm15 = vcmask 654336  }
   0x7   :  { %v127_v22 = vld [vmem:[%s15675_s0 + $0x91] sm:$0xff]  ;;  %v7963_v25 = vpack.i.bf16 %v130_v21, %v129_v20  ;;  %v137_v27 = vld [vmem:[%s15675_s0 + $0x109] sm:$0xff]  ;;  %v136_v30 = vld [vmem:[%s15675_s0 + $0xf9] sm:$0xff] }
   0x8   :  { %v7958_v26 = vpack.i.bf16 %v128_v23, %v127_v22  ;;  %v138_v28 = vld [vmem:[%s15675_s0 + $0x111] sm:$0xff]  ;;  %v133_v31 = vld [vmem:[%s15675_s0 + $0xd9] sm:$0xff]  ;;  %v134_v32 = vld [vmem:[%s15675_s0 + $0xe1] sm:$0xff] }
   0x9   :  { %v135_v29 = vld [vmem:[%s15675_s0 + $0xf1] sm:$0xff]  ;;  %v7983_v33 = vpack.i.bf16 %v138_v28, %v137_v27  ;;  %v7973_v35 = vpack.i.bf16 %v134_v32, %v133_v31  ;;  %v144_v37 = vld [vmem:[%s15675_s0 + $0x159] sm:$0xff]  ;;  %v142_v39 = vld [vmem:[%s15675_s0 + $0x141] sm:$0xff] }
   0xa   :  { %v7978_v34 = vpack.i.bf16 %v136_v30, %v135_v29  ;;  %v143_v36 = vld [vmem:[%s15675_s0 + $0x151] sm:$0xff]  ;;  %v141_v38 = vld [vmem:[%s15675_s0 + $0x139] sm:$0xff]  ;;  %v139_v40 = vld [vmem:[%s15675_s0 + $0x121] sm:$0xff] }
   0xb   :  { %v140_v41 = vld [vmem:[%s15675_s0 + $0x129] sm:$0xff]  ;;  %v7998_v42 = vpack.i.bf16 %v144_v37, %v143_v36  ;;  %v7993_v43 = vpack.i.bf16 %v142_v39, %v141_v38  ;;  %v150_v46 = vld [vmem:[%s15675_s0 + $0x1d1] sm:$0xff]  ;;  %v148_v48 = vld [vmem:[%s15675_s0 + $0x1b9] sm:$0xff] }
   0xc   :  { %7954 = vrot.lane.b32.xlu2 %v7953_v15, %s9792_s30  ;;  %v7988_v44 = vpack.i.bf16 %v140_v41, %v139_v40  ;;  %v149_v45 = vld [vmem:[%s15675_s0 + $0x1c9] sm:$0xff]  ;;  %v147_v47 = vld [vmem:[%s15675_s0 + $0x1b1] sm:$0xff]  ;;  %v156_v55 = vld [vmem:[%s15675_s0 + $0x219] sm:$0xff] }
   0xd   :  { %7944 = vrot.lane.b32.xlu1 %v9927_v16, %s9792_s30  ;;  %7934 = vrot.lane.b32.xlu0 %v9929_v17, %s9792_s30  ;;  %v145_v49 = vld [vmem:[%s15675_s0 + $0x169] sm:$0xff]  ;;  %v146_v50 = vld [vmem:[%s15675_s0 + $0x171] sm:$0xff]  ;;  %v8013_v51 = vpack.i.bf16 %v150_v46, %v149_v45  ;;  %v8008_v52 = vpack.i.bf16 %v148_v48, %v147_v47 }
   0xe   :  { %v8003_v53 = vpack.i.bf16 %v146_v50, %v145_v49  ;;  %v155_v54 = vld [vmem:[%s15675_s0 + $0x211] sm:$0xff]  ;;  %v153_v56 = vld [vmem:[%s15675_s0 + $0x1f9] sm:$0xff]  ;;  %v154_v57 = vld [vmem:[%s15675_s0 + $0x201] sm:$0xff] }
   0xf   :  { %v151_v58 = vld [vmem:[%s15675_s0 + $0x1e1] sm:$0xff]  ;;  %v152_v59 = vld [vmem:[%s15675_s0 + $0x1e9] sm:$0xff]  ;;  %v8028_v60 = vpack.i.bf16 %v156_v55, %v155_v54  ;;  %v8023_v61 = vpack.i.bf16 %v154_v57, %v153_v56  ;;  %v161_v63 = vld [vmem:[%s15675_s0 + $0x259] sm:$0xff] }
  0x10   :  { %v8018_v62 = vpack.i.bf16 %v152_v59, %v151_v58  ;;  %v162_v0 = vld [vmem:[%s15675_s0 + $0x261] sm:$0xff]  ;;  %v160_v2 = vld [vmem:[%s15675_s0 + $0x249] sm:$0xff]  ;;  %v158_v4 = vld [vmem:[%s15675_s0 + $0x231] sm:$0xff] }
  0x11   :  { %v159_v1 = vld [vmem:[%s15675_s0 + $0x241] sm:$0xff]  ;;  %v157_v3 = vld [vmem:[%s15675_s0 + $0x229] sm:$0xff]  ;;  %v8043_v5 = vpack.i.bf16 %v162_v0, %v161_v63  ;;  %v166_v12 = vld [vmem:[%s15675_s0 + $0x291] sm:$0xff] }
  0x12   :  { %v8038_v6 = vpack.i.bf16 %v160_v2, %v159_v1  ;;  %v8033_v8 = vpack.i.bf16 %v158_v4, %v157_v3  ;;  %v167_v9 = vld [vmem:[%s15675_s0 + $0x2a1] sm:$0xff]  ;;  %v168_v10 = vld [vmem:[%s15675_s0 + $0x2a9] sm:$0xff]  ;;  %v163_v13 = vld [vmem:[%s15675_s0 + $0x271] sm:$0xff] }
  0x13   :  { %v165_v11 = vld [vmem:[%s15675_s0 + $0x289] sm:$0xff]  ;;  %v164_v14 = vld [vmem:[%s15675_s0 + $0x279] sm:$0xff]  ;;  %v8058_v15 = vpack.i.bf16 %v168_v10, %v167_v9  ;;  %v174_v21 = vld [vmem:[%s15675_s0 + $0x2f1] sm:$0xff] }
  0x14   :  { %7969 = vrot.lane.b32.xlu2 %v7968_v24, %s9792_s30  ;;  %v8053_v18 = vpack.i.bf16 %v166_v12, %v165_v11  ;;  %v8048_v19 = vpack.i.bf16 %v164_v14, %v163_v13  ;;  %v173_v20 = vld [vmem:[%s15675_s0 + $0x2e9] sm:$0xff]  ;;  %v171_v22 = vld [vmem:[%s15675_s0 + $0x2d1] sm:$0xff]  ;;  %v172_v23 = vld [vmem:[%s15675_s0 + $0x2d9] sm:$0xff] }
  0x15   :  { %7964 = vrot.lane.b32.xlu1 %v7963_v25, %s9792_s30  ;;  %7959 = vrot.lane.b32.xlu0 %v7958_v26, %s9792_s30  ;;  %v169_v24 = vld [vmem:[%s15675_s0 + $0x2b9] sm:$0xff]  ;;  %v170_v25 = vld [vmem:[%s15675_s0 + $0x2c1] sm:$0xff]  ;;  %v8073_v26 = vpack.i.bf16 %v174_v21, %v173_v20  ;;  %v8068_v27 = vpack.i.bf16 %v172_v23, %v171_v22 }
  0x16   :  { %v8063_v28 = vpack.i.bf16 %v170_v25, %v169_v24  ;;  %v179_v29 = vld [vmem:[%s15675_s0 + $0x2] sm:$0xff]  ;;  %v180_v30 = vld [vmem:[%s15675_s0 + $0xa] sm:$0xff]  ;;  %v177_v31 = vld [vmem:[%s15675_s0 + $0x319] sm:$0xff] }
  0x17   :  { %v178_v32 = vld [vmem:[%s15675_s0 + $0x321] sm:$0xff]  ;;  %v185_v38 = vld [vmem:[%s15675_s0 + $0x4a] sm:$0xff]  ;;  %v186_v39 = vld [vmem:[%s15675_s0 + $0x52] sm:$0xff] }
  0x18   :  { %v8083_v36 = vpack.i.bf16 %v178_v32, %v177_v31  ;;  %v183_v40 = vld [vmem:[%s15675_s0 + $0x32] sm:$0xff]  ;;  %v184_v41 = vld [vmem:[%s15675_s0 + $0x3a] sm:$0xff]  ;;  %v198_v58 = vld [vmem:[%s15675_s0 + $0xe2] sm:$0xff] }
  0x19   :  { %v10145_v45 = vpack.i.bf16 %v184_v41, %v183_v40  ;;  %v191_v47 = vld [vmem:[%s15675_s0 + $0x92] sm:$0xff]  ;;  %v192_v48 = vld [vmem:[%s15675_s0 + $0x9a] sm:$0xff]  ;;  %v195_v59 = vld [vmem:[%s15675_s0 + $0xc2] sm:$0xff] }
  0x1a   :  { %v189_v49 = vld [vmem:[%s15675_s0 + $0x7a] sm:$0xff]  ;;  %v8118_v54 = vpack.i.bf16 %v192_v48, %v191_v47  ;;  %v194_v63 = vld [vmem:[%s15675_s0 + $0xb2] sm:$0xff]  ;;  %v203_v3 = vld [vmem:[%s15675_s0 + $0x122] sm:$0xff] }
  0x1b   :  { %v197_v57 = vld [vmem:[%s15675_s0 + $0xda] sm:$0xff]  ;;  %v204_v4 = vld [vmem:[%s15675_s0 + $0x12a] sm:$0xff]  ;;  %v199_v9 = vld [vmem:[%s15675_s0 + $0xf2] sm:$0xff] }
  0x1c   :  { %7984 = vrot.lane.b32.xlu2 %v7983_v33, %s9792_s30  ;;  %v175_v33 = vld [vmem:[%s15675_s0 + $0x301] sm:$0xff]  ;;  %v8133_v0 = vpack.i.bf16 %v198_v58, %v197_v57  ;;  %v8148_v11 = vpack.i.bf16 %v204_v4, %v203_v3  ;;  %v209_v14 = vld [vmem:[%s15675_s0 + $0x16a] sm:$0xff]  ;;  %v214_v32 = vld [vmem:[%s15675_s0 + $0x1d2] sm:$0xff] }
  0x1d   :  { %7979 = vrot.lane.b32.xlu1 %v7978_v34, %s9792_s30  ;;  %7974 = vrot.lane.b32.xlu0 %v7973_v35, %s9792_s30  ;;  %v176_v34 = vld [vmem:[%s15675_s0 + $0x309] sm:$0xff]  ;;  %v8088_v35 = vpack.i.bf16 %v180_v30, %v179_v29  ;;  %v200_v10 = vld [vmem:[%s15675_s0 + $0xfa] sm:$0xff] }
  0x1e   :  { %v8078_v37 = vpack.i.bf16 %v176_v34, %v175_v33  ;;  %v8138_v13 = vpack.i.bf16 %v200_v10, %v199_v9  ;;  %v208_v20 = vld [vmem:[%s15675_s0 + $0x15a] sm:$0xff]  ;;  %v206_v22 = vld [vmem:[%s15675_s0 + $0x142] sm:$0xff]  ;;  %v216_v29 = vld [vmem:[%s15675_s0 + $0x1ea] sm:$0xff] }
  0x1f   :  { %v205_v21 = vld [vmem:[%s15675_s0 + $0x13a] sm:$0xff]  ;;  %v213_v30 = vld [vmem:[%s15675_s0 + $0x1ca] sm:$0xff]  ;;  %v211_v33 = vld [vmem:[%s15675_s0 + $0x1b2] sm:$0xff] }
  0x20   :  { %v212_v34 = vld [vmem:[%s15675_s0 + $0x1ba] sm:$0xff]  ;;  %v221_v40 = vld [vmem:[%s15675_s0 + $0x22a] sm:$0xff]  ;;  %v222_v41 = vld [vmem:[%s15675_s0 + $0x232] sm:$0xff] }
  0x21   :  { %v220_v47 = vld [vmem:[%s15675_s0 + $0x21a] sm:$0xff]  ;;  %v227_v58 = vld [vmem:[%s15675_s0 + $0x272] sm:$0xff]  ;;  %v234_v10 = vld [vmem:[%s15675_s0 + $0x2c2] sm:$0xff] }
  0x22   :  { %v217_v48 = vld [vmem:[%s15675_s0 + $0x1fa] sm:$0xff] }
  0x23   :  { %v233_v9 = vld [vmem:[%s15675_s0 + $0x2ba] sm:$0xff] }
  0x24   :  { %7999 = vrot.lane.b32.xlu2 %v7998_v42, %s9792_s30  ;;  %v181_v42 = vld [vmem:[%s15675_s0 + $0x1a] sm:$0xff] }
  0x25   :  { %7994 = vrot.lane.b32.xlu1 %v7993_v43, %s9792_s30  ;;  %7989 = vrot.lane.b32.xlu0 %v7988_v44, %s9792_s30  ;;  %v182_v43 = vld [vmem:[%s15675_s0 + $0x22] sm:$0xff]  ;;  %v10143_v44 = vpack.i.bf16 %v186_v39, %v185_v38  ;;  %v8173_v38 = vpack.i.bf16 %v214_v32, %v213_v30  ;;  %v8168_v39 = vpack.i.bf16 %v212_v34, %v211_v33  ;;  %v10380_v32 = vld [vmem:[%s15675_s0 + $0x18] sm:$0xff] }
  0x26   :  { %v10147_v46 = vpack.i.bf16 %v182_v43, %v181_v42  ;;  %v219_v42 = vld [vmem:[%s15675_s0 + $0x212] sm:$0xff]  ;;  %v10385_v33 = vld [vmem:[%s15675_s0 + $0x20] sm:$0xff] }
  0x27   :  { %v8233_v34 = vpack.i.bf16 %v10385_v33, %v10380_v32 }
  0x2c   :  { %8014 = vrot.lane.b32.xlu2 %v8013_v51, %s9792_s30  ;;  %v190_v51 = vld [vmem:[%s15675_s0 + $0x82] sm:$0xff] }
  0x2d   :  { %8009 = vrot.lane.b32.xlu1 %v8008_v52, %s9792_s30  ;;  %8004 = vrot.lane.b32.xlu0 %v8003_v53, %s9792_s30  ;;  %v187_v52 = vld [vmem:[%s15675_s0 + $0x62] sm:$0xff]  ;;  %v188_v53 = vld [vmem:[%s15675_s0 + $0x6a] sm:$0xff]  ;;  %v10175_v55 = vpack.i.bf16 %v190_v51, %v189_v49 }
  0x2e   :  { %v10177_v56 = vpack.i.bf16 %v188_v53, %v187_v52  ;;  %v218_v49 = vld [vmem:[%s15675_s0 + $0x202] sm:$0xff]  ;;  %v8193_v53 = vpack.i.bf16 %v222_v41, %v221_v40  ;;  %v10402_v41 = vld [vmem:[%s15675_s0 + $0x30] sm:$0xff] }
  0x2f   :  { %v8183_v57 = vpack.i.bf16 %v218_v49, %v217_v48 }
  0x34   :  { %8029 = vrot.lane.b32.xlu2 %v8028_v60, %s9792_s30 }
  0x35   :  { %8024 = vrot.lane.b32.xlu1 %v8023_v61, %s9792_s30  ;;  %8019 = vrot.lane.b32.xlu0 %v8018_v62, %s9792_s30  ;;  %v196_v61 = vld [vmem:[%s15675_s0 + $0xca] sm:$0xff] }
  0x36   :  { %v193_v62 = vld [vmem:[%s15675_s0 + $0xaa] sm:$0xff]  ;;  %v8128_v1 = vpack.i.bf16 %v196_v61, %v195_v59  ;;  %v228_v59 = vld [vmem:[%s15675_s0 + $0x27a] sm:$0xff] }
  0x37   :  { %v8123_v2 = vpack.i.bf16 %v194_v63, %v193_v62  ;;  %v225_v61 = vld [vmem:[%s15675_s0 + $0x25a] sm:$0xff]  ;;  %v226_v63 = vld [vmem:[%s15675_s0 + $0x262] sm:$0xff]  ;;  %v8208_v4 = vpack.i.bf16 %v228_v59, %v227_v58 }
  0x3c   :  { %8044 = vrot.lane.b32.xlu2 %v8043_v5, %s9792_s30  ;;  %v201_v5 = vld [vmem:[%s15675_s0 + $0x10a] sm:$0xff] }
  0x3d   :  { %8039 = vrot.lane.b32.xlu1 %v8038_v6, %s9792_s30  ;;  %8034 = vrot.lane.b32.xlu0 %v8033_v8, %s9792_s30  ;;  %v202_v8 = vld [vmem:[%s15675_s0 + $0x112] sm:$0xff] }
  0x3e   :  { %v8143_v12 = vpack.i.bf16 %v202_v8, %v201_v5  ;;  %v8203_v5 = vpack.i.bf16 %v226_v63, %v225_v61 }
  0x44   :  { %8059 = vrot.lane.b32.xlu2 %v8058_v15, %s9792_s30  ;;  %v210_v15 = vld [vmem:[%s15675_s0 + $0x172] sm:$0xff] }
  0x45   :  { %8054 = vrot.lane.b32.xlu1 %v8053_v18, %s9792_s30  ;;  %8049 = vrot.lane.b32.xlu0 %v8048_v19, %s9792_s30  ;;  %v207_v18 = vld [vmem:[%s15675_s0 + $0x152] sm:$0xff]  ;;  %v8163_v25 = vpack.i.bf16 %v210_v15, %v209_v14  ;;  %v229_v14 = vld [vmem:[%s15675_s0 + $0x28a] sm:$0xff] }
  0x46   :  { %v230_v15 = vld [vmem:[%s15675_s0 + $0x292] sm:$0xff] }
  0x4c   :  { %8074 = vrot.lane.b32.xlu2 %v8073_v26, %s9792_s30  ;;  %v8158_v26 = vpack.i.bf16 %v208_v20, %v207_v18 }
  0x4d   :  { %8069 = vrot.lane.b32.xlu1 %v8068_v27, %s9792_s30  ;;  %8064 = vrot.lane.b32.xlu0 %v8063_v28, %s9792_s30  ;;  %v8153_v27 = vpack.i.bf16 %v206_v22, %v205_v21  ;;  %v215_v28 = vld [vmem:[%s15675_s0 + $0x1e2] sm:$0xff]  ;;  %v8223_v21 = vpack.i.bf16 %v234_v10, %v233_v9 }
  0x54   :  { %8089 = vrot.lane.b32.xlu2 %v8088_v35, %s15730_s24 }
  0x55   :  { %8084 = vrot.lane.b32.xlu1 %v8083_v36, %s9792_s30  ;;  %8079 = vrot.lane.b32.xlu0 %v8078_v37, %s9792_s30  ;;  %v8178_v37 = vpack.i.bf16 %v216_v29, %v215_v28  ;;  %v236_v28 = vld [vmem:[%s15675_s0 + $0x2da] sm:$0xff]  ;;  %s15732_s30 = smov 40  }
  0x5c   :  { %8104 = vrot.lane.b32.xlu2 %v10143_v44, %s15730_s24 }
  0x5d   :  { %8099 = vrot.lane.b32.xlu1 %v10145_v45, %s15730_s24  ;;  %8094 = vrot.lane.b32.xlu0 %v10147_v46, %s15730_s24 }
  0x5e   :  { %v10164_v50 = vpop.permute.xlu2 %7949 }
  0x64   :  { %8119 = vrot.lane.b32.xlu2 %v8118_v54, %s15730_s24  ;;  %v8188_v54 = vpack.i.bf16 %v220_v47, %v219_v42 }
  0x65   :  { %8114 = vrot.lane.b32.xlu1 %v10175_v55, %s15730_s24  ;;  %8109 = vrot.lane.b32.xlu0 %v10177_v56, %s15730_s24 }
  0x66   :  { %v10193_v60 = vpop.permute.xlu2 %7954 }
  0x6c   :  { %8134 = vrot.lane.b32.xlu2 %v8133_v0, %s15730_s24  ;;  %v223_v0 = vld [vmem:[%s15675_s0 + $0x242] sm:$0xff] }
  0x6d   :  { %8129 = vrot.lane.b32.xlu1 %v8128_v1, %s15730_s24  ;;  %8124 = vrot.lane.b32.xlu0 %v8123_v2, %s15730_s24  ;;  %v224_v1 = vld [vmem:[%s15675_s0 + $0x24a] sm:$0xff] }
  0x6e   :  { %v10216_v6 = vpop.permute.xlu2 %7969  ;;  %v8198_v8 = vpack.i.bf16 %v224_v1, %v223_v0  ;;  %v7595_v0 = vld [vmem:[%s15675_s0 + $0x61] sm:$0xff] }
  0x74   :  { %8149 = vrot.lane.b32.xlu2 %v8148_v11, %s15730_s24  ;;  %v231_v11 = vld [vmem:[%s15675_s0 + $0x2a2] sm:$0xff] }
  0x75   :  { %8144 = vrot.lane.b32.xlu1 %v8143_v12, %s15730_s24  ;;  %8139 = vrot.lane.b32.xlu0 %v8138_v13, %s15730_s24  ;;  %v232_v13 = vld [vmem:[%s15675_s0 + $0x2aa] sm:$0xff] }
  0x76   :  { %v10239_v19 = vpop.permute.xlu2 %7984  ;;  %v8218_v22 = vpack.i.bf16 %v232_v13, %v231_v11 }
  0x77   :  { %15772 = vst [vmem:[#allocation4_spill] sm:$0xff] %v10239_v19  ;;  %v10250_v23 = vpop.permute.xlu1 %7939  ;;  %v10252_v24 = vpop.permute.xlu0 %7929 }
  0x7c   :  { %8164 = vrot.lane.b32.xlu2 %v8163_v25, %s15730_s24  ;;  %v8213_v25 = vpack.i.bf16 %v230_v15, %v229_v14  ;;  %v7597_v15 = vld [vmem:[%s15675_s0 + $0x79] sm:$0xff] }
  0x7d   :  { %8159 = vrot.lane.b32.xlu1 %v8158_v26, %s15730_s24  ;;  %8154 = vrot.lane.b32.xlu0 %v8153_v27, %s15730_s24  ;;  %v235_v27 = vld [vmem:[%s15675_s0 + $0x2d2] sm:$0xff] }
  0x7e   :  { %v10266_v31 = vpop.permute.xlu2 %7999 }
  0x7f   :  { %15773 = vst [vmem:[#allocation5_spill] sm:$0xff] %v10266_v31  ;;  %v10277_v35 = vpop.permute.xlu1 %7944  ;;  %v10279_v36 = vpop.permute.xlu0 %7934  ;;  %v51_v31 = vld [vmem:[%s15675_s0] sm:$0xff] }
  0x84   :  { %8179 = vrot.lane.b32.xlu2 %v8178_v37, %s15730_s24  ;;  %v8228_v37 = vpack.i.bf16 %v236_v28, %v235_v27  ;;  %v10514_v27 = vld [vmem:[%s15675_s0 + $0x78] sm:$0xff]  ;;  %v10519_v28 = vld [vmem:[%s15675_s0 + $0x80] sm:$0xff] }
  0x85   :  { %8174 = vrot.lane.b32.xlu1 %v8173_v38, %s15730_s24  ;;  %8169 = vrot.lane.b32.xlu0 %v8168_v39, %s15730_s24 }
  0x86   :  { %v10293_v43 = vpop.permute.xlu2 %8014 }
  0x87   :  { %15774 = vst [vmem:[#allocation6_spill] sm:$0xff] %v10293_v43  ;;  %v10304_v51 = vpop.permute.xlu1 %7964  ;;  %v10306_v52 = vpop.permute.xlu0 %7959  ;;  %v10603_v43 = vld [vmem:[%s15675_s0 + $0xb0] sm:$0xff] }
  0x8c   :  { %8194 = vrot.lane.b32.xlu2 %v8193_v53, %s15730_s24 }
  0x8d   :  { %8189 = vrot.lane.b32.xlu1 %v8188_v54, %s15730_s24  ;;  %8184 = vrot.lane.b32.xlu0 %v8183_v57, %s15730_s24  ;;  %v10436_v57 = vld [vmem:[%s15675_s0 + $0x48] sm:$0xff] }
  0x8e   :  { %v10320_v62 = vpop.permute.xlu2 %8029 }
  0x8f   :  { %15775 = vst [vmem:[#allocation7_spill] sm:$0xff] %v10320_v62  ;;  %v10331_v2 = vpop.permute.xlu1 %7979  ;;  %v10333_v3 = vpop.permute.xlu0 %7974 }
  0x94   :  { %8209 = vrot.lane.b32.xlu2 %v8208_v4, %s15730_s24 }
  0x95   :  { %8204 = vrot.lane.b32.xlu1 %v8203_v5, %s15730_s24  ;;  %8199 = vrot.lane.b32.xlu0 %v8198_v8, %s15730_s24  ;;  %v10481_v8 = vld [vmem:[%s15675_s0 + $0x68] sm:$0xff] }
  0x96   :  { %v10347_v12 = vpop.permute.xlu2 %8044 }
  0x97   :  { %15776 = vst [vmem:[#allocation8_spill] sm:$0xff] %v10347_v12  ;;  %v10358_v18 = vpop.permute.xlu1 %7994  ;;  %v10360_v20 = vpop.permute.xlu0 %7989 }
  0x98   :  { %15777 = vst [vmem:[#allocation9_spill] sm:$0xff] %v10358_v18 }
  0x99   :  { %15778 = vst [vmem:[#allocation10_spill] sm:$0xff] %v10360_v20 }
  0x9c   :  { %8224 = vrot.lane.b32.xlu2 %v8223_v21, %s15730_s24 }
  0x9d   :  { %8219 = vrot.lane.b32.xlu1 %v8218_v22, %s15730_s24  ;;  %8214 = vrot.lane.b32.xlu0 %v8213_v25, %s15730_s24 }
  0x9e   :  { %v10365_v26 = vpop.permute.xlu2 %8059 }
  0x9f   :  { %15779 = vst [vmem:[#allocation11_spill] sm:$0xff] %v10365_v26  ;;  %v10373_v29 = vpop.permute.xlu1 %8009  ;;  %v10375_v30 = vpop.permute.xlu0 %8004  ;;  %v7883_v26 = vld [vmem:[%s15676_s1] sm:$0xff] }
  0xa0   :  { %15780 = vst [vmem:[#allocation12_spill] sm:$0xff] %v10373_v29  ;;  %v7884_v29 = vld [vmem:[%s15676_s1 + $0x8] sm:$0xff] }
  0xa1   :  { %15781 = vst [vmem:[#allocation13_spill] sm:$0xff] %v10375_v30 }
  0xa4   :  { %8239 = vrot.lane.b32.xlu2 %v9929_v17, %s9794_s29  ;;  %v10407_v17 = vld [vmem:[%s15675_s0 + $0x38] sm:$0xff] }
  0xa5   :  { %8234 = vrot.lane.b32.xlu1 %v8233_v34, %s9795_s16  ;;  %8229 = vrot.lane.b32.xlu0 %v8228_v37, %s15730_s24  ;;  %v8248_v42 = vpack.i.bf16 %v10407_v17, %v10402_v41  ;;  %v8338_v37 = vpack.i.bf16 %v10519_v28, %v10514_v27 }
  0xa6   :  { %v10393_v38 = vpop.permute.xlu2 %8074 }
  0xa7   :  { %15782 = vst [vmem:[#allocation14_spill] sm:$0xff] %v10393_v38  ;;  %v10395_v39 = vpop.permute.xlu1 %8024  ;;  %v10397_v40 = vpop.permute.xlu0 %8019  ;;  %v7663_v38 = vld [vmem:[%s15675_s0 + $0x92] sm:$0xff] }
  0xa8   :  { %15783 = vst [vmem:[#allocation15_spill] sm:$0xff] %v10395_v39 }
  0xa9   :  { %15784 = vst [vmem:[#allocation16_spill] sm:$0xff] %v10397_v40  ;;  %v7602_v40 = vld [vmem:[%s15675_s0 + $0xb1] sm:$0xff] }
  0xac   :  { %8254 = vrot.lane.b32.xlu2 %v9903_v7, %s9796_s21 }
  0xad   :  { %8249 = vrot.lane.b32.xlu1 %v8248_v42, %s9797_s22  ;;  %8244 = vrot.lane.b32.xlu0 %v10147_v46, %s15732_s30 }
  0xae   :  { %v10416_v47 = vpop.permute.xlu2 %8089 }
  0xaf   :  { %v10418_v48 = vpop.permute.xlu1 %8039  ;;  %v10420_v49 = vpop.permute.xlu0 %8034 }
  0xb0   :  { %15785 = vst [vmem:[#allocation17_spill] sm:$0xff] %v10418_v48 }
  0xb1   :  { %15786 = vst [vmem:[#allocation18_spill] sm:$0xff] %v10420_v49 }
  0xb4   :  { %8269 = vrot.lane.b32.xlu2 %v9903_v7, %s9794_s29  ;;  %v10441_v7 = vld [vmem:[%s15675_s0 + $0x50] sm:$0xff] }
  0xb5   :  { %8264 = vrot.lane.b32.xlu1 %v8248_v42, %s9795_s16  ;;  %8259 = vrot.lane.b32.xlu0 %v10145_v45, %s9799_s23  ;;  %v8278_v58 = vpack.i.bf16 %v10441_v7, %v10436_v57 }
  0xb6   :  { %v10427_v53 = vpop.permute.xlu2 %8104 }
  0xb7   :  { %v10429_v54 = vpop.permute.xlu1 %8054  ;;  %v10431_v46 = vpop.permute.xlu0 %8049 }
  0xb8   :  { %15787 = vst [vmem:[#allocation19_spill] sm:$0xff] %v10429_v54 }
  0xb9   :  { %15788 = vst [vmem:[#allocation20_spill] sm:$0xff] %v10431_v46  ;;  %v8091_v46 = vunpack.i.l.bf16 %v10416_v47 }
  0xbc   :  { %8284 = vrot.lane.b32.xlu2 %v9927_v16, %s9796_s21 }
  0xbd   :  { %8279 = vrot.lane.b32.xlu1 %v8278_v58, %s9797_s22  ;;  %8274 = vrot.lane.b32.xlu0 %v10145_v45, %s15732_s30  ;;  %v7596_v45 = vld [vmem:[%s15675_s0 + $0x69] sm:$0xff] }
  0xbe   :  { %v10450_v59 = vpop.permute.xlu2 %8119  ;;  %v8313_v9 = vpack.i.bf16 %v7596_v45, %v7595_v0  ;;  %v7599_v45 = vld [vmem:[%s15675_s0 + $0x91] sm:$0xff] }
  0xbf   :  { %v10452_v61 = vpop.permute.xlu1 %8069  ;;  %v10454_v63 = vpop.permute.xlu0 %8064 }
  0xc0   :  { %15789 = vst [vmem:[#allocation21_spill] sm:$0xff] %v10452_v61 }
  0xc1   :  { %15790 = vst [vmem:[#allocation22_spill] sm:$0xff] %v10454_v63 }
  0xc4   :  { %8299 = vrot.lane.b32.xlu2 %v9927_v16, %s9794_s29  ;;  %v10476_v16 = vld [vmem:[%s15675_s0 + $0x60] sm:$0xff] }
  0xc5   :  { %8294 = vrot.lane.b32.xlu1 %v8278_v58, %s9795_s16  ;;  %8289 = vrot.lane.b32.xlu0 %v10143_v44, %s9799_s23  ;;  %v8308_v10 = vpack.i.bf16 %v10481_v8, %v10476_v16 }
  0xc6   :  { %v10467_v1 = vpop.permute.xlu2 %8134 }
  0xc7   :  { %v10469_v4 = vpop.permute.xlu1 %8084  ;;  %v10471_v5 = vpop.permute.xlu0 %8079 }
  0xc8   :  { %15791 = vst [vmem:[#allocation23_spill] sm:$0xff] %v10469_v4 }
  0xc9   :  { %15792 = vst [vmem:[#allocation24_spill] sm:$0xff] %v10471_v5 }
  0xcc   :  { %8314 = vrot.lane.b32.xlu2 %v8313_v9, %s9796_s21 }
  0xcd   :  { %8309 = vrot.lane.b32.xlu1 %v8308_v10, %s9797_s22  ;;  %8304 = vrot.lane.b32.xlu0 %v10143_v44, %s15732_s30  ;;  %v7598_v44 = vld [vmem:[%s15675_s0 + $0x81] sm:$0xff] }
  0xce   :  { %v10489_v11 = vpop.permute.xlu2 %8149  ;;  %v8343_v34 = vpack.i.bf16 %v7598_v44, %v7597_v15  ;;  %v10552_v44 = vld [vmem:[%s15675_s0 + $0x90] sm:$0xff] }
  0xcf   :  { %15793 = vst [vmem:[#allocation25_spill] sm:$0xff] %v10489_v11  ;;  %v10491_v13 = vpop.permute.xlu1 %8099  ;;  %v10493_v14 = vpop.permute.xlu0 %8094 }
  0xd4   :  { %8329 = vrot.lane.b32.xlu2 %v8313_v9, %s9794_s29 }
  0xd5   :  { %8324 = vrot.lane.b32.xlu1 %v8308_v10, %s9795_s16  ;;  %8319 = vrot.lane.b32.xlu0 %v10177_v56, %s9799_s23 }
  0xd6   :  { %v10505_v21 = vpop.permute.xlu2 %8164 }
  0xd7   :  { %15794 = vst [vmem:[#allocation26_spill] sm:$0xff] %v10505_v21  ;;  %v10507_v22 = vpop.permute.xlu1 %8114  ;;  %v10509_v25 = vpop.permute.xlu0 %8109 }
  0xdc   :  { %8344 = vrot.lane.b32.xlu2 %v8343_v34, %s9796_s21 }
  0xdd   :  { %8339 = vrot.lane.b32.xlu1 %v8338_v37, %s9797_s22  ;;  %8334 = vrot.lane.b32.xlu0 %v10177_v56, %s15732_s30  ;;  %v7600_v56 = vld [vmem:[%s15675_s0 + $0x99] sm:$0xff] }
  0xde   :  { %v10527_v42 = vpop.permute.xlu2 %8179 }
  0xdf   :  { %15795 = vst [vmem:[#allocation27_spill] sm:$0xff] %v10527_v42  ;;  %v10529_v58 = vpop.permute.xlu1 %8129  ;;  %v10531_v0 = vpop.permute.xlu0 %8124  ;;  %v7601_v42 = vld [vmem:[%s15675_s0 + $0xa9] sm:$0xff] }
  0xe0   :  { %v8403_v63 = vpack.i.bf16 %v7602_v40, %v7601_v42  ;;  %v7665_v40 = vld [vmem:[%s15675_s0 + $0xaa] sm:$0xff] }
  0xe4   :  { %8359 = vrot.lane.b32.xlu2 %v8343_v34, %s9794_s29  ;;  %v10557_v34 = vld [vmem:[%s15675_s0 + $0x98] sm:$0xff] }
  0xe5   :  { %8354 = vrot.lane.b32.xlu1 %v8338_v37, %s9795_s16  ;;  %8349 = vrot.lane.b32.xlu0 %v10175_v55, %s9799_s23  ;;  %v8373_v37 = vpack.i.bf16 %v7600_v56, %v7599_v45  ;;  %v8368_v4 = vpack.i.bf16 %v10557_v34, %v10552_v44  ;;  %v7664_v45 = vld [vmem:[%s15675_s0 + $0x9a] sm:$0xff] }
  0xe6   :  { %v10543_v9 = vpop.permute.xlu2 %8194  ;;  %v8378_v49 = vpack.i.bf16 %v7664_v45, %v7663_v38 }
  0xe7   :  { %15796 = vst [vmem:[#allocation28_spill] sm:$0xff] %v10543_v9  ;;  %v10545_v10 = vpop.permute.xlu1 %8144  ;;  %v10547_v15 = vpop.permute.xlu0 %8139 }
  0xe8   :  { %15797 = vst [vmem:[#allocation29_spill] sm:$0xff] %v10545_v10 }
  0xec   :  { %8374 = vrot.lane.b32.xlu2 %v8373_v37, %s9796_s21 }
  0xed   :  { %8369 = vrot.lane.b32.xlu1 %v8368_v4, %s9797_s22  ;;  %8364 = vrot.lane.b32.xlu0 %v10175_v55, %s15732_s30  ;;  %v3237_v55 = vld [vmem:[%s15676_s1 + $0x20] sm:$0xf] }
  0xee   :  { %v10565_v5 = vpop.permute.xlu2 %8209  ;;  %v3255_v61 = vunpack.c.l.b16 %v3237_v55 }
  0xef   :  { %15798 = vst [vmem:[#allocation30_spill] sm:$0xff] %v10565_v5  ;;  %v10573_v56 = vpop.permute.xlu1 %8159  ;;  %v10575_v9 = vpop.permute.xlu0 %8154  ;;  %v8092_v5 = vunpack.i.h.bf16 %v10416_v47 }
  0xf0   :  { %15799 = vst [vmem:[#allocation31_spill] sm:$0xff] %v10573_v56  ;;  %v3260_v62 = vpack.c.b16 %v3255_v61, %v3255_v61  ;;  %v7886_v61 = vld [vmem:[%s15676_s1 + $0x18] sm:$0xff] }
  0xf1   :  { %15800 = vst [vmem:[#allocation32_spill] sm:$0xff] %v10575_v9 }
  0xf4   :  { %8389 = vrot.lane.b32.xlu2 %v8373_v37, %s9794_s29 }
  0xf5   :  { %8384 = vrot.lane.b32.xlu1 %v8368_v4, %s9795_s16  ;;  %8379 = vrot.lane.b32.xlu0 %v8378_v49, %s9799_s23  ;;  %v10598_v4 = vld [vmem:[%s15675_s0 + $0xa8] sm:$0xff] }
  0xf6   :  { %v10589_v38 = vpop.permute.xlu2 %8224  ;;  %v8398_v55 = vpack.i.bf16 %v10603_v43, %v10598_v4 }
  0xf7   :  { %15801 = vst [vmem:[#allocation33_spill] sm:$0xff] %v10589_v38  ;;  %v10591_v37 = vpop.permute.xlu1 %8174  ;;  %v10593_v45 = vpop.permute.xlu0 %8169 }
  0xf8   :  { %15802 = vst [vmem:[#allocation34_spill] sm:$0xff] %v10591_v37  ;;  %v3364_v37 = vsel %vm3362_vm0, %v3260_v62, 0  ;;  %v7666_v62 = vld [vmem:[%s15675_s0 + $0xb2] sm:$0xff] }
  0xf9   :  { %15803 = vst [vmem:[#allocation35_spill] sm:$0xff] %v10593_v45  ;;  %3369 = vmatpush.bf16.msra.mxu0 %v3364_v37  ;;  %7906 = vmatpush.bf16.msra.mxu3 %v3364_v37  ;;  %v8408_v45 = vpack.i.bf16 %v7666_v62, %v7665_v40  ;;  %v7604_v40 = vld [vmem:[%s15675_s0 + $0xc9] sm:$0xff] }
  0xfa   :  { %7905 = vmatpush.bf16.msra.mxu2 %v3364_v37  ;;  %v7603_v37 = vld [vmem:[%s15675_s0 + $0xc1] sm:$0xff] }
  0xfc   :  { %8404 = vrot.lane.b32.xlu2 %v8403_v63, %s9796_s21 }
  0xfd   :  { %8399 = vrot.lane.b32.xlu1 %v8398_v55, %s9797_s22  ;;  %8394 = vrot.lane.b32.xlu0 %v8378_v49, %s15732_s30  ;;  %v7885_v49 = vld [vmem:[%s15676_s1 + $0x10] sm:$0xff] }
  0xfe   :  { %v10614_v38 = vpop.permute.xlu2 %8239  ;;  %3370 = vmatpush.bf16.msra.mxu0 %v7886_v61  ;;  %7908 = vmatpush.bf16.msra.mxu3 %v7886_v61 }
  0xff   :  { %v10622_v42 = vpop.permute.xlu1 %8189  ;;  %v10624_v39 = vpop.permute.xlu0 %8184  ;;  %7907 = vmatpush.bf16.msra.mxu2 %v7886_v61  ;;  %v8241_v18 = vunpack.i.l.bf16 %v10614_v38 }
 0x100   :  { %15804 = vst [vmem:[#allocation36_spill] sm:$0xff] %v10622_v42 }
 0x101   :  { %15805 = vst [vmem:[#allocation37_spill] sm:$0xff] %v10624_v39  ;;  %v8433_v39 = vpack.i.bf16 %v7604_v40, %v7603_v37  ;;  %v7668_v37 = vld [vmem:[%s15675_s0 + $0xca] sm:$0xff] }
 0x102   :  { %3371 = vmatpush.bf16.msra.mxu0 %v7885_v49  ;;  %7910 = vmatpush.bf16.msra.mxu3 %v7885_v49 }
 0x103   :  { %7909 = vmatpush.bf16.msra.mxu2 %v7885_v49  ;;  %v7667_v49 = vld [vmem:[%s15675_s0 + $0xc2] sm:$0xff] }
 0x104   :  { %8419 = vrot.lane.b32.xlu2 %v8403_v63, %s9794_s29  ;;  %v7539_v63 = vld [vmem:[%s15675_s0 + $0xc0] sm:$0xff] }
 0x105   :  { %8414 = vrot.lane.b32.xlu1 %v8398_v55, %s9795_s16  ;;  %8409 = vrot.lane.b32.xlu0 %v8408_v45, %s9799_s23  ;;  %v7540_v55 = vld [vmem:[%s15675_s0 + $0xc8] sm:$0xff] }
 0x106   :  { %v10641_v61 = vpop.permute.xlu2 %8254  ;;  %3372 = vmatpush.bf16.msra.mxu0 %v7884_v29  ;;  %v8428_v21 = vpack.i.bf16 %v7540_v55, %v7539_v63  ;;  %7912 = vmatpush.bf16.msra.mxu3 %v7884_v29  ;;  %v8438_v63 = vpack.i.bf16 %v7668_v37, %v7667_v49  ;;  %v7606_v55 = vld [vmem:[%s15675_s0 + $0xe1] sm:$0xff]  ;;  %v7932_v49 = vunpack.i.h.bf16 %v10252_v24  ;;  %v7931_v37 = vunpack.i.l.bf16 %v10252_v24 }
 0x107   :  { %v10649_v62 = vpop.permute.xlu1 %8204  ;;  %v10651_v42 = vpop.permute.xlu0 %8199  ;;  %7911 = vmatpush.bf16.msra.mxu2 %v7884_v29 }
 0x108   :  { %15806 = vst [vmem:[#allocation38_spill] sm:$0xff] %v10649_v62  ;;  %v2678_v24 = vsel %vm2677_vm1, %v51_v31, %v7931_v37  ;;  %v7352_v31 = vld [vmem:[%s15675_s0 + $0xe0] sm:$0xff] }
 0x109   :  { %15807 = vst [vmem:[#allocation39_spill] sm:$0xff] %v10651_v42  ;;  %v2743_v47 = vsel %vm2742_vm2, %v2678_v24, %v8091_v46  ;;  %v7670_v46 = vld [vmem:[%s15675_s0 + $0xe2] sm:$0xff] }
 0x10a   :  { %3373 = vmatpush.bf16.msra.mxu0 %v7883_v26  ;;  %7914 = vmatpush.bf16.msra.mxu3 %v7883_v26 }
 0x10b   :  { %7913 = vmatpush.bf16.msra.mxu2 %v7883_v26  ;;  %v69_v26 = vld [vmem:[%s15675_s0 + $0xd8] sm:$0xff] }
 0x10c   :  { %8434 = vrot.lane.b32.xlu2 %v8433_v39, %s9796_s21 }
 0x10d   :  { %8429 = vrot.lane.b32.xlu1 %v8428_v21, %s9797_s22  ;;  %8424 = vrot.lane.b32.xlu0 %v8408_v45, %s15732_s30  ;;  %v7605_v45 = vld [vmem:[%s15675_s0 + $0xd9] sm:$0xff] }
 0x10e   :  { %v10659_v30 = vpop.permute.xlu2 %8269 }
 0x10f   :  { %v10667_v40 = vpop.permute.xlu1 %8219  ;;  %v10669_v29 = vpop.permute.xlu0 %8214 }
 0x110   :  { %15808 = vst [vmem:[#allocation40_spill] sm:$0xff] %v10667_v40 }
 0x111   :  { %15809 = vst [vmem:[#allocation41_spill] sm:$0xff] %v10669_v29 }
 0x114   :  { %8449 = vrot.lane.b32.xlu2 %v8433_v39, %s9794_s29  ;;  %v70_v39 = vld [vmem:[%s15675_s0 + $0xe0] sm:$0xff] }
 0x115   :  { %8444 = vrot.lane.b32.xlu1 %v8428_v21, %s9795_s16  ;;  %8439 = vrot.lane.b32.xlu0 %v8438_v63, %s9799_s23  ;;  %v8463_v21 = vpack.i.bf16 %v7606_v55, %v7605_v45  ;;  %v8458_v56 = vpack.i.bf16 %v70_v39, %v69_v26  ;;  %v7351_v39 = vld [vmem:[%s15675_s0 + $0xd8] sm:$0xff] }
 0x116   :  { %v10680_v54 = vpop.permute.xlu2 %8284  ;;  %v8473_v24 = vpack.i.bf16 %v7352_v31, %v7351_v39 }
 0x117   :  { %v8235_v40 = vpop.permute.xlu1 %8234  ;;  %v10682_v29 = vpop.permute.xlu0 %8229 }
 0x118   :  { %15810 = vst [vmem:[#allocation42_spill] sm:$0xff] %v10682_v29  ;;  %v52_v29 = vld [vmem:[%s15675_s0 + $0x8] sm:$0xff]  ;;  %v8237_v45 = vunpack.i.h.bf16 %v8235_v40  ;;  %v8236_v55 = vunpack.i.l.bf16 %v8235_v40  ;;  %v8242_v40 = vunpack.i.h.bf16 %v10614_v38 }
 0x119   :  { %v2679_v26 = vsel %vm2677_vm1, %v52_v29, %v7932_v49 }
 0x11a   :  { %v2744_v9 = vsel %vm2742_vm2, %v2679_v26, %v8092_v5  ;;  %v2808_v5 = vsel %vm2807_vm3, %v2743_v47, %v8236_v55 }
 0x11b   :  { %v2809_v29 = vsel %vm2807_vm3, %v2744_v9, %v8237_v45  ;;  %v2873_v20 = vsel %vm2872_vm4, %v2808_v5, %v8241_v18  ;;  %v8257_v9 = vunpack.i.h.bf16 %v10641_v61  ;;  %v8256_v45 = vunpack.i.l.bf16 %v10641_v61  ;;  %v7607_v18 = vld [vmem:[%s15675_s0 + $0xf1] sm:$0xff] }
 0x11c   :  { %8464 = vrot.lane.b32.xlu2 %v8463_v21, %s9796_s21  ;;  %v2874_v42 = vsel %vm2872_vm4, %v2809_v29, %v8242_v40  ;;  %v7544_v61 = vld [vmem:[%s15675_s0 + $0xf8] sm:$0xff] }
 0x11d   :  { %8459 = vrot.lane.b32.xlu1 %v8458_v56, %s9797_s22  ;;  %8454 = vrot.lane.b32.xlu0 %v8438_v63, %s15732_s30  ;;  %v7669_v56 = vld [vmem:[%s15675_s0 + $0xda] sm:$0xff] }
 0x11e   :  { %v10712_v62 = vpop.permute.xlu2 %8299  ;;  %v8468_v26 = vpack.i.bf16 %v7670_v46, %v7669_v56  ;;  %v7937_v56 = vunpack.i.h.bf16 %v10279_v36 }
 0x11f   :  { %v8250_v63 = vpop.permute.xlu1 %8249  ;;  %v8245_v38 = vpop.permute.xlu0 %8244 }
 0x120   :  { %v8247_v49 = vunpack.i.h.bf16 %v8245_v38  ;;  %v8246_v37 = vunpack.i.l.bf16 %v8245_v38  ;;  %v8252_v12 = vunpack.i.h.bf16 %v8250_v63  ;;  %v8251_v11 = vunpack.i.l.bf16 %v8250_v63 }
 0x121   :  { %v7936_v63 = vunpack.i.l.bf16 %v10279_v36 }
 0x122   :  { %v2938_v48 = vsel %vm2937_vm5, %v2873_v20, %v8246_v37  ;;  %v2939_v55 = vsel %vm2937_vm5, %v2874_v42, %v8247_v49  ;;  %v7608_v20 = vld [vmem:[%s15675_s0 + $0xf9] sm:$0xff] }
 0x123   :  { %v3003_v39 = vsel %vm3002_vm6, %v2938_v48, %v8251_v11  ;;  %v3004_v47 = vsel %vm3002_vm6, %v2939_v55, %v8252_v12  ;;  %v8493_v29 = vpack.i.bf16 %v7608_v20, %v7607_v18  ;;  %v8097_v48 = vunpack.i.h.bf16 %v10493_v14 }
 0x124   :  { %8479 = vrot.lane.b32.xlu2 %v8463_v21, %s9794_s29  ;;  %v7543_v21 = vld [vmem:[%s15675_s0 + $0xf0] sm:$0xff]  ;;  %v3068_v49 = vsel %vm3067_vm7, %v3003_v39, %v8256_v45  ;;  %v3069_v37 = vsel %vm3067_vm7, %v3004_v47, %v8257_v9  ;;  %v8096_v12 = vunpack.i.l.bf16 %v10493_v14  ;;  %v2680_v36 = vsel %vm2677_vm1, %v10380_v32, %v7936_v63 }
 0x125   :  { %8474 = vrot.lane.b32.xlu1 %v8473_v24, %s9795_s16  ;;  %8469 = vrot.lane.b32.xlu0 %v8468_v26, %s9799_s23  ;;  %v8488_v38 = vpack.i.bf16 %v7544_v61, %v7543_v21  ;;  %v2681_v9 = vsel %vm2677_vm1, %v10385_v33, %v7937_v56  ;;  %v8272_v18 = vunpack.i.h.bf16 %v10659_v30  ;;  %v8271_v20 = vunpack.i.l.bf16 %v10659_v30  ;;  %v7671_v32 = vld [vmem:[%s15675_s0 + $0xf2] sm:$0xff]  ;;  %v7672_v33 = vld [vmem:[%s15675_s0 + $0xfa] sm:$0xff] }
 0x126   :  { %v10740_v42 = vpop.permute.xlu2 %8314  ;;  %v2745_v14 = vsel %vm2742_vm2, %v2680_v36, %v8096_v12  ;;  %v2746_v45 = vsel %vm2742_vm2, %v2681_v9, %v8097_v48  ;;  %v7609_v48 = vld [vmem:[%s15675_s0 + $0x109] sm:$0xff]  ;;  %v7610_v12 = vld [vmem:[%s15675_s0 + $0x111] sm:$0xff]  ;;  %v7942_v9 = vunpack.i.h.bf16 %v10250_v23 }
 0x127   :  { %v8265_v40 = vpop.permute.xlu1 %8264  ;;  %v8260_v31 = vpop.permute.xlu0 %8259 }
 0x128   :  { %v8262_v46 = vunpack.i.h.bf16 %v8260_v31  ;;  %v8261_v5 = vunpack.i.l.bf16 %v8260_v31  ;;  %v8267_v55 = vunpack.i.h.bf16 %v8265_v40  ;;  %v8266_v10 = vunpack.i.l.bf16 %v8265_v40 }
 0x129   :  { %v8498_v31 = vpack.i.bf16 %v7672_v33, %v7671_v32 }
 0x12a   :  { %v3133_v11 = vsel %vm3132_vm8, %v3068_v49, %v8261_v5  ;;  %v3134_v24 = vsel %vm3132_vm8, %v3069_v37, %v8262_v46  ;;  %v2811_v61 = vsel %vm2807_vm3, %v2746_v45, %v8267_v55  ;;  %v8286_v37 = vunpack.i.l.bf16 %v10680_v54 }
 0x12b   :  { %v3197_v19 = vpack.c.bf16 %v3134_v24, %v3133_v11  ;;  %v2876_v5 = vsel %vm2872_vm4, %v2811_v61, %v8272_v18  ;;  %v8523_v18 = vpack.i.bf16 %v7610_v12, %v7609_v48  ;;  %v8102_v61 = vunpack.i.h.bf16 %v10491_v13 }
 0x12c   :  { %8494 = vrot.lane.b32.xlu2 %v8493_v29, %s9796_s21 }
 0x12d   :  { %8489 = vrot.lane.b32.xlu1 %v8488_v38, %s9797_s22  ;;  %8484 = vrot.lane.b32.xlu0 %v8468_v26, %s15732_s30  ;;  %v2810_v26 = vsel %vm2807_vm3, %v2745_v14, %v8266_v10  ;;  %v8287_v10 = vunpack.i.h.bf16 %v10680_v54  ;;  %v7546_v54 = vld [vmem:[%s15675_s0 + $0x110] sm:$0xff] }
 0x12e   :  { %7735 = vmatmul.msk.bf16.vlgmr.msra.gmra.mxu0 %vm3265_vm9, %v3197_v19  ;;  %v10770_v21 = vpop.permute.xlu2 %8329  ;;  %v2875_v46 = vsel %vm2872_vm4, %v2810_v26, %v8271_v20  ;;  %v7941_v20 = vunpack.i.l.bf16 %v10250_v23 }
 0x12f   :  { %v8280_v39 = vpop.permute.xlu1 %8279  ;;  %v8275_v47 = vpop.permute.xlu0 %8274 }
 0x130   :  { %v8277_v40 = vunpack.i.h.bf16 %v8275_v47  ;;  %v8276_v30 = vunpack.i.l.bf16 %v8275_v47  ;;  %v8282_v19 = vunpack.i.h.bf16 %v8280_v39  ;;  %v8281_v56 = vunpack.i.l.bf16 %v8280_v39 }
 0x131   :  { %v8101_v39 = vunpack.i.l.bf16 %v10491_v13  ;;  %v2682_v23 = vsel %vm2677_vm1, %v10402_v41, %v7941_v20  ;;  %v7673_v41 = vld [vmem:[%s15675_s0 + $0x10a] sm:$0xff]  ;;  %v8316_v20 = vunpack.i.l.bf16 %v10740_v42 }
 0x132   :  { %v2940_v63 = vsel %vm2937_vm5, %v2875_v46, %v8276_v30  ;;  %v2941_v49 = vsel %vm2937_vm5, %v2876_v5, %v8277_v40  ;;  %v2683_v46 = vsel %vm2677_vm1, %v10407_v17, %v7942_v9  ;;  %v7674_v17 = vld [vmem:[%s15675_s0 + $0x112] sm:$0xff] }
 0x133   :  { %v3006_v24 = vsel %vm3002_vm6, %v2941_v49, %v8282_v19  ;;  %v2747_v13 = vsel %vm2742_vm2, %v2682_v23, %v8101_v39  ;;  %v2748_v5 = vsel %vm2742_vm2, %v2683_v46, %v8102_v61  ;;  %v8301_v49 = vunpack.i.l.bf16 %v10712_v62 }
 0x134   :  { %8509 = vrot.lane.b32.xlu2 %v8493_v29, %s9794_s29  ;;  %v7545_v29 = vld [vmem:[%s15675_s0 + $0x108] sm:$0xff]  ;;  %v3071_v26 = vsel %vm3067_vm7, %v3006_v24, %v8287_v10  ;;  %v7946_v46 = vunpack.i.l.bf16 %v10277_v35 }
 0x135   :  { %8504 = vrot.lane.b32.xlu1 %v8488_v38, %s9795_s16  ;;  %8499 = vrot.lane.b32.xlu0 %v8498_v31, %s9799_s23  ;;  %v3005_v38 = vsel %vm3002_vm6, %v2940_v63, %v8281_v56  ;;  %v8518_v32 = vpack.i.bf16 %v7546_v54, %v7545_v29  ;;  %v8302_v63 = vunpack.i.h.bf16 %v10712_v62  ;;  %v8528_v54 = vpack.i.bf16 %v7674_v17, %v7673_v41 }
 0x136   :  { %v10795_v11 = vpop.permute.xlu2 %8344  ;;  %v3070_v33 = vsel %vm3067_vm7, %v3005_v38, %v8286_v37  ;;  %v8106_v41 = vunpack.i.l.bf16 %v10427_v53 }
 0x137   :  { %v8295_v55 = vpop.permute.xlu1 %8294  ;;  %v8290_v36 = vpop.permute.xlu0 %8289 }
 0x138   :  { %v8292_v14 = vunpack.i.h.bf16 %v8290_v36  ;;  %v8291_v45 = vunpack.i.l.bf16 %v8290_v36  ;;  %v8297_v30 = vunpack.i.h.bf16 %v8295_v55  ;;  %v8296_v19 = vunpack.i.l.bf16 %v8295_v55 }
 0x13a   :  { %v3135_v47 = vsel %vm3132_vm8, %v3070_v33, %v8291_v45  ;;  %v3136_v40 = vsel %vm3132_vm8, %v3071_v26, %v8292_v14  ;;  %v2813_v37 = vsel %vm2807_vm3, %v2748_v5, %v8297_v30  ;;  %v8317_v45 = vunpack.i.h.bf16 %v10740_v42  ;;  %v7611_v33 = vld [vmem:[%s15675_s0 + $0x121] sm:$0xff]  ;;  %v7612_v26 = vld [vmem:[%s15675_s0 + $0x129] sm:$0xff] }
 0x13b   :  { %v3198_v56 = vpack.c.bf16 %v3136_v40, %v3135_v47  ;;  %v2878_v36 = vsel %vm2872_vm4, %v2813_v37, %v8302_v63  ;;  %v7548_v42 = vld [vmem:[%s15675_s0 + $0x128] sm:$0xff]  ;;  %v7947_v30 = vunpack.i.h.bf16 %v10277_v35  ;;  %v8553_v23 = vpack.i.bf16 %v7612_v26, %v7611_v33 }
 0x13c   :  { %8524 = vrot.lane.b32.xlu2 %v8523_v18, %s9796_s21  ;;  %v2684_v35 = vsel %vm2677_vm1, %v10436_v57, %v7946_v46  ;;  %v7675_v57 = vld [vmem:[%s15675_s0 + $0x122] sm:$0xff] }
 0x13d   :  { %8519 = vrot.lane.b32.xlu1 %v8518_v32, %s9797_s22  ;;  %8514 = vrot.lane.b32.xlu0 %v8498_v31, %s15732_s30  ;;  %v2812_v31 = vsel %vm2807_vm3, %v2747_v13, %v8296_v19 }
 0x13e   :  { %7736 = vmatmul.msk.bf16.gmra.mxu0 %vm3265_vm9, %v3198_v56  ;;  %v10825_v10 = vpop.permute.xlu2 %8359  ;;  %v2877_v55 = vsel %vm2872_vm4, %v2812_v31, %v8301_v49  ;;  %v8107_v49 = vunpack.i.h.bf16 %v10427_v53  ;;  %v2749_v53 = vsel %vm2742_vm2, %v2684_v35, %v8106_v41 }
 0x13f   :  { %v8310_v48 = vpop.permute.xlu1 %8309  ;;  %v8305_v12 = vpop.permute.xlu0 %8304 }
 0x140   :  { %v8307_v29 = vunpack.i.h.bf16 %v8305_v12  ;;  %v8306_v62 = vunpack.i.l.bf16 %v8305_v12  ;;  %v8312_v38 = vunpack.i.h.bf16 %v8310_v48  ;;  %v8311_v24 = vunpack.i.l.bf16 %v8310_v48 }
 0x142   :  { %v2942_v9 = vsel %vm2937_vm5, %v2877_v55, %v8306_v62  ;;  %v2943_v14 = vsel %vm2937_vm5, %v2878_v36, %v8307_v29  ;;  %v2685_v29 = vsel %vm2677_vm1, %v10441_v7, %v7947_v30  ;;  %v7676_v7 = vld [vmem:[%s15675_s0 + $0x12a] sm:$0xff]  ;;  %v7613_v30 = vld [vmem:[%s15675_s0 + $0x139] sm:$0xff] }
 0x143   :  { %v3008_v39 = vsel %vm3002_vm6, %v2943_v14, %v8312_v38  ;;  %v2750_v62 = vsel %vm2742_vm2, %v2685_v29, %v8107_v49  ;;  %v8332_v38 = vunpack.i.h.bf16 %v10770_v21  ;;  %v7952_v49 = vunpack.i.h.bf16 %v10164_v50 }
 0x144   :  { %8539 = vrot.lane.b32.xlu2 %v8523_v18, %s9794_s29  ;;  %v7547_v18 = vld [vmem:[%s15675_s0 + $0x120] sm:$0xff]  ;;  %v3073_v63 = vsel %vm3067_vm7, %v3008_v39, %v8317_v45  ;;  %v8112_v29 = vunpack.i.h.bf16 %v10509_v25 }
 0x145   :  { %8534 = vrot.lane.b32.xlu1 %v8518_v32, %s9795_s16  ;;  %8529 = vrot.lane.b32.xlu0 %v8528_v54, %s9799_s23  ;;  %v3007_v32 = vsel %vm3002_vm6, %v2942_v9, %v8311_v24  ;;  %v8548_v13 = vpack.i.bf16 %v7548_v42, %v7547_v18  ;;  %v8331_v24 = vunpack.i.l.bf16 %v10770_v21 }
 0x146   :  { %v10850_v61 = vpop.permute.xlu2 %8374  ;;  %v3072_v5 = vsel %vm3067_vm7, %v3007_v32, %v8316_v20  ;;  %v8558_v20 = vpack.i.bf16 %v7676_v7, %v7675_v57 }
 0x147   :  { %v8325_v47 = vpop.permute.xlu1 %8324  ;;  %v8320_v40 = vpop.permute.xlu0 %8319 }
 0x148   :  { %v8322_v19 = vunpack.i.h.bf16 %v8320_v40  ;;  %v8321_v56 = vunpack.i.l.bf16 %v8320_v40  ;;  %v8327_v37 = vunpack.i.h.bf16 %v8325_v47  ;;  %v8326_v48 = vunpack.i.l.bf16 %v8325_v47 }
 0x149   :  { %v8347_v47 = vunpack.i.h.bf16 %v10795_v11  ;;  %v8346_v40 = vunpack.i.l.bf16 %v10795_v11  ;;  %v7550_v11 = vld [vmem:[%s15675_s0 + $0x140] sm:$0xff] }
 0x14a   :  { %v3137_v17 = vsel %vm3132_vm8, %v3072_v5, %v8321_v56  ;;  %v3138_v31 = vsel %vm3132_vm8, %v3073_v63, %v8322_v19  ;;  %v2815_v36 = vsel %vm2807_vm3, %v2750_v62, %v8327_v37  ;;  %v7614_v19 = vld [vmem:[%s15675_s0 + $0x141] sm:$0xff]  ;;  %v7951_v37 = vunpack.i.l.bf16 %v10164_v50  ;;  %v7443_v50 = vld [vmem:[%s15675_s0 + $0x259] sm:$0xff] }
 0x14b   :  { %v3199_v12 = vpack.c.bf16 %v3138_v31, %v3137_v17  ;;  %v2880_v42 = vsel %vm2872_vm4, %v2815_v36, %v8332_v38  ;;  %v10916_v31 = vpack.i.bf16 %v7614_v19, %v7613_v30  ;;  %v7444_v36 = vld [vmem:[%s15675_s0 + $0x261] sm:$0xff] }
 0x14c   :  { %8554 = vrot.lane.b32.xlu2 %v8553_v23, %s9796_s21 }
 0x14d   :  { %8549 = vrot.lane.b32.xlu1 %v8548_v13, %s9797_s22  ;;  %8544 = vrot.lane.b32.xlu0 %v8528_v54, %s15732_s30  ;;  %v2814_v54 = vsel %vm2807_vm3, %v2749_v53, %v8326_v48  ;;  %v8111_v53 = vunpack.i.l.bf16 %v10509_v25  ;;  %v2687_v25 = vsel %vm2677_vm1, %v10481_v8, %v7952_v49  ;;  %v8361_v8 = vunpack.i.l.bf16 %v10825_v10 }
 0x14e   :  { %7737 = vmatmul.msk.bf16.gmra.mxu0 %vm3265_vm9, %v3199_v12  ;;  %v10880_v55 = vpop.permute.xlu2 %8389  ;;  %v2879_v18 = vsel %vm2872_vm4, %v2814_v54, %v8331_v24  ;;  %v2686_v54 = vsel %vm2677_vm1, %v10476_v16, %v7951_v37  ;;  %v2752_v16 = vsel %vm2742_vm2, %v2687_v25, %v8112_v29  ;;  %v8377_v49 = vunpack.i.h.bf16 %v10850_v61  ;;  %v7507_v37 = vld [vmem:[%s15675_s0 + $0x25a] sm:$0xff] }
 0x14f   :  { %v8340_v9 = vpop.permute.xlu1 %8339  ;;  %v8335_v14 = vpop.permute.xlu0 %8334  ;;  %v8117_v25 = vunpack.i.h.bf16 %v10507_v22 }
 0x150   :  { %v8337_v45 = vunpack.i.h.bf16 %v8335_v14  ;;  %v8336_v21 = vunpack.i.l.bf16 %v8335_v14  ;;  %v8342_v33 = vunpack.i.h.bf16 %v8340_v9  ;;  %v8341_v26 = vunpack.i.l.bf16 %v8340_v9  ;;  %v7379_v9 = vld [vmem:[%s15675_s0 + $0x258] sm:$0xff] }
 0x151   :  { %v2751_v14 = vsel %vm2742_vm2, %v2686_v54, %v8111_v53 }
 0x152   :  { %v2944_v32 = vsel %vm2937_vm5, %v2879_v18, %v8336_v21  ;;  %v2945_v39 = vsel %vm2937_vm5, %v2880_v42, %v8337_v45  ;;  %v8362_v45 = vunpack.i.h.bf16 %v10825_v10 }
 0x153   :  { %v3009_v46 = vsel %vm3002_vm6, %v2944_v32, %v8341_v26  ;;  %v7678_v26 = vld [vmem:[%s15675_s0 + $0x142] sm:$0xff] }
 0x154   :  { %8569 = vrot.lane.b32.xlu2 %v8553_v23, %s9794_s29  ;;  %v7549_v23 = vld [vmem:[%s15675_s0 + $0x138] sm:$0xff]  ;;  %v3074_v12 = vsel %vm3067_vm7, %v3009_v46, %v8346_v40  ;;  %v8598_v40 = vpack.i.bf16 %v7444_v36, %v7443_v50  ;;  %v8116_v36 = vunpack.i.l.bf16 %v10507_v22 }
 0x155   :  { %8564 = vrot.lane.b32.xlu1 %v8548_v13, %s9795_s16  ;;  %8559 = vrot.lane.b32.xlu0 %v8558_v20, %s9799_s23  ;;  %v3010_v13 = vsel %vm3002_vm6, %v2945_v39, %v8342_v33  ;;  %v10919_v48 = vpack.i.bf16 %v7550_v11, %v7549_v23  ;;  %v7677_v33 = vld [vmem:[%s15675_s0 + $0x13a] sm:$0xff]  ;;  %v7635_v22 = vld [vmem:[%s15675_s0 + $0x271] sm:$0xff] }
 0x156   :  { %v10905_v56 = vpop.permute.xlu2 %8404  ;;  %v3075_v35 = vsel %vm3067_vm7, %v3010_v13, %v8347_v47  ;;  %v10963_v19 = vpack.i.bf16 %v7678_v26, %v7677_v33  ;;  %v7636_v33 = vld [vmem:[%s15675_s0 + $0x279] sm:$0xff]  ;;  %v8392_v26 = vunpack.i.h.bf16 %v10880_v55 }
 0x157   :  { %v8355_v5 = vpop.permute.xlu1 %8354  ;;  %v8350_v63 = vpop.permute.xlu0 %8349 }
 0x158   :  { %v8352_v41 = vunpack.i.h.bf16 %v8350_v63  ;;  %v8351_v17 = vunpack.i.l.bf16 %v8350_v63  ;;  %v8357_v24 = vunpack.i.h.bf16 %v8355_v5  ;;  %v8356_v57 = vunpack.i.l.bf16 %v8355_v5 }
 0x15a   :  { %v3139_v62 = vsel %vm3132_vm8, %v3074_v12, %v8351_v17  ;;  %v3140_v38 = vsel %vm3132_vm8, %v3075_v35, %v8352_v41  ;;  %v2816_v18 = vsel %vm2807_vm3, %v2751_v14, %v8356_v57  ;;  %v2817_v10 = vsel %vm2807_vm3, %v2752_v16, %v8357_v24  ;;  %v7508_v12 = vld [vmem:[%s15675_s0 + $0x262] sm:$0xff] }
 0x15b   :  { %v3200_v7 = vpack.c.bf16 %v3140_v38, %v3139_v62  ;;  %v2881_v46 = vsel %vm2872_vm4, %v2816_v18, %v8361_v8  ;;  %v2882_v13 = vsel %vm2872_vm4, %v2817_v10, %v8362_v45  ;;  %v8376_v41 = vunpack.i.l.bf16 %v10850_v61  ;;  %v7572_v10 = vld [vmem:[%s15675_s0 + $0x278] sm:$0xff] }
 0x15c   :  { %8584 = vrot.lane.b32.xlu2 %v10916_v31, %s9796_s21  ;;  %v7957_v62 = vunpack.i.h.bf16 %v10193_v60  ;;  %v7956_v57 = vunpack.i.l.bf16 %v10193_v60 }
 0x15d   :  { %8579 = vrot.lane.b32.xlu1 %v10919_v48, %s9797_s22  ;;  %8574 = vrot.lane.b32.xlu0 %v8558_v20, %s15732_s30  ;;  %v7380_v20 = vld [vmem:[%s15675_s0 + $0x260] sm:$0xff] }
 0x15e   :  { %7738 = vmatmul.msk.bf16.gmra.mxu0 %vm3265_vm9, %v3200_v7  ;;  %v10950_v21 = vpop.permute.xlu2 %8419  ;;  %v8593_v30 = vpack.i.bf16 %v7380_v20, %v7379_v9  ;;  %v8608_v7 = vpack.i.bf16 %v7508_v12, %v7507_v37  ;;  %v2688_v60 = vsel %vm2677_vm1, %v10514_v27, %v7956_v57  ;;  %v2689_v20 = vsel %vm2677_vm1, %v10519_v28, %v7957_v62 }
 0x15f   :  { %v8370_v42 = vpop.permute.xlu1 %8369  ;;  %v8365_v32 = vpop.permute.xlu0 %8364  ;;  %v2754_v27 = vsel %vm2742_vm2, %v2689_v20, %v8117_v25  ;;  %v8391_v28 = vunpack.i.l.bf16 %v10880_v55  ;;  %v8407_v37 = vunpack.i.h.bf16 %v10905_v56  ;;  %v8406_v12 = vunpack.i.l.bf16 %v10905_v56  ;;  %v7700_v56 = vld [vmem:[%s15675_s0 + $0x27a] sm:$0xff] }
 0x160   :  { %v8367_v39 = vunpack.i.h.bf16 %v8365_v32  ;;  %v8366_v47 = vunpack.i.l.bf16 %v8365_v32  ;;  %v8372_v23 = vunpack.i.h.bf16 %v8370_v42  ;;  %v8371_v11 = vunpack.i.l.bf16 %v8370_v42 }
 0x162   :  { %v2946_v5 = vsel %vm2937_vm5, %v2881_v46, %v8366_v47  ;;  %v2947_v63 = vsel %vm2937_vm5, %v2882_v13, %v8367_v39 }
 0x163   :  { %v3011_v35 = vsel %vm3002_vm6, %v2946_v5, %v8371_v11  ;;  %v3012_v29 = vsel %vm3002_vm6, %v2947_v63, %v8372_v23 }
 0x164   :  { %8599 = vrot.lane.b32.xlu2 %v8598_v40, %s9794_s29  ;;  %v3076_v50 = vsel %vm3067_vm7, %v3011_v35, %v8376_v41  ;;  %v3077_v54 = vsel %vm3067_vm7, %v3012_v29, %v8377_v49  ;;  %v7615_v41 = vld [vmem:[%s15675_s0 + $0x151] sm:$0xff]  ;;  %v7616_v35 = vld [vmem:[%s15675_s0 + $0x159] sm:$0xff] }
 0x165   :  { %8594 = vrot.lane.b32.xlu1 %v8593_v30, %s9795_s16  ;;  %8589 = vrot.lane.b32.xlu0 %v10963_v19, %s9799_s23  ;;  %v11023_v30 = vpack.i.bf16 %v7636_v33, %v7635_v22  ;;  %v7699_v29 = vld [vmem:[%s15675_s0 + $0x272] sm:$0xff] }
 0x166   :  { %v10975_v17 = vpop.permute.xlu2 %8434 }
 0x167   :  { %v8385_v61 = vpop.permute.xlu1 %8384  ;;  %v8380_v53 = vpop.permute.xlu0 %8379 }
 0x168   :  { %v8382_v38 = vunpack.i.h.bf16 %v8380_v53  ;;  %v8381_v24 = vunpack.i.l.bf16 %v8380_v53  ;;  %v8387_v16 = vunpack.i.h.bf16 %v8385_v61  ;;  %v8386_v45 = vunpack.i.l.bf16 %v8385_v61  ;;  %v7552_v53 = vld [vmem:[%s15675_s0 + $0x158] sm:$0xff] }
 0x16a   :  { %v3141_v9 = vsel %vm3132_vm8, %v3076_v50, %v8381_v24  ;;  %v3142_v14 = vsel %vm3132_vm8, %v3077_v54, %v8382_v38  ;;  %v2819_v32 = vsel %vm2807_vm3, %v2754_v27, %v8387_v16  ;;  %v7962_v24 = vunpack.i.h.bf16 %v10306_v52 }
 0x16b   :  { %v3201_v8 = vpack.c.bf16 %v3142_v14, %v3141_v9  ;;  %v2884_v5 = vsel %vm2872_vm4, %v2819_v32, %v8392_v26  ;;  %v7961_v50 = vunpack.i.l.bf16 %v10306_v52  ;;  %v11063_v9 = vpack.i.bf16 %v7700_v56, %v7699_v29 }
 0x16c   :  { %8614 = vrot.lane.b32.xlu2 %v10916_v31, %s9794_s29  ;;  %v2753_v31 = vsel %vm2742_vm2, %v2688_v60, %v8116_v36  ;;  %v8643_v36 = vpack.i.bf16 %v7616_v35, %v7615_v41  ;;  %v8121_v60 = vunpack.i.l.bf16 %v10450_v59  ;;  %v2691_v26 = vsel %vm2677_vm1, %v10557_v34, %v7962_v24  ;;  %v7679_v34 = vld [vmem:[%s15675_s0 + $0x152] sm:$0xff] }
 0x16d   :  { %8609 = vrot.lane.b32.xlu1 %v8608_v7, %s15732_s30  ;;  %8604 = vrot.lane.b32.xlu0 %v10919_v48, %s9795_s16  ;;  %v7571_v48 = vld [vmem:[%s15675_s0 + $0x270] sm:$0xff]  ;;  %v2818_v42 = vsel %vm2807_vm3, %v2753_v31, %v8386_v45  ;;  %v2690_v27 = vsel %vm2677_vm1, %v10552_v44, %v7961_v50  ;;  %v7966_v24 = vunpack.i.l.bf16 %v10304_v51 }
 0x16e   :  { %7739 = vmatmul.msk.bf16.gmra.mxu0 %vm3265_vm9, %v3201_v8  ;;  %v11013_v18 = vpop.permute.xlu2 %8449  ;;  %v11025_v23 = vpack.i.bf16 %v7572_v10, %v7571_v48  ;;  %v2883_v13 = vsel %vm2872_vm4, %v2818_v42, %v8391_v28  ;;  %v8122_v8 = vunpack.i.h.bf16 %v10450_v59  ;;  %v2755_v59 = vsel %vm2742_vm2, %v2690_v27, %v8121_v60  ;;  %v7680_v42 = vld [vmem:[%s15675_s0 + $0x15a] sm:$0xff] }
 0x16f   :  { %v8400_v39 = vpop.permute.xlu1 %8399  ;;  %v8395_v47 = vpop.permute.xlu0 %8394  ;;  %v8422_v48 = vunpack.i.h.bf16 %v10950_v21  ;;  %v8421_v10 = vunpack.i.l.bf16 %v10950_v21 }
 0x170   :  { %v8397_v40 = vunpack.i.h.bf16 %v8395_v47  ;;  %v8396_v55 = vunpack.i.l.bf16 %v8395_v47  ;;  %v8402_v11 = vunpack.i.h.bf16 %v8400_v39  ;;  %v8401_v46 = vunpack.i.l.bf16 %v8400_v39 }
 0x171   :  { %v2756_v28 = vsel %vm2742_vm2, %v2691_v26, %v8122_v8 }
 0x172   :  { %v2948_v63 = vsel %vm2937_vm5, %v2883_v13, %v8396_v55  ;;  %v2949_v49 = vsel %vm2937_vm5, %v2884_v5, %v8397_v40 }
 0x173   :  { %v3013_v62 = vsel %vm3002_vm6, %v2948_v63, %v8401_v46  ;;  %v3014_v38 = vsel %vm3002_vm6, %v2949_v49, %v8402_v11  ;;  %v8648_v11 = vpack.i.bf16 %v7680_v42, %v7679_v34 }
 0x174   :  { %8629 = vrot.lane.b32.xlu2 %v11023_v30, %s9796_s21  ;;  %v3078_v16 = vsel %vm3067_vm7, %v3013_v62, %v8406_v12  ;;  %v3079_v45 = vsel %vm3067_vm7, %v3014_v38, %v8407_v37  ;;  %v8437_v37 = vunpack.i.h.bf16 %v10975_v17  ;;  %v8436_v12 = vunpack.i.l.bf16 %v10975_v17 }
 0x175   :  { %8624 = vrot.lane.b32.xlu1 %v10963_v19, %s15732_s30  ;;  %8619 = vrot.lane.b32.xlu0 %v11025_v23, %s9797_s22  ;;  %v7551_v19 = vld [vmem:[%s15675_s0 + $0x150] sm:$0xff] }
 0x176   :  { %v11048_v61 = vpop.permute.xlu2 %8464  ;;  %v11065_v14 = vpack.i.bf16 %v7552_v53, %v7551_v19 }
 0x177   :  { %v8415_v57 = vpop.permute.xlu1 %8414  ;;  %v8410_v7 = vpop.permute.xlu0 %8409 }
 0x178   :  { %v8412_v54 = vunpack.i.h.bf16 %v8410_v7  ;;  %v8411_v25 = vunpack.i.l.bf16 %v8410_v7  ;;  %v8417_v52 = vunpack.i.h.bf16 %v8415_v57  ;;  %v8416_v33 = vunpack.i.l.bf16 %v8415_v57 }
 0x179   :  { %v8127_v57 = vunpack.i.h.bf16 %v10531_v0  ;;  %v8126_v7 = vunpack.i.l.bf16 %v10531_v0  ;;  %v7637_v0 = vld [vmem:[%s15675_s0 + $0x289] sm:$0xff] }
 0x17a   :  { %v3143_v20 = vsel %vm3132_vm8, %v3078_v16, %v8411_v25  ;;  %v3144_v22 = vsel %vm3132_vm8, %v3079_v45, %v8412_v54  ;;  %v2820_v32 = vsel %vm2807_vm3, %v2755_v59, %v8416_v33  ;;  %v2821_v39 = vsel %vm2807_vm3, %v2756_v28, %v8417_v52 }
 0x17b   :  { %v3202_v31 = vpack.c.bf16 %v3144_v22, %v3143_v20  ;;  %v2885_v5 = vsel %vm2872_vm4, %v2820_v32, %v8421_v10  ;;  %v2886_v63 = vsel %vm2872_vm4, %v2821_v39, %v8422_v48  ;;  %v8451_v20 = vunpack.i.l.bf16 %v11013_v18  ;;  %v7574_v22 = vld [vmem:[%s15675_s0 + $0x290] sm:$0xff] }
 0x17c   :  { %8644 = vrot.lane.b32.xlu2 %v8643_v36, %s9796_s21 }
 0x17d   :  { %8639 = vrot.lane.b32.xlu1 %v11063_v9, %s9799_s23  ;;  %8634 = vrot.lane.b32.xlu0 %v11065_v14, %s9797_s22 }
 0x17e   :  { %7740 = vmatmul.msk.bf16.gmra.mxu0 %vm3265_vm9, %v3202_v31  ;;  %v11087_v44 = vpop.permute.xlu2 %8479 }
 0x17f   :  { %v8430_v47 = vpop.permute.xlu1 %8429  ;;  %v8425_v40 = vpop.permute.xlu0 %8424 }
 0x180   :  { %v8427_v55 = vunpack.i.h.bf16 %v8425_v40  ;;  %v8426_v21 = vunpack.i.l.bf16 %v8425_v40  ;;  %v8432_v46 = vunpack.i.h.bf16 %v8430_v47  ;;  %v8431_v13 = vunpack.i.l.bf16 %v8430_v47  ;;  %v7617_v47 = vld [vmem:[%s15675_s0 + $0x169] sm:$0xff] }
 0x181   :  { %v8467_v40 = vunpack.i.h.bf16 %v11048_v61 }
 0x182   :  { %v2950_v49 = vsel %vm2937_vm5, %v2885_v5, %v8426_v21  ;;  %v2951_v41 = vsel %vm2937_vm5, %v2886_v63, %v8427_v55  ;;  %v8466_v55 = vunpack.i.l.bf16 %v11048_v61  ;;  %v7618_v21 = vld [vmem:[%s15675_s0 + $0x171] sm:$0xff]  ;;  %v7553_v61 = vld [vmem:[%s15675_s0 + $0x168] sm:$0xff] }
 0x183   :  { %v3015_v29 = vsel %vm3002_vm6, %v2950_v49, %v8431_v13  ;;  %v3016_v56 = vsel %vm3002_vm6, %v2951_v41, %v8432_v46  ;;  %v7701_v46 = vld [vmem:[%s15675_s0 + $0x28a] sm:$0xff]  ;;  %v7702_v5 = vld [vmem:[%s15675_s0 + $0x292] sm:$0xff]  ;;  %v7972_v41 = vunpack.i.h.bf16 %v10216_v6 }
 0x184   :  { %8659 = vrot.lane.b32.xlu2 %v11023_v30, %s9794_s29  ;;  %v7967_v30 = vunpack.i.h.bf16 %v10304_v51  ;;  %v3080_v17 = vsel %vm3067_vm7, %v3015_v29, %v8436_v12  ;;  %v2692_v51 = vsel %vm2677_vm1, %v10598_v4, %v7966_v24  ;;  %v7971_v29 = vunpack.i.l.bf16 %v10216_v6  ;;  %v68_v6 = vld [vmem:[%s15675_s0 + $0xc8] sm:$0xff] }
 0x185   :  { %8654 = vrot.lane.b32.xlu1 %v11025_v23, %s9795_s16  ;;  %8649 = vrot.lane.b32.xlu0 %v8648_v11, %s9799_s23  ;;  %v3081_v23 = vsel %vm3067_vm7, %v3016_v56, %v8437_v37  ;;  %v2757_v60 = vsel %vm2742_vm2, %v2692_v51, %v8126_v7  ;;  %v2695_v51 = vsel %vm2677_vm1, %v68_v6, %v7972_v41 }
 0x186   :  { %v11108_v35 = vpop.permute.xlu2 %8494  ;;  %v2693_v8 = vsel %vm2677_vm1, %v10603_v43, %v7967_v30  ;;  %v8452_v43 = vunpack.i.h.bf16 %v11013_v18 }
 0x187   :  { %v8445_v19 = vpop.permute.xlu1 %8444  ;;  %v8440_v53 = vpop.permute.xlu0 %8439  ;;  %v2758_v4 = vsel %vm2742_vm2, %v2693_v8, %v8127_v57  ;;  %v8131_v57 = vunpack.i.l.bf16 %v10529_v58 }
 0x188   :  { %v8442_v62 = vunpack.i.h.bf16 %v8440_v53  ;;  %v8441_v38 = vunpack.i.l.bf16 %v8440_v53  ;;  %v8447_v25 = vunpack.i.h.bf16 %v8445_v19  ;;  %v8446_v16 = vunpack.i.l.bf16 %v8445_v19 }
 0x189   :  { %v11189_v53 = vpack.i.bf16 %v7618_v21, %v7617_v47 }
 0x18a   :  { %v3145_v50 = vsel %vm3132_vm8, %v3080_v17, %v8441_v38  ;;  %v3146_v54 = vsel %vm3132_vm8, %v3081_v23, %v8442_v62  ;;  %v2822_v52 = vsel %vm2807_vm3, %v2757_v60, %v8446_v16  ;;  %v2823_v33 = vsel %vm2807_vm3, %v2758_v4, %v8447_v25  ;;  %v67_v17 = vld [vmem:[%s15675_s0 + $0xc0] sm:$0xff]  ;;  %v7681_v4 = vld [vmem:[%s15675_s0 + $0x16a] sm:$0xff] }
 0x18b   :  { %v3203_v45 = vpack.c.bf16 %v3146_v54, %v3145_v50  ;;  %v2887_v34 = vsel %vm2872_vm4, %v2822_v52, %v8451_v20  ;;  %v2888_v42 = vsel %vm2872_vm4, %v2823_v33, %v8452_v43  ;;  %v11191_v62 = vpack.i.bf16 %v7702_v5, %v7701_v46  ;;  %v7682_v43 = vld [vmem:[%s15675_s0 + $0x172] sm:$0xff] }
 0x18c   :  { %8674 = vrot.lane.b32.xlu2 %v8643_v36, %s9794_s29  ;;  %v7638_v36 = vld [vmem:[%s15675_s0 + $0x291] sm:$0xff]  ;;  %v8132_v23 = vunpack.i.h.bf16 %v10529_v58  ;;  %v7977_v5 = vunpack.i.h.bf16 %v10333_v3 }
 0x18d   :  { %8669 = vrot.lane.b32.xlu1 %v11063_v9, %s15732_s30  ;;  %8664 = vrot.lane.b32.xlu0 %v11065_v14, %s9795_s16  ;;  %v7573_v14 = vld [vmem:[%s15675_s0 + $0x288] sm:$0xff]  ;;  %v11150_v59 = vpack.i.bf16 %v7638_v36, %v7637_v0  ;;  %v8482_v0 = vunpack.i.h.bf16 %v11087_v44  ;;  %v8481_v36 = vunpack.i.l.bf16 %v11087_v44 }
 0x18e   :  { %7741 = vmatmul.msk.bf16.gmra.mxu0 %vm3265_vm9, %v3203_v45  ;;  %v11140_v9 = vpop.permute.xlu2 %8509  ;;  %v11152_v28 = vpack.i.bf16 %v7574_v22, %v7573_v14  ;;  %v2694_v45 = vsel %vm2677_vm1, %v67_v17, %v7971_v29  ;;  %v2760_v8 = vsel %vm2742_vm2, %v2695_v51, %v8132_v23 }
 0x18f   :  { %v8460_v31 = vpop.permute.xlu1 %8459  ;;  %v8455_v27 = vpop.permute.xlu0 %8454  ;;  %v2759_v58 = vsel %vm2742_vm2, %v2694_v45, %v8131_v57  ;;  %v8512_v6 = vunpack.i.h.bf16 %v11140_v9  ;;  %v8511_v23 = vunpack.i.l.bf16 %v11140_v9  ;;  %v7576_v57 = vld [vmem:[%s15675_s0 + $0x2a8] sm:$0xff] }
 0x190   :  { %v8457_v26 = vunpack.i.h.bf16 %v8455_v27  ;;  %v8456_v18 = vunpack.i.l.bf16 %v8455_v27  ;;  %v8462_v48 = vunpack.i.h.bf16 %v8460_v31  ;;  %v8461_v10 = vunpack.i.l.bf16 %v8460_v31 }
 0x191   :  { %v11230_v31 = vpack.i.bf16 %v7682_v43, %v7681_v4 }
 0x192   :  { %v2952_v32 = vsel %vm2937_vm5, %v2887_v34, %v8456_v18  ;;  %v2953_v39 = vsel %vm2937_vm5, %v2888_v42, %v8457_v26  ;;  %v8497_v42 = vunpack.i.h.bf16 %v11108_v35 }
 0x193   :  { %v3017_v63 = vsel %vm3002_vm6, %v2952_v32, %v8461_v10  ;;  %v3018_v49 = vsel %vm3002_vm6, %v2953_v39, %v8462_v48  ;;  %v8496_v32 = vunpack.i.l.bf16 %v11108_v35  ;;  %v7976_v35 = vunpack.i.l.bf16 %v10333_v3  ;;  %v9790_v3 = vld [vmem:[%s15675_s0 + $0xd8] sm:$0xff] }
 0x194   :  { %8689 = vrot.lane.b32.xlu2 %v11150_v59, %s9796_s21  ;;  %v3082_v30 = vsel %vm3067_vm7, %v3017_v63, %v8466_v55  ;;  %v3083_v24 = vsel %vm3067_vm7, %v3018_v49, %v8467_v40  ;;  %v8136_v63 = vunpack.i.l.bf16 %v10467_v1 }
 0x195   :  { %8684 = vrot.lane.b32.xlu1 %v8648_v11, %s15732_s30  ;;  %8679 = vrot.lane.b32.xlu0 %v11152_v28, %s9797_s22  ;;  %v7554_v11 = vld [vmem:[%s15675_s0 + $0x170] sm:$0xff] }
 0x196   :  { %v11174_v13 = vpop.permute.xlu2 %8524  ;;  %v11193_v38 = vpack.i.bf16 %v7554_v11, %v7553_v61  ;;  %v8137_v11 = vunpack.i.h.bf16 %v10467_v1  ;;  %v9791_v1 = vld [vmem:[%s15675_s0 + $0xe0] sm:$0xff] }
 0x197   :  { %v8475_v37 = vpop.permute.xlu1 %8474  ;;  %v8470_v12 = vpop.permute.xlu0 %8469 }
 0x198   :  { %v8472_v56 = vunpack.i.h.bf16 %v8470_v12  ;;  %v8471_v19 = vunpack.i.l.bf16 %v8470_v12  ;;  %v8477_v54 = vunpack.i.h.bf16 %v8475_v37  ;;  %v8476_v25 = vunpack.i.l.bf16 %v8475_v37 }
 0x19a   :  { %v3147_v7 = vsel %vm3132_vm8, %v3082_v30, %v8471_v19  ;;  %v3148_v50 = vsel %vm3132_vm8, %v3083_v24, %v8472_v56  ;;  %v2824_v20 = vsel %vm2807_vm3, %v2759_v58, %v8476_v25  ;;  %v2825_v14 = vsel %vm2807_vm3, %v2760_v8, %v8477_v54  ;;  %v7640_v30 = vld [vmem:[%s15675_s0 + $0x2a9] sm:$0xff] }
 0x19b   :  { %v3204_v16 = vpack.c.bf16 %v3148_v50, %v3147_v7  ;;  %v2889_v18 = vsel %vm2872_vm4, %v2824_v20, %v8481_v36  ;;  %v2890_v48 = vsel %vm2872_vm4, %v2825_v14, %v8482_v0  ;;  %v2696_v56 = vsel %vm2677_vm1, %v9790_v3, %v7976_v35  ;;  %v7619_v20 = vld [vmem:[%s15675_s0 + $0x181] sm:$0xff] }
 0x19c   :  { %8704 = vrot.lane.b32.xlu2 %v11189_v53, %s9796_s21  ;;  %v2697_v19 = vsel %vm2677_vm1, %v9791_v1, %v7977_v5  ;;  %v2761_v24 = vsel %vm2742_vm2, %v2696_v56, %v8136_v63  ;;  %v8527_v14 = vunpack.i.h.bf16 %v11174_v13  ;;  %v71_v5 = vld [vmem:[%s15675_s0 + $0xf0] sm:$0xff]  ;;  %v8142_v35 = vunpack.i.h.bf16 %v10547_v15 }
 0x19d   :  { %8699 = vrot.lane.b32.xlu1 %v11191_v62, %s9799_s23  ;;  %8694 = vrot.lane.b32.xlu0 %v11193_v38, %s9797_s22  ;;  %v2762_v17 = vsel %vm2742_vm2, %v2697_v19, %v8137_v11  ;;  %v7683_v19 = vld [vmem:[%s15675_s0 + $0x182] sm:$0xff] }
 0x19e   :  { %7742 = vmatmul.msk.bf16.gmra.mxu0 %vm3265_vm9, %v3204_v16  ;;  %v11220_v60 = vpop.permute.xlu2 %8539 }
 0x19f   :  { %v8490_v22 = vpop.permute.xlu1 %8489  ;;  %v8485_v52 = vpop.permute.xlu0 %8484  ;;  %v8542_v3 = vunpack.i.h.bf16 %v11220_v60  ;;  %v8541_v56 = vunpack.i.l.bf16 %v11220_v60 }
 0x1a0   :  { %v8487_v33 = vunpack.i.h.bf16 %v8485_v52  ;;  %v8486_v44 = vunpack.i.l.bf16 %v8485_v52  ;;  %v8492_v27 = vunpack.i.h.bf16 %v8490_v22  ;;  %v8491_v26 = vunpack.i.l.bf16 %v8490_v22  ;;  %v7620_v52 = vld [vmem:[%s15675_s0 + $0x189] sm:$0xff] }
 0x1a1   :  { %v8526_v22 = vunpack.i.l.bf16 %v11174_v13  ;;  %v7704_v13 = vld [vmem:[%s15675_s0 + $0x2aa] sm:$0xff] }
 0x1a2   :  { %v2954_v10 = vsel %vm2937_vm5, %v2889_v18, %v8486_v44  ;;  %v2955_v34 = vsel %vm2937_vm5, %v2890_v48, %v8487_v33  ;;  %v7703_v33 = vld [vmem:[%s15675_s0 + $0x2a2] sm:$0xff]  ;;  %v7982_v48 = vunpack.i.h.bf16 %v10331_v2 }
 0x1a3   :  { %v3019_v47 = vsel %vm3002_vm6, %v2954_v10, %v8491_v26  ;;  %v3020_v40 = vsel %vm3002_vm6, %v2955_v34, %v8492_v27  ;;  %v7556_v27 = vld [vmem:[%s15675_s0 + $0x188] sm:$0xff] }
 0x1a4   :  { %8719 = vrot.lane.b32.xlu2 %v11150_v59, %s9794_s29  ;;  %v3084_v61 = vsel %vm3067_vm7, %v3019_v47, %v8496_v32 }
 0x1a5   :  { %8714 = vrot.lane.b32.xlu1 %v11152_v28, %s9795_s16  ;;  %8709 = vrot.lane.b32.xlu0 %v11230_v31, %s9799_s23  ;;  %v3085_v28 = vsel %vm3067_vm7, %v3020_v40, %v8497_v42  ;;  %v7981_v42 = vunpack.i.l.bf16 %v10331_v2  ;;  %v11331_v40 = vpack.i.bf16 %v7620_v52, %v7619_v20  ;;  %v72_v2 = vld [vmem:[%s15675_s0 + $0xf8] sm:$0xff] }
 0x1a6   :  { %v11244_v39 = vpop.permute.xlu2 %8554 }
 0x1a7   :  { %v8505_v55 = vpop.permute.xlu1 %8504  ;;  %v8500_v21 = vpop.permute.xlu0 %8499 }
 0x1a8   :  { %v8502_v46 = vunpack.i.h.bf16 %v8500_v21  ;;  %v8501_v59 = vunpack.i.l.bf16 %v8500_v21  ;;  %v8507_v37 = vunpack.i.h.bf16 %v8505_v55  ;;  %v8506_v12 = vunpack.i.l.bf16 %v8505_v55 }
 0x1a9   :  { %v11333_v55 = vpack.i.bf16 %v7704_v13, %v7703_v33  ;;  %v73_v33 = vld [vmem:[%s15675_s0 + $0x108] sm:$0xff]  ;;  %v74_v13 = vld [vmem:[%s15675_s0 + $0x110] sm:$0xff] }
 0x1aa   :  { %v3149_v49 = vsel %vm3132_vm8, %v3084_v61, %v8501_v59  ;;  %v3150_v41 = vsel %vm3132_vm8, %v3085_v28, %v8502_v46  ;;  %v2826_v7 = vsel %vm2807_vm3, %v2761_v24, %v8506_v12  ;;  %v2827_v50 = vsel %vm2807_vm3, %v2762_v17, %v8507_v37 }
 0x1ab   :  { %v3205_v29 = vpack.c.bf16 %v3150_v41, %v3149_v49  ;;  %v2891_v0 = vsel %vm2872_vm4, %v2826_v7, %v8511_v23  ;;  %v2892_v36 = vsel %vm2872_vm4, %v2827_v50, %v8512_v6  ;;  %v8141_v61 = vunpack.i.l.bf16 %v10547_v15 }
 0x1ac   :  { %8734 = vrot.lane.b32.xlu2 %v11189_v53, %s9794_s29  ;;  %v7639_v53 = vld [vmem:[%s15675_s0 + $0x2a1] sm:$0xff]  ;;  %v2698_v37 = vsel %vm2677_vm1, %v71_v5, %v7981_v42  ;;  %v2699_v12 = vsel %vm2677_vm1, %v72_v2, %v7982_v48 }
 0x1ad   :  { %8729 = vrot.lane.b32.xlu1 %v11191_v62, %s15732_s30  ;;  %8724 = vrot.lane.b32.xlu0 %v11193_v38, %s9795_s16  ;;  %v7575_v38 = vld [vmem:[%s15675_s0 + $0x2a0] sm:$0xff]  ;;  %v11291_v45 = vpack.i.bf16 %v7640_v30, %v7639_v53  ;;  %v2763_v15 = vsel %vm2742_vm2, %v2698_v37, %v8141_v61  ;;  %v7684_v53 = vld [vmem:[%s15675_s0 + $0x18a] sm:$0xff] }
 0x1ae   :  { %7743 = vmatmul.msk.bf16.gmra.mxu0 %vm3265_vm9, %v3205_v29  ;;  %v11281_v62 = vpop.permute.xlu2 %8569  ;;  %v11293_v51 = vpack.i.bf16 %v7576_v57, %v7575_v38  ;;  %v2764_v29 = vsel %vm2742_vm2, %v2699_v12, %v8142_v35  ;;  %v11372_v38 = vpack.i.bf16 %v7684_v53, %v7683_v19  ;;  %v7578_v61 = vld [vmem:[%s15675_s0 + $0x2c0] sm:$0xff] }
 0x1af   :  { %v8520_v54 = vpop.permute.xlu1 %8519  ;;  %v8515_v25 = vpop.permute.xlu0 %8514  ;;  %v8572_v2 = vunpack.i.h.bf16 %v11281_v62  ;;  %v8571_v35 = vunpack.i.l.bf16 %v11281_v62 }
 0x1b0   :  { %v8517_v16 = vunpack.i.h.bf16 %v8515_v25  ;;  %v8516_v9 = vunpack.i.l.bf16 %v8515_v25  ;;  %v8522_v58 = vunpack.i.h.bf16 %v8520_v54  ;;  %v8521_v8 = vunpack.i.l.bf16 %v8520_v54 }
 0x1b2   :  { %v2956_v4 = vsel %vm2937_vm5, %v2891_v0, %v8516_v9  ;;  %v2957_v43 = vsel %vm2937_vm5, %v2892_v36, %v8517_v16  ;;  %v8557_v9 = vunpack.i.h.bf16 %v11244_v39 }
 0x1b3   :  { %v3021_v26 = vsel %vm3002_vm6, %v2956_v4, %v8521_v8  ;;  %v3022_v18 = vsel %vm3002_vm6, %v2957_v43, %v8522_v58  ;;  %v8556_v58 = vunpack.i.l.bf16 %v11244_v39 }
 0x1b4   :  { %8749 = vrot.lane.b32.xlu2 %v11291_v45, %s9796_s21  ;;  %v3086_v46 = vsel %vm3067_vm7, %v3021_v26, %v8526_v22  ;;  %v3087_v59 = vsel %vm3067_vm7, %v3022_v18, %v8527_v14  ;;  %v15811_v14 = vld [vmem:[#allocation4_spill] sm:$0xff] }
 0x1b5   :  { %8744 = vrot.lane.b32.xlu1 %v11230_v31, %s15732_s30  ;;  %8739 = vrot.lane.b32.xlu0 %v11293_v51, %s9797_s22  ;;  %v7555_v31 = vld [vmem:[%s15675_s0 + $0x180] sm:$0xff]  ;;  %v7987_v22 = vunpack.i.h.bf16 %v15811_v14  ;;  %v7986_v39 = vunpack.i.l.bf16 %v15811_v14 }
 0x1b6   :  { %v11316_v44 = vpop.permute.xlu2 %8584  ;;  %v11335_v21 = vpack.i.bf16 %v7556_v27, %v7555_v31  ;;  %v15812_v31 = vld [vmem:[#allocation29_spill] sm:$0xff] }
 0x1b7   :  { %v8535_v10 = vpop.permute.xlu1 %8534  ;;  %v8530_v34 = vpop.permute.xlu0 %8529  ;;  %v8147_v27 = vunpack.i.h.bf16 %v15812_v31  ;;  %v8146_v26 = vunpack.i.l.bf16 %v15812_v31  ;;  %v15813_v31 = vld [vmem:[#allocation17_spill] sm:$0xff] }
 0x1b8   :  { %v8532_v32 = vunpack.i.h.bf16 %v8530_v34  ;;  %v8531_v47 = vunpack.i.l.bf16 %v8530_v34  ;;  %v8537_v63 = vunpack.i.h.bf16 %v8535_v10  ;;  %v8536_v49 = vunpack.i.l.bf16 %v8535_v10 }
 0x1ba   :  { %v3151_v28 = vsel %vm3132_vm8, %v3086_v46, %v8531_v47  ;;  %v3152_v11 = vsel %vm3132_vm8, %v3087_v59, %v8532_v32  ;;  %v2828_v30 = vsel %vm2807_vm3, %v2763_v15, %v8536_v49  ;;  %v2829_v24 = vsel %vm2807_vm3, %v2764_v29, %v8537_v63  ;;  %v7641_v46 = vld [vmem:[%s15675_s0 + $0x2b9] sm:$0xff]  ;;  %v7642_v59 = vld [vmem:[%s15675_s0 + $0x2c1] sm:$0xff] }
 0x1bb   :  { %v3206_v41 = vpack.c.bf16 %v3152_v11, %v3151_v28  ;;  %v2893_v50 = vsel %vm2872_vm4, %v2828_v30, %v8541_v56  ;;  %v2894_v54 = vsel %vm2872_vm4, %v2829_v24, %v8542_v3  ;;  %v2700_v32 = vsel %vm2677_vm1, %v73_v33, %v7986_v39  ;;  %v7621_v30 = vld [vmem:[%s15675_s0 + $0x199] sm:$0xff] }
 0x1bc   :  { %8764 = vrot.lane.b32.xlu2 %v11331_v40, %s9796_s21  ;;  %v2701_v47 = vsel %vm2677_vm1, %v74_v13, %v7987_v22  ;;  %v8808_v37 = vpack.i.bf16 %v7642_v59, %v7641_v46  ;;  %v8587_v24 = vunpack.i.h.bf16 %v11316_v44  ;;  %v7685_v39 = vld [vmem:[%s15675_s0 + $0x19a] sm:$0xff] }
 0x1bd   :  { %8759 = vrot.lane.b32.xlu1 %v11333_v55, %s9799_s23  ;;  %8754 = vrot.lane.b32.xlu0 %v11335_v21, %s9797_s22  ;;  %v2766_v5 = vsel %vm2742_vm2, %v2701_v47, %v8147_v27  ;;  %v8042_v27 = vunpack.i.h.bf16 %v15813_v31  ;;  %v7432_v47 = vld [vmem:[%s15675_s0 + $0x1d1] sm:$0xff] }
 0x1be   :  { %7744 = vmatmul.msk.bf16.gmra.mxu0 %vm3265_vm9, %v3206_v41  ;;  %v11362_v1 = vpop.permute.xlu2 %8599 }
 0x1bf   :  { %v8550_v17 = vpop.permute.xlu1 %8549  ;;  %v8545_v6 = vpop.permute.xlu0 %8544 }
 0x1c0   :  { %v8547_v23 = vunpack.i.h.bf16 %v8545_v6  ;;  %v8546_v60 = vunpack.i.l.bf16 %v8545_v6  ;;  %v8552_v57 = vunpack.i.h.bf16 %v8550_v17  ;;  %v8551_v7 = vunpack.i.l.bf16 %v8550_v17  ;;  %v7622_v6 = vld [vmem:[%s15675_s0 + $0x1a1] sm:$0xff] }
 0x1c1   :  { %v8586_v17 = vunpack.i.l.bf16 %v11316_v44  ;;  %v7557_v44 = vld [vmem:[%s15675_s0 + $0x198] sm:$0xff] }
 0x1c2   :  { %v2958_v25 = vsel %vm2937_vm5, %v2893_v50, %v8546_v60  ;;  %v2959_v16 = vsel %vm2937_vm5, %v2894_v54, %v8547_v23  ;;  %v7705_v23 = vld [vmem:[%s15675_s0 + $0x2ba] sm:$0xff] }
 0x1c3   :  { %v3023_v0 = vsel %vm3002_vm6, %v2958_v25, %v8551_v7  ;;  %v3024_v36 = vsel %vm3002_vm6, %v2959_v16, %v8552_v57  ;;  %v7706_v57 = vld [vmem:[%s15675_s0 + $0x2c2] sm:$0xff] }
 0x1c4   :  { %8779 = vrot.lane.b32.xlu2 %v11291_v45, %s9794_s29  ;;  %v3088_v52 = vsel %vm3067_vm7, %v3023_v0, %v8556_v58  ;;  %v8823_v58 = vpack.i.bf16 %v7622_v6, %v7621_v30  ;;  %v11465_v0 = vpack.i.bf16 %v7706_v57, %v7705_v23 }
 0x1c5   :  { %8774 = vrot.lane.b32.xlu1 %v11293_v51, %s9795_s16  ;;  %8769 = vrot.lane.b32.xlu0 %v11372_v38, %s9799_s23  ;;  %v3089_v51 = vsel %vm3067_vm7, %v3024_v36, %v8557_v9 }
 0x1c6   :  { %v11386_v8 = vpop.permute.xlu2 %8614 }
 0x1c7   :  { %v8565_v4 = vpop.permute.xlu1 %8564  ;;  %v8560_v43 = vpop.permute.xlu0 %8559 }
 0x1c8   :  { %v8562_v20 = vunpack.i.h.bf16 %v8560_v43  ;;  %v8561_v45 = vunpack.i.l.bf16 %v8560_v43  ;;  %v8567_v10 = vunpack.i.h.bf16 %v8565_v4  ;;  %v8566_v34 = vunpack.i.l.bf16 %v8565_v4 }
 0x1ca   :  { %v3153_v18 = vsel %vm3132_vm8, %v3088_v52, %v8561_v45  ;;  %v3154_v48 = vsel %vm3132_vm8, %v3089_v51, %v8562_v20  ;;  %v2831_v11 = vsel %vm2807_vm3, %v2766_v5, %v8567_v10  ;;  %v7686_v52 = vld [vmem:[%s15675_s0 + $0x1a2] sm:$0xff]  ;;  %v15814_v10 = vld [vmem:[#allocation39_spill] sm:$0xff]  ;;  %v7368_v5 = vld [vmem:[%s15675_s0 + $0x1d0] sm:$0xff] }
 0x1cb   :  { %v3207_v42 = vpack.c.bf16 %v3154_v48, %v3153_v18  ;;  %v2896_v56 = vsel %vm2872_vm4, %v2831_v11, %v8572_v2  ;;  %v8828_v13 = vpack.i.bf16 %v7686_v52, %v7685_v39  ;;  %v95_v18 = vld [vmem:[%s15675_s0 + $0x240] sm:$0xff]  ;;  %v96_v48 = vld [vmem:[%s15675_s0 + $0x248] sm:$0xff]  ;;  %v15815_v2 = vld [vmem:[#allocation10_spill] sm:$0xff] }
 0x1cc   :  { %8794 = vrot.lane.b32.xlu2 %v11331_v40, %s9794_s29  ;;  %v2765_v40 = vsel %vm2742_vm2, %v2700_v32, %v8146_v26  ;;  %v8041_v26 = vunpack.i.l.bf16 %v15813_v31  ;;  %v7431_v32 = vld [vmem:[%s15675_s0 + $0x1c9] sm:$0xff]  ;;  %v7992_v11 = vunpack.i.h.bf16 %v15815_v2 }
 0x1cd   :  { %8789 = vrot.lane.b32.xlu1 %v11333_v55, %s15732_s30  ;;  %8784 = vrot.lane.b32.xlu0 %v11335_v21, %s9795_s16  ;;  %v7577_v21 = vld [vmem:[%s15675_s0 + $0x2b8] sm:$0xff]  ;;  %v2830_v28 = vsel %vm2807_vm3, %v2765_v40, %v8566_v34  ;;  %v8202_v34 = vunpack.i.h.bf16 %v15814_v10  ;;  %v7367_v40 = vld [vmem:[%s15675_s0 + $0x1c8] sm:$0xff] }
 0x1ce   :  { %7745 = vmatmul.msk.bf16.gmra.mxu0 %vm3265_vm9, %v3207_v42  ;;  %v11423_v55 = vpop.permute.xlu2 %8629  ;;  %v8798_v12 = vpack.i.bf16 %v7578_v61, %v7577_v21  ;;  %v2895_v3 = vsel %vm2872_vm4, %v2830_v28, %v8571_v35  ;;  %v8201_v42 = vunpack.i.l.bf16 %v15814_v10  ;;  %v7991_v35 = vunpack.i.l.bf16 %v15815_v2 }
 0x1cf   :  { %v8580_v63 = vpop.permute.xlu1 %8579  ;;  %v8575_v49 = vpop.permute.xlu0 %8574  ;;  %v2722_v21 = vsel %vm2677_vm1, %v95_v18, %v8041_v26  ;;  %v2723_v61 = vsel %vm2677_vm1, %v96_v48, %v8042_v27 }
 0x1d0   :  { %v8577_v41 = vunpack.i.h.bf16 %v8575_v49  ;;  %v8576_v62 = vunpack.i.l.bf16 %v8575_v49  ;;  %v8582_v15 = vunpack.i.h.bf16 %v8580_v63  ;;  %v8581_v29 = vunpack.i.l.bf16 %v8580_v63  ;;  %v75_v63 = vld [vmem:[%s15675_s0 + $0x120] sm:$0xff]  ;;  %v15816_v49 = vld [vmem:[#allocation25_spill] sm:$0xff] }
 0x1d1   :  { %v2702_v23 = vsel %vm2677_vm1, %v75_v63, %v7991_v35  ;;  %v8152_v57 = vunpack.i.h.bf16 %v15816_v49 }
 0x1d2   :  { %v2960_v19 = vsel %vm2937_vm5, %v2895_v3, %v8576_v62  ;;  %v2961_v53 = vsel %vm2937_vm5, %v2896_v56, %v8577_v41  ;;  %v8151_v41 = vunpack.i.l.bf16 %v15816_v49  ;;  %v2787_v62 = vsel %vm2742_vm2, %v2722_v21, %v8201_v42 }
 0x1d3   :  { %v3025_v7 = vsel %vm3002_vm6, %v2960_v19, %v8581_v29  ;;  %v3026_v50 = vsel %vm3002_vm6, %v2961_v53, %v8582_v15  ;;  %v76_v29 = vld [vmem:[%s15675_s0 + $0x128] sm:$0xff]  ;;  %v8602_v3 = vunpack.i.h.bf16 %v11362_v1  ;;  %v8601_v56 = vunpack.i.l.bf16 %v11362_v1  ;;  %v7643_v1 = vld [vmem:[%s15675_s0 + $0x2d1] sm:$0xff] }
 0x1d4   :  { %8809 = vrot.lane.b32.xlu2 %v8808_v37, %s9796_s21  ;;  %v3090_v4 = vsel %vm3067_vm7, %v3025_v7, %v8586_v17  ;;  %v3091_v43 = vsel %vm3067_vm7, %v3026_v50, %v8587_v24  ;;  %v8853_v19 = vpack.i.bf16 %v7432_v47, %v7431_v32  ;;  %v8843_v53 = vpack.i.bf16 %v7368_v5, %v7367_v40 }
 0x1d5   :  { %8804 = vrot.lane.b32.xlu1 %v11372_v38, %s15732_s30  ;;  %8799 = vrot.lane.b32.xlu0 %v8798_v12, %s9797_s22  ;;  %v7558_v38 = vld [vmem:[%s15675_s0 + $0x1a0] sm:$0xff]  ;;  %v2703_v7 = vsel %vm2677_vm1, %v76_v29, %v7992_v11  ;;  %v2767_v50 = vsel %vm2742_vm2, %v2702_v23, %v8151_v41  ;;  %v11585_v11 = vpop.f32.mrf.mxu0  ;;  %v7624_v29 = vld [vmem:[%s15675_s0 + $0x1e9] sm:$0xff] }
 0x1d6   :  { %v11452_v60 = vpop.permute.xlu2 %8644  ;;  %v8813_v36 = vpack.i.bf16 %v7558_v38, %v7557_v44  ;;  %v7623_v41 = vld [vmem:[%s15675_s0 + $0x1e1] sm:$0xff] }
 0x1d7   :  { %v8595_v54 = vpop.permute.xlu1 %8594  ;;  %v8590_v25 = vpop.permute.xlu0 %8589 }
 0x1d8   :  { %v8592_v16 = vunpack.i.h.bf16 %v8590_v25  ;;  %v8591_v9 = vunpack.i.l.bf16 %v8590_v25  ;;  %v8597_v46 = vunpack.i.h.bf16 %v8595_v54  ;;  %v8596_v59 = vunpack.i.l.bf16 %v8595_v54  ;;  %v7644_v54 = vld [vmem:[%s15675_s0 + $0x2d9] sm:$0xff]  ;;  %v7495_v25 = vld [vmem:[%s15675_s0 + $0x1ca] sm:$0xff] }
 0x1d9   :  { %v11573_v48 = vpack.i.bf16 %v7644_v54, %v7643_v1 }
 0x1da   :  { %v3155_v20 = vsel %vm3132_vm8, %v3090_v4, %v8591_v9  ;;  %v3156_v45 = vsel %vm3132_vm8, %v3091_v43, %v8592_v16  ;;  %v2852_v30 = vsel %vm2807_vm3, %v2787_v62, %v8596_v59  ;;  %v7496_v4 = vld [vmem:[%s15675_s0 + $0x1d2] sm:$0xff]  ;;  %v8647_v62 = vunpack.i.h.bf16 %v11452_v60 }
 0x1db   :  { %v3208_v14 = vpack.c.bf16 %v3156_v45, %v3155_v20  ;;  %v2917_v16 = vsel %vm2872_vm4, %v2852_v30, %v8601_v56  ;;  %v7579_v43 = vld [vmem:[%s15675_s0 + $0x2d0] sm:$0xff]  ;;  %v7580_v20 = vld [vmem:[%s15675_s0 + $0x2d8] sm:$0xff]  ;;  %v8632_v45 = vunpack.i.h.bf16 %v11423_v55  ;;  %v8863_v10 = vpack.i.bf16 %v7496_v4, %v7495_v25  ;;  %v7559_v30 = vld [vmem:[%s15675_s0 + $0x1e0] sm:$0xff] }
 0x1dc   :  { %8824 = vrot.lane.b32.xlu2 %v8823_v58, %s9796_s21 }
 0x1dd   :  { %8819 = vrot.lane.b32.xlu1 %v11465_v0, %s9799_s23  ;;  %8814 = vrot.lane.b32.xlu0 %v8813_v36, %s9797_s22  ;;  %v11648_v4 = vpop.f32.mrf.mxu0 }
 0x1de   :  { %7746 = vmatmul.msk.bf16.gmra.mxu0 %vm3265_vm9, %v3208_v14  ;;  %v11476_v22 = vpop.permute.xlu2 %8659  ;;  %v8631_v14 = vunpack.i.l.bf16 %v11423_v55  ;;  %v8616_v55 = vunpack.i.l.bf16 %v11386_v8 }
 0x1df   :  { %v8610_v51 = vpop.permute.xlu1 %8609  ;;  %v11484_v33 = vpop.permute.xlu0 %8604 }
 0x1e0   :  { %v8612_v17 = vunpack.i.h.bf16 %v8610_v51  ;;  %v8611_v6 = vunpack.i.l.bf16 %v8610_v51  ;;  %v8607_v58 = vunpack.i.h.bf16 %v11484_v33  ;;  %v8606_v36 = vunpack.i.l.bf16 %v11484_v33 }
 0x1e1   :  { %v2768_v51 = vsel %vm2742_vm2, %v2703_v7, %v8152_v57  ;;  %v8617_v33 = vunpack.i.h.bf16 %v11386_v8 }
 0x1e2   :  { %v2982_v39 = vsel %vm2937_vm5, %v2917_v16, %v8611_v6  ;;  %v2833_v42 = vsel %vm2807_vm3, %v2768_v51, %v8607_v58  ;;  %v7438_v58 = vld [vmem:[%s15675_s0 + $0x219] sm:$0xff] }
 0x1e3   :  { %v2898_v49 = vsel %vm2872_vm4, %v2833_v42, %v8617_v33 }
 0x1e4   :  { %8839 = vrot.lane.b32.xlu2 %v8808_v37, %s9794_s29  ;;  %v2788_v37 = vsel %vm2742_vm2, %v2723_v61, %v8202_v34  ;;  %v2832_v34 = vsel %vm2807_vm3, %v2767_v50, %v8606_v36  ;;  %v7373_v36 = vld [vmem:[%s15675_s0 + $0x210] sm:$0xff] }
 0x1e5   :  { %8834 = vrot.lane.b32.xlu1 %v8798_v12, %s9795_s16  ;;  %8829 = vrot.lane.b32.xlu0 %v8828_v13, %s9799_s23  ;;  %v2853_v24 = vsel %vm2807_vm3, %v2788_v37, %v8597_v46  ;;  %v2897_v63 = vsel %vm2872_vm4, %v2832_v34, %v8616_v55  ;;  %v8646_v37 = vunpack.i.l.bf16 %v11452_v60  ;;  %v15818_v34 = vld [vmem:[#allocation38_spill] sm:$0xff] }
 0x1e6   :  { %v11514_v28 = vpop.permute.xlu2 %8674  ;;  %v2918_v9 = vsel %vm2872_vm4, %v2853_v24, %v8602_v3  ;;  %v7707_v3 = vld [vmem:[%s15675_s0 + $0x2d2] sm:$0xff]  ;;  %v7560_v24 = vld [vmem:[%s15675_s0 + $0x1e8] sm:$0xff]  ;;  %v8207_v42 = vunpack.i.h.bf16 %v15818_v34 }
 0x1e7   :  { %v11523_v12 = vpop.permute.xlu1 %8624  ;;  %v8620_v15 = vpop.permute.xlu0 %8619  ;;  %v2983_v52 = vsel %vm2937_vm5, %v2918_v9, %v8612_v17  ;;  %v11629_v1 = vpack.i.bf16 %v7560_v24, %v7559_v30  ;;  %v7437_v9 = vld [vmem:[%s15675_s0 + $0x211] sm:$0xff] }
 0x1e8   :  { %v8622_v44 = vunpack.i.h.bf16 %v8620_v15  ;;  %v8621_v38 = vunpack.i.l.bf16 %v8620_v15  ;;  %v8627_v46 = vunpack.i.h.bf16 %v11523_v12  ;;  %v8626_v59 = vunpack.i.l.bf16 %v11523_v12 }
 0x1e9   :  { %v11664_v51 = vpack.i.bf16 %v7438_v58, %v7437_v9 }
 0x1ea   :  { %v3047_v13 = vsel %vm3002_vm6, %v2982_v39, %v8621_v38  ;;  %v3048_v31 = vsel %vm3002_vm6, %v2983_v52, %v8622_v44  ;;  %v2962_v12 = vsel %vm2937_vm5, %v2897_v63, %v8626_v59  ;;  %v2963_v15 = vsel %vm2937_vm5, %v2898_v49, %v8627_v46  ;;  %v7630_v46 = vld [vmem:[%s15675_s0 + $0x231] sm:$0xff]  ;;  %v7565_v59 = vld [vmem:[%s15675_s0 + $0x228] sm:$0xff] }
 0x1eb   :  { %v3112_v40 = vsel %vm3067_vm7, %v3047_v13, %v8631_v14  ;;  %v3113_v8 = vsel %vm3067_vm7, %v3048_v31, %v8632_v45  ;;  %v11623_v44 = vpack.i.bf16 %v7624_v29, %v7623_v41  ;;  %v7687_v45 = vld [vmem:[%s15675_s0 + $0x1e2] sm:$0xff]  ;;  %v7688_v14 = vld [vmem:[%s15675_s0 + $0x1ea] sm:$0xff] }
 0x1ec   :  { %8854 = vrot.lane.b32.xlu2 %v8853_v19, %s9794_s29  ;;  %v11668_v13 = vpack.i.bf16 %v7688_v14, %v7687_v45  ;;  %v15817_v31 = vld [vmem:[#allocation8_spill] sm:$0xff]  ;;  %v15819_v49 = vld [vmem:[#allocation9_spill] sm:$0xff] }
 0x1ed   :  { %8849 = vrot.lane.b32.xlu1 %v11465_v0, %s15732_s30  ;;  %8844 = vrot.lane.b32.xlu0 %v8843_v53, %s9795_s16  ;;  %v11575_v0 = vpack.i.bf16 %v7580_v20, %v7579_v43  ;;  %v7708_v53 = vld [vmem:[%s15675_s0 + $0x2da] sm:$0xff]  ;;  %v8047_v55 = vunpack.i.h.bf16 %v15817_v31  ;;  %v7996_v41 = vunpack.i.l.bf16 %v15819_v49  ;;  %v7693_v14 = vld [vmem:[%s15675_s0 + $0x22a] sm:$0xff] }
 0x1ee   :  { %v11570_v27 = vpop.permute.xlu2 %8689  ;;  %v11627_v50 = vpack.i.bf16 %v7708_v53, %v7707_v3  ;;  %v7374_v20 = vld [vmem:[%s15675_s0 + $0x218] sm:$0xff] }
 0x1ef   :  { %v8640_v26 = vpop.permute.xlu1 %8639  ;;  %v8635_v18 = vpop.permute.xlu0 %8634  ;;  %v11666_v33 = vpack.i.bf16 %v7374_v20, %v7373_v36  ;;  %v77_v3 = vld [vmem:[%s15675_s0 + $0x138] sm:$0xff] }
 0x1f0   :  { %v8642_v32 = vunpack.i.h.bf16 %v8640_v26  ;;  %v8641_v47 = vunpack.i.l.bf16 %v8640_v26  ;;  %v8637_v5 = vunpack.i.h.bf16 %v8635_v18  ;;  %v8636_v2 = vunpack.i.l.bf16 %v8635_v18  ;;  %v97_v18 = vld [vmem:[%s15675_s0 + $0x258] sm:$0xff] }
 0x1f1   :  { %v8046_v26 = vunpack.i.l.bf16 %v15817_v31  ;;  %v8692_v31 = vunpack.i.h.bf16 %v11570_v27 }
 0x1f2   :  { %v3177_v35 = vsel %vm3132_vm8, %v3112_v40, %v8641_v47  ;;  %v3178_v21 = vsel %vm3132_vm8, %v3113_v8, %v8642_v32  ;;  %v3027_v56 = vsel %vm3002_vm6, %v2962_v12, %v8636_v2  ;;  %v3028_v60 = vsel %vm3002_vm6, %v2963_v15, %v8637_v5  ;;  %v7629_v47 = vld [vmem:[%s15675_s0 + $0x229] sm:$0xff]  ;;  %v7501_v2 = vld [vmem:[%s15675_s0 + $0x212] sm:$0xff] }
 0x1f3   :  { %v3219_v61 = vpack.c.bf16 %v3178_v21, %v3177_v35  ;;  %v3092_v38 = vsel %vm3067_vm7, %v3027_v56, %v8646_v37  ;;  %v3093_v7 = vsel %vm3067_vm7, %v3028_v60, %v8647_v62  ;;  %v8206_v32 = vunpack.i.l.bf16 %v15818_v34  ;;  %v7566_v40 = vld [vmem:[%s15675_s0 + $0x230] sm:$0xff]  ;;  %v7502_v35 = vld [vmem:[%s15675_s0 + $0x21a] sm:$0xff] }
 0x1f4   :  { %8869 = vrot.lane.b32.xlu2 %v11573_v48, %s9796_s21  ;;  %v2724_v21 = vsel %vm2677_vm1, %v97_v18, %v8046_v26  ;;  %v8662_v12 = vunpack.i.h.bf16 %v11476_v22  ;;  %v8661_v56 = vunpack.i.l.bf16 %v11476_v22  ;;  %v11720_v60 = vpack.i.bf16 %v7630_v46, %v7629_v47  ;;  %v78_v22 = vld [vmem:[%s15675_s0 + $0x140] sm:$0xff] }
 0x1f5   :  { %8864 = vrot.lane.b32.xlu1 %v8863_v10, %s15732_s30  ;;  %8859 = vrot.lane.b32.xlu0 %v11575_v0, %s9797_s22  ;;  %v98_v10 = vld [vmem:[%s15675_s0 + $0x260] sm:$0xff]  ;;  %v2789_v62 = vsel %vm2742_vm2, %v2724_v21, %v8206_v32  ;;  %v11722_v53 = vpack.i.bf16 %v7566_v40, %v7565_v59  ;;  %v11724_v30 = vpack.i.bf16 %v7502_v35, %v7501_v2  ;;  %v8677_v47 = vunpack.i.h.bf16 %v11514_v28 }
 0x1f6   :  { %7757 = vmatmul.msk.bf16.vlgmr.msra.gmra.mxu3 %vm3265_vm9, %v3219_v61  ;;  %v11610_v19 = vpop.permute.xlu2 %8704  ;;  %v2725_v61 = vsel %vm2677_vm1, %v98_v10, %v8047_v55  ;;  %v8691_v55 = vunpack.i.l.bf16 %v11570_v27  ;;  %v8676_v46 = vunpack.i.l.bf16 %v11514_v28 }
 0x1f7   :  { %v11621_v17 = vpop.permute.xlu1 %8654  ;;  %v8650_v6 = vpop.permute.xlu0 %8649  ;;  %v2790_v37 = vsel %vm2742_vm2, %v2725_v61, %v8207_v42 }
 0x1f8   :  { %v8652_v23 = vunpack.i.h.bf16 %v8650_v6  ;;  %v8651_v57 = vunpack.i.l.bf16 %v8650_v6  ;;  %v8657_v8 = vunpack.i.h.bf16 %v11621_v17  ;;  %v8656_v5 = vunpack.i.l.bf16 %v11621_v17 }
 0x1fa   :  { %v3157_v54 = vsel %vm3132_vm8, %v3092_v38, %v8651_v57  ;;  %v3158_v25 = vsel %vm3132_vm8, %v3093_v7, %v8652_v23  ;;  %v2854_v24 = vsel %vm2807_vm3, %v2789_v62, %v8656_v5  ;;  %v2855_v17 = vsel %vm2807_vm3, %v2790_v37, %v8657_v8  ;;  %v15820_v38 = vld [vmem:[#allocation32_spill] sm:$0xff] }
 0x1fb   :  { %v3209_v16 = vpack.c.bf16 %v3158_v25, %v3157_v54  ;;  %v7997_v57 = vunpack.i.h.bf16 %v15819_v49  ;;  %v8156_v7 = vunpack.i.l.bf16 %v15820_v38  ;;  %v8157_v9 = vunpack.i.h.bf16 %v15820_v38 }
 0x1fc   :  { %8884 = vrot.lane.b32.xlu2 %v11623_v44, %s9796_s21  ;;  %v2919_v58 = vsel %vm2872_vm4, %v2854_v24, %v8661_v56  ;;  %v2920_v36 = vsel %vm2872_vm4, %v2855_v17, %v8662_v12  ;;  %v11774_v56 = vpop.f32.mrf.mxu0 }
 0x1fd   :  { %8879 = vrot.lane.b32.xlu1 %v11627_v50, %s9799_s23  ;;  %8874 = vrot.lane.b32.xlu0 %v11629_v1, %s9797_s22 }
 0x1fe   :  { %7747 = vmatmul.msk.bf16.gmra.mxu0 %vm3265_vm9, %v3209_v16  ;;  %v11651_v43 = vpop.permute.xlu2 %8719  ;;  %v2704_v16 = vsel %vm2677_vm1, %v77_v3, %v7996_v41 }
 0x1ff   :  { %v8670_v39 = vpop.permute.xlu1 %8669  ;;  %v11662_v52 = vpop.permute.xlu0 %8664  ;;  %v2769_v10 = vsel %vm2742_vm2, %v2704_v16, %v8156_v7 }
 0x200   :  { %v8672_v6 = vunpack.i.h.bf16 %v8670_v39  ;;  %v8671_v23 = vunpack.i.l.bf16 %v8670_v39  ;;  %v8667_v20 = vunpack.i.h.bf16 %v11662_v52  ;;  %v8666_v45 = vunpack.i.l.bf16 %v11662_v52  ;;  %v7694_v39 = vld [vmem:[%s15675_s0 + $0x232] sm:$0xff] }
 0x201   :  { %v2705_v52 = vsel %vm2677_vm1, %v78_v22, %v7997_v57  ;;  %v11764_v8 = vpack.i.bf16 %v7694_v39, %v7693_v14 }
 0x202   :  { %v2984_v26 = vsel %vm2937_vm5, %v2919_v58, %v8671_v23  ;;  %v2985_v18 = vsel %vm2937_vm5, %v2920_v36, %v8672_v6  ;;  %v2770_v27 = vsel %vm2742_vm2, %v2705_v52, %v8157_v9  ;;  %v2834_v5 = vsel %vm2807_vm3, %v2769_v10, %v8666_v45  ;;  %v7646_v45 = vld [vmem:[%s15675_s0 + $0x2f1] sm:$0xff] }
 0x203   :  { %v2835_v2 = vsel %vm2807_vm3, %v2770_v27, %v8667_v20  ;;  %v2899_v24 = vsel %vm2872_vm4, %v2834_v5, %v8676_v46  ;;  %v8706_v6 = vunpack.i.l.bf16 %v11610_v19  ;;  %v7645_v20 = vld [vmem:[%s15675_s0 + $0x2e9] sm:$0xff] }
 0x204   :  { %8899 = vrot.lane.b32.xlu2 %v11664_v51, %s9794_s29  ;;  %v2900_v17 = vsel %vm2872_vm4, %v2835_v2, %v8677_v47  ;;  %v11809_v14 = vpop.f32.mrf.mxu0  ;;  %v15822_v27 = vld [vmem:[#allocation30_spill] sm:$0xff] }
 0x205   :  { %8894 = vrot.lane.b32.xlu1 %v11666_v33, %s9795_s16  ;;  %8889 = vrot.lane.b32.xlu0 %v11668_v13, %s9799_s23  ;;  %v8212_v47 = vunpack.i.h.bf16 %v15822_v27  ;;  %v8211_v46 = vunpack.i.l.bf16 %v15822_v27  ;;  %v7709_v5 = vld [vmem:[%s15675_s0 + $0x2ea] sm:$0xff]  ;;  %v7710_v2 = vld [vmem:[%s15675_s0 + $0x2f2] sm:$0xff] }
 0x206   :  { %v11708_v63 = vpop.permute.xlu2 %8734 }
 0x207   :  { %v11714_v15 = vpop.permute.xlu1 %8684  ;;  %v8680_v29 = vpop.permute.xlu0 %8679 }
 0x208   :  { %v8682_v54 = vunpack.i.h.bf16 %v8680_v29  ;;  %v8681_v25 = vunpack.i.l.bf16 %v8680_v29  ;;  %v8687_v61 = vunpack.i.h.bf16 %v11714_v15  ;;  %v8686_v49 = vunpack.i.l.bf16 %v11714_v15 }
 0x209   :  { %v8707_v15 = vunpack.i.h.bf16 %v11610_v19 }
 0x20a   :  { %v3049_v34 = vsel %vm3002_vm6, %v2984_v26, %v8681_v25  ;;  %v3050_v42 = vsel %vm3002_vm6, %v2985_v18, %v8682_v54  ;;  %v2964_v23 = vsel %vm2937_vm5, %v2899_v24, %v8686_v49  ;;  %v2965_v57 = vsel %vm2937_vm5, %v2900_v17, %v8687_v61  ;;  %v15821_v18 = vld [vmem:[#allocation20_spill] sm:$0xff]  ;;  %v7561_v61 = vld [vmem:[%s15675_s0 + $0x1f8] sm:$0xff] }
 0x20b   :  { %v3114_v41 = vsel %vm3067_vm7, %v3049_v34, %v8691_v55  ;;  %v3115_v62 = vsel %vm3067_vm7, %v3050_v42, %v8692_v31  ;;  %v11822_v55 = vpack.i.bf16 %v7646_v45, %v7645_v20  ;;  %v8052_v52 = vunpack.i.h.bf16 %v15821_v18  ;;  %v99_v34 = vld [vmem:[%s15675_s0 + $0x270] sm:$0xff]  ;;  %v100_v42 = vld [vmem:[%s15675_s0 + $0x278] sm:$0xff]  ;;  %v7562_v49 = vld [vmem:[%s15675_s0 + $0x200] sm:$0xff] }
 0x20c   :  { %8914 = vrot.lane.b32.xlu2 %v11720_v60, %s9796_s21  ;;  %v8051_v10 = vunpack.i.l.bf16 %v15821_v18 }
 0x20d   :  { %8909 = vrot.lane.b32.xlu1 %v11722_v53, %s9797_s22  ;;  %8904 = vrot.lane.b32.xlu0 %v11724_v30, %s15732_s30 }
 0x20e   :  { %v11759_v32 = vpop.permute.xlu2 %8749 }
 0x20f   :  { %v8700_v59 = vpop.permute.xlu1 %8699  ;;  %v8695_v40 = vpop.permute.xlu0 %8694 }
 0x210   :  { %v8702_v35 = vunpack.i.h.bf16 %v8700_v59  ;;  %v8701_v21 = vunpack.i.l.bf16 %v8700_v59  ;;  %v8697_v37 = vunpack.i.h.bf16 %v8695_v40  ;;  %v8696_v28 = vunpack.i.l.bf16 %v8695_v40  ;;  %v7625_v59 = vld [vmem:[%s15675_s0 + $0x1f9] sm:$0xff]  ;;  %v7626_v40 = vld [vmem:[%s15675_s0 + $0x201] sm:$0xff] }
 0x212   :  { %v3179_v12 = vsel %vm3132_vm8, %v3114_v41, %v8701_v21  ;;  %v3180_v29 = vsel %vm3132_vm8, %v3115_v62, %v8702_v35  ;;  %v3029_v38 = vsel %vm3002_vm6, %v2964_v23, %v8696_v28  ;;  %v3030_v7 = vsel %vm3002_vm6, %v2965_v57, %v8697_v37  ;;  %v15823_v28 = vld [vmem:[#allocation5_spill] sm:$0xff] }
 0x213   :  { %v3220_v3 = vpack.c.bf16 %v3180_v29, %v3179_v12  ;;  %v3094_v16 = vsel %vm3067_vm7, %v3029_v38, %v8706_v6  ;;  %v3095_v9 = vsel %vm3067_vm7, %v3030_v7, %v8707_v15  ;;  %v2726_v41 = vsel %vm2677_vm1, %v99_v34, %v8051_v10  ;;  %v79_v15 = vld [vmem:[%s15675_s0 + $0x150] sm:$0xff]  ;;  %v11873_v6 = vpop.f32.mrf.mxu0  ;;  %v7690_v10 = vld [vmem:[%s15675_s0 + $0x202] sm:$0xff] }
 0x214   :  { %8929 = vrot.lane.b32.xlu2 %v11573_v48, %s9794_s29  ;;  %v2727_v62 = vsel %vm2677_vm1, %v100_v42, %v8052_v52  ;;  %v8001_v12 = vunpack.i.l.bf16 %v15823_v28  ;;  %v8721_v23 = vunpack.i.l.bf16 %v11651_v43  ;;  %v11876_v57 = vpack.i.bf16 %v7626_v40, %v7625_v59  ;;  %v7689_v52 = vld [vmem:[%s15675_s0 + $0x1fa] sm:$0xff] }
 0x215   :  { %8924 = vrot.lane.b32.xlu1 %v11575_v0, %s9795_s16  ;;  %8919 = vrot.lane.b32.xlu0 %v11764_v8, %s9799_s23  ;;  %v2792_v29 = vsel %vm2742_vm2, %v2727_v62, %v8212_v47  ;;  %v11878_v38 = vpack.i.bf16 %v7710_v2, %v7709_v5  ;;  %v11880_v7 = vpack.i.bf16 %v7562_v49, %v7561_v61  ;;  %v8752_v34 = vunpack.i.h.bf16 %v11759_v32 }
 0x216   :  { %7758 = vmatmul.msk.bf16.gmra.mxu3 %vm3265_vm9, %v3220_v3  ;;  %v11791_v48 = vpop.permute.xlu2 %8764  ;;  %v8722_v3 = vunpack.i.h.bf16 %v11651_v43  ;;  %v80_v43 = vld [vmem:[%s15675_s0 + $0x158] sm:$0xff]  ;;  %v2706_v20 = vsel %vm2677_vm1, %v79_v15, %v8001_v12  ;;  %v8751_v42 = vunpack.i.l.bf16 %v11759_v32  ;;  %v8737_v2 = vunpack.i.h.bf16 %v11708_v63 }
 0x217   :  { %v8715_v54 = vpop.permute.xlu1 %8714  ;;  %v8710_v19 = vpop.permute.xlu0 %8709  ;;  %v11920_v49 = vpack.i.bf16 %v7690_v10, %v7689_v52 }
 0x218   :  { %v8712_v25 = vunpack.i.h.bf16 %v8710_v19  ;;  %v8711_v22 = vunpack.i.l.bf16 %v8710_v19  ;;  %v8717_v35 = vunpack.i.h.bf16 %v8715_v54  ;;  %v8716_v21 = vunpack.i.l.bf16 %v8715_v54 }
 0x21a   :  { %v3159_v0 = vsel %vm3132_vm8, %v3094_v16, %v8711_v22  ;;  %v3160_v58 = vsel %vm3132_vm8, %v3095_v9, %v8712_v25  ;;  %v2857_v19 = vsel %vm2807_vm3, %v2792_v29, %v8717_v35  ;;  %v8002_v16 = vunpack.i.h.bf16 %v15823_v28  ;;  %v15824_v9 = vld [vmem:[#allocation31_spill] sm:$0xff] }
 0x21b   :  { %v3210_v36 = vpack.c.bf16 %v3160_v58, %v3159_v0  ;;  %v8161_v0 = vunpack.i.l.bf16 %v15824_v9  ;;  %v8162_v45 = vunpack.i.h.bf16 %v15824_v9  ;;  %v8736_v35 = vunpack.i.l.bf16 %v11708_v63  ;;  %v11928_v15 = vpop.f32.mrf.mxu0 }
 0x21c   :  { %8944 = vrot.lane.b32.xlu2 %v11623_v44, %s9794_s29  ;;  %v7581_v44 = vld [vmem:[%s15675_s0 + $0x2e8] sm:$0xff]  ;;  %v8766_v9 = vunpack.i.l.bf16 %v11791_v48 }
 0x21d   :  { %8939 = vrot.lane.b32.xlu1 %v11627_v50, %s15732_s30  ;;  %8934 = vrot.lane.b32.xlu0 %v11629_v1, %s9795_s16  ;;  %v7582_v50 = vld [vmem:[%s15675_s0 + $0x2f0] sm:$0xff] }
 0x21e   :  { %7748 = vmatmul.msk.bf16.gmra.mxu0 %vm3265_vm9, %v3210_v36  ;;  %v11812_v39 = vpop.permute.xlu2 %8779  ;;  %v11824_v26 = vpack.i.bf16 %v7582_v50, %v7581_v44  ;;  %v2922_v50 = vsel %vm2872_vm4, %v2857_v19, %v8722_v3 }
 0x21f   :  { %v8730_v1 = vpop.permute.xlu1 %8729  ;;  %v11820_v31 = vpop.permute.xlu0 %8724 }
 0x220   :  { %v8732_v25 = vunpack.i.h.bf16 %v8730_v1  ;;  %v8731_v22 = vunpack.i.l.bf16 %v8730_v1  ;;  %v8727_v1 = vunpack.i.h.bf16 %v11820_v31  ;;  %v8726_v18 = vunpack.i.l.bf16 %v11820_v31 }
 0x221   :  { %v2707_v31 = vsel %vm2677_vm1, %v80_v43, %v8002_v16 }
 0x222   :  { %v2987_v47 = vsel %vm2937_vm5, %v2922_v50, %v8732_v25  ;;  %v2772_v32 = vsel %vm2742_vm2, %v2707_v31, %v8162_v45  ;;  %v7568_v45 = vld [vmem:[%s15675_s0 + $0x248] sm:$0xff] }
 0x223   :  { %v2837_v62 = vsel %vm2807_vm3, %v2772_v32, %v8727_v1  ;;  %v7696_v32 = vld [vmem:[%s15675_s0 + $0x24a] sm:$0xff] }
 0x224   :  { %8959 = vrot.lane.b32.xlu2 %v11822_v55, %s9796_s21  ;;  %v2902_v16 = vsel %vm2872_vm4, %v2837_v62, %v8737_v2  ;;  %v101_v62 = vld [vmem:[%s15675_s0 + $0x288] sm:$0xff] }
 0x225   :  { %8954 = vrot.lane.b32.xlu1 %v11668_v13, %s15732_s30  ;;  %8949 = vrot.lane.b32.xlu0 %v11824_v26, %s9797_s22  ;;  %v2791_v13 = vsel %vm2742_vm2, %v2726_v41, %v8211_v46  ;;  %v2771_v46 = vsel %vm2742_vm2, %v2706_v20, %v8161_v0 }
 0x226   :  { %v11862_v37 = vpop.permute.xlu2 %8794  ;;  %v2856_v54 = vsel %vm2807_vm3, %v2791_v13, %v8716_v21  ;;  %v2836_v41 = vsel %vm2807_vm3, %v2771_v46, %v8726_v18  ;;  %v11969_v46 = vpop.f32.mrf.mxu0 }
 0x227   :  { %v11868_v24 = vpop.permute.xlu1 %8744  ;;  %v8740_v17 = vpop.permute.xlu0 %8739  ;;  %v2921_v44 = vsel %vm2872_vm4, %v2856_v54, %v8721_v23 }
 0x228   :  { %v8742_v58 = vunpack.i.h.bf16 %v8740_v17  ;;  %v8741_v36 = vunpack.i.l.bf16 %v8740_v17  ;;  %v2986_v27 = vsel %vm2937_vm5, %v2921_v44, %v8731_v22  ;;  %v8747_v13 = vunpack.i.h.bf16 %v11868_v24 }
 0x229   :  { %v8746_v29 = vunpack.i.l.bf16 %v11868_v24  ;;  %v2901_v22 = vsel %vm2872_vm4, %v2836_v41, %v8736_v35  ;;  %v8767_v24 = vunpack.i.h.bf16 %v11791_v48 }
 0x22a   :  { %v3051_v59 = vsel %vm3002_vm6, %v2986_v27, %v8741_v36  ;;  %v3052_v40 = vsel %vm3002_vm6, %v2987_v47, %v8742_v58  ;;  %v2967_v58 = vsel %vm2937_vm5, %v2902_v16, %v8747_v13  ;;  %v7631_v36 = vld [vmem:[%s15675_s0 + $0x241] sm:$0xff] }
 0x22b   :  { %v3116_v3 = vsel %vm3067_vm7, %v3051_v59, %v8751_v42  ;;  %v3117_v17 = vsel %vm3067_vm7, %v3052_v40, %v8752_v34  ;;  %v2966_v0 = vsel %vm2937_vm5, %v2901_v22, %v8746_v29  ;;  %v7695_v40 = vld [vmem:[%s15675_s0 + $0x242] sm:$0xff] }
 0x22c   :  { %8974 = vrot.lane.b32.xlu2 %v11876_v57, %s9796_s21 }
 0x22d   :  { %8969 = vrot.lane.b32.xlu1 %v11878_v38, %s9799_s23  ;;  %8964 = vrot.lane.b32.xlu0 %v11880_v7, %s9797_s22 }
 0x22e   :  { %v11915_v5 = vpop.permute.xlu2 %8809 }
 0x22f   :  { %v8760_v21 = vpop.permute.xlu1 %8759  ;;  %v8755_v61 = vpop.permute.xlu0 %8754 }
 0x230   :  { %v8762_v28 = vunpack.i.h.bf16 %v8760_v21  ;;  %v8761_v12 = vunpack.i.l.bf16 %v8760_v21  ;;  %v8757_v63 = vunpack.i.h.bf16 %v8755_v61  ;;  %v8756_v23 = vunpack.i.l.bf16 %v8755_v61  ;;  %v15825_v61 = vld [vmem:[#allocation19_spill] sm:$0xff] }
 0x231   :  { %v11988_v21 = vpack.i.bf16 %v7696_v32, %v7695_v40  ;;  %v8057_v41 = vunpack.i.h.bf16 %v15825_v61 }
 0x232   :  { %v3181_v54 = vsel %vm3132_vm8, %v3116_v3, %v8761_v12  ;;  %v3182_v19 = vsel %vm3132_vm8, %v3117_v17, %v8762_v28  ;;  %v3031_v48 = vsel %vm3002_vm6, %v2966_v0, %v8756_v23  ;;  %v3032_v43 = vsel %vm3002_vm6, %v2967_v58, %v8757_v63  ;;  %v102_v28 = vld [vmem:[%s15675_s0 + $0x290] sm:$0xff]  ;;  %v15826_v12 = vld [vmem:[#allocation41_spill] sm:$0xff]  ;;  %v12006_v63 = vpop.f32.mrf.mxu0 }
 0x233   :  { %v3221_v25 = vpack.c.bf16 %v3182_v19, %v3181_v54  ;;  %v3096_v10 = vsel %vm3067_vm7, %v3031_v48, %v8766_v9  ;;  %v3097_v34 = vsel %vm3067_vm7, %v3032_v43, %v8767_v24  ;;  %v8217_v13 = vunpack.i.h.bf16 %v15826_v12  ;;  %v15827_v54 = vld [vmem:[#allocation13_spill] sm:$0xff]  ;;  %v82_v9 = vld [vmem:[%s15675_s0 + $0x170] sm:$0xff] }
 0x234   :  { %8989 = vrot.lane.b32.xlu2 %v11720_v60, %s9794_s29  ;;  %v7632_v60 = vld [vmem:[%s15675_s0 + $0x249] sm:$0xff]  ;;  %v8216_v29 = vunpack.i.l.bf16 %v15826_v12  ;;  %v8007_v19 = vunpack.i.h.bf16 %v15827_v54 }
 0x235   :  { %8984 = vrot.lane.b32.xlu1 %v11722_v53, %s9795_s16  ;;  %8979 = vrot.lane.b32.xlu0 %v11920_v49, %s9799_s23  ;;  %v7567_v53 = vld [vmem:[%s15675_s0 + $0x240] sm:$0xff]  ;;  %v11961_v52 = vpack.i.bf16 %v7632_v60, %v7631_v36  ;;  %v8782_v36 = vunpack.i.h.bf16 %v11812_v39  ;;  %v8781_v60 = vunpack.i.l.bf16 %v11812_v39 }
 0x236   :  { %7759 = vmatmul.msk.bf16.gmra.mxu3 %vm3265_vm9, %v3221_v25  ;;  %v11953_v20 = vpop.permute.xlu2 %8824  ;;  %v11965_v42 = vpack.i.bf16 %v7568_v45, %v7567_v53  ;;  %v8006_v25 = vunpack.i.l.bf16 %v15827_v54  ;;  %v7647_v39 = vld [vmem:[%s15675_s0 + $0x301] sm:$0xff] }
 0x237   :  { %v8775_v44 = vpop.permute.xlu1 %8774  ;;  %v8770_v50 = vpop.permute.xlu0 %8769 }
 0x238   :  { %v8772_v1 = vunpack.i.h.bf16 %v8770_v50  ;;  %v8771_v18 = vunpack.i.l.bf16 %v8770_v50  ;;  %v8777_v3 = vunpack.i.h.bf16 %v8775_v44  ;;  %v8776_v17 = vunpack.i.l.bf16 %v8775_v44  ;;  %v15828_v44 = vld [vmem:[#allocation26_spill] sm:$0xff] }
 0x239   :  { %v8167_v50 = vunpack.i.h.bf16 %v15828_v44 }
 0x23a   :  { %v3161_v27 = vsel %vm3132_vm8, %v3096_v10, %v8771_v18  ;;  %v3162_v47 = vsel %vm3132_vm8, %v3097_v34, %v8772_v1  ;;  %v8166_v1 = vunpack.i.l.bf16 %v15828_v44 }
 0x23b   :  { %v3211_v31 = vpack.c.bf16 %v3162_v47, %v3161_v27  ;;  %v2709_v27 = vsel %vm2677_vm1, %v82_v9, %v8007_v19 }
 0x23c   :  { %9004 = vrot.lane.b32.xlu2 %v11961_v52, %s9796_s21  ;;  %v2774_v12 = vsel %vm2742_vm2, %v2709_v27, %v8167_v50 }
 0x23d   :  { %8999 = vrot.lane.b32.xlu1 %v11965_v42, %s9797_s22  ;;  %8994 = vrot.lane.b32.xlu0 %v11764_v8, %s15732_s30  ;;  %v8056_v8 = vunpack.i.l.bf16 %v15825_v61  ;;  %v7583_v61 = vld [vmem:[%s15675_s0 + $0x300] sm:$0xff] }
 0x23e   :  { %7749 = vmatmul.msk.bf16.gmra.mxu0 %vm3265_vm9, %v3211_v31  ;;  %v11978_v59 = vpop.permute.xlu2 %8839 }
 0x23f   :  { %v8790_v2 = vpop.permute.xlu1 %8789  ;;  %v11986_v35 = vpop.permute.xlu0 %8784  ;;  %v2728_v22 = vsel %vm2677_vm1, %v101_v62, %v8056_v8  ;;  %v8812_v8 = vunpack.i.h.bf16 %v11915_v5  ;;  %v8811_v62 = vunpack.i.l.bf16 %v11915_v5  ;;  %v8797_v5 = vunpack.i.h.bf16 %v11862_v37 }
 0x240   :  { %v2793_v0 = vsel %vm2742_vm2, %v2728_v22, %v8216_v29  ;;  %v8792_v53 = vunpack.i.h.bf16 %v8790_v2  ;;  %v8791_v45 = vunpack.i.l.bf16 %v8790_v2  ;;  %v8787_v40 = vunpack.i.h.bf16 %v11986_v35  ;;  %v7648_v2 = vld [vmem:[%s15675_s0 + $0x309] sm:$0xff] }
 0x241   :  { %v2858_v48 = vsel %vm2807_vm3, %v2793_v0, %v8776_v17  ;;  %v8786_v32 = vunpack.i.l.bf16 %v11986_v35  ;;  %v8796_v17 = vunpack.i.l.bf16 %v11862_v37 }
 0x242   :  { %v2923_v47 = vsel %vm2872_vm4, %v2858_v48, %v8781_v60 }
 0x243   :  { %v2988_v35 = vsel %vm2937_vm5, %v2923_v47, %v8791_v45  ;;  %v7712_v47 = vld [vmem:[%s15675_s0 + $0x30a] sm:$0xff] }
 0x244   :  { %9019 = vrot.lane.b32.xlu2 %v11822_v55, %s9794_s29  ;;  %v2729_v55 = vsel %vm2677_vm1, %v102_v28, %v8057_v41  ;;  %v7584_v41 = vld [vmem:[%s15675_s0 + $0x308] sm:$0xff] }
 0x245   :  { %9014 = vrot.lane.b32.xlu1 %v11824_v26, %s9795_s16  ;;  %9009 = vrot.lane.b32.xlu0 %v11988_v21, %s9799_s23  ;;  %v81_v26 = vld [vmem:[%s15675_s0 + $0x168] sm:$0xff]  ;;  %v2794_v58 = vsel %vm2742_vm2, %v2729_v55, %v8217_v13  ;;  %v12068_v22 = vpack.i.bf16 %v7584_v41, %v7583_v61 }
 0x246   :  { %v12008_v23 = vpop.permute.xlu2 %8854  ;;  %v2859_v43 = vsel %vm2807_vm3, %v2794_v58, %v8777_v3  ;;  %v2708_v34 = vsel %vm2677_vm1, %v81_v26, %v8006_v25  ;;  %v12066_v25 = vpack.i.bf16 %v7648_v2, %v7647_v39 }
 0x247   :  { %v12014_v16 = vpop.permute.xlu1 %8804  ;;  %v8800_v24 = vpop.permute.xlu0 %8799  ;;  %v2924_v31 = vsel %vm2872_vm4, %v2859_v43, %v8782_v36  ;;  %v2773_v28 = vsel %vm2742_vm2, %v2708_v34, %v8166_v1  ;;  %v8826_v1 = vunpack.i.l.bf16 %v11953_v20 }
 0x248   :  { %v8802_v18 = vunpack.i.h.bf16 %v8800_v24  ;;  %v8801_v10 = vunpack.i.l.bf16 %v8800_v24  ;;  %v2838_v55 = vsel %vm2807_vm3, %v2773_v28, %v8786_v32  ;;  %v2839_v24 = vsel %vm2807_vm3, %v2774_v12, %v8787_v40 }
 0x249   :  { %v8807_v0 = vunpack.i.h.bf16 %v12014_v16  ;;  %v8806_v58 = vunpack.i.l.bf16 %v12014_v16  ;;  %v2903_v44 = vsel %vm2872_vm4, %v2838_v55, %v8796_v17  ;;  %v2904_v50 = vsel %vm2872_vm4, %v2839_v24, %v8797_v5 }
 0x24a   :  { %v3053_v13 = vsel %vm3002_vm6, %v2988_v35, %v8801_v10  ;;  %v8827_v16 = vunpack.i.h.bf16 %v11953_v20  ;;  %v7711_v20 = vld [vmem:[%s15675_s0 + $0x302] sm:$0xff] }
 0x24b   :  { %v3118_v37 = vsel %vm3067_vm7, %v3053_v13, %v8811_v62  ;;  %v2969_v10 = vsel %vm2937_vm5, %v2904_v50, %v8807_v0  ;;  %v12105_v41 = vpack.i.bf16 %v7712_v47, %v7711_v20  ;;  %v83_v50 = vld [vmem:[%s15675_s0 + $0x1b0] sm:$0xff] }
 0x24c   :  { %9034 = vrot.lane.b32.xlu2 %v11876_v57, %s9794_s29  ;;  %v2989_v57 = vsel %vm2937_vm5, %v2924_v31, %v8792_v53 }
 0x24d   :  { %9029 = vrot.lane.b32.xlu1 %v11878_v38, %s15732_s30  ;;  %9024 = vrot.lane.b32.xlu0 %v11880_v7, %s9795_s16  ;;  %v3054_v29 = vsel %vm3002_vm6, %v2989_v57, %v8802_v18  ;;  %v12070_v7 = vpop.f32.mrf.mxu0  ;;  %v2968_v18 = vsel %vm2937_vm5, %v2903_v44, %v8806_v58 }
 0x24e   :  { %v12062_v3 = vpop.permute.xlu2 %8869  ;;  %v3119_v36 = vsel %vm3067_vm7, %v3054_v29, %v8812_v8  ;;  %v15829_v29 = vld [vmem:[#allocation11_spill] sm:$0xff] }
 0x24f   :  { %v8820_v54 = vpop.permute.xlu1 %8819  ;;  %v8815_v19 = vpop.permute.xlu0 %8814  ;;  %v8062_v5 = vunpack.i.h.bf16 %v15829_v29  ;;  %v8061_v17 = vunpack.i.l.bf16 %v15829_v29 }
 0x250   :  { %v8822_v26 = vunpack.i.h.bf16 %v8820_v54  ;;  %v8821_v9 = vunpack.i.l.bf16 %v8820_v54  ;;  %v8817_v60 = vunpack.i.h.bf16 %v8815_v19  ;;  %v8816_v48 = vunpack.i.l.bf16 %v8815_v19  ;;  %v104_v54 = vld [vmem:[%s15675_s0 + $0x2a8] sm:$0xff] }
 0x252   :  { %v3183_v43 = vsel %vm3132_vm8, %v3118_v37, %v8821_v9  ;;  %v3184_v53 = vsel %vm3132_vm8, %v3119_v36, %v8822_v26  ;;  %v3033_v34 = vsel %vm3002_vm6, %v2968_v18, %v8816_v48  ;;  %v3034_v27 = vsel %vm3002_vm6, %v2969_v10, %v8817_v60  ;;  %v7633_v26 = vld [vmem:[%s15675_s0 + $0x259] sm:$0xff]  ;;  %v7634_v9 = vld [vmem:[%s15675_s0 + $0x261] sm:$0xff] }
 0x253   :  { %v3222_v45 = vpack.c.bf16 %v3184_v53, %v3183_v43  ;;  %v3098_v2 = vsel %vm3067_vm7, %v3033_v34, %v8826_v1  ;;  %v3099_v61 = vsel %vm3067_vm7, %v3034_v27, %v8827_v16  ;;  %v7570_v37 = vld [vmem:[%s15675_s0 + $0x260] sm:$0xff]  ;;  %v2731_v60 = vsel %vm2677_vm1, %v104_v54, %v8062_v5 }
 0x254   :  { %9049 = vrot.lane.b32.xlu2 %v12066_v25, %s9796_s21  ;;  %v15831_v43 = vld [vmem:[#allocation12_spill] sm:$0xff]  ;;  %v8842_v16 = vunpack.i.h.bf16 %v11978_v59  ;;  %v8841_v1 = vunpack.i.l.bf16 %v11978_v59  ;;  %v9093_v18 = vpack.i.bf16 %v7634_v9, %v7633_v26  ;;  %v8871_v54 = vunpack.i.l.bf16 %v12062_v3 }
 0x255   :  { %9044 = vrot.lane.b32.xlu1 %v11920_v49, %s15732_s30  ;;  %9039 = vrot.lane.b32.xlu0 %v12068_v22, %s9797_s22  ;;  %v12107_v8 = vpop.f32.mrf.mxu0  ;;  %v8011_v53 = vunpack.i.l.bf16 %v15831_v43  ;;  %v7697_v5 = vld [vmem:[%s15675_s0 + $0x25a] sm:$0xff] }
 0x256   :  { %7760 = vmatmul.msk.bf16.gmra.mxu3 %vm3265_vm9, %v3222_v45  ;;  %v12095_v39 = vpop.permute.xlu2 %8884 }
 0x257   :  { %v8835_v49 = vpop.permute.xlu1 %8834  ;;  %v8830_v31 = vpop.permute.xlu0 %8829  ;;  %v2710_v59 = vsel %vm2677_vm1, %v83_v50, %v8011_v53 }
 0x258   :  { %v8832_v40 = vunpack.i.h.bf16 %v8830_v31  ;;  %v8831_v32 = vunpack.i.l.bf16 %v8830_v31  ;;  %v8837_v0 = vunpack.i.h.bf16 %v8835_v49  ;;  %v8836_v58 = vunpack.i.l.bf16 %v8835_v49  ;;  %v15832_v31 = vld [vmem:[#allocation35_spill] sm:$0xff] }
 0x259   :  { %v8012_v49 = vunpack.i.h.bf16 %v15831_v43 }
 0x25a   :  { %v3163_v62 = vsel %vm3132_vm8, %v3098_v2, %v8831_v32  ;;  %v3164_v35 = vsel %vm3132_vm8, %v3099_v61, %v8832_v40  ;;  %v8171_v40 = vunpack.i.l.bf16 %v15832_v31  ;;  %v84_v61 = vld [vmem:[%s15675_s0 + $0x1b8] sm:$0xff] }
 0x25b   :  { %v3212_v57 = vpack.c.bf16 %v3164_v35, %v3163_v62  ;;  %v8172_v62 = vunpack.i.h.bf16 %v15832_v31 }
 0x25c   :  { %9064 = vrot.lane.b32.xlu2 %v11664_v51, %s9796_s21  ;;  %v103_v51 = vld [vmem:[%s15675_s0 + $0x2a0] sm:$0xff] }
 0x25d   :  { %9059 = vrot.lane.b32.xlu1 %v12105_v41, %s9799_s23  ;;  %9054 = vrot.lane.b32.xlu0 %v11666_v33, %s9797_s22  ;;  %v15830_v33 = vld [vmem:[#allocation40_spill] sm:$0xff]  ;;  %v12132_v24 = vpop.f32.mrf.mxu0  ;;  %v2730_v36 = vsel %vm2677_vm1, %v103_v51, %v8061_v17  ;;  %v8872_v51 = vunpack.i.h.bf16 %v12062_v3 }
 0x25e   :  { %7750 = vmatmul.msk.bf16.gmra.mxu0 %vm3265_vm9, %v3212_v57  ;;  %v12118_v28 = vpop.permute.xlu2 %8899  ;;  %v8222_v19 = vunpack.i.h.bf16 %v15830_v33  ;;  %v8221_v55 = vunpack.i.l.bf16 %v15830_v33  ;;  %v7698_v17 = vld [vmem:[%s15675_s0 + $0x262] sm:$0xff] }
 0x25f   :  { %v8850_v12 = vpop.permute.xlu1 %8849  ;;  %v12120_v13 = vpop.permute.xlu0 %8844 }
 0x260   :  { %v8852_v20 = vunpack.i.h.bf16 %v8850_v12  ;;  %v8851_v47 = vunpack.i.l.bf16 %v8850_v12  ;;  %v8847_v12 = vunpack.i.h.bf16 %v12120_v13  ;;  %v8846_v29 = vunpack.i.l.bf16 %v12120_v13 }
 0x261   :  { %v2711_v13 = vsel %vm2677_vm1, %v84_v61, %v8012_v49  ;;  %v8886_v49 = vunpack.i.l.bf16 %v12095_v39 }
 0x264   :  { %9079 = vrot.lane.b32.xlu2 %v11961_v52, %s9794_s29  ;;  %v7569_v52 = vld [vmem:[%s15675_s0 + $0x258] sm:$0xff] }
 0x265   :  { %9074 = vrot.lane.b32.xlu1 %v11965_v42, %s9795_s16  ;;  %9069 = vrot.lane.b32.xlu0 %v11724_v30, %s9799_s23  ;;  %v2795_v42 = vsel %vm2742_vm2, %v2730_v36, %v8221_v55  ;;  %v2796_v30 = vsel %vm2742_vm2, %v2731_v60, %v8222_v19  ;;  %v9088_v10 = vpack.i.bf16 %v7570_v37, %v7569_v52  ;;  %v12195_v26 = vpop.f32.mrf.mxu0  ;;  %v8857_v52 = vunpack.i.h.bf16 %v12008_v23 }
 0x266   :  { %v12154_v48 = vpop.permute.xlu2 %8914  ;;  %v2860_v34 = vsel %vm2807_vm3, %v2795_v42, %v8836_v58  ;;  %v2861_v27 = vsel %vm2807_vm3, %v2796_v30, %v8837_v0  ;;  %v2775_v55 = vsel %vm2742_vm2, %v2710_v59, %v8171_v40  ;;  %v2776_v58 = vsel %vm2742_vm2, %v2711_v13, %v8172_v62  ;;  %v15835_v13 = vld [vmem:[#allocation37_spill] sm:$0xff] }
 0x267   :  { %v12159_v45 = vpop.permute.xlu1 %8864  ;;  %v8860_v44 = vpop.permute.xlu0 %8859  ;;  %v2925_v35 = vsel %vm2872_vm4, %v2860_v34, %v8841_v1  ;;  %v2926_v57 = vsel %vm2872_vm4, %v2861_v27, %v8842_v16  ;;  %v8856_v37 = vunpack.i.l.bf16 %v12008_v23  ;;  %v9098_v60 = vpack.i.bf16 %v7698_v17, %v7697_v5 }
 0x268   :  { %v8862_v32 = vunpack.i.h.bf16 %v8860_v44  ;;  %v8861_v2 = vunpack.i.l.bf16 %v8860_v44  ;;  %v2990_v33 = vsel %vm2937_vm5, %v2925_v35, %v8851_v47  ;;  %v2991_v19 = vsel %vm2937_vm5, %v2926_v57, %v8852_v20 }
 0x269   :  { %v2840_v43 = vsel %vm2807_vm3, %v2775_v55, %v8846_v29  ;;  %v2841_v53 = vsel %vm2807_vm3, %v2776_v58, %v8847_v12  ;;  %v8867_v44 = vunpack.i.h.bf16 %v12159_v45  ;;  %v8866_v50 = vunpack.i.l.bf16 %v12159_v45  ;;  %v15834_v29 = vld [vmem:[#allocation15_spill] sm:$0xff] }
 0x26a   :  { %v3055_v9 = vsel %vm3002_vm6, %v2990_v33, %v8861_v2  ;;  %v3056_v0 = vsel %vm3002_vm6, %v2991_v19, %v8862_v32  ;;  %v2905_v20 = vsel %vm2872_vm4, %v2840_v43, %v8856_v37  ;;  %v2906_v47 = vsel %vm2872_vm4, %v2841_v53, %v8857_v52  ;;  %v7585_v32 = vld [vmem:[%s15675_s0 + $0x318] sm:$0xff]  ;;  %v90_v19 = vld [vmem:[%s15675_s0 + $0x200] sm:$0xff] }
 0x26b   :  { %v3120_v16 = vsel %vm3067_vm7, %v3055_v9, %v8871_v54  ;;  %v3121_v1 = vsel %vm3067_vm7, %v3056_v0, %v8872_v51  ;;  %v8887_v45 = vunpack.i.h.bf16 %v12095_v39  ;;  %v2970_v31 = vsel %vm2937_vm5, %v2905_v20, %v8866_v50  ;;  %v89_v33 = vld [vmem:[%s15675_s0 + $0x1f8] sm:$0xff] }
 0x26c   :  { %9094 = vrot.lane.b32.xlu2 %v9093_v18, %s9796_s21  ;;  %v2971_v40 = vsel %vm2937_vm5, %v2906_v47, %v8867_v44  ;;  %v8027_v5 = vunpack.i.h.bf16 %v15834_v29  ;;  %v8026_v17 = vunpack.i.l.bf16 %v15834_v29  ;;  %v8187_v55 = vunpack.i.h.bf16 %v15835_v13  ;;  %v7649_v43 = vld [vmem:[%s15675_s0 + $0x319] sm:$0xff] }
 0x26d   :  { %9089 = vrot.lane.b32.xlu1 %v9088_v10, %s9797_s22  ;;  %9084 = vrot.lane.b32.xlu0 %v11988_v21, %s15732_s30  ;;  %v12234_v62 = vpop.f32.mrf.mxu0  ;;  %v8186_v9 = vunpack.i.l.bf16 %v15835_v13  ;;  %v8901_v44 = vunpack.i.l.bf16 %v12118_v28 }
 0x26e   :  { %v12199_v3 = vpop.permute.xlu2 %8929 }
 0x26f   :  { %v8880_v36 = vpop.permute.xlu1 %8879  ;;  %v8875_v21 = vpop.permute.xlu0 %8874 }
 0x270   :  { %v8882_v42 = vunpack.i.h.bf16 %v8880_v36  ;;  %v8881_v30 = vunpack.i.l.bf16 %v8880_v36  ;;  %v8877_v18 = vunpack.i.h.bf16 %v8875_v21  ;;  %v8876_v10 = vunpack.i.l.bf16 %v8875_v21 }
 0x271   :  { %v2716_v21 = vsel %vm2677_vm1, %v89_v33, %v8026_v17 }
 0x272   :  { %v3185_v23 = vsel %vm3132_vm8, %v3120_v16, %v8881_v30  ;;  %v3186_v34 = vsel %vm3132_vm8, %v3121_v1, %v8882_v42  ;;  %v3035_v2 = vsel %vm3002_vm6, %v2970_v31, %v8876_v10  ;;  %v3036_v39 = vsel %vm3002_vm6, %v2971_v40, %v8877_v18  ;;  %v7713_v16 = vld [vmem:[%s15675_s0 + $0x31a] sm:$0xff]  ;;  %v7714_v1 = vld [vmem:[%s15675_s0 + $0x322] sm:$0xff] }
 0x273   :  { %v3223_v27 = vpack.c.bf16 %v3186_v34, %v3185_v23  ;;  %v3100_v51 = vsel %vm3067_vm7, %v3035_v2, %v8886_v49  ;;  %v3101_v54 = vsel %vm3067_vm7, %v3036_v39, %v8887_v45  ;;  %v2781_v53 = vsel %vm2742_vm2, %v2716_v21, %v8186_v9  ;;  %v7587_v9 = vld [vmem:[%s15675_s0 + $0x330] sm:$0xff]  ;;  %v7526_v21 = vld [vmem:[%s15675_s0 + $0x33a] sm:$0xff] }
 0x274   :  { %9109 = vrot.lane.b32.xlu2 %v12068_v22, %s9795_s16  ;;  %v7586_v22 = vld [vmem:[%s15675_s0 + $0x320] sm:$0xff]  ;;  %v8902_v30 = vunpack.i.h.bf16 %v12118_v28  ;;  %v12278_v47 = vpack.i.bf16 %v7714_v1, %v7713_v16  ;;  %v8917_v39 = vunpack.i.h.bf16 %v12154_v48  ;;  %v15837_v16 = vld [vmem:[#allocation33_spill] sm:$0xff] }
 0x275   :  { %9104 = vrot.lane.b32.xlu1 %v11878_v38, %s15833_s27  ;;  %9099 = vrot.lane.b32.xlu0 %v9098_v60, %s9799_s23  ;;  %v9123_v12 = vpack.i.bf16 %v7586_v22, %v7585_v32  ;;  %v2717_v60 = vsel %vm2677_vm1, %v90_v19, %v8027_v5  ;;  %v12280_v45 = vpop.f32.mrf.mxu0  ;;  %v8226_v1 = vunpack.i.l.bf16 %v15837_v16 }
 0x276   :  { %7761 = vmatmul.msk.bf16.gmra.mxu3 %vm3265_vm9, %v3223_v27  ;;  %v12232_v61 = vpop.permute.xlu2 %8944  ;;  %v2782_v42 = vsel %vm2742_vm2, %v2717_v60, %v8187_v55 }
 0x277   :  { %v8895_v59 = vpop.permute.xlu1 %8894  ;;  %v8890_v38 = vpop.permute.xlu0 %8889 }
 0x278   :  { %v8892_v35 = vunpack.i.h.bf16 %v8890_v38  ;;  %v8891_v57 = vunpack.i.l.bf16 %v8890_v38  ;;  %v8897_v52 = vunpack.i.h.bf16 %v8895_v59  ;;  %v8896_v37 = vunpack.i.l.bf16 %v8895_v59 }
 0x279   :  { %v8916_v59 = vunpack.i.l.bf16 %v12154_v48 }
 0x27a   :  { %v3165_v0 = vsel %vm3132_vm8, %v3100_v51, %v8891_v57  ;;  %v3166_v58 = vsel %vm3132_vm8, %v3101_v54, %v8892_v35  ;;  %v2846_v18 = vsel %vm2807_vm3, %v2781_v53, %v8896_v37  ;;  %v2847_v28 = vsel %vm2807_vm3, %v2782_v42, %v8897_v52  ;;  %v7652_v37 = vld [vmem:[%s15675_s0 + $0x339] sm:$0xff]  ;;  %v15836_v42 = vld [vmem:[#allocation22_spill] sm:$0xff] }
 0x27b   :  { %v3213_v36 = vpack.c.bf16 %v3166_v58, %v3165_v0  ;;  %v2911_v40 = vsel %vm2872_vm4, %v2846_v18, %v8901_v44  ;;  %v2912_v32 = vsel %vm2872_vm4, %v2847_v28, %v8902_v30  ;;  %v7588_v0 = vld [vmem:[%s15675_s0 + $0x338] sm:$0xff]  ;;  %v8066_v30 = vunpack.i.l.bf16 %v15836_v42  ;;  %v106_v18 = vld [vmem:[%s15675_s0 + $0x2c0] sm:$0xff] }
 0x27c   :  { %9124 = vrot.lane.b32.xlu2 %v9123_v12, %s9797_s22  ;;  %v7651_v58 = vld [vmem:[%s15675_s0 + $0x331] sm:$0xff]  ;;  %v9158_v60 = vpack.i.bf16 %v7588_v0, %v7587_v9  ;;  %v8067_v44 = vunpack.i.h.bf16 %v15836_v42  ;;  %v8227_v28 = vunpack.i.h.bf16 %v15837_v16  ;;  %v7589_v42 = vld [vmem:[%s15675_s0 + $0x348] sm:$0xff] }
 0x27d   :  { %9114 = vrot.lane.b32.xlu0 %v12066_v25, %s9794_s29  ;;  %7751 = vmatmul.msk.bf16.gmra.mxu0 %vm3265_vm9, %v3213_v36  ;;  %v7650_v25 = vld [vmem:[%s15675_s0 + $0x321] sm:$0xff]  ;;  %v12301_v13 = vpop.f32.mrf.mxu0  ;;  %v7525_v36 = vld [vmem:[%s15675_s0 + $0x332] sm:$0xff] }
 0x27e   :  { %9119 = vrot.lane.b32.xlu1 %v12105_v41, %s15732_s30  ;;  %v12265_v50 = vpop.permute.xlu2 %8959  ;;  %v9128_v20 = vpack.i.bf16 %v7650_v25, %v7649_v43  ;;  %v9163_v43 = vpack.i.bf16 %v7652_v37, %v7651_v58  ;;  %v12330_v53 = vpack.i.bf16 %v7526_v21, %v7525_v36  ;;  %v105_v25 = vld [vmem:[%s15675_s0 + $0x2b8] sm:$0xff] }
 0x27f   :  { %v8910_v10 = vpop.permute.xlu1 %8909  ;;  %v8905_v23 = vpop.permute.xlu0 %8904 }
 0x280   :  { %v8907_v34 = vunpack.i.h.bf16 %v8905_v23  ;;  %v8906_v27 = vunpack.i.l.bf16 %v8905_v23  ;;  %v8912_v49 = vunpack.i.h.bf16 %v8910_v10  ;;  %v8911_v31 = vunpack.i.l.bf16 %v8910_v10 }
 0x282   :  { %v2976_v22 = vsel %vm2937_vm5, %v2911_v40, %v8906_v27  ;;  %v2977_v2 = vsel %vm2937_vm5, %v2912_v32, %v8907_v34  ;;  %v15838_v27 = vld [vmem:[#allocation6_spill] sm:$0xff] }
 0x283   :  { %v3041_v35 = vsel %vm3002_vm6, %v2976_v22, %v8911_v31  ;;  %v3042_v57 = vsel %vm3002_vm6, %v2977_v2, %v8912_v49  ;;  %v8016_v49 = vunpack.i.l.bf16 %v15838_v27  ;;  %v2732_v31 = vsel %vm2677_vm1, %v105_v25, %v8066_v30  ;;  %v85_v22 = vld [vmem:[%s15675_s0 + $0x1c8] sm:$0xff] }
 0x284   :  { %9139 = vrot.lane.b32.xlu2 %v12105_v41, %s15833_s27  ;;  %v3106_v41 = vsel %vm3067_vm7, %v3041_v35, %v8916_v59  ;;  %v3107_v54 = vsel %vm3067_vm7, %v3042_v57, %v8917_v39  ;;  %v2733_v2 = vsel %vm2677_vm1, %v106_v18, %v8067_v44  ;;  %v2797_v39 = vsel %vm2742_vm2, %v2732_v31, %v8226_v1  ;;  %v15839_v59 = vld [vmem:[#allocation34_spill] sm:$0xff] }
 0x285   :  { %9129 = vrot.lane.b32.xlu0 %v9128_v20, %s9796_s21  ;;  %v12345_v23 = vpop.f32.mrf.mxu0  ;;  %v8176_v35 = vunpack.i.l.bf16 %v15839_v59  ;;  %v8931_v57 = vunpack.i.l.bf16 %v12199_v3  ;;  %v2712_v0 = vsel %vm2677_vm1, %v85_v22, %v8016_v49  ;;  %v8961_v30 = vunpack.i.l.bf16 %v12265_v50 }
 0x286   :  { %9134 = vrot.lane.b32.xlu1 %v12278_v47, %s9799_s23  ;;  %v12293_v38 = vpop.permute.xlu2 %8974  ;;  %v8962_v18 = vunpack.i.h.bf16 %v12265_v50 }
 0x287   :  { %v8925_v29 = vpop.permute.xlu1 %8924  ;;  %v8920_v5 = vpop.permute.xlu0 %8919  ;;  %v2777_v36 = vsel %vm2742_vm2, %v2712_v0, %v8176_v35 }
 0x288   :  { %v8922_v17 = vunpack.i.h.bf16 %v8920_v5  ;;  %v8921_v51 = vunpack.i.l.bf16 %v8920_v5  ;;  %v8926_v10 = vunpack.i.l.bf16 %v8925_v29  ;;  %v8927_v34 = vunpack.i.h.bf16 %v8925_v29  ;;  %v86_v5 = vld [vmem:[%s15675_s0 + $0x1d0] sm:$0xff] }
 0x28a   :  { %v3171_v48 = vsel %vm3132_vm8, %v3106_v41, %v8921_v51  ;;  %v3172_v33 = vsel %vm3132_vm8, %v3107_v54, %v8922_v17  ;;  %v2798_v17 = vsel %vm2742_vm2, %v2733_v2, %v8227_v28  ;;  %v8932_v51 = vunpack.i.h.bf16 %v12199_v3 }
 0x28b   :  { %v3216_v19 = vpack.c.bf16 %v3172_v33, %v3171_v48  ;;  %v2862_v41 = vsel %vm2807_vm3, %v2797_v39, %v8926_v10  ;;  %v8177_v48 = vunpack.i.h.bf16 %v15839_v59  ;;  %v2863_v33 = vsel %vm2807_vm3, %v2798_v17, %v8927_v34 }
 0x28c   :  { %9154 = vrot.lane.b32.xlu2 %v12278_v47, %s15732_s30  ;;  %v2927_v21 = vsel %vm2872_vm4, %v2862_v41, %v8931_v57  ;;  %v2928_v44 = vsel %vm2872_vm4, %v2863_v33, %v8932_v51  ;;  %v8946_v34 = vunpack.i.l.bf16 %v12232_v61 }
 0x28d   :  { %9144 = vrot.lane.b32.xlu0 %v9123_v12, %s9795_s16  ;;  %7754 = vmatmul.msk.bf16.vlgmr.msra.gmra.mxu2 %vm3265_vm9, %v3216_v19  ;;  %v12402_v31 = vpop.f32.mrf.mxu0 }
 0x28e   :  { %9149 = vrot.lane.b32.xlu1 %v9128_v20, %s9794_s29  ;;  %v12308_v55 = vpop.permute.xlu2 %8989  ;;  %v8017_v20 = vunpack.i.h.bf16 %v15838_v27 }
 0x28f   :  { %v8940_v52 = vpop.permute.xlu1 %8939  ;;  %v12319_v12 = vpop.permute.xlu0 %8934 }
 0x290   :  { %v8941_v54 = vunpack.i.l.bf16 %v8940_v52  ;;  %v8942_v19 = vunpack.i.h.bf16 %v8940_v52  ;;  %v2713_v37 = vsel %vm2677_vm1, %v86_v5, %v8017_v20  ;;  %v8936_v3 = vunpack.i.l.bf16 %v12319_v12  ;;  %v7590_v52 = vld [vmem:[%s15675_s0 + $0x350] sm:$0xff] }
 0x291   :  { %v8937_v16 = vunpack.i.h.bf16 %v12319_v12  ;;  %v2778_v1 = vsel %vm2742_vm2, %v2713_v37, %v8177_v48  ;;  %v7654_v12 = vld [vmem:[%s15675_s0 + $0x351] sm:$0xff]  ;;  %v9193_v49 = vpack.i.bf16 %v7590_v52, %v7589_v42 }
 0x292   :  { %v2992_v25 = vsel %vm2937_vm5, %v2927_v21, %v8941_v54  ;;  %v2993_v28 = vsel %vm2937_vm5, %v2928_v44, %v8942_v19  ;;  %v7717_v21 = vld [vmem:[%s15675_s0 + $0x34a] sm:$0xff] }
 0x293   :  { %v2843_v39 = vsel %vm2807_vm3, %v2778_v1, %v8937_v16 }
 0x294   :  { %9169 = vrot.lane.b32.xlu2 %v12330_v53, %s9799_s23 }
 0x295   :  { %9159 = vrot.lane.b32.xlu0 %v9158_v60, %s9797_s22 }
 0x296   :  { %9164 = vrot.lane.b32.xlu1 %v9163_v43, %s9796_s21  ;;  %v12360_v29 = vpop.permute.xlu2 %9004 }
 0x297   :  { %v12351_v40 = vpop.permute.xlu1 %8954  ;;  %v8950_v32 = vpop.permute.xlu0 %8949 }
 0x298   :  { %v8951_v9 = vunpack.i.l.bf16 %v8950_v32  ;;  %v8952_v58 = vunpack.i.h.bf16 %v8950_v32  ;;  %v8957_v59 = vunpack.i.h.bf16 %v12351_v40  ;;  %v8956_v35 = vunpack.i.l.bf16 %v12351_v40 }
 0x299   :  { %v8977_v40 = vunpack.i.h.bf16 %v12293_v38 }
 0x29a   :  { %v3057_v10 = vsel %vm3002_vm6, %v2992_v25, %v8951_v9  ;;  %v3058_v50 = vsel %vm3002_vm6, %v2993_v28, %v8952_v58  ;;  %v8976_v9 = vunpack.i.l.bf16 %v12293_v38  ;;  %v7718_v38 = vld [vmem:[%s15675_s0 + $0x352] sm:$0xff] }
 0x29b   :  { %v3123_v51 = vsel %vm3067_vm7, %v3058_v50, %v8962_v18  ;;  %v9203_v1 = vpack.i.bf16 %v7718_v38, %v7717_v21  ;;  %v91_v28 = vld [vmem:[%s15675_s0 + $0x210] sm:$0xff]  ;;  %v92_v50 = vld [vmem:[%s15675_s0 + $0x218] sm:$0xff] }
 0x29c   :  { %9184 = vrot.lane.b32.xlu2 %v9163_v43, %s9794_s29  ;;  %v7653_v43 = vld [vmem:[%s15675_s0 + $0x349] sm:$0xff] }
 0x29d   :  { %9174 = vrot.lane.b32.xlu0 %v12278_v47, %s15833_s27  ;;  %v8947_v47 = vunpack.i.h.bf16 %v12232_v61  ;;  %v9198_v2 = vpack.i.bf16 %v7654_v12, %v7653_v43  ;;  %v3122_v61 = vsel %vm3067_vm7, %v3057_v10, %v8961_v30  ;;  %v15841_v30 = vld [vmem:[#allocation7_spill] sm:$0xff]  ;;  %v15842_v10 = vld [vmem:[#allocation36_spill] sm:$0xff]  ;;  %v12441_v12 = vpop.f32.mrf.mxu0 }
 0x29e   :  { %9179 = vrot.lane.b32.xlu1 %v9158_v60, %s9795_s16  ;;  %v2842_v60 = vsel %vm2807_vm3, %v2777_v36, %v8936_v3  ;;  %v12409_v57 = vpop.permute.xlu2 %9019  ;;  %s15840_s16 = smov 40   ;;  %v8031_v44 = vunpack.i.l.bf16 %v15841_v30  ;;  %v8032_v18 = vunpack.i.h.bf16 %v15841_v30  ;;  %v8191_v43 = vunpack.i.l.bf16 %v15842_v10 }
 0x29f   :  { %v8970_v27 = vpop.permute.xlu1 %8969  ;;  %v8965_v20 = vpop.permute.xlu0 %8964  ;;  %v2907_v48 = vsel %vm2872_vm4, %v2842_v60, %v8946_v34  ;;  %v2908_v33 = vsel %vm2872_vm4, %v2843_v39, %v8947_v47 }
 0x2a0   :  { %v8972_v32 = vunpack.i.h.bf16 %v8970_v27  ;;  %v8971_v22 = vunpack.i.l.bf16 %v8970_v27  ;;  %v8967_v5 = vunpack.i.h.bf16 %v8965_v20  ;;  %v8966_v17 = vunpack.i.l.bf16 %v8965_v20 }
 0x2a1   :  { %v2972_v0 = vsel %vm2937_vm5, %v2907_v48, %v8956_v35  ;;  %v2973_v58 = vsel %vm2937_vm5, %v2908_v33, %v8957_v59  ;;  %v8192_v27 = vunpack.i.h.bf16 %v15842_v10  ;;  %v8991_v59 = vunpack.i.l.bf16 %v12308_v55 }
 0x2a2   :  { %v3187_v41 = vsel %vm3132_vm8, %v3122_v61, %v8971_v22  ;;  %v3188_v54 = vsel %vm3132_vm8, %v3123_v51, %v8972_v32  ;;  %v3037_v37 = vsel %vm3002_vm6, %v2972_v0, %v8966_v17  ;;  %v3038_v36 = vsel %vm3002_vm6, %v2973_v58, %v8967_v5 }
 0x2a3   :  { %v3224_v19 = vpack.c.bf16 %v3188_v54, %v3187_v41  ;;  %v3102_v25 = vsel %vm3067_vm7, %v3037_v37, %v8976_v9  ;;  %v3103_v16 = vsel %vm3067_vm7, %v3038_v36, %v8977_v40  ;;  %v2718_v22 = vsel %vm2677_vm1, %v91_v28, %v8031_v44 }
 0x2a4   :  { %9199 = vrot.lane.b32.xlu2 %v9198_v2, %s9796_s21  ;;  %v2719_v2 = vsel %vm2677_vm1, %v92_v50, %v8032_v18  ;;  %v2783_v39 = vsel %vm2742_vm2, %v2718_v22, %v8191_v43  ;;  %v8992_v61 = vunpack.i.h.bf16 %v12308_v55  ;;  %v9006_v37 = vunpack.i.l.bf16 %v12360_v29 }
 0x2a5   :  { %9189 = vrot.lane.b32.xlu0 %v12330_v53, %s15840_s16  ;;  %7762 = vmatmul.msk.bf16.gmra.mxu3 %vm3265_vm9, %v3224_v19  ;;  %v2784_v35 = vsel %vm2742_vm2, %v2719_v2, %v8192_v27  ;;  %v12464_v58 = vpop.f32.mrf.mxu0  ;;  %v9007_v36 = vunpack.i.h.bf16 %v12360_v29  ;;  %v107_v27 = vld [vmem:[%s15675_s0 + $0x2d0] sm:$0xff] }
 0x2a6   :  { %9194 = vrot.lane.b32.xlu1 %v9193_v49, %s9797_s22  ;;  %v12449_v60 = vpop.permute.xlu2 %9034 }
 0x2a7   :  { %v8985_v3 = vpop.permute.xlu1 %8984  ;;  %v8980_v42 = vpop.permute.xlu0 %8979 }
 0x2a8   :  { %v8982_v52 = vunpack.i.h.bf16 %v8980_v42  ;;  %v8981_v53 = vunpack.i.l.bf16 %v8980_v42  ;;  %v8986_v20 = vunpack.i.l.bf16 %v8985_v3  ;;  %v8987_v32 = vunpack.i.h.bf16 %v8985_v3 }
 0x2aa   :  { %v3167_v47 = vsel %vm3132_vm8, %v3102_v25, %v8981_v53  ;;  %v3168_v34 = vsel %vm3132_vm8, %v3103_v16, %v8982_v52  ;;  %v2848_v5 = vsel %vm2807_vm3, %v2783_v39, %v8986_v20  ;;  %v2849_v41 = vsel %vm2807_vm3, %v2784_v35, %v8987_v32  ;;  %v108_v20 = vld [vmem:[%s15675_s0 + $0x2d8] sm:$0xff] }
 0x2ab   :  { %v3214_v49 = vpack.c.bf16 %v3168_v34, %v3167_v47  ;;  %v2913_v19 = vsel %vm2872_vm4, %v2848_v5, %v8991_v59  ;;  %v2914_v9 = vsel %vm2872_vm4, %v2849_v41, %v8992_v61  ;;  %v15843_v47 = vld [vmem:[#allocation21_spill] sm:$0xff] }
 0x2ac   :  { %v8072_v34 = vunpack.i.h.bf16 %v15843_v47  ;;  %v8071_v50 = vunpack.i.l.bf16 %v15843_v47 }
 0x2ad   :  { %9204 = vrot.lane.b32.xlu0 %v9203_v1, %s9799_s23  ;;  %7752 = vmatmul.msk.bf16.gmra.mxu0 %vm3265_vm9, %v3214_v49  ;;  %v12477_v29 = vpop.f32.mrf.mxu0  ;;  %v15844_v49 = vld [vmem:[#allocation42_spill] sm:$0xff] }
 0x2ae   :  { %v12469_v21 = vpop.permute.xlu2 %9049  ;;  %v8232_v32 = vunpack.i.h.bf16 %v15844_v49  ;;  %v8231_v22 = vunpack.i.l.bf16 %v15844_v49  ;;  %v2734_v59 = vsel %vm2677_vm1, %v107_v27, %v8071_v50  ;;  %v2735_v35 = vsel %vm2677_vm1, %v108_v20, %v8072_v34 }
 0x2af   :  { %v9000_v17 = vpop.permute.xlu1 %8999  ;;  %v8995_v51 = vpop.permute.xlu0 %8994 }
 0x2b0   :  { %v8997_v54 = vunpack.i.h.bf16 %v8995_v51  ;;  %v8996_v48 = vunpack.i.l.bf16 %v8995_v51  ;;  %v9001_v33 = vunpack.i.l.bf16 %v9000_v17  ;;  %v9002_v40 = vunpack.i.h.bf16 %v9000_v17 }
 0x2b1   :  { %v2799_v17 = vsel %vm2742_vm2, %v2734_v59, %v8231_v22  ;;  %v2800_v51 = vsel %vm2742_vm2, %v2735_v35, %v8232_v32  ;;  %v9037_v22 = vunpack.i.h.bf16 %v12449_v60 }
 0x2b2   :  { %v2978_v0 = vsel %vm2937_vm5, %v2913_v19, %v8996_v48  ;;  %v2979_v55 = vsel %vm2937_vm5, %v2914_v9, %v8997_v54  ;;  %v9022_v54 = vunpack.i.h.bf16 %v12409_v57  ;;  %v9021_v48 = vunpack.i.l.bf16 %v12409_v57  ;;  %v88_v57 = vld [vmem:[%s15675_s0 + $0x1e8] sm:$0xff] }
 0x2b3   :  { %v3043_v38 = vsel %vm3002_vm6, %v2978_v0, %v9001_v33  ;;  %v3044_v52 = vsel %vm3002_vm6, %v2979_v55, %v9002_v40  ;;  %v15845_v0 = vld [vmem:[#allocation16_spill] sm:$0xff] }
 0x2b4   :  { %v3108_v44 = vsel %vm3067_vm7, %v3043_v38, %v9006_v37  ;;  %v3109_v25 = vsel %vm3067_vm7, %v3044_v52, %v9007_v36  ;;  %v8022_v55 = vunpack.i.h.bf16 %v15845_v0  ;;  %v8021_v37 = vunpack.i.l.bf16 %v15845_v0  ;;  %v15846_v52 = vld [vmem:[#allocation27_spill] sm:$0xff] }
 0x2b5   :  { %v12496_v41 = vpop.f32.mrf.mxu0 }
 0x2b6   :  { %v12480_v43 = vpop.permute.xlu2 %9064  ;;  %v2715_v27 = vsel %vm2677_vm1, %v88_v57, %v8022_v55 }
 0x2b7   :  { %v9015_v3 = vpop.permute.xlu1 %9014  ;;  %v9010_v42 = vpop.permute.xlu0 %9009 }
 0x2b8   :  { %v9012_v53 = vunpack.i.h.bf16 %v9010_v42  ;;  %v9011_v30 = vunpack.i.l.bf16 %v9010_v42  ;;  %v9017_v2 = vunpack.i.h.bf16 %v9015_v3  ;;  %v9016_v39 = vunpack.i.l.bf16 %v9015_v3  ;;  %v87_v42 = vld [vmem:[%s15675_s0 + $0x1e0] sm:$0xff] }
 0x2b9   :  { %v2714_v50 = vsel %vm2677_vm1, %v87_v42, %v8021_v37  ;;  %v9066_v42 = vunpack.i.l.bf16 %v12480_v43 }
 0x2ba   :  { %v3173_v16 = vsel %vm3132_vm8, %v3108_v44, %v9011_v30  ;;  %v3174_v1 = vsel %vm3132_vm8, %v3109_v25, %v9012_v53  ;;  %v2864_v33 = vsel %vm2807_vm3, %v2799_v17, %v9016_v39  ;;  %v2865_v19 = vsel %vm2807_vm3, %v2800_v51, %v9017_v2 }
 0x2bb   :  { %v3217_v18 = vpack.c.bf16 %v3174_v1, %v3173_v16  ;;  %v8182_v53 = vunpack.i.h.bf16 %v15846_v52  ;;  %v8181_v30 = vunpack.i.l.bf16 %v15846_v52  ;;  %v2929_v44 = vsel %vm2872_vm4, %v2864_v33, %v9021_v48 }
 0x2bc   :  { %v2930_v25 = vsel %vm2872_vm4, %v2865_v19, %v9022_v54 }
 0x2bd   :  { %7755 = vmatmul.msk.bf16.gmra.mxu2 %vm3265_vm9, %v3217_v18  ;;  %v9052_v18 = vunpack.i.h.bf16 %v12469_v21  ;;  %v2779_v32 = vsel %vm2742_vm2, %v2714_v50, %v8181_v30  ;;  %v12532_v19 = vpop.f32.mrf.mxu0  ;;  %v93_v50 = vld [vmem:[%s15675_s0 + $0x228] sm:$0xff] }
 0x2be   :  { %v12504_v36 = vpop.permute.xlu2 %9079 }
 0x2bf   :  { %v9030_v28 = vpop.permute.xlu1 %9029  ;;  %v9025_v10 = vpop.permute.xlu0 %9024 }
 0x2c0   :  { %v9032_v40 = vunpack.i.h.bf16 %v9030_v28  ;;  %v9031_v9 = vunpack.i.l.bf16 %v9030_v28  ;;  %v9027_v16 = vunpack.i.h.bf16 %v9025_v10  ;;  %v9026_v1 = vunpack.i.l.bf16 %v9025_v10 }
 0x2c1   :  { %v9051_v28 = vunpack.i.l.bf16 %v12469_v21  ;;  %v2780_v10 = vsel %vm2742_vm2, %v2715_v27, %v8182_v53  ;;  %v9036_v21 = vunpack.i.l.bf16 %v12449_v60  ;;  %v94_v27 = vld [vmem:[%s15675_s0 + $0x230] sm:$0xff] }
 0x2c2   :  { %v2994_v47 = vsel %vm2937_vm5, %v2929_v44, %v9031_v9  ;;  %v2995_v34 = vsel %vm2937_vm5, %v2930_v25, %v9032_v40  ;;  %v2844_v59 = vsel %vm2807_vm3, %v2779_v32, %v9026_v1  ;;  %v2845_v35 = vsel %vm2807_vm3, %v2780_v10, %v9027_v16 }
 0x2c6   :  { %v9095_v37 = vpop.permute.xlu2 %9094 }
 0x2c7   :  { %v9045_v61 = vpop.permute.xlu1 %9044  ;;  %v9040_v5 = vpop.permute.xlu0 %9039 }
 0x2c8   :  { %v9042_v38 = vunpack.i.h.bf16 %v9040_v5  ;;  %v9041_v3 = vunpack.i.l.bf16 %v9040_v5  ;;  %v9047_v51 = vunpack.i.h.bf16 %v9045_v61  ;;  %v9046_v54 = vunpack.i.l.bf16 %v9045_v61 }
 0x2c9   :  { %v9067_v61 = vunpack.i.h.bf16 %v12480_v43 }
 0x2ca   :  { %v3059_v20 = vsel %vm3002_vm6, %v2994_v47, %v9041_v3  ;;  %v3060_v49 = vsel %vm3002_vm6, %v2995_v34, %v9042_v38  ;;  %v2909_v38 = vsel %vm2872_vm4, %v2844_v59, %v9036_v21  ;;  %v2910_v3 = vsel %vm2872_vm4, %v2845_v35, %v9037_v22  ;;  %v12559_v59 = vpop.f32.mrf.mxu0 }
 0x2cb   :  { %v3124_v48 = vsel %vm3067_vm7, %v3059_v20, %v9051_v28  ;;  %v3125_v33 = vsel %vm3067_vm7, %v3060_v49, %v9052_v18  ;;  %v2974_v57 = vsel %vm2937_vm5, %v2909_v38, %v9046_v54  ;;  %v2975_v52 = vsel %vm2937_vm5, %v2910_v3, %v9047_v51  ;;  %v15847_v18 = vld [vmem:[#allocation18_spill] sm:$0xff]  ;;  %v15848_v20 = vld [vmem:[#allocation28_spill] sm:$0xff] }
 0x2cc   :  { %v8037_v28 = vunpack.i.h.bf16 %v15847_v18  ;;  %v8036_v47 = vunpack.i.l.bf16 %v15847_v18  ;;  %v8197_v49 = vunpack.i.h.bf16 %v15848_v20  ;;  %v8196_v32 = vunpack.i.l.bf16 %v15848_v20 }
 0x2cd   :  { %v9082_v54 = vunpack.i.h.bf16 %v12504_v36 }
 0x2ce   :  { %v2720_v35 = vsel %vm2677_vm1, %v93_v50, %v8036_v47 }
 0x2cf   :  { %v9060_v2 = vpop.permute.xlu1 %9059  ;;  %v9055_v39 = vpop.permute.xlu0 %9054 }
 0x2d0   :  { %v9062_v5 = vunpack.i.h.bf16 %v9060_v2  ;;  %v9061_v17 = vunpack.i.l.bf16 %v9060_v2  ;;  %v9057_v40 = vunpack.i.h.bf16 %v9055_v39  ;;  %v9056_v9 = vunpack.i.l.bf16 %v9055_v39 }
 0x2d2   :  { %v3189_v60 = vsel %vm3132_vm8, %v3124_v48, %v9061_v17  ;;  %v3190_v0 = vsel %vm3132_vm8, %v3125_v33, %v9062_v5  ;;  %v3039_v53 = vsel %vm3002_vm6, %v2974_v57, %v9056_v9  ;;  %v3040_v30 = vsel %vm3002_vm6, %v2975_v52, %v9057_v40  ;;  %v9110_v33 = vpop.permute.xlu2 %9109 }
 0x2d3   :  { %v3225_v55 = vpack.c.bf16 %v3190_v0, %v3189_v60  ;;  %v3104_v43 = vsel %vm3067_vm7, %v3039_v53, %v9066_v42  ;;  %v3105_v34 = vsel %vm3067_vm7, %v3040_v30, %v9067_v61  ;;  %v2721_v5 = vsel %vm2677_vm1, %v94_v27, %v8037_v28  ;;  %v15849_v27 = vld [vmem:[#allocation14_spill] sm:$0xff] }
 0x2d4   :  { %v2785_v17 = vsel %vm2742_vm2, %v2720_v35, %v8196_v32  ;;  %v2786_v51 = vsel %vm2742_vm2, %v2721_v5, %v8197_v49  ;;  %v9081_v48 = vunpack.i.l.bf16 %v12504_v36  ;;  %v9097_v36 = vunpack.i.h.bf16 %v9095_v37 }
 0x2d5   :  { %7763 = vmatmul.msk.bf16.gmra.mxu3 %vm3265_vm9, %v3225_v55  ;;  %v9096_v30 = vunpack.i.l.bf16 %v9095_v37  ;;  %v8077_v20 = vunpack.i.h.bf16 %v15849_v27  ;;  %v8076_v49 = vunpack.i.l.bf16 %v15849_v27 }
 0x2d7   :  { %v9075_v44 = vpop.permute.xlu1 %9074  ;;  %v9070_v25 = vpop.permute.xlu0 %9069 }
 0x2d8   :  { %v9072_v16 = vunpack.i.h.bf16 %v9070_v25  ;;  %v9071_v1 = vunpack.i.l.bf16 %v9070_v25  ;;  %v9077_v21 = vunpack.i.h.bf16 %v9075_v44  ;;  %v9076_v2 = vunpack.i.l.bf16 %v9075_v44  ;;  %v12574_v44 = vpop.f32.mrf.mxu0 }
 0x2da   :  { %v3169_v10 = vsel %vm3132_vm8, %v3104_v43, %v9071_v1  ;;  %v3170_v22 = vsel %vm3132_vm8, %v3105_v34, %v9072_v16  ;;  %v2850_v40 = vsel %vm2807_vm3, %v2785_v17, %v9076_v2  ;;  %v2851_v9 = vsel %vm2807_vm3, %v2786_v51, %v9077_v21  ;;  %v9125_v43 = vpop.permute.xlu2 %9124 }
 0x2db   :  { %v3215_v39 = vpack.c.bf16 %v3170_v22, %v3169_v10  ;;  %v2915_v42 = vsel %vm2872_vm4, %v2850_v40, %v9081_v48  ;;  %v2916_v57 = vsel %vm2872_vm4, %v2851_v9, %v9082_v54  ;;  %v109_v10 = vld [vmem:[%s15675_s0 + $0x2e8] sm:$0xff]  ;;  %v110_v22 = vld [vmem:[%s15675_s0 + $0x2f0] sm:$0xff]  ;;  %v9112_v51 = vunpack.i.h.bf16 %v9110_v33 }
 0x2dc   :  { %v2736_v35 = vsel %vm2677_vm1, %v109_v10, %v8076_v49  ;;  %v2737_v5 = vsel %vm2677_vm1, %v110_v22, %v8077_v20  ;;  %v9111_v54 = vunpack.i.l.bf16 %v9110_v33  ;;  %v9127_v33 = vunpack.i.h.bf16 %v9125_v43 }
 0x2dd   :  { %7753 = vmatmul.msk.bf16.gmra.mxu0 %vm3265_vm9, %v3215_v39 }
 0x2df   :  { %v9090_v60 = vpop.permute.xlu1 %9089  ;;  %v9085_v0 = vpop.permute.xlu0 %9084 }
 0x2e0   :  { %v9087_v55 = vunpack.i.h.bf16 %v9085_v0  ;;  %v9086_v38 = vunpack.i.l.bf16 %v9085_v0  ;;  %v9092_v3 = vunpack.i.h.bf16 %v9090_v60  ;;  %v9091_v61 = vunpack.i.l.bf16 %v9090_v60  ;;  %v12593_v17 = vpop.f32.mrf.mxu0 }
 0x2e2   :  { %v2980_v52 = vsel %vm2937_vm5, %v2915_v42, %v9086_v38  ;;  %v2981_v53 = vsel %vm2937_vm5, %v2916_v57, %v9087_v55  ;;  %v9140_v57 = vpop.permute.xlu2 %9139 }
 0x2e3   :  { %v3045_v25 = vsel %vm3002_vm6, %v2980_v52, %v9091_v61  ;;  %v3046_v16 = vsel %vm3002_vm6, %v2981_v53, %v9092_v3 }
 0x2e4   :  { %v3110_v34 = vsel %vm3067_vm7, %v3045_v25, %v9096_v30  ;;  %v3111_v50 = vsel %vm3067_vm7, %v3046_v16, %v9097_v36  ;;  %v9126_v36 = vunpack.i.l.bf16 %v9125_v43 }
 0x2e7   :  { %v9105_v1 = vpop.permute.xlu1 %9104  ;;  %v9100_v18 = vpop.permute.xlu0 %9099 }
 0x2e8   :  { %v9102_v28 = vunpack.i.h.bf16 %v9100_v18  ;;  %v9101_v47 = vunpack.i.l.bf16 %v9100_v18  ;;  %v9107_v21 = vunpack.i.h.bf16 %v9105_v1  ;;  %v9106_v2 = vunpack.i.l.bf16 %v9105_v1  ;;  %v12603_v1 = vpop.f32.mrf.mxu0 }
 0x2ea   :  { %v3175_v37 = vsel %vm3132_vm8, %v3110_v34, %v9101_v47  ;;  %v3176_v32 = vsel %vm3132_vm8, %v3111_v50, %v9102_v28  ;;  %v2801_v48 = vsel %vm2742_vm2, %v2736_v35, %v9106_v2  ;;  %v2802_v40 = vsel %vm2742_vm2, %v2737_v5, %v9107_v21  ;;  %v9155_v10 = vpop.permute.xlu2 %9154  ;;  %v15850_v21 = vld [vmem:[#allocation24_spill] sm:$0xff]  ;;  %v112_v5 = vld [vmem:[%s15675_s0 + $0x308] sm:$0xff] }
 0x2eb   :  { %v3218_v39 = vpack.c.bf16 %v3176_v32, %v3175_v37  ;;  %v2866_v38 = vsel %vm2807_vm3, %v2801_v48, %v9111_v54  ;;  %v2867_v3 = vsel %vm2807_vm3, %v2802_v40, %v9112_v51  ;;  %v8082_v2 = vunpack.i.h.bf16 %v15850_v21  ;;  %v111_v35 = vld [vmem:[%s15675_s0 + $0x300] sm:$0xff] }
 0x2ec   :  { %v9142_v51 = vunpack.i.h.bf16 %v9140_v57  ;;  %v9141_v54 = vunpack.i.l.bf16 %v9140_v57 }
 0x2ed   :  { %7756 = vmatmul.msk.bf16.gmra.mxu2 %vm3265_vm9, %v3218_v39  ;;  %v8081_v39 = vunpack.i.l.bf16 %v15850_v21 }
 0x2ef   :  { %v9115_v9 = vpop.permute.xlu0 %9114 }
 0x2f0   :  { %v9117_v60 = vunpack.i.h.bf16 %v9115_v9  ;;  %v9116_v0 = vunpack.i.l.bf16 %v9115_v9  ;;  %v9120_v55 = vpop.permute.xlu1 %9119  ;;  %v12620_v40 = vpop.f32.mrf.mxu0 }
 0x2f1   :  { %v9122_v61 = vunpack.i.h.bf16 %v9120_v55  ;;  %v9121_v42 = vunpack.i.l.bf16 %v9120_v55  ;;  %v2738_v55 = vsel %vm2677_vm1, %v111_v35, %v8081_v39 }
 0x2f2   :  { %v2931_v52 = vsel %vm2872_vm4, %v2866_v38, %v9116_v0  ;;  %v2932_v53 = vsel %vm2872_vm4, %v2867_v3, %v9117_v60  ;;  %v2739_v38 = vsel %vm2677_vm1, %v112_v5, %v8082_v2  ;;  %v2803_v3 = vsel %vm2742_vm2, %v2738_v55, %v9141_v54  ;;  %v113_v55 = vld [vmem:[%s15675_s0 + $0x318] sm:$0xff] }
 0x2f3   :  { %v2996_v30 = vsel %vm2937_vm5, %v2931_v52, %v9121_v42  ;;  %v2997_v25 = vsel %vm2937_vm5, %v2932_v53, %v9122_v61  ;;  %v2804_v61 = vsel %vm2742_vm2, %v2739_v38, %v9142_v51  ;;  %v114_v38 = vld [vmem:[%s15675_s0 + $0x320] sm:$0xff] }
 0x2f4   :  { %v3061_v34 = vsel %vm3002_vm6, %v2996_v30, %v9126_v36  ;;  %v3062_v50 = vsel %vm3002_vm6, %v2997_v25, %v9127_v33  ;;  %v12628_v33 = vpop.f32.mrf.mxu3  ;;  %v9157_v36 = vunpack.i.h.bf16 %v9155_v10  ;;  %v9156_v30 = vunpack.i.l.bf16 %v9155_v10  ;;  %v9170_v25 = vpop.permute.xlu2 %9169 }
 0x2f7   :  { %v9130_v16 = vpop.permute.xlu0 %9129 }
 0x2f8   :  { %v9132_v18 = vunpack.i.h.bf16 %v9130_v16  ;;  %v9131_v28 = vunpack.i.l.bf16 %v9130_v16  ;;  %v9135_v47 = vpop.permute.xlu1 %9134 }
 0x2f9   :  { %v9137_v27 = vunpack.i.h.bf16 %v9135_v47  ;;  %v9136_v20 = vunpack.i.l.bf16 %v9135_v47 }
 0x2fa   :  { %v3126_v49 = vsel %vm3067_vm7, %v3061_v34, %v9131_v28  ;;  %v3127_v43 = vsel %vm3067_vm7, %v3062_v50, %v9132_v18 }
 0x2fb   :  { %v3191_v37 = vsel %vm3132_vm8, %v3126_v49, %v9136_v20  ;;  %v3192_v32 = vsel %vm3132_vm8, %v3127_v43, %v9137_v27  ;;  %v9172_v27 = vunpack.i.h.bf16 %v9170_v25  ;;  %v9171_v20 = vunpack.i.l.bf16 %v9170_v25 }
 0x2fc   :  { %v3226_v22 = vpack.c.bf16 %v3192_v32, %v3191_v37  ;;  %v12642_v54 = vpop.f32.mrf.mxu3 }
 0x2fe   :  { %7764 = vmatmul.msk.bf16.gmra.mxu3 %vm3265_vm9, %v3226_v22  ;;  %v12634_v22 = vpop.f32.mrf.mxu0 }
 0x2ff   :  { %v9145_v48 = vpop.permute.xlu0 %9144 }
 0x300   :  { %v9147_v9 = vunpack.i.h.bf16 %v9145_v48  ;;  %v9146_v60 = vunpack.i.l.bf16 %v9145_v48  ;;  %v9150_v0 = vpop.permute.xlu1 %9149  ;;  %v15851_v48 = vld [vmem:[#allocation23_spill] sm:$0xff] }
 0x301   :  { %v9152_v42 = vunpack.i.h.bf16 %v9150_v0  ;;  %v9151_v52 = vunpack.i.l.bf16 %v9150_v0 }
 0x302   :  { %v2868_v57 = vsel %vm2807_vm3, %v2803_v3, %v9146_v60  ;;  %v2869_v53 = vsel %vm2807_vm3, %v2804_v61, %v9147_v9  ;;  %v8087_v9 = vunpack.i.h.bf16 %v15851_v48  ;;  %v8086_v60 = vunpack.i.l.bf16 %v15851_v48 }
 0x303   :  { %v2933_v16 = vsel %vm2872_vm4, %v2868_v57, %v9151_v52  ;;  %v2934_v18 = vsel %vm2872_vm4, %v2869_v53, %v9152_v42  ;;  %v9185_v52 = vpop.permute.xlu2 %9184 }
 0x304   :  { %v2998_v49 = vsel %vm2937_vm5, %v2933_v16, %v9156_v30  ;;  %v2999_v43 = vsel %vm2937_vm5, %v2934_v18, %v9157_v36  ;;  %v2740_v53 = vsel %vm2677_vm1, %v113_v55, %v8086_v60  ;;  %v2741_v36 = vsel %vm2677_vm1, %v114_v38, %v8087_v9 }
 0x305   :  { %v3537_v9 = vsel %vm2742_vm2, %v11585_v11, 0.0  ;;  %v3540_v60 = vsel %vm2742_vm2, %v11774_v56, 0.0 }
 0x306   :  { %v12653_v57 = vpop.f32.mrf.mxu0 }
 0x307   :  { %v9160_v28 = vpop.permute.xlu0 %9159 }
 0x308   :  { %v9162_v47 = vunpack.i.h.bf16 %v9160_v28  ;;  %v9161_v34 = vunpack.i.l.bf16 %v9160_v28  ;;  %v9165_v50 = vpop.permute.xlu1 %9164  ;;  %v12659_v28 = vpop.f32.mrf.mxu3 }
 0x309   :  { %v9167_v37 = vunpack.i.h.bf16 %v9165_v50  ;;  %v9166_v32 = vunpack.i.l.bf16 %v9165_v50 }
 0x30a   :  { %v3063_v10 = vsel %vm3002_vm6, %v2998_v49, %v9161_v34  ;;  %v3064_v21 = vsel %vm3002_vm6, %v2999_v43, %v9162_v47  ;;  %v9187_v47 = vunpack.i.h.bf16 %v9185_v52  ;;  %v9186_v34 = vunpack.i.l.bf16 %v9185_v52 }
 0x30b   :  { %v3128_v2 = vsel %vm3067_vm7, %v3063_v10, %v9166_v32  ;;  %v3129_v39 = vsel %vm3067_vm7, %v3064_v21, %v9167_v37 }
 0x30c   :  { %v3193_v35 = vsel %vm3132_vm8, %v3128_v2, %v9171_v20  ;;  %v3194_v5 = vsel %vm3132_vm8, %v3129_v39, %v9172_v27  ;;  %v9200_v39 = vpop.permute.xlu2 %9199 }
 0x30d   :  { %v3227_v51 = vpack.c.bf16 %v3194_v5, %v3193_v35  ;;  %v3538_v35 = vsel %vm2742_vm2, %v11648_v4, 0.0  ;;  %v9201_v55 = vunpack.i.l.bf16 %v9200_v39 }
 0x30e   :  { %v12669_v48 = vpop.f32.mrf.mxu0  ;;  %v3539_v38 = vadd.f32 %v3538_v35, %v3537_v9  ;;  %v3552_v35 = vsel %vm2742_vm2, %v12070_v7, 0.0 }
 0x30f   :  { %v9175_v0 = vpop.permute.xlu0 %9174  ;;  %7765 = vmatmul.msk.bf16.gmra.mxu3 %vm3265_vm9, %v3227_v51 }
 0x310   :  { %v9177_v3 = vunpack.i.h.bf16 %v9175_v0  ;;  %v9176_v61 = vunpack.i.l.bf16 %v9175_v0  ;;  %v9180_v42 = vpop.permute.xlu1 %9179  ;;  %v9202_v0 = vunpack.i.h.bf16 %v9200_v39 }
 0x311   :  { %v9182_v30 = vunpack.i.h.bf16 %v9180_v42  ;;  %v9181_v25 = vunpack.i.l.bf16 %v9180_v42  ;;  %v3542_v42 = vsel %vm2742_vm2, %v11809_v14, 0.0 }
 0x312   :  { %v2805_v16 = vsel %vm2742_vm2, %v2740_v53, %v9176_v61  ;;  %v2806_v18 = vsel %vm2742_vm2, %v2741_v36, %v9177_v3  ;;  %v3541_v53 = vadd.f32 %v3540_v60, %v3539_v38  ;;  %v12679_v36 = vpop.f32.mrf.mxu3  ;;  %v3556_v60 = vsel %vm2742_vm2, %v12132_v24, 0.0 }
 0x313   :  { %v2870_v50 = vsel %vm2807_vm3, %v2805_v16, %v9181_v25  ;;  %v2871_v27 = vsel %vm2807_vm3, %v2806_v18, %v9182_v30  ;;  %15852 = vst [vmem:[#allocation4_spill] sm:$0xff] %v12679_v36  ;;  %v3544_v16 = vsel %vm2742_vm2, %v11873_v6, 0.0  ;;  %v3558_v38 = vsel %vm2742_vm2, %v12195_v26, 0.0 }
 0x314   :  { %v2935_v32 = vsel %vm2872_vm4, %v2870_v50, %v9186_v34  ;;  %v2936_v10 = vsel %vm2872_vm4, %v2871_v27, %v9187_v47  ;;  %v3543_v34 = vadd.f32 %v3542_v42, %v3541_v53  ;;  %v3562_v53 = vsel %vm2742_vm2, %v12280_v45, 0.0 }
 0x315   :  { %vm5165_vm3 = vcmask 785408  }
 0x317   :  { %v9190_v20 = vpop.permute.xlu0 %9189 }
 0x318   :  { %v9192_v49 = vunpack.i.h.bf16 %v9190_v20  ;;  %v9191_v43 = vunpack.i.l.bf16 %v9190_v20  ;;  %v9195_v37 = vpop.permute.xlu1 %9194  ;;  %v3546_v20 = vsel %vm2742_vm2, %v11928_v15, 0.0 }
 0x319   :  { %v9197_v21 = vunpack.i.h.bf16 %v9195_v37  ;;  %v9196_v2 = vunpack.i.l.bf16 %v9195_v37  ;;  %v12689_v37 = vpop.f32.mrf.mxu0 }
 0x31a   :  { %v3000_v5 = vsel %vm2937_vm5, %v2935_v32, %v9191_v43  ;;  %v3001_v51 = vsel %vm2937_vm5, %v2936_v10, %v9192_v49  ;;  %v3545_v43 = vadd.f32 %v3544_v16, %v3543_v34  ;;  %v3548_v32 = vsel %vm2742_vm2, %v11969_v46, 0.0  ;;  %v12696_v39 = vpop.f32.mrf.mxu3 }
 0x31b   :  { %v3065_v3 = vsel %vm3002_vm6, %v3000_v5, %v9196_v2  ;;  %v3066_v61 = vsel %vm3002_vm6, %v3001_v51, %v9197_v21  ;;  %v3550_v21 = vsel %vm2742_vm2, %v12006_v63, 0.0  ;;  %v3554_v51 = vsel %vm2742_vm2, %v12107_v8, 0.0 }
 0x31c   :  { %v3130_v18 = vsel %vm3067_vm7, %v3065_v3, %v9201_v55  ;;  %v3131_v47 = vsel %vm3067_vm7, %v3066_v61, %v9202_v0  ;;  %v3547_v10 = vadd.f32 %v3546_v20, %v3545_v43  ;;  %v3560_v61 = vsel %vm2742_vm2, %v12234_v62, 0.0 }
 0x31d   :  { %vm5182_vm5 = vcmask 916480  }
 0x31e   :  { %v3549_v2 = vadd.f32 %v3548_v32, %v3547_v10  ;;  %v3572_v32 = vsel %vm2742_vm2, %v12464_v58, 0.0 }
 0x31f   :  { %v9205_v52 = vpop.permute.xlu0 %9204 }
 0x320   :  { %v9207_v30 = vunpack.i.h.bf16 %v9205_v52  ;;  %v9206_v25 = vunpack.i.l.bf16 %v9205_v52  ;;  %v3551_v5 = vadd.f32 %v3550_v21, %v3549_v2  ;;  %v3574_v21 = vsel %vm2742_vm2, %v12477_v29, 0.0 }
 0x321   :  { %v12704_v55 = vpop.f32.mrf.mxu0 }
 0x322   :  { %v3195_v50 = vsel %vm3132_vm8, %v3130_v18, %v9206_v25  ;;  %v3196_v27 = vsel %vm3132_vm8, %v3131_v47, %v9207_v30  ;;  %v3553_v9 = vadd.f32 %v3552_v35, %v3551_v5  ;;  %v12710_v52 = vpop.f32.mrf.mxu3  ;;  %v3564_v25 = vsel %vm2742_vm2, %v12301_v13, 0.0 }
 0x323   :  { %v3228_v49 = vpack.c.bf16 %v3196_v27, %v3195_v50  ;;  %v3566_v47 = vsel %vm2742_vm2, %v12345_v23, 0.0  ;;  %v3568_v50 = vsel %vm2742_vm2, %v12402_v31, 0.0  ;;  %v3576_v5 = vsel %vm2742_vm2, %v12496_v41, 0.0 }
 0x324   :  { %v3555_v0 = vadd.f32 %v3554_v51, %v3553_v9  ;;  %v3578_v9 = vsel %vm2742_vm2, %v12532_v19, 0.0 }
 0x325   :  { %7766 = vmatmul.msk.bf16.gmra.mxu3 %vm3265_vm9, %v3228_v49  ;;  %v3570_v49 = vsel %vm2742_vm2, %v12441_v12, 0.0 }
 0x326   :  { %v3557_v3 = vadd.f32 %v3556_v60, %v3555_v0 }
 0x328   :  { %v3559_v42 = vadd.f32 %v3558_v38, %v3557_v3  ;;  %v3580_v38 = vsel %vm2742_vm2, %v12559_v59, 0.0 }
 0x329   :  { %v12716_v18 = vpop.f32.mrf.mxu0 }
 0x32a   :  { %v3561_v30 = vadd.f32 %v3560_v61, %v3559_v42  ;;  %v12722_v20 = vpop.f32.mrf.mxu3  ;;  %v3582_v61 = vsel %vm2742_vm2, %v12574_v44, 0.0 }
 0x32c   :  { %v3563_v16 = vadd.f32 %v3562_v53, %v3561_v30  ;;  %v3584_v30 = vsel %vm2742_vm2, %v12593_v17, 0.0 }
 0x32e   :  { %v3565_v34 = vadd.f32 %v3564_v25, %v3563_v16  ;;  %v3586_v16 = vsel %vm2742_vm2, %v12603_v1, 0.0 }
 0x330   :  { %v3567_v27 = vadd.f32 %v3566_v47, %v3565_v34 }
 0x331   :  { %v12730_v35 = vpop.f32.mrf.mxu0 }
 0x332   :  { %v3569_v43 = vadd.f32 %v3568_v50, %v3567_v27  ;;  %v12736_v0 = vpop.f32.mrf.mxu3  ;;  %v12750_v50 = vpop.f32.mrf.mxu2  ;;  %v3588_v27 = vsel %vm2742_vm2, %v12620_v40, 0.0 }
 0x333   :  { %15853 = vst [vmem:[#allocation29_spill] sm:$0xff] %v12736_v0 }
 0x334   :  { %v3571_v10 = vadd.f32 %v3570_v49, %v3569_v43  ;;  %15855 = vst [vmem:[#allocation39_spill] sm:$0xff] %v12750_v50  ;;  %v3590_v43 = vsel %vm2742_vm2, %v12634_v22, 0.0 }
 0x336   :  { %v3573_v2 = vadd.f32 %v3572_v32, %v3571_v10  ;;  %v3592_v10 = vsel %vm2742_vm2, %v12653_v57, 0.0 }
 0x338   :  { %v3575_v51 = vadd.f32 %v3574_v21, %v3573_v2 }
 0x339   :  { %v12742_v53 = vpop.f32.mrf.mxu0 }
 0x33a   :  { %v3577_v60 = vadd.f32 %v3576_v5, %v3575_v51  ;;  %v12748_v34 = vpop.f32.mrf.mxu3  ;;  %v3594_v5 = vsel %vm2742_vm2, %v12669_v48, 0.0 }
 0x33b   :  { %15854 = vst [vmem:[#allocation17_spill] sm:$0xff] %v12748_v34 }
 0x33c   :  { %v3579_v3 = vadd.f32 %v3578_v9, %v3577_v60  ;;  %v3596_v9 = vsel %vm2742_vm2, %v12689_v37, 0.0 }
 0x33e   :  { %v3581_v42 = vadd.f32 %v3580_v38, %v3579_v3  ;;  %v12766_v3 = vpop.f32.mrf.mxu2 }
 0x33f   :  { %15858 = vst [vmem:[#allocation8_spill] sm:$0xff] %v12766_v3 }
 0x340   :  { %v3583_v25 = vadd.f32 %v3582_v61, %v3581_v42  ;;  %v3598_v61 = vsel %vm2742_vm2, %v12704_v55, 0.0 }
 0x341   :  { %v12758_v2 = vpop.f32.mrf.mxu0 }
 0x342   :  { %v3585_v47 = vadd.f32 %v3584_v30, %v3583_v25  ;;  %15856 = vst [vmem:[#allocation10_spill] sm:$0xff] %v12758_v2  ;;  %v12764_v38 = vpop.f32.mrf.mxu3  ;;  %v3600_v30 = vsel %vm2742_vm2, %v12716_v18, 0.0 }
 0x343   :  { %15857 = vst [vmem:[#allocation25_spill] sm:$0xff] %v12764_v38 }
 0x344   :  { %v3587_v49 = vadd.f32 %v3586_v16, %v3585_v47  ;;  %v3602_v47 = vsel %vm2742_vm2, %v12730_v35, 0.0 }
 0x346   :  { %v3589_v32 = vadd.f32 %v3588_v27, %v3587_v49  ;;  %v3604_v49 = vsel %vm2742_vm2, %v12742_v53, 0.0 }
 0x348   :  { %v3591_v21 = vadd.f32 %v3590_v43, %v3589_v32 }
 0x34a   :  { %v3593_v51 = vadd.f32 %v3592_v10, %v3591_v21  ;;  %v12778_v32 = vpop.f32.mrf.mxu3  ;;  %v12780_v10 = vpop.f32.mrf.mxu2  ;;  %v3606_v21 = vsel %vm2742_vm2, %v12758_v2, 0.0 }
 0x34b   :  { %15859 = vst [vmem:[#allocation38_spill] sm:$0xff] %v12778_v32 }
 0x34c   :  { %v3595_v60 = vadd.f32 %v3594_v5, %v3593_v51  ;;  %15860 = vst [vmem:[#allocation9_spill] sm:$0xff] %v12780_v10 }
 0x34e   :  { %v3597_v42 = vadd.f32 %v3596_v9, %v3595_v60 }
 0x350   :  { %v3599_v25 = vadd.f32 %v3598_v61, %v3597_v42 }
 0x352   :  { %v3601_v27 = vadd.f32 %v3600_v30, %v3599_v25  ;;  %v12790_v25 = vpop.f32.mrf.mxu3 }
 0x353   :  { %15861 = vst [vmem:[#allocation32_spill] sm:$0xff] %v12790_v25 }
 0x354   :  { %v3603_v43 = vadd.f32 %v3602_v47, %v3601_v27  ;;  %v12792_v47 = vpop.f32.mrf.mxu2  ;;  %v3612_v27 = vsel %vm2742_vm2, %v12750_v50, 0.0 }
 0x355   :  { %15862 = vst [vmem:[#allocation20_spill] sm:$0xff] %v12792_v47 }
 0x356   :  { %v3605_v5 = vadd.f32 %v3604_v49, %v3603_v43  ;;  %v3614_v49 = vsel %vm2742_vm2, %v12766_v3, 0.0 }
 0x358   :  { %v3607_v9 = vadd.f32 %v3606_v21, %v3605_v5 }
 0x35a   :  { %v12772_v16 = vpop.f32.mrf.mxu0  ;;  %v12798_v21 = vpop.f32.mrf.mxu3 }
 0x35b   :  { %v3608_v51 = vsel %vm2742_vm2, %v12772_v16, 0.0  ;;  %15863 = vst [vmem:[#allocation30_spill] sm:$0xff] %v12798_v21 }
 0x35c   :  { %v3609_v42 = vadd.f32 %v3608_v51, %v3607_v9  ;;  %v3616_v51 = vsel %vm2742_vm2, %v12780_v10, 0.0  ;;  %v3624_v10 = vsel %vm2742_vm2, %v12628_v33, 0.0 }
 0x362   :  { %v12786_v60 = vpop.f32.mrf.mxu0 }
 0x363   :  { %v3610_v61 = vsel %vm2742_vm2, %v12786_v60, 0.0 }
 0x364   :  { %v3611_v30 = vadd.f32 %v3610_v61, %v3609_v42  ;;  %v3618_v61 = vsel %vm2742_vm2, %v12792_v47, 0.0 }
 0x366   :  { %v3613_v2 = vadd.f32 %v3612_v27, %v3611_v30 }
 0x368   :  { %v3615_v43 = vadd.f32 %v3614_v49, %v3613_v2  ;;  %v12812_v49 = vpop.f32.mrf.mxu3 }
 0x369   :  { %15865 = vst [vmem:[#allocation31_spill] sm:$0xff] %v12812_v49 }
 0x36a   :  { %v3617_v9 = vadd.f32 %v3616_v51, %v3615_v43  ;;  %v3626_v51 = vsel %vm2742_vm2, %v12642_v54, 0.0 }
 0x36c   :  { %v3619_v50 = vadd.f32 %v3618_v61, %v3617_v9  ;;  %v3628_v9 = vsel %vm2742_vm2, %v12659_v28, 0.0  ;;  %v3630_v61 = vsel %vm2742_vm2, %v12679_v36, 0.0 }
 0x370   :  { %v12800_v5 = vpop.f32.mrf.mxu2 }
 0x371   :  { %v3620_v42 = vsel %vm2742_vm2, %v12800_v5, 0.0 }
 0x372   :  { %v3621_v30 = vadd.f32 %v3620_v42, %v3619_v50 }
 0x378   :  { %v12808_v27 = vpop.f32.mrf.mxu2 }
 0x379   :  { %15864 = vst [vmem:[#allocation5_spill] sm:$0xff] %v12808_v27  ;;  %v3622_v2 = vsel %vm2742_vm2, %v12808_v27, 0.0 }
 0x37a   :  { %v3623_v3 = vadd.f32 %v3622_v2, %v3621_v30  ;;  %v3632_v30 = vsel %vm2742_vm2, %v12696_v39, 0.0 }
 0x37c   :  { %v3625_v43 = vadd.f32 %v3624_v10, %v3623_v3  ;;  %v3634_v3 = vsel %vm2742_vm2, %v12710_v52, 0.0 }
 0x37e   :  { %v3627_v47 = vadd.f32 %v3626_v51, %v3625_v43  ;;  %v3636_v43 = vsel %vm2742_vm2, %v12722_v20, 0.0 }
 0x380   :  { %v3629_v50 = vadd.f32 %v3628_v9, %v3627_v47  ;;  %v3638_v47 = vsel %vm2742_vm2, %v12736_v0, 0.0 }
 0x381   :  { %v12822_v27 = vpop.f32.mrf.mxu3 }
 0x382   :  { %v3631_v42 = vadd.f32 %v3630_v61, %v3629_v50  ;;  %15866 = vst [vmem:[#allocation19_spill] sm:$0xff] %v12822_v27  ;;  %v3640_v50 = vsel %vm2742_vm2, %v12748_v34, 0.0 }
 0x384   :  { %v3633_v2 = vadd.f32 %v3632_v30, %v3631_v42  ;;  %v3642_v42 = vsel %vm2742_vm2, %v12764_v38, 0.0 }
 0x386   :  { %v3635_v10 = vadd.f32 %v3634_v3, %v3633_v2  ;;  %v3644_v2 = vsel %vm2742_vm2, %v12778_v32, 0.0 }
 0x388   :  { %v3637_v51 = vadd.f32 %v3636_v43, %v3635_v10  ;;  %v3646_v10 = vsel %vm2742_vm2, %v12790_v25, 0.0 }
 0x389   :  { %v12834_v36 = vpop.f32.mrf.mxu3 }
 0x38a   :  { %v3639_v9 = vadd.f32 %v3638_v47, %v3637_v51  ;;  %15867 = vst [vmem:[#allocation41_spill] sm:$0xff] %v12834_v36  ;;  %v3648_v51 = vsel %vm2742_vm2, %v12798_v21, 0.0 }
 0x38c   :  { %v3641_v61 = vadd.f32 %v3640_v50, %v3639_v9  ;;  %v3650_v9 = vsel %vm2742_vm2, %v12812_v49, 0.0 }
 0x38e   :  { %v3643_v30 = vadd.f32 %v3642_v42, %v3641_v61  ;;  %v3652_v61 = vsel %vm2742_vm2, %v12822_v27, 0.0 }
 0x390   :  { %v3645_v3 = vadd.f32 %v3644_v2, %v3643_v30  ;;  %v3654_v30 = vsel %vm2742_vm2, %v12834_v36, 0.0 }
 0x392   :  { %v3647_v43 = vadd.f32 %v3646_v10, %v3645_v3  ;;  %v3525_v0 = vpop.f32.mrf.mxu3 }
 0x393   :  { %v3656_v3 = vsel %vm2742_vm2, %v3525_v0, 0.0 }
 0x394   :  { %v3649_v47 = vadd.f32 %v3648_v51, %v3647_v43 }
 0x396   :  { %v3651_v50 = vadd.f32 %v3650_v9, %v3649_v47 }
 0x398   :  { %v3653_v42 = vadd.f32 %v3652_v61, %v3651_v50 }
 0x39a   :  { %v3527_v34 = vpop.f32.mrf.mxu3  ;;  %v3655_v2 = vadd.f32 %v3654_v30, %v3653_v42 }
 0x39b   :  { %v3658_v21 = vsel %vm2742_vm2, %v3527_v34, 0.0 }
 0x39c   :  { %v3657_v10 = vadd.f32 %v3656_v3, %v3655_v2 }
 0x39e   :  { %v3659_v51 = vadd.f32 %v3658_v21, %v3657_v10 }
 0x3a8   :  { %v3530_v25 = vpop.f32.mrf.mxu3 }
 0x3a9   :  { %v3660_v43 = vsel %vm2742_vm2, %v3530_v25, 0.0 }
 0x3aa   :  { %v3661_v49 = vadd.f32 %v3660_v43, %v3659_v51 }
 0x3b0   :  { %v12853_v47 = vpop.f32.mrf.mxu3 }
 0x3b1   :  { %v3662_v9 = vsel %vm2742_vm2, %v12853_v47, 0.0 }
 0x3b2   :  { %v3663_v50 = vadd.f32 %v3662_v9, %v3661_v49 }
 0x3b4   :  { %v3664_v61 = vrot.slane %v3663_v50, 4 }
 0x3b6   :  { %v3665_v27 = vadd.f32 %v3664_v61, %v3663_v50 }
 0x3b8   :  { %v3666_v36 = vrot.slane %v3665_v27, 2 }
 0x3ba   :  { %v3667_v42 = vadd.f32 %v3666_v36, %v3665_v27 }
 0x3bc   :  { %v3668_v30 = vrot.slane %v3667_v42, 1 }
 0x3be   :  { %v3669_v32 = vadd.f32 %v3668_v30, %v3667_v42 }
 0x3c0   :  { %v12857_v38 = vmul.f32 0.001953125, %v3669_v32 }
 0x3c2   :  { %v12860_v2 = vsub.f32 %v3525_v0, %v12857_v38  ;;  %v12863_v21 = vsub.f32 %v3527_v34, %v12857_v38  ;;  %v12866_v3 = vsub.f32 %v3530_v25, %v12857_v38  ;;  %v12870_v49 = vsub.f32 %v11585_v11, %v12857_v38 }
 0x3c3   :  { %v12874_v36 = vsub.f32 %v11648_v4, %v12857_v38  ;;  %v12878_v32 = vsub.f32 %v11774_v56, %v12857_v38  ;;  %v12882_v0 = vsub.f32 %v11809_v14, %v12857_v38  ;;  %v12890_v11 = vsub.f32 %v11873_v6, %v12857_v38 }
 0x3c4   :  { %15868 = vst [vmem:[#allocation13_spill] sm:$0xff] %v12860_v2  ;;  %v3735_v34 = vmul.f32 %v12870_v49, %v12870_v49  ;;  %v12896_v56 = vsub.f32 %v11928_v15, %v12857_v38  ;;  %v12904_v51 = vsub.f32 %v11969_v46, %v12857_v38  ;;  %v12911_v15 = vsub.f32 %v12006_v63, %v12857_v38 }
 0x3c5   :  { %15869 = vst [vmem:[#allocation26_spill] sm:$0xff] %v12863_v21  ;;  %v3736_v25 = vmul.f32 %v12874_v36, %v12874_v36  ;;  %v3737_v4 = vmul.f32 %v12878_v32, %v12878_v32  ;;  %v3738_v14 = vmul.f32 %v12882_v0, %v12882_v0  ;;  %v3739_v6 = vmul.f32 %v12890_v11, %v12890_v11 }
 0x3c6   :  { %15870 = vst [vmem:[#allocation11_spill] sm:$0xff] %v12866_v3  ;;  %v3799_v27 = vsel %vm2742_vm2, %v3735_v34, 0.0  ;;  %v3740_v61 = vmul.f32 %v12896_v56, %v12896_v56  ;;  %v12918_v46 = vsub.f32 %v12070_v7, %v12857_v38  ;;  %v3741_v34 = vmul.f32 %v12904_v51, %v12904_v51 }
 0x3c7   :  { %v3800_v10 = vsel %vm2742_vm2, %v3736_v25, 0.0  ;;  %v3802_v9 = vsel %vm2742_vm2, %v3737_v4, 0.0  ;;  %v3804_v42 = vsel %vm2742_vm2, %v3738_v14, 0.0  ;;  %v3806_v25 = vsel %vm2742_vm2, %v3739_v6, 0.0 }
 0x3c8   :  { %v3801_v43 = vadd.f32 %v3800_v10, %v3799_v27  ;;  %v12925_v63 = vsub.f32 %v12107_v8, %v12857_v38  ;;  %v3742_v27 = vmul.f32 %v12911_v15, %v12911_v15  ;;  %v3808_v14 = vsel %vm2742_vm2, %v3740_v61, 0.0 }
 0x3c9   :  { %v12932_v7 = vsub.f32 %v12132_v24, %v12857_v38  ;;  %v3810_v6 = vsel %vm2742_vm2, %v3741_v34, 0.0  ;;  %v12939_v8 = vsub.f32 %v12195_v26, %v12857_v38  ;;  %v12946_v24 = vsub.f32 %v12234_v62, %v12857_v38 }
 0x3ca   :  { %v3803_v50 = vadd.f32 %v3802_v9, %v3801_v43  ;;  %v3743_v43 = vmul.f32 %v12918_v46, %v12918_v46  ;;  %v3812_v61 = vsel %vm2742_vm2, %v3742_v27, 0.0  ;;  %v12953_v26 = vsub.f32 %v12280_v45, %v12857_v38 }
 0x3cb   :  { %v12960_v62 = vsub.f32 %v12301_v13, %v12857_v38  ;;  %v12967_v45 = vsub.f32 %v12345_v23, %v12857_v38  ;;  %v12974_v13 = vsub.f32 %v12402_v31, %v12857_v38  ;;  %v12981_v23 = vsub.f32 %v12441_v12, %v12857_v38 }
 0x3cc   :  { %v3805_v30 = vadd.f32 %v3804_v42, %v3803_v50  ;;  %v3744_v50 = vmul.f32 %v12925_v63, %v12925_v63  ;;  %v3814_v34 = vsel %vm2742_vm2, %v3743_v43, 0.0  ;;  %v12988_v31 = vsub.f32 %v12464_v58, %v12857_v38 }
 0x3cd   :  { %v12995_v12 = vsub.f32 %v12477_v29, %v12857_v38  ;;  %v13002_v58 = vsub.f32 %v12496_v41, %v12857_v38  ;;  %v13009_v29 = vsub.f32 %v12532_v19, %v12857_v38  ;;  %v13016_v41 = vsub.f32 %v12559_v59, %v12857_v38 }
 0x3ce   :  { %v3807_v4 = vadd.f32 %v3806_v25, %v3805_v30  ;;  %v3745_v30 = vmul.f32 %v12932_v7, %v12932_v7  ;;  %v3816_v27 = vsel %vm2742_vm2, %v3744_v50, 0.0  ;;  %v13023_v19 = vsub.f32 %v12574_v44, %v12857_v38 }
 0x3cf   :  { %v13030_v59 = vsub.f32 %v12593_v17, %v12857_v38  ;;  %v13037_v44 = vsub.f32 %v12603_v1, %v12857_v38  ;;  %v13044_v17 = vsub.f32 %v12620_v40, %v12857_v38  ;;  %v13051_v1 = vsub.f32 %v12634_v22, %v12857_v38 }
 0x3d0   :  { %v3809_v10 = vadd.f32 %v3808_v14, %v3807_v4  ;;  %v3746_v4 = vmul.f32 %v12939_v8, %v12939_v8  ;;  %v3818_v43 = vsel %vm2742_vm2, %v3745_v30, 0.0  ;;  %v13058_v40 = vsub.f32 %v12653_v57, %v12857_v38 }
 0x3d1   :  { %v13065_v22 = vsub.f32 %v12669_v48, %v12857_v38  ;;  %v13072_v57 = vsub.f32 %v12689_v37, %v12857_v38  ;;  %v13079_v48 = vsub.f32 %v12704_v55, %v12857_v38  ;;  %v13086_v37 = vsub.f32 %v12716_v18, %v12857_v38 }
 0x3d2   :  { %v3811_v9 = vadd.f32 %v3810_v6, %v3809_v10  ;;  %v3747_v10 = vmul.f32 %v12946_v24, %v12946_v24  ;;  %v3820_v50 = vsel %vm2742_vm2, %v3746_v4, 0.0  ;;  %v13093_v55 = vsub.f32 %v12730_v35, %v12857_v38 }
 0x3d3   :  { %v13100_v18 = vsub.f32 %v12742_v53, %v12857_v38  ;;  %v13114_v53 = vsub.f32 %v12772_v16, %v12857_v38 }
 0x3d4   :  { %v3813_v42 = vadd.f32 %v3812_v61, %v3811_v9  ;;  %v3748_v9 = vmul.f32 %v12953_v26, %v12953_v26  ;;  %v3822_v30 = vsel %vm2742_vm2, %v3747_v10, 0.0 }
 0x3d5   :  { %15872 = vst [vmem:[#allocation40_spill] sm:$0xff] %v13114_v53 }
 0x3d6   :  { %v3815_v25 = vadd.f32 %v3814_v34, %v3813_v42  ;;  %v3749_v42 = vmul.f32 %v12960_v62, %v12960_v62  ;;  %v3824_v4 = vsel %vm2742_vm2, %v3748_v9, 0.0 }
 0x3d8   :  { %v3817_v14 = vadd.f32 %v3816_v27, %v3815_v25  ;;  %v3750_v25 = vmul.f32 %v12967_v45, %v12967_v45  ;;  %v3826_v10 = vsel %vm2742_vm2, %v3749_v42, 0.0 }
 0x3da   :  { %v3819_v6 = vadd.f32 %v3818_v43, %v3817_v14  ;;  %v3751_v14 = vmul.f32 %v12974_v13, %v12974_v13  ;;  %v3828_v9 = vsel %vm2742_vm2, %v3750_v25, 0.0 }
 0x3dc   :  { %v3821_v61 = vadd.f32 %v3820_v50, %v3819_v6  ;;  %v3752_v6 = vmul.f32 %v12981_v23, %v12981_v23  ;;  %v3830_v42 = vsel %vm2742_vm2, %v3751_v14, 0.0 }
 0x3de   :  { %v3823_v34 = vadd.f32 %v3822_v30, %v3821_v61  ;;  %v3753_v61 = vmul.f32 %v12988_v31, %v12988_v31  ;;  %v3832_v25 = vsel %vm2742_vm2, %v3752_v6, 0.0 }
 0x3e0   :  { %v3825_v27 = vadd.f32 %v3824_v4, %v3823_v34  ;;  %v3754_v34 = vmul.f32 %v12995_v12, %v12995_v12  ;;  %v3834_v14 = vsel %vm2742_vm2, %v3753_v61, 0.0 }
 0x3e2   :  { %v3827_v43 = vadd.f32 %v3826_v10, %v3825_v27  ;;  %v3755_v27 = vmul.f32 %v13002_v58, %v13002_v58  ;;  %v3836_v6 = vsel %vm2742_vm2, %v3754_v34, 0.0 }
 0x3e4   :  { %v3829_v50 = vadd.f32 %v3828_v9, %v3827_v43  ;;  %v3756_v43 = vmul.f32 %v13009_v29, %v13009_v29  ;;  %v3838_v61 = vsel %vm2742_vm2, %v3755_v27, 0.0 }
 0x3e6   :  { %v3831_v30 = vadd.f32 %v3830_v42, %v3829_v50  ;;  %v3757_v50 = vmul.f32 %v13016_v41, %v13016_v41  ;;  %v3840_v34 = vsel %vm2742_vm2, %v3756_v43, 0.0 }
 0x3e8   :  { %v3833_v4 = vadd.f32 %v3832_v25, %v3831_v30  ;;  %v3758_v30 = vmul.f32 %v13023_v19, %v13023_v19  ;;  %v3842_v27 = vsel %vm2742_vm2, %v3757_v50, 0.0 }
 0x3ea   :  { %v3835_v10 = vadd.f32 %v3834_v14, %v3833_v4  ;;  %v3759_v4 = vmul.f32 %v13030_v59, %v13030_v59  ;;  %v3844_v43 = vsel %vm2742_vm2, %v3758_v30, 0.0 }
 0x3ec   :  { %v3837_v9 = vadd.f32 %v3836_v6, %v3835_v10  ;;  %v3760_v10 = vmul.f32 %v13037_v44, %v13037_v44  ;;  %v3846_v50 = vsel %vm2742_vm2, %v3759_v4, 0.0 }
 0x3ee   :  { %v3839_v42 = vadd.f32 %v3838_v61, %v3837_v9  ;;  %v3761_v9 = vmul.f32 %v13044_v17, %v13044_v17  ;;  %v3848_v30 = vsel %vm2742_vm2, %v3760_v10, 0.0 }
 0x3f0   :  { %v3841_v25 = vadd.f32 %v3840_v34, %v3839_v42  ;;  %v3762_v42 = vmul.f32 %v13051_v1, %v13051_v1  ;;  %v3850_v4 = vsel %vm2742_vm2, %v3761_v9, 0.0 }
 0x3f2   :  { %v3843_v14 = vadd.f32 %v3842_v27, %v3841_v25  ;;  %v3763_v25 = vmul.f32 %v13058_v40, %v13058_v40  ;;  %v3852_v10 = vsel %vm2742_vm2, %v3762_v42, 0.0 }
 0x3f4   :  { %v3845_v6 = vadd.f32 %v3844_v43, %v3843_v14  ;;  %v3764_v14 = vmul.f32 %v13065_v22, %v13065_v22  ;;  %v3854_v9 = vsel %vm2742_vm2, %v3763_v25, 0.0 }
 0x3f6   :  { %v3847_v61 = vadd.f32 %v3846_v50, %v3845_v6  ;;  %v3765_v6 = vmul.f32 %v13072_v57, %v13072_v57  ;;  %v3856_v42 = vsel %vm2742_vm2, %v3764_v14, 0.0 }
 0x3f8   :  { %v3849_v34 = vadd.f32 %v3848_v30, %v3847_v61  ;;  %v3766_v61 = vmul.f32 %v13079_v48, %v13079_v48  ;;  %v3858_v25 = vsel %vm2742_vm2, %v3765_v6, 0.0 }
 0x3fa   :  { %v3851_v27 = vadd.f32 %v3850_v4, %v3849_v34  ;;  %v3767_v34 = vmul.f32 %v13086_v37, %v13086_v37  ;;  %v3860_v14 = vsel %vm2742_vm2, %v3766_v61, 0.0 }
 0x3fc   :  { %v3853_v43 = vadd.f32 %v3852_v10, %v3851_v27  ;;  %v15871_v27 = vld [vmem:[#allocation10_spill] sm:$0xff]  ;;  %v3768_v10 = vmul.f32 %v13093_v55, %v13093_v55  ;;  %v3862_v6 = vsel %vm2742_vm2, %v3767_v34, 0.0 }
 0x3fd   :  { %v13107_v35 = vsub.f32 %v15871_v27, %v12857_v38  ;;  %v3771_v27 = vmul.f32 %v13114_v53, %v13114_v53 }
 0x3fe   :  { %v3855_v50 = vadd.f32 %v3854_v9, %v3853_v43  ;;  %v3769_v9 = vmul.f32 %v13100_v18, %v13100_v18  ;;  %v3864_v61 = vsel %vm2742_vm2, %v3768_v10, 0.0 }
 0x400   :  { %v3857_v30 = vadd.f32 %v3856_v42, %v3855_v50  ;;  %v13121_v42 = vsub.f32 %v12786_v60, %v12857_v38  ;;  %v3866_v34 = vsel %vm2742_vm2, %v3769_v9, 0.0  ;;  %v3870_v9 = vsel %vm2742_vm2, %v3771_v27, 0.0 }
 0x402   :  { %v3859_v4 = vadd.f32 %v3858_v25, %v3857_v30  ;;  %15873 = vst [vmem:[#allocation12_spill] sm:$0xff] %v13121_v42  ;;  %v3770_v30 = vmul.f32 %v13107_v35, %v13107_v35 }
 0x404   :  { %v3861_v43 = vadd.f32 %v3860_v14, %v3859_v4  ;;  %v15874_v4 = vld [vmem:[#allocation39_spill] sm:$0xff]  ;;  %v3868_v10 = vsel %vm2742_vm2, %v3770_v30, 0.0 }
 0x405   :  { %v13128_v16 = vsub.f32 %v15874_v4, %v12857_v38 }
 0x406   :  { %v3863_v50 = vadd.f32 %v3862_v6, %v3861_v43  ;;  %v15875_v43 = vld [vmem:[#allocation8_spill] sm:$0xff]  ;;  %v3772_v6 = vmul.f32 %v13121_v42, %v13121_v42 }
 0x407   :  { %v13135_v60 = vsub.f32 %v15875_v43, %v12857_v38  ;;  %v3773_v53 = vmul.f32 %v13128_v16, %v13128_v16 }
 0x408   :  { %v3865_v25 = vadd.f32 %v3864_v61, %v3863_v50  ;;  %v15877_v61 = vld [vmem:[#allocation9_spill] sm:$0xff]  ;;  %v3872_v30 = vsel %vm2742_vm2, %v3772_v6, 0.0 }
 0x409   :  { %15876 = vst [vmem:[#allocation35_spill] sm:$0xff] %v13135_v60  ;;  %v13142_v4 = vsub.f32 %v15877_v61, %v12857_v38  ;;  %v3774_v42 = vmul.f32 %v13135_v60, %v13135_v60  ;;  %v3874_v27 = vsel %vm2742_vm2, %v3773_v53, 0.0 }
 0x40a   :  { %v3867_v14 = vadd.f32 %v3866_v34, %v3865_v25  ;;  %v15878_v34 = vld [vmem:[#allocation20_spill] sm:$0xff] }
 0x40b   :  { %v13149_v43 = vsub.f32 %v15878_v34, %v12857_v38  ;;  %v3775_v61 = vmul.f32 %v13142_v4, %v13142_v4  ;;  %v3876_v6 = vsel %vm2742_vm2, %v3774_v42, 0.0 }
 0x40c   :  { %v3869_v50 = vadd.f32 %v3868_v10, %v3867_v14  ;;  %v13156_v10 = vsub.f32 %v12800_v5, %v12857_v38  ;;  %v13170_v5 = vsub.f32 %v12628_v33, %v12857_v38  ;;  %v13184_v33 = vsub.f32 %v12659_v28, %v12857_v38 }
 0x40d   :  { %v3776_v60 = vmul.f32 %v13149_v43, %v13149_v43  ;;  %v3878_v53 = vsel %vm2742_vm2, %v3775_v61, 0.0  ;;  %v13198_v28 = vsub.f32 %v12696_v39, %v12857_v38  ;;  %v13212_v39 = vsub.f32 %v12722_v20, %v12857_v38 }
 0x40e   :  { %v3871_v25 = vadd.f32 %v3870_v9, %v3869_v50  ;;  %v15879_v9 = vld [vmem:[#allocation5_spill] sm:$0xff]  ;;  %15881 = vst [vmem:[#allocation37_spill] sm:$0xff] %v13184_v33 }
 0x40f   :  { %v13163_v34 = vsub.f32 %v15879_v9, %v12857_v38  ;;  %v3880_v42 = vsel %vm2742_vm2, %v3776_v60, 0.0  ;;  %15884 = vst [vmem:[#allocation33_spill] sm:$0xff] %v13198_v28 }
 0x410   :  { %v3873_v14 = vadd.f32 %v3872_v30, %v3871_v25  ;;  %v3777_v30 = vmul.f32 %v13156_v10, %v13156_v10  ;;  %15886 = vst [vmem:[#allocation34_spill] sm:$0xff] %v13212_v39 }
 0x411   :  { %15880 = vst [vmem:[#allocation15_spill] sm:$0xff] %v13163_v34  ;;  %v3778_v9 = vmul.f32 %v13163_v34, %v13163_v34 }
 0x412   :  { %v3875_v50 = vadd.f32 %v3874_v27, %v3873_v14  ;;  %v13177_v27 = vsub.f32 %v12642_v54, %v12857_v38  ;;  %v3882_v61 = vsel %vm2742_vm2, %v3777_v30, 0.0 }
 0x413   :  { %v3884_v60 = vsel %vm2742_vm2, %v3778_v9, 0.0 }
 0x414   :  { %v3877_v25 = vadd.f32 %v3876_v6, %v3875_v50  ;;  %v3779_v6 = vmul.f32 %v13170_v5, %v13170_v5  ;;  %v3780_v34 = vmul.f32 %v13177_v27, %v13177_v27 }
 0x416   :  { %v3879_v14 = vadd.f32 %v3878_v53, %v3877_v25  ;;  %v15882_v53 = vld [vmem:[#allocation4_spill] sm:$0xff]  ;;  %v3886_v30 = vsel %vm2742_vm2, %v3779_v6, 0.0  ;;  %v3888_v9 = vsel %vm2742_vm2, %v3780_v34, 0.0 }
 0x417   :  { %v13191_v54 = vsub.f32 %v15882_v53, %v12857_v38 }
 0x418   :  { %v3881_v50 = vadd.f32 %v3880_v42, %v3879_v14  ;;  %v3781_v42 = vmul.f32 %v13184_v33, %v13184_v33 }
 0x419   :  { %15883 = vst [vmem:[#allocation22_spill] sm:$0xff] %v13191_v54  ;;  %v3782_v53 = vmul.f32 %v13191_v54, %v13191_v54 }
 0x41a   :  { %v3883_v25 = vadd.f32 %v3882_v61, %v3881_v50  ;;  %v13205_v61 = vsub.f32 %v12710_v52, %v12857_v38  ;;  %v3890_v6 = vsel %vm2742_vm2, %v3781_v42, 0.0 }
 0x41b   :  { %v3892_v34 = vsel %vm2742_vm2, %v3782_v53, 0.0 }
 0x41c   :  { %v3885_v14 = vadd.f32 %v3884_v60, %v3883_v25  ;;  %15885 = vst [vmem:[#allocation6_spill] sm:$0xff] %v13205_v61  ;;  %v3783_v60 = vmul.f32 %v13198_v28, %v13198_v28  ;;  %v3784_v54 = vmul.f32 %v13205_v61, %v13205_v61  ;;  %v3785_v28 = vmul.f32 %v13212_v39, %v13212_v39 }
 0x41e   :  { %v3887_v50 = vadd.f32 %v3886_v30, %v3885_v14  ;;  %v15887_v30 = vld [vmem:[#allocation29_spill] sm:$0xff]  ;;  %v3894_v42 = vsel %vm2742_vm2, %v3783_v60, 0.0  ;;  %v3896_v53 = vsel %vm2742_vm2, %v3784_v54, 0.0  ;;  %v3898_v60 = vsel %vm2742_vm2, %v3785_v28, 0.0 }
 0x41f   :  { %v13219_v52 = vsub.f32 %v15887_v30, %v12857_v38 }
 0x420   :  { %v3889_v25 = vadd.f32 %v3888_v9, %v3887_v50  ;;  %v15889_v9 = vld [vmem:[#allocation17_spill] sm:$0xff] }
 0x421   :  { %15888 = vst [vmem:[#allocation7_spill] sm:$0xff] %v13219_v52  ;;  %v13226_v20 = vsub.f32 %v15889_v9, %v12857_v38  ;;  %v3786_v61 = vmul.f32 %v13219_v52, %v13219_v52 }
 0x422   :  { %v3891_v14 = vadd.f32 %v3890_v6, %v3889_v25  ;;  %v15891_v6 = vld [vmem:[#allocation25_spill] sm:$0xff] }
 0x423   :  { %15890 = vst [vmem:[#allocation36_spill] sm:$0xff] %v13226_v20  ;;  %v13233_v30 = vsub.f32 %v15891_v6, %v12857_v38  ;;  %v3787_v39 = vmul.f32 %v13226_v20, %v13226_v20  ;;  %v3900_v54 = vsel %vm2742_vm2, %v3786_v61, 0.0 }
 0x424   :  { %v3893_v50 = vadd.f32 %v3892_v34, %v3891_v14  ;;  %v15893_v34 = vld [vmem:[#allocation38_spill] sm:$0xff] }
 0x425   :  { %15892 = vst [vmem:[#allocation21_spill] sm:$0xff] %v13233_v30  ;;  %v13240_v9 = vsub.f32 %v15893_v34, %v12857_v38  ;;  %v3788_v52 = vmul.f32 %v13233_v30, %v13233_v30  ;;  %v3902_v28 = vsel %vm2742_vm2, %v3787_v39, 0.0 }
 0x426   :  { %v3895_v25 = vadd.f32 %v3894_v42, %v3893_v50  ;;  %v15895_v42 = vld [vmem:[#allocation32_spill] sm:$0xff] }
 0x427   :  { %15894 = vst [vmem:[#allocation42_spill] sm:$0xff] %v13240_v9  ;;  %v13247_v6 = vsub.f32 %v15895_v42, %v12857_v38  ;;  %v3789_v20 = vmul.f32 %v13240_v9, %v13240_v9  ;;  %v3904_v61 = vsel %vm2742_vm2, %v3788_v52, 0.0 }
 0x428   :  { %v3897_v14 = vadd.f32 %v3896_v53, %v3895_v25  ;;  %v15897_v53 = vld [vmem:[#allocation30_spill] sm:$0xff] }
 0x429   :  { %15896 = vst [vmem:[#allocation16_spill] sm:$0xff] %v13247_v6  ;;  %v13254_v34 = vsub.f32 %v15897_v53, %v12857_v38  ;;  %v3790_v30 = vmul.f32 %v13247_v6, %v13247_v6  ;;  %v3906_v39 = vsel %vm2742_vm2, %v3789_v20, 0.0 }
 0x42a   :  { %v3899_v50 = vadd.f32 %v3898_v60, %v3897_v14  ;;  %v15899_v60 = vld [vmem:[#allocation31_spill] sm:$0xff] }
 0x42b   :  { %15898 = vst [vmem:[#allocation27_spill] sm:$0xff] %v13254_v34  ;;  %v13261_v42 = vsub.f32 %v15899_v60, %v12857_v38  ;;  %v3791_v9 = vmul.f32 %v13254_v34, %v13254_v34  ;;  %v3908_v52 = vsel %vm2742_vm2, %v3790_v30, 0.0  ;;  %v3734_v30 = vsub.f32 %v12853_v47, %v12857_v38 }
 0x42c   :  { %v3901_v25 = vadd.f32 %v3900_v54, %v3899_v50  ;;  %v15901_v54 = vld [vmem:[#allocation19_spill] sm:$0xff] }
 0x42d   :  { %15900 = vst [vmem:[#allocation18_spill] sm:$0xff] %v13261_v42  ;;  %v13268_v53 = vsub.f32 %v15901_v54, %v12857_v38  ;;  %v3792_v6 = vmul.f32 %v13261_v42, %v13261_v42  ;;  %v3910_v54 = vsel %vm2742_vm2, %v3791_v9, 0.0 }
 0x42e   :  { %v3903_v14 = vadd.f32 %v3902_v28, %v3901_v25  ;;  %v15903_v28 = vld [vmem:[#allocation41_spill] sm:$0xff] }
 0x42f   :  { %15902 = vst [vmem:[#allocation28_spill] sm:$0xff] %v13268_v53  ;;  %v13275_v60 = vsub.f32 %v15903_v28, %v12857_v38  ;;  %v3795_v28 = vmul.f32 %v12860_v2, %v12860_v2 }
 0x430   :  { %v3905_v50 = vadd.f32 %v3904_v61, %v3903_v14  ;;  %v3793_v61 = vmul.f32 %v13268_v53, %v13268_v53 }
 0x431   :  { %15904 = vst [vmem:[#allocation14_spill] sm:$0xff] %v13275_v60  ;;  %v3794_v20 = vmul.f32 %v13275_v60, %v13275_v60 }
 0x432   :  { %v3907_v25 = vadd.f32 %v3906_v39, %v3905_v50  ;;  %v3912_v50 = vsel %vm2742_vm2, %v3792_v6, 0.0  ;;  %v3914_v42 = vsel %vm2742_vm2, %v3793_v61, 0.0 }
 0x433   :  { %v3916_v9 = vsel %vm2742_vm2, %v3794_v20, 0.0 }
 0x434   :  { %v3909_v14 = vadd.f32 %v3908_v52, %v3907_v25  ;;  %v3796_v25 = vmul.f32 %v12863_v21, %v12863_v21 }
 0x436   :  { %v3911_v33 = vadd.f32 %v3910_v54, %v3909_v14  ;;  %v3797_v14 = vmul.f32 %v12866_v3, %v12866_v3  ;;  %v3798_v54 = vmul.f32 %v3734_v30, %v3734_v30 }
 0x438   :  { %v3913_v39 = vadd.f32 %v3912_v50, %v3911_v33  ;;  %v3918_v33 = vsel %vm2742_vm2, %v3795_v28, 0.0  ;;  %v3920_v50 = vsel %vm2742_vm2, %v3796_v25, 0.0  ;;  %v3924_v38 = vsel %vm2742_vm2, %v3798_v54, 0.0  ;;  %v7895_v28 = vld [vmem:[%s15679_s2 + $0x40] sm:$0xff] }
 0x439   :  { %5367 = vmatpush.bf16.msrb.mxu2 %v7895_v28 }
 0x43a   :  { %v3915_v34 = vadd.f32 %v3914_v42, %v3913_v39  ;;  %v3922_v42 = vsel %vm2742_vm2, %v3797_v14, 0.0 }
 0x43c   :  { %v3917_v52 = vadd.f32 %v3916_v9, %v3915_v34 }
 0x43e   :  { %v3919_v6 = vadd.f32 %v3918_v33, %v3917_v52 }
 0x440   :  { %v3921_v61 = vadd.f32 %v3920_v50, %v3919_v6 }
 0x442   :  { %v3923_v39 = vadd.f32 %v3922_v42, %v3921_v61 }
 0x444   :  { %v3925_v47 = vadd.f32 %v3924_v38, %v3923_v39 }
 0x446   :  { %v3926_v21 = vrot.slane %v3925_v47, 4 }
 0x448   :  { %v3927_v2 = vadd.f32 %v3926_v21, %v3925_v47 }
 0x44a   :  { %v3928_v20 = vrot.slane %v3927_v2, 2 }
 0x44c   :  { %v3929_v34 = vadd.f32 %v3928_v20, %v3927_v2  ;;  %v13306_v2 = vld [vmem:[%s15677_s7] ss:$0 sm:$0xff]  ;;  %s9801_s7 = smov 80  }
 0x44d   :  { %v15906_v20 = vld [vmem:[#allocation40_spill] sm:$0xff] }
 0x44e   :  { %v3930_v9 = vrot.slane %v3929_v34, 1 }
 0x450   :  { %v3931_v60 = vadd.f32 %v3930_v9, %v3929_v34  ;;  %v15907_v34 = vld [vmem:[#allocation12_spill] sm:$0xff]  ;;  %v15908_v9 = vld [vmem:[#allocation35_spill] sm:$0xff] }
 0x452   :  { %v3932_v3 = vmul.f32 0.001953125, %v3931_v60 }
 0x454   :  { %v3933_v53 = vadd.f32 1e-05, %v3932_v3  ;;  %v13313_v3 = vld [vmem:[%s15678_s8] ss:$0 sm:$0xff]  ;;  %s9802_s8 = smov 96  }
 0x455   :  { %15905 = vst [vmem:[#allocation24_spill] sm:$0xff] %v13313_v3 }
 0x456   :  { %9776 = vrsqrt.f32 %v3933_v53  ;;  %vm3940_vm11 = vweird.f32 %v3933_v53 }
 0x45c   :  { %v9777_v25 = vpop.eup %9776 }
 0x45d   :  { %v3935_v52 = vmul.f32 %v9777_v25, %v3933_v53  ;;  %vm3941_vm10 = vweird.f32 %v9777_v25 }
 0x45e   :  { %vm3942_vm12 = vmor %vm3940_vm11, %vm3941_vm10  ;;  %vm7095_vm11 = vcmask 1041409  }
 0x45f   :  { %v3936_v14 = vmul.f32 %v9777_v25, %v3935_v52  ;;  %v15909_v52 = vld [vmem:[#allocation15_spill] sm:$0xff] }
 0x461   :  { %v3937_v33 = vmul.f32 0.5, %v3936_v14 }
 0x463   :  { %v3938_v6 = vsub.f32 1.5, %v3937_v33  ;;  %v15910_v33 = vld [vmem:[#allocation37_spill] sm:$0xff] }
 0x465   :  { %v3939_v54 = vmul.f32 %v9777_v25, %v3938_v6  ;;  %v15911_v6 = vld [vmem:[#allocation22_spill] sm:$0xff] }
 0x467   :  { %v13308_v21 = vsel %vm3942_vm12, %v9777_v25, %v3939_v54  ;;  %v15912_v54 = vld [vmem:[#allocation33_spill] sm:$0xff] }
 0x468   :  { %v4007_v60 = vmul.f32 %v13308_v21, %v3734_v30  ;;  %v13318_v50 = vmul.f32 %v13308_v21, %v12870_v49  ;;  %v13322_v53 = vmul.f32 %v13308_v21, %v12874_v36  ;;  %v13326_v61 = vmul.f32 %v13308_v21, %v12878_v32 }
 0x469   :  { %v13330_v42 = vmul.f32 %v13308_v21, %v12882_v0  ;;  %v13334_v39 = vmul.f32 %v13308_v21, %v12890_v11  ;;  %v13338_v49 = vmul.f32 %v13308_v21, %v12896_v56  ;;  %v13342_v36 = vmul.f32 %v13308_v21, %v12904_v51 }
 0x46a   :  { %v4074_v30 = vmul.f32 %v13306_v2, %v4007_v60  ;;  %v13347_v32 = vmul.f32 %v13308_v21, %v12911_v15  ;;  %v13351_v0 = vmul.f32 %v13308_v21, %v12918_v46  ;;  %v13355_v11 = vmul.f32 %v13308_v21, %v12925_v63 }
 0x46b   :  { %v13359_v56 = vmul.f32 %v13308_v21, %v12932_v7  ;;  %v13363_v51 = vmul.f32 %v13308_v21, %v12939_v8  ;;  %v13367_v15 = vmul.f32 %v13308_v21, %v12946_v24  ;;  %v13371_v46 = vmul.f32 %v13308_v21, %v12953_v26 }
 0x46c   :  { %v4141_v38 = vadd.f32 %v13313_v3, %v4074_v30  ;;  %v13376_v63 = vmul.f32 %v13308_v21, %v12960_v62  ;;  %v13380_v7 = vmul.f32 %v13308_v21, %v12967_v45  ;;  %v13384_v8 = vmul.f32 %v13308_v21, %v12974_v13  ;;  %v15913_v30 = vld [vmem:[#allocation6_spill] sm:$0xff]  ;;  %v15925_v3 = vld [vmem:[#allocation27_spill] sm:$0xff] }
 0x46d   :  { %v13388_v24 = vmul.f32 %v13308_v21, %v12981_v23  ;;  %v13392_v26 = vmul.f32 %v13308_v21, %v12988_v31  ;;  %v13396_v62 = vmul.f32 %v13308_v21, %v12995_v12  ;;  %v13400_v45 = vmul.f32 %v13308_v21, %v13002_v58 }
 0x46e   :  { %v4205_v47 = vmax.f32 %v4141_v38, 0.0  ;;  %v13404_v13 = vmul.f32 %v13308_v21, %v13009_v29  ;;  %v13408_v23 = vmul.f32 %v13308_v21, %v13016_v41  ;;  %v13412_v31 = vmul.f32 %v13308_v21, %v13023_v19  ;;  %v15914_v38 = vld [vmem:[#allocation34_spill] sm:$0xff] }
 0x46f   :  { %v13416_v12 = vmul.f32 %v13308_v21, %v13030_v59  ;;  %v13420_v58 = vmul.f32 %v13308_v21, %v13037_v44  ;;  %v13424_v29 = vmul.f32 %v13308_v21, %v13044_v17  ;;  %v13428_v41 = vmul.f32 %v13308_v21, %v13051_v1 }
 0x470   :  { %4349 = vst.msk [vmem:[#allocation2 + $0x339] sm:$0xff] %vm2742_vm2, %v4205_v47  ;;  %v13433_v19 = vmul.f32 %v13308_v21, %v13058_v40  ;;  %v13437_v59 = vmul.f32 %v13308_v21, %v13065_v22  ;;  %v13441_v44 = vmul.f32 %v13308_v21, %v13072_v57  ;;  %v13445_v17 = vmul.f32 %v13308_v21, %v13079_v48  ;;  %v15915_v47 = vld [vmem:[#allocation7_spill] sm:$0xff] }
 0x471   :  { %v13449_v1 = vmul.f32 %v13308_v21, %v13086_v37  ;;  %v13453_v40 = vmul.f32 %v13308_v21, %v13093_v55  ;;  %v13457_v22 = vmul.f32 %v13308_v21, %v13100_v18  ;;  %v13461_v57 = vmul.f32 %v13308_v21, %v13107_v35 }
 0x472   :  { %v13465_v48 = vmul.f32 %v13308_v21, %v15906_v20  ;;  %v13469_v37 = vmul.f32 %v13308_v21, %v15907_v34  ;;  %v13473_v55 = vmul.f32 %v13308_v21, %v13128_v16  ;;  %v13477_v18 = vmul.f32 %v13308_v21, %v15908_v9  ;;  %v15917_v34 = vld [vmem:[#allocation36_spill] sm:$0xff] }
 0x473   :  { %v13481_v35 = vmul.f32 %v13308_v21, %v13142_v4  ;;  %v13485_v28 = vmul.f32 %v13308_v21, %v13149_v43  ;;  %v13489_v25 = vmul.f32 %v13308_v21, %v13156_v10  ;;  %v13493_v16 = vmul.f32 %v13308_v21, %v15909_v52  ;;  %v15919_v52 = vld [vmem:[#allocation21_spill] sm:$0xff] }
 0x474   :  { %v13497_v14 = vmul.f32 %v13308_v21, %v13170_v5  ;;  %v13501_v4 = vmul.f32 %v13308_v21, %v13177_v27  ;;  %v13505_v43 = vmul.f32 %v13308_v21, %v15910_v33  ;;  %v13509_v10 = vmul.f32 %v13308_v21, %v15911_v6  ;;  %v15921_v6 = vld [vmem:[#allocation42_spill] sm:$0xff] }
 0x475   :  { %v13513_v60 = vmul.f32 %v13308_v21, %v15912_v54  ;;  %v13517_v5 = vmul.f32 %v13308_v21, %v15913_v30  ;;  %v13521_v27 = vmul.f32 %v13308_v21, %v15914_v38  ;;  %v13525_v20 = vmul.f32 %v13308_v21, %v15915_v47  ;;  %v15923_v30 = vld [vmem:[#allocation16_spill] sm:$0xff] }
 0x476   :  { %v13529_v9 = vmul.f32 %v13308_v21, %v15917_v34  ;;  %v13533_v33 = vmul.f32 %v13308_v21, %v15919_v52  ;;  %v13537_v54 = vmul.f32 %v13308_v21, %v15921_v6  ;;  %v13541_v38 = vmul.f32 %v13308_v21, %v15923_v30 }
 0x477   :  { %15916 = vst [vmem:[#allocation23_spill] sm:$0xff] %v13525_v20  ;;  %v13545_v47 = vmul.f32 %v13308_v21, %v15925_v3  ;;  %v15927_v20 = vld [vmem:[#allocation18_spill] sm:$0xff] }
 0x478   :  { %15918 = vst [vmem:[#allocation10_spill] sm:$0xff] %v13529_v9  ;;  %v13549_v34 = vmul.f32 %v13308_v21, %v15927_v20  ;;  %v15928_v9 = vld [vmem:[#allocation28_spill] sm:$0xff] }
 0x479   :  { %15920 = vst [vmem:[#allocation39_spill] sm:$0xff] %v13533_v33  ;;  %v13553_v52 = vmul.f32 %v13308_v21, %v15928_v9  ;;  %v15929_v33 = vld [vmem:[#allocation14_spill] sm:$0xff]  ;;  %v13573_v9 = vmul.f32 %v13306_v2, %v13318_v50  ;;  %v4017_v50 = vmul.f32 %v13306_v2, %v13342_v36  ;;  %v13613_v36 = vmul.f32 %v13306_v2, %v13367_v15 }
 0x47a   :  { %15922 = vst [vmem:[#allocation8_spill] sm:$0xff] %v13537_v54  ;;  %v13557_v6 = vmul.f32 %v13308_v21, %v15929_v33  ;;  %v15930_v54 = vld [vmem:[#allocation13_spill] sm:$0xff]  ;;  %v13577_v33 = vmul.f32 %v13306_v2, %v13322_v53  ;;  %v4018_v53 = vmul.f32 %v13306_v2, %v13347_v32  ;;  %v13617_v32 = vmul.f32 %v13306_v2, %v13371_v46 }
 0x47b   :  { %15924 = vst [vmem:[#allocation9_spill] sm:$0xff] %v13541_v38  ;;  %v13561_v30 = vmul.f32 %v13308_v21, %v15930_v54  ;;  %v15932_v38 = vld [vmem:[#allocation26_spill] sm:$0xff]  ;;  %v4013_v54 = vmul.f32 %v13306_v2, %v13326_v61  ;;  %v13597_v61 = vmul.f32 %v13306_v2, %v13351_v0  ;;  %v13621_v0 = vmul.f32 %v13306_v2, %v13376_v63 }
 0x47c   :  { %15926 = vst [vmem:[#allocation20_spill] sm:$0xff] %v13545_v47  ;;  %v13565_v3 = vmul.f32 %v13308_v21, %v15932_v38  ;;  %v15933_v47 = vld [vmem:[#allocation11_spill] sm:$0xff]  ;;  %v13585_v38 = vmul.f32 %v13306_v2, %v13334_v39  ;;  %v13605_v39 = vmul.f32 %v13306_v2, %v13359_v56  ;;  %v13629_v56 = vmul.f32 %v13306_v2, %v13384_v8 }
 0x47d   :  { %15931 = vst [vmem:[#allocation5_spill] sm:$0xff] %v13561_v30  ;;  %v13569_v20 = vmul.f32 %v13308_v21, %v15933_v47  ;;  %v4014_v30 = vmul.f32 %v13306_v2, %v13330_v42  ;;  %v13589_v21 = vmul.f32 %v13306_v2, %v13338_v49  ;;  %v13601_v42 = vmul.f32 %v13306_v2, %v13355_v11 }
 0x47e   :  { %v13609_v49 = vmul.f32 %v13306_v2, %v13363_v51  ;;  %v13625_v11 = vmul.f32 %v13306_v2, %v13380_v7  ;;  %v13633_v51 = vmul.f32 %v13306_v2, %v13388_v24  ;;  %v13637_v15 = vmul.f32 %v13306_v2, %v13392_v26 }
 0x47f   :  { %v13641_v46 = vmul.f32 %v13306_v2, %v13396_v62  ;;  %v13645_v63 = vmul.f32 %v13306_v2, %v13400_v45  ;;  %v13649_v7 = vmul.f32 %v13306_v2, %v13404_v13  ;;  %v13653_v8 = vmul.f32 %v13306_v2, %v13408_v23  ;;  %v15939_v47 = vld [vmem:[#allocation10_spill] sm:$0xff] }
 0x480   :  { %v13657_v24 = vmul.f32 %v13306_v2, %v13412_v31  ;;  %v13661_v26 = vmul.f32 %v13306_v2, %v13416_v12  ;;  %v13665_v62 = vmul.f32 %v13306_v2, %v13420_v58  ;;  %v13669_v45 = vmul.f32 %v13306_v2, %v13424_v29 }
 0x481   :  { %v13673_v13 = vmul.f32 %v13306_v2, %v13428_v41  ;;  %v13677_v23 = vmul.f32 %v13306_v2, %v13433_v19  ;;  %v13681_v31 = vmul.f32 %v13306_v2, %v13437_v59  ;;  %v13685_v12 = vmul.f32 %v13306_v2, %v13441_v44 }
 0x482   :  { %v13689_v58 = vmul.f32 %v13306_v2, %v13445_v17  ;;  %v13693_v29 = vmul.f32 %v13306_v2, %v13449_v1  ;;  %v13697_v41 = vmul.f32 %v13306_v2, %v13453_v40  ;;  %v13701_v19 = vmul.f32 %v13306_v2, %v13457_v22 }
 0x483   :  { %v13705_v59 = vmul.f32 %v13306_v2, %v13461_v57  ;;  %v13709_v44 = vmul.f32 %v13306_v2, %v13465_v48  ;;  %v13713_v17 = vmul.f32 %v13306_v2, %v13469_v37  ;;  %v13717_v1 = vmul.f32 %v13306_v2, %v13473_v55 }
 0x484   :  { %v13721_v40 = vmul.f32 %v13306_v2, %v13477_v18  ;;  %v13725_v22 = vmul.f32 %v13306_v2, %v13481_v35  ;;  %v13729_v57 = vmul.f32 %v13306_v2, %v13485_v28  ;;  %v13733_v48 = vmul.f32 %v13306_v2, %v13489_v25 }
 0x485   :  { %v13737_v37 = vmul.f32 %v13306_v2, %v13493_v16  ;;  %v13741_v55 = vmul.f32 %v13306_v2, %v13497_v14  ;;  %v13745_v18 = vmul.f32 %v13306_v2, %v13501_v4  ;;  %v13749_v35 = vmul.f32 %v13306_v2, %v13505_v43  ;;  %v15938_v4 = vld [vmem:[#allocation23_spill] sm:$0xff] }
 0x486   :  { %v13753_v28 = vmul.f32 %v13306_v2, %v13509_v10  ;;  %v13757_v25 = vmul.f32 %v13306_v2, %v13513_v60  ;;  %v13761_v16 = vmul.f32 %v13306_v2, %v13517_v5  ;;  %v13765_v14 = vmul.f32 %v13306_v2, %v13521_v27 }
 0x487   :  { %v13769_v43 = vmul.f32 %v13306_v2, %v15938_v4  ;;  %v13773_v10 = vmul.f32 %v13306_v2, %v15939_v47  ;;  %v13793_v47 = vmul.f32 %v13306_v2, %v13549_v34  ;;  %v13813_v34 = vmul.f32 %v13306_v2, %v13569_v20 }
 0x488   :  { %15934 = vst [vmem:[#allocation4_spill] sm:$0xff] %v13753_v28  ;;  %v15940_v28 = vld [vmem:[#allocation39_spill] sm:$0xff] }
 0x489   :  { %15935 = vst [vmem:[#allocation29_spill] sm:$0xff] %v13757_v25  ;;  %v13777_v60 = vmul.f32 %v13306_v2, %v15940_v28  ;;  %v15941_v25 = vld [vmem:[#allocation8_spill] sm:$0xff]  ;;  %v13797_v28 = vmul.f32 %v13306_v2, %v13553_v52 }
 0x48a   :  { %15936 = vst [vmem:[#allocation17_spill] sm:$0xff] %v13761_v16  ;;  %v13781_v5 = vmul.f32 %v13306_v2, %v15941_v25  ;;  %v15943_v16 = vld [vmem:[#allocation9_spill] sm:$0xff]  ;;  %v13801_v25 = vmul.f32 %v13306_v2, %v13557_v6 }
 0x48b   :  { %15937 = vst [vmem:[#allocation25_spill] sm:$0xff] %v13765_v14  ;;  %v13785_v27 = vmul.f32 %v13306_v2, %v15943_v16  ;;  %v15944_v14 = vld [vmem:[#allocation20_spill] sm:$0xff] }
 0x48c   :  { %15942 = vst [vmem:[#allocation38_spill] sm:$0xff] %v13781_v5  ;;  %v13789_v4 = vmul.f32 %v13306_v2, %v15944_v14  ;;  %v15948_v5 = vld [vmem:[#allocation5_spill] sm:$0xff]  ;;  %v13809_v14 = vmul.f32 %v13306_v2, %v13565_v3 }
 0x48d   :  { %15946 = vst [vmem:[#allocation30_spill] sm:$0xff] %v13793_v47  ;;  %v13805_v16 = vmul.f32 %v13306_v2, %v15948_v5  ;;  %v15951_v47 = vld [vmem:[#allocation24_spill] sm:$0xff] }
 0x48e   :  { %15945 = vst [vmem:[#allocation32_spill] sm:$0xff] %v13789_v4  ;;  %v4080_v4 = vadd.f32 %v15951_v47, %v4013_v54  ;;  %v4081_v52 = vadd.f32 %v15951_v47, %v4014_v30  ;;  %v4085_v6 = vadd.f32 %v15951_v47, %v4018_v53  ;;  %v13821_v5 = vadd.f32 %v15951_v47, %v13573_v9 }
 0x48f   :  { %15947 = vst [vmem:[#allocation31_spill] sm:$0xff] %v13797_v28  ;;  %v4084_v28 = vadd.f32 %v15951_v47, %v4017_v50  ;;  %v13825_v3 = vadd.f32 %v15951_v47, %v13577_v33  ;;  %v13829_v2 = vadd.f32 %v15951_v47, %v13585_v38  ;;  %v13833_v30 = vadd.f32 %v15951_v47, %v13589_v21 }
 0x490   :  { %15949 = vst [vmem:[#allocation19_spill] sm:$0xff] %v13805_v16  ;;  %v4145_v16 = vmax.f32 %v4081_v52, 0.0  ;;  %v4149_v54 = vmax.f32 %v4085_v6, 0.0  ;;  %v13837_v9 = vadd.f32 %v15951_v47, %v13597_v61  ;;  %v13841_v33 = vadd.f32 %v15951_v47, %v13601_v42 }
 0x491   :  { %15950 = vst [vmem:[#allocation41_spill] sm:$0xff] %v13809_v14  ;;  %v4144_v14 = vmax.f32 %v4080_v4, 0.0  ;;  %v4148_v20 = vmax.f32 %v4084_v28, 0.0  ;;  %v13846_v38 = vadd.f32 %v15951_v47, %v13605_v39  ;;  %v13850_v21 = vadd.f32 %v15951_v47, %v13609_v49  ;;  %v15952_v4 = vld [vmem:[#allocation4_spill] sm:$0xff]  ;;  %v15953_v28 = vld [vmem:[#allocation29_spill] sm:$0xff] }
 0x492   :  { %v13854_v50 = vadd.f32 %v15951_v47, %v13613_v36  ;;  %v13858_v53 = vadd.f32 %v15951_v47, %v13617_v32  ;;  %4289 = vst.msk [vmem:[#allocation2 + $0x39] sm:$0xff] %vm2742_vm2, %v4145_v16  ;;  %v13863_v61 = vadd.f32 %v15951_v47, %v13621_v0  ;;  %v13867_v42 = vadd.f32 %v15951_v47, %v13625_v11  ;;  %v15954_v16 = vld [vmem:[#allocation17_spill] sm:$0xff] }
 0x493   :  { %4288 = vst.msk [vmem:[#allocation2 + $0x31] sm:$0xff] %vm2742_vm2, %v4144_v14  ;;  %v13871_v39 = vadd.f32 %v15951_v47, %v13629_v56  ;;  %v13875_v49 = vadd.f32 %v15951_v47, %v13633_v51  ;;  %v13880_v36 = vadd.f32 %v15951_v47, %v13637_v15  ;;  %v13884_v32 = vadd.f32 %v15951_v47, %v13641_v46  ;;  %v15955_v52 = vld [vmem:[#allocation25_spill] sm:$0xff] }
 0x494   :  { %4292 = vst.msk [vmem:[#allocation2 + $0x61] sm:$0xff] %vm2742_vm2, %v4148_v20  ;;  %v13888_v0 = vadd.f32 %v15951_v47, %v13645_v63  ;;  %v13892_v11 = vadd.f32 %v15951_v47, %v13649_v7  ;;  %v13897_v56 = vadd.f32 %v15951_v47, %v13653_v8  ;;  %v13901_v51 = vadd.f32 %v15951_v47, %v13657_v24 }
 0x495   :  { %4293 = vst.msk [vmem:[#allocation2 + $0x69] sm:$0xff] %vm2742_vm2, %v4149_v54  ;;  %v13905_v15 = vadd.f32 %v15951_v47, %v13661_v26  ;;  %v13909_v46 = vadd.f32 %v15951_v47, %v13665_v62  ;;  %v13913_v63 = vadd.f32 %v15951_v47, %v13669_v45  ;;  %v13917_v7 = vadd.f32 %v15951_v47, %v13673_v13 }
 0x496   :  { %v13921_v8 = vadd.f32 %v15951_v47, %v13677_v23  ;;  %v13925_v24 = vadd.f32 %v15951_v47, %v13681_v31  ;;  %v13929_v26 = vadd.f32 %v15951_v47, %v13685_v12  ;;  %v13933_v62 = vadd.f32 %v15951_v47, %v13689_v58 }
 0x497   :  { %v13937_v45 = vadd.f32 %v15951_v47, %v13693_v29  ;;  %v13941_v13 = vadd.f32 %v15951_v47, %v13697_v41  ;;  %v13945_v23 = vadd.f32 %v15951_v47, %v13701_v19  ;;  %v13949_v31 = vadd.f32 %v15951_v47, %v13705_v59 }
 0x498   :  { %v13953_v12 = vadd.f32 %v15951_v47, %v13709_v44  ;;  %v13957_v58 = vadd.f32 %v15951_v47, %v13713_v17  ;;  %v13961_v29 = vadd.f32 %v15951_v47, %v13717_v1  ;;  %v13965_v41 = vadd.f32 %v15951_v47, %v13721_v40 }
 0x499   :  { %v13969_v19 = vadd.f32 %v15951_v47, %v13725_v22  ;;  %v13973_v59 = vadd.f32 %v15951_v47, %v13729_v57  ;;  %v13977_v17 = vadd.f32 %v15951_v47, %v13733_v48  ;;  %v13981_v1 = vadd.f32 %v15951_v47, %v13737_v37 }
 0x49a   :  { %v4605_v44 = vld [vmem:[#allocation2 + $0x32] ss:$2 sm:$0xff]  ;;  %v13985_v40 = vadd.f32 %v15951_v47, %v13741_v55  ;;  %v13989_v22 = vadd.f32 %v15951_v47, %v13745_v18  ;;  %v13993_v57 = vadd.f32 %v15951_v47, %v13749_v35  ;;  %v13997_v48 = vadd.f32 %v15951_v47, %v15952_v4 }
 0x49b   :  { %v14001_v37 = vadd.f32 %v15951_v47, %v15953_v28  ;;  %v14005_v55 = vadd.f32 %v15951_v47, %v15954_v16  ;;  %v14009_v18 = vadd.f32 %v15951_v47, %v15955_v52  ;;  %v14013_v35 = vadd.f32 %v15951_v47, %v13769_v43  ;;  %v15958_v4 = vld [vmem:[#allocation38_spill] sm:$0xff]  ;;  %v15959_v52 = vld [vmem:[#allocation32_spill] sm:$0xff] }
 0x49c   :  { %v4607_v14 = vld [vmem:[#allocation2 + $0x62] ss:$2 sm:$0xff]  ;;  %v14017_v6 = vadd.f32 %v15951_v47, %v13773_v10  ;;  %v14021_v20 = vadd.f32 %v15951_v47, %v13777_v60  ;;  %v14025_v28 = vadd.f32 %v15951_v47, %v15958_v4  ;;  %v14029_v16 = vadd.f32 %v15951_v47, %v13785_v27 }
 0x49d   :  { %15956 = vst [vmem:[#allocation40_spill] sm:$0xff] %v14013_v35  ;;  %v5200_v54 = vpack.c.bf16 %v4607_v14, %v4605_v44  ;;  %v14033_v43 = vadd.f32 %v15951_v47, %v15959_v52  ;;  %v15960_v35 = vld [vmem:[#allocation30_spill] sm:$0xff]  ;;  %v14045_v44 = vadd.f32 %v15951_v47, %v13801_v25  ;;  %v15962_v14 = vld [vmem:[#allocation19_spill] sm:$0xff]  ;;  %v15963_v4 = vld [vmem:[#allocation41_spill] sm:$0xff] }
 0x49e   :  { %15957 = vst [vmem:[#allocation12_spill] sm:$0xff] %v14017_v6  ;;  %v14037_v10 = vadd.f32 %v15951_v47, %v15960_v35  ;;  %v15961_v6 = vld [vmem:[#allocation31_spill] sm:$0xff]  ;;  %v14049_v27 = vadd.f32 %v15951_v47, %v15962_v14  ;;  %v14054_v52 = vadd.f32 %v15951_v47, %v15963_v4  ;;  %v14058_v35 = vadd.f32 %v15951_v47, %v13813_v34 }
 0x49f   :  { %v14041_v60 = vadd.f32 %v15951_v47, %v15961_v6  ;;  %7803 = vmatmul.msk.bf16.vlgmr.msrb.gmra.mxu2 %vm2742_vm2, %v5200_v54  ;;  %v9800_v6 = vmov 0.0   ;;  %v4416_v25 = vld [vmem:[#allocation2 + $0x32] ss:$2 sm:$0xff]  ;;  %v4384_v14 = vld [vmem:[#allocation2 + $0x31] ss:$2 sm:$0xff] }
 0x4a0   :  { %15964 = vst [vmem:[#allocation35_spill] sm:$0xff] %v14058_v35  ;;  %v4142_v35 = vmax.f32 %v13821_v5, 0.0  ;;  %v4150_v5 = vmax.f32 %v13837_v9, 0.0  ;;  %v4155_v9 = vmax.f32 %v13858_v53, 0.0  ;;  %v4160_v53 = vmax.f32 %v13880_v36, 0.0 }
 0x4a1   :  { %4206 = vst.msk [vmem:[#allocation2] sm:$0xff] %vm2742_vm2, %v9800_v6  ;;  %v4165_v36 = vmax.f32 %v13901_v51, 0.0  ;;  %v4170_v51 = vmax.f32 %v13921_v8, 0.0  ;;  %v4175_v8 = vmax.f32 %v13941_v13, 0.0  ;;  %v4180_v13 = vmax.f32 %v13961_v29, 0.0 }
 0x4a2   :  { %4207 = vst.msk [vmem:[#allocation2 + $0x8] sm:$0xff] %vm2742_vm2, %v9800_v6  ;;  %v4185_v29 = vmax.f32 %v13981_v1, 0.0  ;;  %v4190_v1 = vmax.f32 %v14001_v37, 0.0  ;;  %v4195_v37 = vmax.f32 %v14021_v20, 0.0  ;;  %v4200_v20 = vmax.f32 %v14041_v60, 0.0 }
 0x4a3   :  { %4209 = vst.msk [vmem:[#allocation2 + $0x10] sm:$0x3] %vm4208_vm13, %v9800_v6 }
 0x4a4   :  { %4210 = vst.msk [vmem:[#allocation2 + $0x1b0] sm:$0xff] %vm2742_vm2, %v9800_v6 }
 0x4a5   :  { %4211 = vst.msk [vmem:[#allocation2 + $0x1b8] sm:$0xff] %vm2742_vm2, %v9800_v6 }
 0x4a6   :  { %4212 = vst.msk [vmem:[#allocation2 + $0x1c0] sm:$0x3] %vm4208_vm13, %v9800_v6 }
 0x4a7   :  { %5600 = vst.msk [vmem:[#allocation3] sm:$0xff] %vm2742_vm2, %v9800_v6 }
 0x4a8   :  { %5601 = vst.msk [vmem:[#allocation3 + $0x8] sm:$0x3] %vm4208_vm13, %v9800_v6 }
 0x4a9   :  { %v4382_v54 = vld [vmem:[#allocation2 + $0x1] ss:$2 sm:$0xff]  ;;  %5602 = vst.msk [vmem:[#allocation3 + $0xa0] sm:$0xff] %vm2742_vm2, %v9800_v6 }
 0x4aa   :  { %v4414_v47 = vld [vmem:[#allocation2 + $0x2] ss:$2 sm:$0xff]  ;;  %v9208_v4 = vpack.i.bf16 %v4384_v14, %v4382_v54  ;;  %5603 = vst.msk [vmem:[#allocation3 + $0xa8] sm:$0x3] %vm4208_vm13, %v9800_v6  ;;  %v4151_v54 = vmax.f32 %v13841_v33, 0.0  ;;  %v4156_v33 = vmax.f32 %v13863_v61, 0.0 }
 0x4ab   :  { %v9213_v34 = vpack.i.bf16 %v4416_v25, %v4414_v47  ;;  %5605 = vst.msk [vmem:[#allocation3 + $0x90] sm:$0xff] %vm2742_vm2, %v9800_v6  ;;  %v4143_v25 = vmax.f32 %v13825_v3, 0.0  ;;  %v4146_v47 = vmax.f32 %v13829_v2, 0.0  ;;  %v4152_v3 = vmax.f32 %v13846_v38, 0.0  ;;  %v15966_v14 = vld [vmem:[#allocation12_spill] sm:$0xff] }
 0x4ac   :  { %9209 = vrot.lane.b32.xlu1 %v9208_v4, %s15833_s27  ;;  %5606 = vst.msk [vmem:[#allocation3 + $0x98] sm:$0x3] %vm4208_vm13, %v9800_v6  ;;  %v4153_v2 = vmax.f32 %v13850_v21, 0.0  ;;  %v4157_v38 = vmax.f32 %v13867_v42, 0.0  ;;  %v4158_v21 = vmax.f32 %v13871_v39, 0.0  ;;  %v4161_v61 = vmax.f32 %v13884_v32, 0.0 }
 0x4ad   :  { %9214 = vrot.lane.b32.xlu2 %v9213_v34, %s9794_s29  ;;  %5607 = vst.msk [vmem:[#allocation3 + $0x130] sm:$0xff] %vm2742_vm2, %v9800_v6  ;;  %v4147_v34 = vmax.f32 %v13833_v30, 0.0  ;;  %v4154_v30 = vmax.f32 %v13854_v50, 0.0  ;;  %v4159_v50 = vmax.f32 %v13875_v49, 0.0  ;;  %v4162_v42 = vmax.f32 %v13888_v0, 0.0 }
 0x4ae   :  { %5608 = vst.msk [vmem:[#allocation3 + $0x138] sm:$0x3] %vm4208_vm13, %v9800_v6  ;;  %v4163_v39 = vmax.f32 %v13892_v11, 0.0  ;;  %v4164_v49 = vmax.f32 %v13897_v56, 0.0  ;;  %v4166_v32 = vmax.f32 %v13905_v15, 0.0  ;;  %v4167_v0 = vmax.f32 %v13909_v46, 0.0 }
 0x4af   :  { %4286 = vst.msk [vmem:[#allocation2 + $0x19] sm:$0xff] %vm2742_vm2, %v4142_v35  ;;  %v4168_v11 = vmax.f32 %v13913_v63, 0.0  ;;  %v4169_v56 = vmax.f32 %v13917_v7, 0.0  ;;  %v4171_v15 = vmax.f32 %v13925_v24, 0.0  ;;  %v4172_v46 = vmax.f32 %v13929_v26, 0.0  ;;  %v15965_v35 = vld [vmem:[#allocation40_spill] sm:$0xff] }
 0x4b0   :  { %4287 = vst.msk [vmem:[#allocation2 + $0x21] sm:$0xff] %vm2742_vm2, %v4143_v25  ;;  %v4173_v63 = vmax.f32 %v13933_v62, 0.0  ;;  %v4174_v7 = vmax.f32 %v13937_v45, 0.0  ;;  %v4176_v24 = vmax.f32 %v13945_v23, 0.0  ;;  %v4177_v26 = vmax.f32 %v13949_v31, 0.0 }
 0x4b1   :  { %4290 = vst.msk [vmem:[#allocation2 + $0x49] sm:$0xff] %vm2742_vm2, %v4146_v47  ;;  %v4178_v62 = vmax.f32 %v13953_v12, 0.0  ;;  %v4179_v45 = vmax.f32 %v13957_v58, 0.0  ;;  %v4181_v23 = vmax.f32 %v13965_v41, 0.0  ;;  %v4182_v31 = vmax.f32 %v13969_v19, 0.0  ;;  %v15967_v47 = vld [vmem:[#allocation35_spill] sm:$0xff] }
 0x4b2   :  { %4291 = vst.msk [vmem:[#allocation2 + $0x51] sm:$0xff] %vm2742_vm2, %v4147_v34  ;;  %v4183_v12 = vmax.f32 %v13973_v59, 0.0  ;;  %v4184_v58 = vmax.f32 %v13977_v17, 0.0  ;;  %v4186_v41 = vmax.f32 %v13985_v40, 0.0  ;;  %v4187_v19 = vmax.f32 %v13989_v22, 0.0 }
 0x4b3   :  { %4294 = vst.msk [vmem:[#allocation2 + $0x79] sm:$0xff] %vm2742_vm2, %v4150_v5  ;;  %v4188_v59 = vmax.f32 %v13993_v57, 0.0  ;;  %v4189_v17 = vmax.f32 %v13997_v48, 0.0  ;;  %v4191_v40 = vmax.f32 %v14005_v55, 0.0  ;;  %v4192_v22 = vmax.f32 %v14009_v18, 0.0 }
 0x4b4   :  { %4295 = vst.msk [vmem:[#allocation2 + $0x81] sm:$0xff] %vm2742_vm2, %v4151_v54  ;;  %v4193_v57 = vmax.f32 %v15965_v35, 0.0  ;;  %v4194_v48 = vmax.f32 %v15966_v14, 0.0  ;;  %v4196_v55 = vmax.f32 %v14025_v28, 0.0  ;;  %v4197_v18 = vmax.f32 %v14029_v16, 0.0 }
 0x4b5   :  { %4296 = vst.msk [vmem:[#allocation2 + $0x91] sm:$0xff] %vm2742_vm2, %v4152_v3  ;;  %v4198_v4 = vmax.f32 %v14033_v43, 0.0  ;;  %v4199_v25 = vmax.f32 %v14037_v10, 0.0  ;;  %v4201_v28 = vmax.f32 %v14045_v44, 0.0  ;;  %v4202_v16 = vmax.f32 %v14049_v27, 0.0 }
 0x4b6   :  { %4297 = vst.msk [vmem:[#allocation2 + $0x99] sm:$0xff] %vm2742_vm2, %v4153_v2  ;;  %v4203_v43 = vmax.f32 %v14054_v52, 0.0  ;;  %v4204_v10 = vmax.f32 %v15967_v47, 0.0 }
 0x4b7   :  { %4298 = vst.msk [vmem:[#allocation2 + $0xa9] sm:$0xff] %vm2742_vm2, %v4154_v30  ;;  %v4509_v60 = vld [vmem:[#allocation2 + $0x1a] ss:$2 sm:$0xff]  ;;  %v4477_v34 = vld [vmem:[#allocation2 + $0x19] ss:$2 sm:$0xff] }
 0x4b8   :  { %4299 = vst.msk [vmem:[#allocation2 + $0xb1] sm:$0xff] %vm2742_vm2, %v4155_v9 }
 0x4b9   :  { %4300 = vst.msk [vmem:[#allocation2 + $0xc1] sm:$0xff] %vm2742_vm2, %v4156_v33  ;;  %v4511_v44 = vld [vmem:[#allocation2 + $0x4a] ss:$2 sm:$0xff]  ;;  %v4479_v54 = vld [vmem:[#allocation2 + $0x49] ss:$2 sm:$0xff] }
 0x4ba   :  { %4301 = vst.msk [vmem:[#allocation2 + $0xc9] sm:$0xff] %vm2742_vm2, %v4157_v38  ;;  %v9228_v52 = vpack.i.bf16 %v4511_v44, %v4509_v60  ;;  %v9223_v2 = vpack.i.bf16 %v4479_v54, %v4477_v34  ;;  %v4386_v38 = vld [vmem:[#allocation2 + $0x61] ss:$2 sm:$0xff] }
 0x4bb   :  { %4302 = vst.msk [vmem:[#allocation2 + $0xd9] sm:$0xff] %vm2742_vm2, %v4158_v21 }
 0x4bc   :  { %4303 = vst.msk [vmem:[#allocation2 + $0xe1] sm:$0xff] %vm2742_vm2, %v4159_v50  ;;  %9229 = vrot.lane.b32.xlu2 %v9228_v52, %s9801_s7  ;;  %9224 = vrot.lane.b32.xlu1 %v9223_v2, %s9799_s23 }
 0x4bd   :  { %4304 = vst.msk [vmem:[#allocation2 + $0xf1] sm:$0xff] %vm2742_vm2, %v4160_v53  ;;  %v4609_v30 = vld [vmem:[#allocation2 + $0x92] ss:$2 sm:$0xff]  ;;  %v4388_v21 = vld [vmem:[#allocation2 + $0x91] ss:$2 sm:$0xff] }
 0x4be   :  { %4305 = vst.msk [vmem:[#allocation2 + $0xf9] sm:$0xff] %vm2742_vm2, %v4161_v61  ;;  %v4573_v61 = vld [vmem:[#allocation2 + $0x31] ss:$2 sm:$0xff] }
 0x4bf   :  { %4306 = vst.msk [vmem:[#allocation2 + $0x109] sm:$0xff] %vm2742_vm2, %v4162_v42  ;;  %v4575_v42 = vld [vmem:[#allocation2 + $0x61] ss:$2 sm:$0xff] }
 0x4c0   :  { %4307 = vst.msk [vmem:[#allocation2 + $0x111] sm:$0xff] %vm2742_vm2, %v4163_v39  ;;  %v9243_v39 = vpack.i.bf16 %v4388_v21, %v4386_v38 }
 0x4c1   :  { %4308 = vst.msk [vmem:[#allocation2 + $0x121] sm:$0xff] %vm2742_vm2, %v4164_v49  ;;  %v4611_v9 = vld [vmem:[#allocation2 + $0xc2] ss:$2 sm:$0xff] }
 0x4c2   :  { %4309 = vst.msk [vmem:[#allocation2 + $0x129] sm:$0xff] %vm2742_vm2, %v4165_v36  ;;  %v5202_v33 = vpack.c.bf16 %v4611_v9, %v4609_v30  ;;  %v9238_v36 = vpack.i.bf16 %v4575_v42, %v4573_v61 }
 0x4c3   :  { %4310 = vst.msk [vmem:[#allocation2 + $0x139] sm:$0xff] %vm2742_vm2, %v4166_v32  ;;  %v4481_v32 = vld [vmem:[#allocation2 + $0x79] ss:$2 sm:$0xff] }
 0x4c4   :  { %4311 = vst.msk [vmem:[#allocation2 + $0x141] sm:$0xff] %vm2742_vm2, %v4167_v0  ;;  %7804 = vmatmul.msk.bf16.gmra.mxu2 %vm2742_vm2, %v5202_v33  ;;  %9244 = vrot.lane.b32.xlu2 %v9243_v39, %s15833_s27  ;;  %v4483_v0 = vld [vmem:[#allocation2 + $0xa9] ss:$2 sm:$0xff] }
 0x4c5   :  { %4312 = vst.msk [vmem:[#allocation2 + $0x151] sm:$0xff] %vm2742_vm2, %v4168_v11  ;;  %9239 = vrot.lane.b32.xlu1 %v9238_v36, %s9803_s26  ;;  %v4418_v11 = vld [vmem:[#allocation2 + $0x62] ss:$2 sm:$0xff] }
 0x4c6   :  { %4313 = vst.msk [vmem:[#allocation2 + $0x159] sm:$0xff] %vm2742_vm2, %v4169_v56  ;;  %v4420_v56 = vld [vmem:[#allocation2 + $0x92] ss:$2 sm:$0xff] }
 0x4c7   :  { %4314 = vst.msk [vmem:[#allocation2 + $0x169] sm:$0xff] %vm2742_vm2, %v4170_v51 }
 0x4c8   :  { %4315 = vst.msk [vmem:[#allocation2 + $0x171] sm:$0xff] %vm2742_vm2, %v4171_v15 }
 0x4c9   :  { %4316 = vst.msk [vmem:[#allocation2 + $0x181] sm:$0xff] %vm2742_vm2, %v4172_v46  ;;  %v9258_v46 = vpack.i.bf16 %v4483_v0, %v4481_v32  ;;  %v4426_v60 = vld [vmem:[#allocation2 + $0x122] ss:$2 sm:$0xff]  ;;  %v4583_v52 = vld [vmem:[#allocation2 + $0x121] ss:$2 sm:$0xff] }
 0x4ca   :  { %4317 = vst.msk [vmem:[#allocation2 + $0x189] sm:$0xff] %vm2742_vm2, %v4173_v63  ;;  %v4613_v63 = vld [vmem:[#allocation2 + $0xf2] ss:$2 sm:$0xff]  ;;  %v4394_v34 = vld [vmem:[#allocation2 + $0x121] ss:$2 sm:$0xff] }
 0x4cb   :  { %4318 = vst.msk [vmem:[#allocation2 + $0x1c9] sm:$0xff] %vm2742_vm2, %v4174_v7  ;;  %v4615_v7 = vld [vmem:[#allocation2 + $0x122] ss:$2 sm:$0xff]  ;;  %v4489_v61 = vld [vmem:[#allocation2 + $0x139] ss:$2 sm:$0xff] }
 0x4cc   :  { %4319 = vst.msk [vmem:[#allocation2 + $0x1d1] sm:$0xff] %vm2742_vm2, %v4175_v8  ;;  %v9248_v8 = vpack.i.bf16 %v4420_v56, %v4418_v11  ;;  %9259 = vrot.lane.b32.xlu2 %v9258_v46, %s9799_s23  ;;  %v4521_v38 = vld [vmem:[#allocation2 + $0x13a] ss:$2 sm:$0xff]  ;;  %v4398_v32 = vld [vmem:[#allocation2 + $0x1b1] ss:$2 sm:$0xff] }
 0x4cd   :  { %4320 = vst.msk [vmem:[#allocation2 + $0x1e1] sm:$0xff] %vm2742_vm2, %v4176_v24  ;;  %v4428_v44 = vld [vmem:[#allocation2 + $0x152] ss:$2 sm:$0xff] }
 0x4ce   :  { %4321 = vst.msk [vmem:[#allocation2 + $0x1e9] sm:$0xff] %vm2742_vm2, %v4177_v26  ;;  %v5204_v26 = vpack.c.bf16 %v4615_v7, %v4613_v63  ;;  %v9318_v54 = vpack.i.bf16 %v4428_v44, %v4426_v60 }
 0x4cf   :  { %4322 = vst.msk [vmem:[#allocation2 + $0x1f9] sm:$0xff] %vm2742_vm2, %v4178_v62  ;;  %v4577_v62 = vld [vmem:[#allocation2 + $0x91] ss:$2 sm:$0xff]  ;;  %v4523_v21 = vld [vmem:[#allocation2 + $0x16a] ss:$2 sm:$0xff] }
 0x4d0   :  { %4323 = vst.msk [vmem:[#allocation2 + $0x201] sm:$0xff] %vm2742_vm2, %v4179_v45  ;;  %v4579_v45 = vld [vmem:[#allocation2 + $0xc1] ss:$2 sm:$0xff]  ;;  %v9333_v39 = vpack.i.bf16 %v4523_v21, %v4521_v38  ;;  %v7889_v38 = vld [vmem:[%s15679_s2 + $0x10] sm:$0xff] }
 0x4d1   :  { %4324 = vst.msk [vmem:[#allocation2 + $0x211] sm:$0xff] %vm2742_vm2, %v4180_v13  ;;  %v4513_v13 = vld [vmem:[#allocation2 + $0x7a] ss:$2 sm:$0xff]  ;;  %v4491_v42 = vld [vmem:[#allocation2 + $0x169] ss:$2 sm:$0xff] }
 0x4d2   :  { %4325 = vst.msk [vmem:[#allocation2 + $0x219] sm:$0xff] %vm2742_vm2, %v4181_v23  ;;  %v4515_v23 = vld [vmem:[#allocation2 + $0xaa] ss:$2 sm:$0xff]  ;;  %v9328_v36 = vpack.i.bf16 %v4491_v42, %v4489_v61 }
 0x4d3   :  { %4326 = vst.msk [vmem:[#allocation2 + $0x229] sm:$0xff] %vm2742_vm2, %v4182_v31  ;;  %v4619_v14 = vld [vmem:[#allocation2 + $0x182] ss:$2 sm:$0xff] }
 0x4d4   :  { %4327 = vst.msk [vmem:[#allocation2 + $0x231] sm:$0xff] %vm2742_vm2, %v4183_v12  ;;  %7805 = vmatmul.msk.bf16.gmra.mxu2 %vm2742_vm2, %v5204_v26 }
 0x4d5   :  { %4328 = vst.msk [vmem:[#allocation2 + $0x241] sm:$0xff] %vm2742_vm2, %v4184_v58  ;;  %v9273_v58 = vpack.i.bf16 %v4579_v45, %v4577_v62  ;;  %v4400_v0 = vld [vmem:[#allocation2 + $0x1e1] ss:$2 sm:$0xff] }
 0x4d6   :  { %4329 = vst.msk [vmem:[#allocation2 + $0x249] sm:$0xff] %vm2742_vm2, %v4185_v29  ;;  %v9263_v29 = vpack.i.bf16 %v4515_v23, %v4513_v13  ;;  %v9348_v46 = vpack.i.bf16 %v4400_v0, %v4398_v32  ;;  %v4493_v62 = vld [vmem:[#allocation2 + $0x1c9] ss:$2 sm:$0xff]  ;;  %v4430_v13 = vld [vmem:[#allocation2 + $0x1b2] ss:$2 sm:$0xff] }
 0x4d7   :  { %4330 = vst.msk [vmem:[#allocation2 + $0x259] sm:$0xff] %vm2742_vm2, %v4186_v41  ;;  %9274 = vrot.lane.b32.xlu2 %v9273_v58, %s9803_s26  ;;  %v4495_v45 = vld [vmem:[#allocation2 + $0x1f9] ss:$2 sm:$0xff]  ;;  %v4432_v23 = vld [vmem:[#allocation2 + $0x1e2] ss:$2 sm:$0xff] }
 0x4d8   :  { %4331 = vst.msk [vmem:[#allocation2 + $0x261] sm:$0xff] %vm2742_vm2, %v4187_v19  ;;  %v9363_v58 = vpack.i.bf16 %v4495_v45, %v4493_v62 }
 0x4d9   :  { %4332 = vst.msk [vmem:[#allocation2 + $0x271] sm:$0xff] %vm2742_vm2, %v4188_v59  ;;  %v4623_v2 = vld [vmem:[#allocation2 + $0x212] ss:$2 sm:$0xff] }
 0x4da   :  { %4333 = vst.msk [vmem:[#allocation2 + $0x279] sm:$0xff] %vm2742_vm2, %v4189_v17  ;;  %v4390_v17 = vld [vmem:[#allocation2 + $0xc1] ss:$2 sm:$0xff] }
 0x4db   :  { %4334 = vst.msk [vmem:[#allocation2 + $0x289] sm:$0xff] %vm2742_vm2, %v4190_v1  ;;  %v4392_v1 = vld [vmem:[#allocation2 + $0xf1] ss:$2 sm:$0xff] }
 0x4dc   :  { %4335 = vst.msk [vmem:[#allocation2 + $0x291] sm:$0xff] %vm2742_vm2, %v4191_v40  ;;  %v4422_v40 = vld [vmem:[#allocation2 + $0xc2] ss:$2 sm:$0xff] }
 0x4dd   :  { %4336 = vst.msk [vmem:[#allocation2 + $0x2a1] sm:$0xff] %vm2742_vm2, %v4192_v22  ;;  %v4424_v22 = vld [vmem:[#allocation2 + $0xf2] ss:$2 sm:$0xff]  ;;  %v4625_v63 = vld [vmem:[#allocation2 + $0x242] ss:$2 sm:$0xff] }
 0x4de   :  { %4337 = vst.msk [vmem:[#allocation2 + $0x2a9] sm:$0xff] %vm2742_vm2, %v4193_v57  ;;  %v4617_v57 = vld [vmem:[#allocation2 + $0x152] ss:$2 sm:$0xff]  ;;  %v4436_v60 = vld [vmem:[#allocation2 + $0x242] ss:$2 sm:$0xff] }
 0x4df   :  { %4338 = vst.msk [vmem:[#allocation2 + $0x2b9] sm:$0xff] %vm2742_vm2, %v4194_v48  ;;  %v9278_v48 = vpack.i.bf16 %v4392_v1, %v4390_v17  ;;  %v4589_v17 = vld [vmem:[#allocation2 + $0x1e1] ss:$2 sm:$0xff]  ;;  %v4591_v1 = vld [vmem:[#allocation2 + $0x211] ss:$2 sm:$0xff] }
 0x4e0   :  { %4339 = vst.msk [vmem:[#allocation2 + $0x2c1] sm:$0xff] %vm2742_vm2, %v4195_v37  ;;  %v9283_v37 = vpack.i.bf16 %v4424_v22, %v4422_v40  ;;  %v4527_v40 = vld [vmem:[#allocation2 + $0x1fa] ss:$2 sm:$0xff]  ;;  %v7893_v22 = vld [vmem:[%s15679_s2 + $0x30] sm:$0xff] }
 0x4e1   :  { %4340 = vst.msk [vmem:[#allocation2 + $0x2d1] sm:$0xff] %vm2742_vm2, %v4196_v55  ;;  %v5206_v55 = vpack.c.bf16 %v4619_v14, %v4617_v57  ;;  %v4627_v7 = vld [vmem:[#allocation2 + $0x272] ss:$2 sm:$0xff]  ;;  %v9378_v14 = vpack.i.bf16 %v4591_v1, %v4589_v17 }
 0x4e2   :  { %4341 = vst.msk [vmem:[#allocation2 + $0x2d9] sm:$0xff] %vm2742_vm2, %v4197_v18  ;;  %v5210_v26 = vpack.c.bf16 %v4627_v7, %v4625_v63  ;;  %v4438_v32 = vld [vmem:[#allocation2 + $0x272] ss:$2 sm:$0xff] }
 0x4e3   :  { %4342 = vst.msk [vmem:[#allocation2 + $0x2e9] sm:$0xff] %vm2742_vm2, %v4198_v4  ;;  %v7887_v63 = vld [vmem:[%s15679_s2] sm:$0xff]  ;;  %v4533_v62 = vld [vmem:[#allocation2 + $0x28a] ss:$2 sm:$0xff] }
 0x4e4   :  { %4343 = vst.msk [vmem:[#allocation2 + $0x2f1] sm:$0xff] %vm2742_vm2, %v4199_v25  ;;  %v4485_v25 = vld [vmem:[#allocation2 + $0xd9] ss:$2 sm:$0xff]  ;;  %7806 = vmatmul.msk.bf16.gmra.mxu2 %vm2742_vm2, %v5206_v55 }
 0x4e5   :  { %4344 = vst.msk [vmem:[#allocation2 + $0x301] sm:$0xff] %vm2742_vm2, %v4200_v20  ;;  %v4487_v20 = vld [vmem:[#allocation2 + $0x109] ss:$2 sm:$0xff]  ;;  %v4440_v0 = vld [vmem:[#allocation2 + $0x2a2] ss:$2 sm:$0xff] }
 0x4e6   :  { %4345 = vst.msk [vmem:[#allocation2 + $0x309] sm:$0xff] %vm2742_vm2, %v4201_v28  ;;  %v4517_v28 = vld [vmem:[#allocation2 + $0xda] ss:$2 sm:$0xff]  ;;  %v9293_v47 = vpack.i.bf16 %v4487_v20, %v4485_v25 }
 0x4e7   :  { %4346 = vst.msk [vmem:[#allocation2 + $0x319] sm:$0xff] %vm2742_vm2, %v4202_v16  ;;  %v4519_v16 = vld [vmem:[#allocation2 + $0x10a] ss:$2 sm:$0xff]  ;;  %v4535_v45 = vld [vmem:[#allocation2 + $0x2ba] ss:$2 sm:$0xff] }
 0x4e8   :  { %4347 = vst.msk [vmem:[#allocation2 + $0x321] sm:$0xff] %vm2742_vm2, %v4203_v43  ;;  %v7892_v20 = vld [vmem:[%s15679_s2 + $0x28] sm:$0xff] }
 0x4e9   :  { %4348 = vst.msk [vmem:[#allocation2 + $0x331] sm:$0xff] %vm2742_vm2, %v4204_v10  ;;  %v9298_v10 = vpack.i.bf16 %v4519_v16, %v4517_v28 }
 0x4ea   :  { %4222 = vst.msk [vmem:[#allocation2 + $0x18] sm:$0x1] %vm4221_vm14, %v9800_v6 }
 0x4eb   :  { %4224 = vst.msk [vmem:[#allocation2 + $0x48] sm:$0x1] %vm4221_vm14, %v9800_v6 }
 0x4ec   :  { %4223 = vst.msk [vmem:[#allocation2 + $0x30] sm:$0x1] %vm4221_vm14, %v9800_v6 }
 0x4ed   :  { %4225 = vst.msk [vmem:[#allocation2 + $0x60] sm:$0x1] %vm4221_vm14, %v9800_v6 }
 0x4ee   :  { %4226 = vst.msk [vmem:[#allocation2 + $0x78] sm:$0x1] %vm4221_vm14, %v9800_v6 }
 0x4ef   :  { %4227 = vst.msk [vmem:[#allocation2 + $0x90] sm:$0x1] %vm4221_vm14, %v9800_v6 }
 0x4f0   :  { %4228 = vst.msk [vmem:[#allocation2 + $0xa8] sm:$0x1] %vm4221_vm14, %v9800_v6 }
 0x4f1   :  { %v4445_v27 = vld [vmem:[#allocation2 + $0x18] ss:$2 sm:$0xff]  ;;  %4229 = vst.msk [vmem:[#allocation2 + $0xc0] sm:$0x1] %vm4221_vm14, %v9800_v6 }
 0x4f2   :  { %v4447_v5 = vld [vmem:[#allocation2 + $0x48] ss:$2 sm:$0xff]  ;;  %4230 = vst.msk [vmem:[#allocation2 + $0xd8] sm:$0x1] %vm4221_vm14, %v9800_v6 }
 0x4f3   :  { %v9218_v3 = vpack.i.bf16 %v4447_v5, %v4445_v27  ;;  %4231 = vst.msk [vmem:[#allocation2 + $0xf0] sm:$0x1] %vm4221_vm14, %v9800_v6  ;;  %v4541_v50 = vld [vmem:[#allocation2 + $0x30] ss:$2 sm:$0xff]  ;;  %v4581_v27 = vld [vmem:[#allocation2 + $0xf1] ss:$2 sm:$0xff] }
 0x4f4   :  { %4232 = vst.msk [vmem:[#allocation2 + $0x108] sm:$0x1] %vm4221_vm14, %v9800_v6  ;;  %v4543_v53 = vld [vmem:[#allocation2 + $0x60] ss:$2 sm:$0xff]  ;;  %v4396_v5 = vld [vmem:[#allocation2 + $0x151] ss:$2 sm:$0xff]  ;;  %v9308_v30 = vpack.i.bf16 %v4583_v52, %v4581_v27 }
 0x4f5   :  { %9219 = vrot.lane.b32.xlu0 %v9218_v3, %s9797_s22  ;;  %4233 = vst.msk [vmem:[#allocation2 + $0x120] sm:$0x1] %vm4221_vm14, %v9800_v6  ;;  %v9233_v49 = vpack.i.bf16 %v4543_v53, %v4541_v50  ;;  %v4449_v51 = vld [vmem:[#allocation2 + $0x78] ss:$2 sm:$0xff]  ;;  %v9313_v9 = vpack.i.bf16 %v4396_v5, %v4394_v34 }
 0x4f6   :  { %4234 = vst.msk [vmem:[#allocation2 + $0x138] sm:$0x1] %vm4221_vm14, %v9800_v6  ;;  %v4545_v31 = vld [vmem:[#allocation2 + $0x90] ss:$2 sm:$0xff]  ;;  %v7891_v27 = vld [vmem:[%s15679_s2 + $0x20] sm:$0xff] }
 0x4f7   :  { %4235 = vst.msk [vmem:[#allocation2 + $0x150] sm:$0x1] %vm4221_vm14, %v9800_v6  ;;  %v4451_v15 = vld [vmem:[#allocation2 + $0xa8] ss:$2 sm:$0xff] }
 0x4f8   :  { %4236 = vst.msk [vmem:[#allocation2 + $0x168] sm:$0x1] %vm4221_vm14, %v9800_v6  ;;  %v9253_v24 = vpack.i.bf16 %v4451_v15, %v4449_v51  ;;  %v4547_v12 = vld [vmem:[#allocation2 + $0xc0] ss:$2 sm:$0xff]  ;;  %v4585_v51 = vld [vmem:[#allocation2 + $0x151] ss:$2 sm:$0xff] }
 0x4f9   :  { %4237 = vst.msk [vmem:[#allocation2 + $0x180] sm:$0x1] %vm4221_vm14, %v9800_v6  ;;  %v9268_v41 = vpack.i.bf16 %v4547_v12, %v4545_v31  ;;  %v4453_v19 = vld [vmem:[#allocation2 + $0xd8] ss:$2 sm:$0xff]  ;;  %v4587_v15 = vld [vmem:[#allocation2 + $0x181] ss:$2 sm:$0xff] }
 0x4fa   :  { %4238 = vst.msk [vmem:[#allocation2 + $0x1c8] sm:$0x1] %vm4221_vm14, %v9800_v6  ;;  %9254 = vrot.lane.b32.xlu1 %v9253_v24, %s9797_s22  ;;  %v4549_v18 = vld [vmem:[#allocation2 + $0xf0] ss:$2 sm:$0xff]  ;;  %v9343_v24 = vpack.i.bf16 %v4587_v15, %v4585_v51  ;;  %v4406_v51 = vld [vmem:[#allocation2 + $0x271] ss:$2 sm:$0xff] }
 0x4fb   :  { %4239 = vst.msk [vmem:[#allocation2 + $0x1e0] sm:$0x1] %vm4221_vm14, %v9800_v6  ;;  %v4455_v59 = vld [vmem:[#allocation2 + $0x108] ss:$2 sm:$0xff]  ;;  %v4408_v15 = vld [vmem:[#allocation2 + $0x2a1] ss:$2 sm:$0xff] }
 0x4fc   :  { %4240 = vst.msk [vmem:[#allocation2 + $0x1f8] sm:$0x1] %vm4221_vm14, %v9800_v6  ;;  %v9288_v35 = vpack.i.bf16 %v4455_v59, %v4453_v19  ;;  %v4551_v4 = vld [vmem:[#allocation2 + $0x120] ss:$2 sm:$0xff]  ;;  %v7894_v19 = vld [vmem:[%s15679_s2 + $0x38] sm:$0xff] }
 0x4fd   :  { %4241 = vst.msk [vmem:[#allocation2 + $0x210] sm:$0x1] %vm4221_vm14, %v9800_v6  ;;  %9234 = vrot.lane.b32.xlu0 %v9233_v49, %s9802_s8  ;;  %v9303_v43 = vpack.i.bf16 %v4551_v4, %v4549_v18  ;;  %v4621_v3 = vld [vmem:[#allocation2 + $0x1e2] ss:$2 sm:$0xff]  ;;  %5311 = vmatpush.bf16.msra.mxu1 %v7894_v19 }
 0x4fe   :  { %4242 = vst.msk [vmem:[#allocation2 + $0x228] sm:$0x1] %vm4221_vm14, %v9800_v6  ;;  %9289 = vrot.lane.b32.xlu2 %v9288_v35, %s9797_s22  ;;  %v5208_v33 = vpack.c.bf16 %v4623_v2, %v4621_v3  ;;  %v4457_v50 = vld [vmem:[#allocation2 + $0x138] ss:$2 sm:$0xff]  ;;  %v4497_v2 = vld [vmem:[#allocation2 + $0x229] ss:$2 sm:$0xff] }
 0x4ff   :  { %4243 = vst.msk [vmem:[#allocation2 + $0x240] sm:$0x1] %vm4221_vm14, %v9800_v6  ;;  %v4459_v53 = vld [vmem:[#allocation2 + $0x168] ss:$2 sm:$0xff] }
 0x500   :  { %4244 = vst.msk [vmem:[#allocation2 + $0x258] sm:$0x1] %vm4221_vm14, %v9800_v6  ;;  %7807 = vmatmul.msk.bf16.gmra.mxu2 %vm2742_vm2, %v5208_v33  ;;  %v9323_v49 = vpack.i.bf16 %v4459_v53, %v4457_v50  ;;  %v4553_v11 = vld [vmem:[#allocation2 + $0x150] ss:$2 sm:$0xff]  ;;  %v4555_v56 = vld [vmem:[#allocation2 + $0x180] ss:$2 sm:$0xff] }
 0x501   :  { %4245 = vst.msk [vmem:[#allocation2 + $0x270] sm:$0x1] %vm4221_vm14, %v9800_v6  ;;  %v4461_v31 = vld [vmem:[#allocation2 + $0x1c8] ss:$2 sm:$0xff]  ;;  %5312 = vmatpush.bf16.msra.mxu1 %v7893_v22 }
 0x502   :  { %4246 = vst.msk [vmem:[#allocation2 + $0x288] sm:$0x1] %vm4221_vm14, %v9800_v6  ;;  %9269 = vrot.lane.b32.xlu1 %v9268_v41, %s9802_s8  ;;  %v4525_v59 = vld [vmem:[#allocation2 + $0x1ca] ss:$2 sm:$0xff]  ;;  %v4531_v33 = vld [vmem:[#allocation2 + $0x25a] ss:$2 sm:$0xff] }
 0x503   :  { %4247 = vst.msk [vmem:[#allocation2 + $0x2a0] sm:$0x1] %vm4221_vm14, %v9800_v6  ;;  %v4463_v12 = vld [vmem:[#allocation2 + $0x1f8] ss:$2 sm:$0xff]  ;;  %v9368_v55 = vpack.i.bf16 %v4527_v40, %v4525_v59 }
 0x504   :  { %4248 = vst.msk [vmem:[#allocation2 + $0x2b8] sm:$0x1] %vm4221_vm14, %v9800_v6  ;;  %v9358_v41 = vpack.i.bf16 %v4463_v12, %v4461_v31  ;;  %v4557_v35 = vld [vmem:[#allocation2 + $0x1e0] ss:$2 sm:$0xff]  ;;  %v4559_v57 = vld [vmem:[#allocation2 + $0x210] ss:$2 sm:$0xff] }
 0x505   :  { %4249 = vst.msk [vmem:[#allocation2 + $0x2d0] sm:$0x1] %vm4221_vm14, %v9800_v6  ;;  %9249 = vrot.lane.b32.xlu0 %v9248_v8, %s9794_s29  ;;  %v9338_v8 = vpack.i.bf16 %v4555_v56, %v4553_v11  ;;  %v9373_v18 = vpack.i.bf16 %v4559_v57, %v4557_v35  ;;  %v4465_v28 = vld [vmem:[#allocation2 + $0x228] ss:$2 sm:$0xff]  ;;  %5313 = vmatpush.bf16.msra.mxu1 %v7892_v20  ;;  %v4593_v11 = vld [vmem:[#allocation2 + $0x241] ss:$2 sm:$0xff] }
 0x506   :  { %4250 = vst.msk [vmem:[#allocation2 + $0x2e8] sm:$0x1] %vm4221_vm14, %v9800_v6  ;;  %9304 = vrot.lane.b32.xlu2 %v9303_v43, %s9802_s8  ;;  %v4402_v43 = vld [vmem:[#allocation2 + $0x211] ss:$2 sm:$0xff]  ;;  %v4633_v50 = vld [vmem:[#allocation2 + $0x302] ss:$2 sm:$0xff] }
 0x507   :  { %4251 = vst.msk [vmem:[#allocation2 + $0x300] sm:$0x1] %vm4221_vm14, %v9800_v6  ;;  %v14366_v4 = vpop.permute.xlu2 %9214  ;;  %v4467_v16 = vld [vmem:[#allocation2 + $0x258] ss:$2 sm:$0xff]  ;;  %v4595_v56 = vld [vmem:[#allocation2 + $0x271] ss:$2 sm:$0xff] }
 0x508   :  { %4252 = vst.msk [vmem:[#allocation2 + $0x318] sm:$0x1] %vm4221_vm14, %v9800_v6  ;;  %v9393_v44 = vpack.i.bf16 %v4467_v16, %v4465_v28  ;;  %v4563_v3 = vld [vmem:[#allocation2 + $0x270] ss:$2 sm:$0xff]  ;;  %v9413_v7 = vpack.i.bf16 %v4595_v56, %v4593_v11  ;;  %v4501_v31 = vld [vmem:[#allocation2 + $0x289] ss:$2 sm:$0xff]  ;;  %v9217_v57 = vunpack.i.h.bf16 %v14366_v4 }
 0x509   :  { %4253 = vst.msk [vmem:[#allocation2 + $0x330] sm:$0x1] %vm4221_vm14, %v9800_v6  ;;  %5314 = vmatpush.bf16.msra.mxu1 %v7891_v27  ;;  %v4635_v53 = vld [vmem:[#allocation2 + $0x332] ss:$2 sm:$0xff]  ;;  %v4503_v12 = vld [vmem:[#allocation2 + $0x2b9] ss:$2 sm:$0xff] }
 0x50a   :  { %9284 = vrot.lane.b32.xlu1 %v9283_v37, %s9794_s29  ;;  %5610 = vst.msk [vmem:[#allocation3 + $0x10] sm:$0x1] %vm4221_vm14, %v9800_v6  ;;  %v4631_v37 = vld [vmem:[#allocation2 + $0x2d2] ss:$2 sm:$0xff]  ;;  %v9433_v17 = vpack.i.bf16 %v4503_v12, %v4501_v31  ;;  %v4601_v12 = vld [vmem:[#allocation2 + $0x301] ss:$2 sm:$0xff] }
 0x50b   :  { %5611 = vst.msk [vmem:[#allocation3 + $0x20] sm:$0x1] %vm4221_vm14, %v9800_v6  ;;  %v4350_v19 = vld [vmem:[#allocation2] ss:$2 sm:$0xff]  ;;  %v4352_v1 = vld [vmem:[#allocation2 + $0x30] ss:$2 sm:$0xff] }
 0x50c   :  { %5612 = vst.msk [vmem:[#allocation3 + $0x30] sm:$0x1] %vm4221_vm14, %v9800_v6  ;;  %v4567_v16 = vld [vmem:[#allocation2 + $0x2d0] ss:$2 sm:$0xff] }
 0x50d   :  { %9264 = vrot.lane.b32.xlu0 %v9263_v29, %s9801_s7  ;;  %5613 = vst.msk [vmem:[#allocation3 + $0x40] sm:$0x1] %vm4221_vm14, %v9800_v6  ;;  %v9353_v29 = vpack.i.bf16 %v4432_v23, %v4430_v13  ;;  %v4469_v13 = vld [vmem:[#allocation2 + $0x288] ss:$2 sm:$0xff]  ;;  %v4471_v23 = vld [vmem:[#allocation2 + $0x2b8] ss:$2 sm:$0xff] }
 0x50e   :  { %9319 = vrot.lane.b32.xlu2 %v9318_v54, %s9794_s29  ;;  %5614 = vst.msk [vmem:[#allocation3 + $0x50] sm:$0x1] %vm4221_vm14, %v9800_v6  ;;  %v4561_v54 = vld [vmem:[#allocation2 + $0x240] ss:$2 sm:$0xff]  ;;  %v9428_v59 = vpack.i.bf16 %v4471_v23, %v4469_v13 }
 0x50f   :  { %5615 = vst.msk [vmem:[#allocation3 + $0x60] sm:$0x1] %vm4221_vm14, %v9800_v6  ;;  %v9408_v21 = vpack.i.bf16 %v4563_v3, %v4561_v54  ;;  %v4473_v56 = vld [vmem:[#allocation2 + $0x2e8] ss:$2 sm:$0xff] }
 0x510   :  { %5616 = vst.msk [vmem:[#allocation3 + $0x70] sm:$0x1] %vm4221_vm14, %v9800_v6  ;;  %7808 = vmatmul.msk.bf16.gmra.mxu2 %vm2742_vm2, %v5210_v26 }
 0x511   :  { %5617 = vst.msk [vmem:[#allocation3 + $0x80] sm:$0x1] %vm4221_vm14, %v9800_v6 }
 0x512   :  { %9299 = vrot.lane.b32.xlu1 %v9298_v10, %s9801_s7  ;;  %5618 = vst.msk [vmem:[#allocation3 + $0xb0] sm:$0x1] %vm4221_vm14, %v9800_v6  ;;  %v4434_v10 = vld [vmem:[#allocation2 + $0x212] ss:$2 sm:$0xff] }
 0x513   :  { %5619 = vst.msk [vmem:[#allocation3 + $0xc0] sm:$0x1] %vm4221_vm14, %v9800_v6  ;;  %v9388_v34 = vpack.i.bf16 %v4436_v60, %v4434_v10  ;;  %v4597_v10 = vld [vmem:[#allocation2 + $0x2a1] ss:$2 sm:$0xff]  ;;  %v4599_v60 = vld [vmem:[#allocation2 + $0x2d1] ss:$2 sm:$0xff] }
 0x514   :  { %5620 = vst.msk [vmem:[#allocation3 + $0xd0] sm:$0x1] %vm4221_vm14, %v9800_v6  ;;  %v9448_v54 = vpack.i.bf16 %v4599_v60, %v4597_v10 }
 0x515   :  { %9279 = vrot.lane.b32.xlu0 %v9278_v48, %s15833_s27  ;;  %5621 = vst.msk [vmem:[#allocation3 + $0xe0] sm:$0x1] %vm4221_vm14, %v9800_v6  ;;  %v4629_v48 = vld [vmem:[#allocation2 + $0x2a2] ss:$2 sm:$0xff] }
 0x516   :  { %9334 = vrot.lane.b32.xlu2 %v9333_v39, %s9801_s7  ;;  %5622 = vst.msk [vmem:[#allocation3 + $0xf0] sm:$0x1] %vm4221_vm14, %v9800_v6  ;;  %v5212_v25 = vpack.c.bf16 %v4631_v37, %v4629_v48  ;;  %v14392_v5 = vpop.permute.xlu2 %9229  ;;  %v4410_v48 = vld [vmem:[#allocation2 + $0x2d1] ss:$2 sm:$0xff]  ;;  %v4412_v37 = vld [vmem:[#allocation2 + $0x301] ss:$2 sm:$0xff] }
 0x517   :  { %5623 = vst.msk [vmem:[#allocation3 + $0x100] sm:$0x1] %vm4221_vm14, %v9800_v6 }
 0x518   :  { %5624 = vst.msk [vmem:[#allocation3 + $0x110] sm:$0x1] %vm4221_vm14, %v9800_v6 }
 0x519   :  { %5625 = vst.msk [vmem:[#allocation3 + $0x120] sm:$0x1] %vm4221_vm14, %v9800_v6 }
 0x51a   :  { %9314 = vrot.lane.b32.xlu1 %v9313_v9, %s15833_s27  ;;  %5626 = vst.msk [vmem:[#allocation3 + $0x19] sm:$0x1] %vm4221_vm14, %v9800_v6  ;;  %v4529_v9 = vld [vmem:[#allocation2 + $0x22a] ss:$2 sm:$0xff] }
 0x51b   :  { %5627 = vst.msk [vmem:[#allocation3 + $0x29] sm:$0x1] %vm4221_vm14, %v9800_v6  ;;  %v9403_v42 = vpack.i.bf16 %v4531_v33, %v4529_v9  ;;  %v9231_v9 = vunpack.i.l.bf16 %v14392_v5 }
 0x51c   :  { %5628 = vst.msk [vmem:[#allocation3 + $0x39] sm:$0x1] %vm4221_vm14, %v9800_v6 }
 0x51d   :  { %9294 = vrot.lane.b32.xlu0 %v9293_v47, %s9799_s23  ;;  %5629 = vst.msk [vmem:[#allocation3 + $0x49] sm:$0x1] %vm4221_vm14, %v9800_v6  ;;  %v4404_v47 = vld [vmem:[#allocation2 + $0x241] ss:$2 sm:$0xff] }
 0x51e   :  { %9349 = vrot.lane.b32.xlu2 %v9348_v46, %s15833_s27  ;;  %5630 = vst.msk [vmem:[#allocation3 + $0x59] sm:$0x1] %vm4221_vm14, %v9800_v6  ;;  %v9383_v52 = vpack.i.bf16 %v4404_v47, %v4402_v43  ;;  %v14403_v39 = vpop.permute.xlu2 %9244  ;;  %v9423_v46 = vpack.i.bf16 %v4440_v0, %v4438_v32 }
 0x51f   :  { %5631 = vst.msk [vmem:[#allocation3 + $0x69] sm:$0x1] %vm4221_vm14, %v9800_v6  ;;  %v9247_v13 = vunpack.i.h.bf16 %v14403_v39  ;;  %v9246_v23 = vunpack.i.l.bf16 %v14403_v39 }
 0x520   :  { %5632 = vst.msk [vmem:[#allocation3 + $0x79] sm:$0x1] %vm4221_vm14, %v9800_v6  ;;  %7809 = vmatmul.msk.bf16.gmra.mxu2 %vm2742_vm2, %v5212_v25 }
 0x521   :  { %5633 = vst.msk [vmem:[#allocation3 + $0x89] sm:$0x1] %vm4221_vm14, %v9800_v6 }
 0x522   :  { %9329 = vrot.lane.b32.xlu1 %v9328_v36, %s9799_s23  ;;  %5634 = vst.msk [vmem:[#allocation3 + $0xb9] sm:$0x1] %vm4221_vm14, %v9800_v6  ;;  %v7888_v36 = vld [vmem:[%s15679_s2 + $0x8] sm:$0xff] }
 0x523   :  { %5635 = vst.msk [vmem:[#allocation3 + $0xc9] sm:$0x1] %vm4221_vm14, %v9800_v6 }
 0x524   :  { %5636 = vst.msk [vmem:[#allocation3 + $0xd9] sm:$0x1] %vm4221_vm14, %v9800_v6 }
 0x525   :  { %9309 = vrot.lane.b32.xlu0 %v9308_v30, %s9803_s26  ;;  %5637 = vst.msk [vmem:[#allocation3 + $0xe9] sm:$0x1] %vm4221_vm14, %v9800_v6  ;;  %v4499_v30 = vld [vmem:[#allocation2 + $0x259] ss:$2 sm:$0xff] }
 0x526   :  { %9364 = vrot.lane.b32.xlu2 %v9363_v58, %s9799_s23  ;;  %5638 = vst.msk [vmem:[#allocation3 + $0xf9] sm:$0x1] %vm4221_vm14, %v9800_v6  ;;  %v9398_v61 = vpack.i.bf16 %v4499_v30, %v4497_v2  ;;  %v14415_v26 = vpop.permute.xlu2 %9259  ;;  %v9232_v30 = vunpack.i.h.bf16 %v14392_v5  ;;  %v4444_v5 = vld [vmem:[#allocation2 + $0x302] ss:$2 sm:$0xff] }
 0x527   :  { %5639 = vst.msk [vmem:[#allocation3 + $0x109] sm:$0x1] %vm4221_vm14, %v9800_v6  ;;  %v9262_v10 = vunpack.i.h.bf16 %v14415_v26  ;;  %v9261_v60 = vunpack.i.l.bf16 %v14415_v26 }
 0x528   :  { %5640 = vst.msk [vmem:[#allocation3 + $0x119] sm:$0x1] %vm4221_vm14, %v9800_v6 }
 0x529   :  { %5641 = vst.msk [vmem:[#allocation3 + $0x129] sm:$0x1] %vm4221_vm14, %v9800_v6  ;;  %v7890_v6 = vld [vmem:[%s15679_s2 + $0x18] sm:$0xff] }
 0x52a   :  { %9344 = vrot.lane.b32.xlu1 %v9343_v24, %s9803_s26  ;;  %5315 = vmatpush.bf16.msra.mxu1 %v7890_v6  ;;  %v9210_v24 = vpop.permute.xlu1 %9209 }
 0x52b   :  { %v9212_v58 = vunpack.i.h.bf16 %v9210_v24 }
 0x52d   :  { %9324 = vrot.lane.b32.xlu0 %v9323_v49, %s9797_s22  ;;  %v5214_v49 = vpack.c.bf16 %v4635_v53, %v4633_v50  ;;  %v5085_v22 = vsel %vm2742_vm2, %v4352_v1, %v9212_v58  ;;  %v4442_v53 = vld [vmem:[#allocation2 + $0x2d2] ss:$2 sm:$0xff]  ;;  %v4603_v58 = vld [vmem:[#allocation2 + $0x331] ss:$2 sm:$0xff] }
 0x52e   :  { %9379 = vrot.lane.b32.xlu2 %v9378_v14, %s9803_s26  ;;  %5316 = vmatpush.bf16.msra.mxu1 %v7889_v38  ;;  %v9216_v14 = vunpack.i.l.bf16 %v14366_v4  ;;  %v5101_v28 = vsel %vm2872_vm4, %v5085_v22, %v9217_v57  ;;  %v4505_v38 = vld [vmem:[#allocation2 + $0x2e9] ss:$2 sm:$0xff]  ;;  %v4539_v1 = vld [vmem:[#allocation2 + $0x31a] ss:$2 sm:$0xff] }
 0x52f   :  { %v4569_v57 = vld [vmem:[#allocation2 + $0x300] ss:$2 sm:$0xff] }
 0x530   :  { %7810 = vmatmul.msk.bf16.gmra.mxu2 %vm2742_vm2, %v5214_v49 }
 0x531   :  { %v14422_v35 = vpop.permute.xlu2 %9274 }
 0x532   :  { %9359 = vrot.lane.b32.xlu1 %v9358_v41, %s9797_s22  ;;  %5317 = vmatpush.bf16.msra.mxu1 %v7888_v36  ;;  %v9438_v41 = vpack.i.bf16 %v4535_v45, %v4533_v62  ;;  %v9225_v25 = vpop.permute.xlu1 %9224  ;;  %v9276_v26 = vunpack.i.l.bf16 %v14422_v35 }
 0x533   :  { %v9227_v43 = vunpack.i.h.bf16 %v9225_v25  ;;  %v9226_v47 = vunpack.i.l.bf16 %v9225_v25 }
 0x535   :  { %9339 = vrot.lane.b32.xlu0 %v9338_v8, %s9802_s8  ;;  %v9418_v8 = vpack.i.bf16 %v4408_v15, %v4406_v51  ;;  %v4475_v51 = vld [vmem:[#allocation2 + $0x318] ss:$2 sm:$0xff] }
 0x536   :  { %9394 = vrot.lane.b32.xlu2 %v9393_v44, %s9797_s22  ;;  %5318 = vmatpush.bf16.msra.mxu1 %v7887_v63 }
 0x53a   :  { %9374 = vrot.lane.b32.xlu1 %v9373_v18, %s9802_s8  ;;  %v4565_v18 = vld [vmem:[#allocation2 + $0x2a0] ss:$2 sm:$0xff] }
 0x53b   :  { %v9443_v6 = vpack.i.bf16 %v4567_v16, %v4565_v18 }
 0x53d   :  { %9354 = vrot.lane.b32.xlu0 %v9353_v29, %s9794_s29  ;;  %v9211_v29 = vunpack.i.l.bf16 %v9210_v24 }
 0x53e   :  { %9409 = vrot.lane.b32.xlu2 %v9408_v21, %s9802_s8  ;;  %v4507_v21 = vld [vmem:[#allocation2 + $0x319] ss:$2 sm:$0xff] }
 0x53f   :  { %v5084_v40 = vsel %vm2742_vm2, %v4350_v19, %v9211_v29  ;;  %v9468_v15 = vpack.i.bf16 %v4507_v21, %v4505_v38 }
 0x540   :  { %v5100_v20 = vsel %vm2872_vm4, %v5084_v40, %v9216_v14  ;;  %v4571_v14 = vld [vmem:[#allocation2 + $0x330] ss:$2 sm:$0xff] }
 0x541   :  { %v9478_v16 = vpack.i.bf16 %v4571_v14, %v4569_v57 }
 0x542   :  { %9389 = vrot.lane.b32.xlu1 %v9388_v34, %s9794_s29 }
 0x545   :  { %9369 = vrot.lane.b32.xlu0 %v9368_v55, %s9801_s7 }
 0x546   :  { %9424 = vrot.lane.b32.xlu2 %v9423_v46, %s9794_s29 }
 0x54a   :  { %9404 = vrot.lane.b32.xlu1 %v9403_v42, %s9801_s7 }
 0x54d   :  { %9384 = vrot.lane.b32.xlu0 %v9383_v52, %s15833_s27  ;;  %v9453_v52 = vpack.i.bf16 %v4412_v37, %v4410_v48  ;;  %v4354_v48 = vld [vmem:[#allocation2 + $0x60] ss:$2 sm:$0xff]  ;;  %v4356_v37 = vld [vmem:[#allocation2 + $0x90] ss:$2 sm:$0xff] }
 0x54e   :  { %9439 = vrot.lane.b32.xlu2 %v9438_v41, %s9801_s7  ;;  %v4537_v41 = vld [vmem:[#allocation2 + $0x2ea] ss:$2 sm:$0xff]  ;;  %v5087_v39 = vsel %vm2742_vm2, %v4356_v37, %v9247_v13  ;;  %v5086_v18 = vsel %vm2742_vm2, %v4354_v48, %v9246_v23 }
 0x552   :  { %9419 = vrot.lane.b32.xlu1 %v9418_v8, %s15833_s27  ;;  %v9463_v8 = vpack.i.bf16 %v4475_v51, %v4473_v56  ;;  %v4358_v56 = vld [vmem:[#allocation2 + $0xc0] ss:$2 sm:$0xff]  ;;  %v4360_v51 = vld [vmem:[#allocation2 + $0xf0] ss:$2 sm:$0xff] }
 0x555   :  { %9399 = vrot.lane.b32.xlu0 %v9398_v61, %s9799_s23  ;;  %v9240_v61 = vpop.permute.xlu1 %9239 }
 0x556   :  { %9454 = vrot.lane.b32.xlu2 %v9453_v52, %s15833_s27  ;;  %v9242_v0 = vunpack.i.h.bf16 %v9240_v61  ;;  %v9241_v11 = vunpack.i.l.bf16 %v9240_v61 }
 0x558   :  { %v14437_v33 = vpop.permute.xlu2 %9289 }
 0x55a   :  { %9434 = vrot.lane.b32.xlu1 %v9433_v17, %s9799_s23 }
 0x55d   :  { %9414 = vrot.lane.b32.xlu0 %v9413_v7, %s9803_s26  ;;  %v9458_v7 = vpack.i.bf16 %v4444_v5, %v4442_v53 }
 0x55e   :  { %9469 = vrot.lane.b32.xlu2 %v9468_v15, %s9799_s23 }
 0x560   :  { %v14450_v31 = vpop.permute.xlu2 %9304 }
 0x562   :  { %9449 = vrot.lane.b32.xlu1 %v9448_v54, %s9803_s26 }
 0x565   :  { %9429 = vrot.lane.b32.xlu0 %v9428_v59, %s9797_s22 }
 0x567   :  { %v9220_v55 = vpop.permute.xlu0 %9219 }
 0x568   :  { %v9222_v44 = vunpack.i.h.bf16 %v9220_v55  ;;  %v9221_v27 = vunpack.i.l.bf16 %v9220_v55  ;;  %v9483_v55 = vpack.i.bf16 %v4603_v58, %v4601_v12  ;;  %v14465_v54 = vpop.permute.xlu2 %9319 }
 0x56a   :  { %v5117_v34 = vsel %vm3002_vm6, %v5101_v28, %v9222_v44  ;;  %v5116_v4 = vsel %vm3002_vm6, %v5100_v20, %v9221_v27  ;;  %9464 = vrot.lane.b32.xlu1 %v9463_v8, %s9797_s22  ;;  %v9473_v28 = vpack.i.bf16 %v4539_v1, %v4537_v41  ;;  %9484 = vrot.lane.b32.xlu2 %v9483_v55, %s9803_s26  ;;  %v9292_v8 = vunpack.i.h.bf16 %v14437_v33 }
 0x56b   :  { %v5132_v3 = vsel %vm3132_vm8, %v5116_v4, %v9226_v47  ;;  %v5133_v2 = vsel %vm3132_vm8, %v5117_v34, %v9227_v43 }
 0x56c   :  { %v5149_v42 = vsel %vm5148_vm15, %v5132_v3, %v9231_v9  ;;  %v5150_v49 = vsel %vm5148_vm15, %v5133_v2, %v9232_v30  ;;  %v9255_v19 = vpop.permute.xlu1 %9254  ;;  %v9277_v30 = vunpack.i.h.bf16 %v14422_v35 }
 0x56d   :  { %9444 = vrot.lane.b32.xlu0 %v9443_v6, %s9802_s8  ;;  %v9257_v40 = vunpack.i.h.bf16 %v9255_v19  ;;  %v9256_v22 = vunpack.i.l.bf16 %v9255_v19 }
 0x56f   :  { %v9235_v50 = vpop.permute.xlu0 %9234 }
 0x570   :  { %v9237_v36 = vunpack.i.h.bf16 %v9235_v50  ;;  %v9236_v32 = vunpack.i.l.bf16 %v9235_v50 }
 0x572   :  { %v5166_v46 = vsel %vm5165_vm3, %v5149_v42, %v9236_v32  ;;  %v5167_v63 = vsel %vm5165_vm3, %v5150_v49, %v9237_v36  ;;  %9479 = vrot.lane.b32.xlu1 %v9478_v16, %s9802_s8 }
 0x573   :  { %v5183_v24 = vsel %vm5182_vm5, %v5166_v46, %v9241_v11  ;;  %v5184_v62 = vsel %vm5182_vm5, %v5167_v63, %v9242_v0  ;;  %v9335_v11 = vpop.permute.xlu2 %9334 }
 0x574   :  { %v5199_v45 = vpack.c.bf16 %v5184_v62, %v5183_v24  ;;  %v9270_v34 = vpop.permute.xlu1 %9269  ;;  %v9291_v24 = vunpack.i.l.bf16 %v14437_v33 }
 0x575   :  { %9459 = vrot.lane.b32.xlu0 %v9458_v7, %s9794_s29  ;;  %v9272_v3 = vunpack.i.h.bf16 %v9270_v34  ;;  %v9271_v2 = vunpack.i.l.bf16 %v9270_v34 }
 0x576   :  { %5319 = vmatmul.bf16.vlgmr.msra.gmra.mxu1 %v5199_v45 }
 0x577   :  { %v9250_v29 = vpop.permute.xlu0 %9249 }
 0x578   :  { %v9252_v59 = vunpack.i.h.bf16 %v9250_v29  ;;  %v9251_v17 = vunpack.i.l.bf16 %v9250_v29 }
 0x57a   :  { %v5103_v25 = vsel %vm2872_vm4, %v5087_v39, %v9252_v59  ;;  %v5102_v20 = vsel %vm2872_vm4, %v5086_v18, %v9251_v17 }
 0x57b   :  { %v5118_v43 = vsel %vm3002_vm6, %v5102_v20, %v9256_v22  ;;  %v5119_v47 = vsel %vm3002_vm6, %v5103_v25, %v9257_v40  ;;  %v14485_v17 = vpop.permute.xlu2 %9349  ;;  %v9307_v40 = vunpack.i.h.bf16 %v14450_v31  ;;  %v9306_v22 = vunpack.i.l.bf16 %v14450_v31 }
 0x57c   :  { %v5134_v27 = vsel %vm3132_vm8, %v5118_v43, %v9261_v60  ;;  %v5135_v52 = vsel %vm3132_vm8, %v5119_v47, %v9262_v10  ;;  %v9285_v36 = vpop.permute.xlu1 %9284  ;;  %v4362_v43 = vld [vmem:[#allocation2 + $0x120] ss:$2 sm:$0xff]  ;;  %v4364_v47 = vld [vmem:[#allocation2 + $0x150] ss:$2 sm:$0xff]  ;;  %v9322_v60 = vunpack.i.h.bf16 %v14465_v54 }
 0x57d   :  { %9474 = vrot.lane.b32.xlu0 %v9473_v28, %s9801_s7  ;;  %v9287_v0 = vunpack.i.h.bf16 %v9285_v36  ;;  %v9286_v35 = vunpack.i.l.bf16 %v9285_v36 }
 0x57f   :  { %v9265_v44 = vpop.permute.xlu0 %9264 }
 0x580   :  { %v9267_v4 = vunpack.i.h.bf16 %v9265_v44  ;;  %v9266_v6 = vunpack.i.l.bf16 %v9265_v44  ;;  %v9321_v44 = vunpack.i.l.bf16 %v14465_v54  ;;  %v9337_v54 = vunpack.i.h.bf16 %v9335_v11 }
 0x582   :  { %v5151_v9 = vsel %vm5148_vm15, %v5134_v27, %v9266_v6  ;;  %v5152_v38 = vsel %vm5148_vm15, %v5135_v52, %v9267_v4 }
 0x583   :  { %v5168_v21 = vsel %vm5165_vm3, %v5151_v9, %v9271_v2  ;;  %v5169_v50 = vsel %vm5165_vm3, %v5152_v38, %v9272_v3  ;;  %v9365_v27 = vpop.permute.xlu2 %9364 }
 0x584   :  { %v5185_v53 = vsel %vm5182_vm5, %v5168_v21, %v9276_v26  ;;  %v5186_v61 = vsel %vm5182_vm5, %v5169_v50, %v9277_v30  ;;  %v9300_v45 = vpop.permute.xlu1 %9299 }
 0x585   :  { %v5201_v42 = vpack.c.bf16 %v5186_v61, %v5185_v53  ;;  %v9302_v29 = vunpack.i.h.bf16 %v9300_v45  ;;  %v9301_v41 = vunpack.i.l.bf16 %v9300_v45  ;;  %v9336_v53 = vunpack.i.l.bf16 %v9335_v11 }
 0x587   :  { %v9280_v49 = vpop.permute.xlu0 %9279  ;;  %5324 = vmatmul.bf16.gmra.mxu1 %v5201_v42 }
 0x588   :  { %v9282_v32 = vunpack.i.h.bf16 %v9280_v49  ;;  %v9281_v5 = vunpack.i.l.bf16 %v9280_v49 }
 0x58a   :  { %v5089_v15 = vsel %vm2742_vm2, %v4360_v51, %v9282_v32  ;;  %v5088_v46 = vsel %vm2742_vm2, %v4358_v56, %v9281_v5 }
 0x58b   :  { %v5104_v63 = vsel %vm2872_vm4, %v5088_v46, %v9286_v35  ;;  %v5105_v7 = vsel %vm2872_vm4, %v5089_v15, %v9287_v0  ;;  %v9380_v32 = vpop.permute.xlu2 %9379 }
 0x58c   :  { %v5120_v13 = vsel %vm3002_vm6, %v5104_v63, %v9291_v24  ;;  %v5121_v23 = vsel %vm3002_vm6, %v5105_v7, %v9292_v8  ;;  %v9315_v14 = vpop.permute.xlu1 %9314  ;;  %v9352_v7 = vunpack.i.h.bf16 %v14485_v17  ;;  %v9351_v8 = vunpack.i.l.bf16 %v14485_v17  ;;  %v4366_v24 = vld [vmem:[#allocation2 + $0x1b0] ss:$2 sm:$0xff] }
 0x58d   :  { %v9317_v18 = vunpack.i.h.bf16 %v9315_v14  ;;  %v9316_v25 = vunpack.i.l.bf16 %v9315_v14 }
 0x58f   :  { %v9295_v62 = vpop.permute.xlu0 %9294  ;;  %v5091_v10 = vsel %vm2742_vm2, %v4364_v47, %v9317_v18  ;;  %v5090_v31 = vsel %vm2742_vm2, %v4362_v43, %v9316_v25 }
 0x590   :  { %v9297_v12 = vunpack.i.h.bf16 %v9295_v62  ;;  %v9296_v58 = vunpack.i.l.bf16 %v9295_v62  ;;  %v5106_v4 = vsel %vm2872_vm4, %v5090_v31, %v9321_v44  ;;  %v5107_v6 = vsel %vm2872_vm4, %v5091_v10, %v9322_v60 }
 0x592   :  { %v5136_v19 = vsel %vm3132_vm8, %v5120_v13, %v9296_v58  ;;  %v5137_v59 = vsel %vm3132_vm8, %v5121_v23, %v9297_v12 }
 0x593   :  { %v5153_v1 = vsel %vm5148_vm15, %v5136_v19, %v9301_v41  ;;  %v5154_v33 = vsel %vm5148_vm15, %v5137_v59, %v9302_v29  ;;  %v4368_v29 = vld [vmem:[#allocation2 + $0x1e0] ss:$2 sm:$0xff]  ;;  %v5092_v19 = vsel %vm2742_vm2, %v4366_v24, %v9351_v8  ;;  %v9395_v59 = vpop.permute.xlu2 %9394 }
 0x594   :  { %v5170_v48 = vsel %vm5165_vm3, %v5153_v1, %v9306_v22  ;;  %v5171_v37 = vsel %vm5165_vm3, %v5154_v33, %v9307_v40  ;;  %v9330_v34 = vpop.permute.xlu1 %9329  ;;  %v5093_v41 = vsel %vm2742_vm2, %v4368_v29, %v9352_v7  ;;  %v9367_v22 = vunpack.i.h.bf16 %v9365_v27 }
 0x595   :  { %v9332_v3 = vunpack.i.h.bf16 %v9330_v34  ;;  %v9331_v2 = vunpack.i.l.bf16 %v9330_v34 }
 0x597   :  { %v9310_v57 = vpop.permute.xlu0 %9309 }
 0x598   :  { %v9312_v55 = vunpack.i.h.bf16 %v9310_v57  ;;  %v9311_v39 = vunpack.i.l.bf16 %v9310_v57  ;;  %v9366_v57 = vunpack.i.l.bf16 %v9365_v27 }
 0x59a   :  { %v5187_v20 = vsel %vm5182_vm5, %v5170_v48, %v9311_v39  ;;  %v5188_v28 = vsel %vm5182_vm5, %v5171_v37, %v9312_v55 }
 0x59b   :  { %v5203_v16 = vpack.c.bf16 %v5188_v28, %v5187_v20  ;;  %v9382_v28 = vunpack.i.h.bf16 %v9380_v32  ;;  %v9410_v60 = vpop.permute.xlu2 %9409 }
 0x59c   :  { %v9345_v42 = vpop.permute.xlu1 %9344  ;;  %v9412_v7 = vunpack.i.h.bf16 %v9410_v60  ;;  %v9411_v8 = vunpack.i.l.bf16 %v9410_v60 }
 0x59d   :  { %5329 = vmatmul.bf16.gmra.mxu1 %v5203_v16  ;;  %v9347_v35 = vunpack.i.h.bf16 %v9345_v42  ;;  %v9346_v56 = vunpack.i.l.bf16 %v9345_v42  ;;  %v9381_v16 = vunpack.i.l.bf16 %v9380_v32 }
 0x59f   :  { %v9325_v52 = vpop.permute.xlu0 %9324 }
 0x5a0   :  { %v9327_v30 = vunpack.i.h.bf16 %v9325_v52  ;;  %v9326_v26 = vunpack.i.l.bf16 %v9325_v52 }
 0x5a2   :  { %v5123_v9 = vsel %vm3002_vm6, %v5107_v6, %v9327_v30  ;;  %v5122_v38 = vsel %vm3002_vm6, %v5106_v4, %v9326_v26  ;;  %v4370_v26 = vld [vmem:[#allocation2 + $0x210] ss:$2 sm:$0xff] }
 0x5a3   :  { %v5138_v21 = vsel %vm3132_vm8, %v5122_v38, %v9331_v2  ;;  %v5139_v50 = vsel %vm3132_vm8, %v5123_v9, %v9332_v3  ;;  %v4372_v9 = vld [vmem:[#allocation2 + $0x240] ss:$2 sm:$0xff]  ;;  %v9425_v42 = vpop.permute.xlu2 %9424 }
 0x5a4   :  { %v5155_v49 = vsel %vm5148_vm15, %v5138_v21, %v9336_v53  ;;  %v5156_v36 = vsel %vm5148_vm15, %v5139_v50, %v9337_v54  ;;  %v9360_v45 = vpop.permute.xlu1 %9359  ;;  %v9397_v53 = vunpack.i.h.bf16 %v9395_v59 }
 0x5a5   :  { %v9362_v12 = vunpack.i.h.bf16 %v9360_v45  ;;  %v9361_v58 = vunpack.i.l.bf16 %v9360_v45 }
 0x5a7   :  { %v9340_v61 = vpop.permute.xlu0 %9339 }
 0x5a8   :  { %v9342_v5 = vunpack.i.h.bf16 %v9340_v61  ;;  %v9341_v0 = vunpack.i.l.bf16 %v9340_v61  ;;  %v9396_v61 = vunpack.i.l.bf16 %v9395_v59 }
 0x5aa   :  { %v5172_v51 = vsel %vm5165_vm3, %v5155_v49, %v9341_v0  ;;  %v5173_v15 = vsel %vm5165_vm3, %v5156_v36, %v9342_v5 }
 0x5ab   :  { %v5189_v46 = vsel %vm5182_vm5, %v5172_v51, %v9346_v56  ;;  %v5190_v63 = vsel %vm5182_vm5, %v5173_v15, %v9347_v35 }
 0x5ac   :  { %v5205_v11 = vpack.c.bf16 %v5190_v63, %v5189_v46  ;;  %v9375_v55 = vpop.permute.xlu1 %9374 }
 0x5ad   :  { %v9377_v25 = vunpack.i.h.bf16 %v9375_v55  ;;  %v9376_v20 = vunpack.i.l.bf16 %v9375_v55 }
 0x5ae   :  { %5334 = vmatmul.bf16.gmra.mxu1 %v5205_v11 }
 0x5af   :  { %v9355_v62 = vpop.permute.xlu0 %9354 }
 0x5b0   :  { %v9357_v13 = vunpack.i.h.bf16 %v9355_v62  ;;  %v9356_v23 = vunpack.i.l.bf16 %v9355_v62 }
 0x5b2   :  { %v5109_v1 = vsel %vm2872_vm4, %v5093_v41, %v9357_v13  ;;  %v5108_v33 = vsel %vm2872_vm4, %v5092_v19, %v9356_v23  ;;  %v9440_v23 = vpop.permute.xlu2 %9439 }
 0x5b3   :  { %v5124_v17 = vsel %vm3002_vm6, %v5108_v33, %v9361_v58  ;;  %v5125_v40 = vsel %vm3002_vm6, %v5109_v1, %v9362_v12  ;;  %v4374_v33 = vld [vmem:[#allocation2 + $0x270] ss:$2 sm:$0xff]  ;;  %v9442_v60 = vunpack.i.h.bf16 %v9440_v23 }
 0x5b4   :  { %v5140_v48 = vsel %vm3132_vm8, %v5124_v17, %v9366_v57  ;;  %v5141_v37 = vsel %vm3132_vm8, %v5125_v40, %v9367_v22  ;;  %v9390_v4 = vpop.permute.xlu1 %9389  ;;  %v4376_v17 = vld [vmem:[#allocation2 + $0x2a0] ss:$2 sm:$0xff]  ;;  %v9427_v57 = vunpack.i.h.bf16 %v9425_v42 }
 0x5b5   :  { %v9392_v2 = vunpack.i.h.bf16 %v9390_v4  ;;  %v9391_v30 = vunpack.i.l.bf16 %v9390_v4 }
 0x5b7   :  { %v9370_v14 = vpop.permute.xlu0 %9369 }
 0x5b8   :  { %v9372_v39 = vunpack.i.h.bf16 %v9370_v14  ;;  %v9371_v18 = vunpack.i.l.bf16 %v9370_v14  ;;  %v9426_v14 = vunpack.i.l.bf16 %v9425_v42 }
 0x5ba   :  { %v5157_v43 = vsel %vm5148_vm15, %v5140_v48, %v9371_v18  ;;  %v5158_v47 = vsel %vm5148_vm15, %v5141_v37, %v9372_v39 }
 0x5bb   :  { %v5174_v10 = vsel %vm5165_vm3, %v5157_v43, %v9376_v20  ;;  %v5175_v31 = vsel %vm5165_vm3, %v5158_v47, %v9377_v25 }
 0x5bc   :  { %v5191_v44 = vsel %vm5182_vm5, %v5174_v10, %v9381_v16  ;;  %v5192_v27 = vsel %vm5182_vm5, %v5175_v31, %v9382_v28  ;;  %v9405_v36 = vpop.permute.xlu1 %9404  ;;  %v9455_v16 = vpop.permute.xlu2 %9454 }
 0x5bd   :  { %v5207_v52 = vpack.c.bf16 %v5192_v27, %v5191_v44  ;;  %v9407_v56 = vunpack.i.h.bf16 %v9405_v36  ;;  %v9406_v51 = vunpack.i.l.bf16 %v9405_v36  ;;  %v9441_v44 = vunpack.i.l.bf16 %v9440_v23 }
 0x5be   :  { %v9456_v42 = vunpack.i.l.bf16 %v9455_v16 }
 0x5bf   :  { %v9385_v34 = vpop.permute.xlu0 %9384  ;;  %5339 = vmatmul.bf16.gmra.mxu1 %v5207_v52 }
 0x5c0   :  { %v9387_v6 = vunpack.i.h.bf16 %v9385_v34  ;;  %v9386_v3 = vunpack.i.l.bf16 %v9385_v34 }
 0x5c2   :  { %v5095_v38 = vsel %vm2742_vm2, %v4372_v9, %v9387_v6  ;;  %v5094_v21 = vsel %vm2742_vm2, %v4370_v26, %v9386_v3 }
 0x5c3   :  { %v5110_v50 = vsel %vm2872_vm4, %v5094_v21, %v9391_v30  ;;  %v5111_v54 = vsel %vm2872_vm4, %v5095_v38, %v9392_v2 }
 0x5c4   :  { %v5126_v32 = vsel %vm3002_vm6, %v5110_v50, %v9396_v61  ;;  %v5127_v5 = vsel %vm3002_vm6, %v5111_v54, %v9397_v53  ;;  %v9420_v62 = vpop.permute.xlu1 %9419  ;;  %v9470_v50 = vpop.permute.xlu2 %9469  ;;  %v9457_v61 = vunpack.i.h.bf16 %v9455_v16 }
 0x5c5   :  { %v9422_v29 = vunpack.i.h.bf16 %v9420_v62  ;;  %v9421_v41 = vunpack.i.l.bf16 %v9420_v62  ;;  %v5369_v53 = vpop.f32.mrf.mxu2  ;;  %v9471_v62 = vunpack.i.l.bf16 %v9470_v50 }
 0x5c7   :  { %v9400_v49 = vpop.permute.xlu0 %9399  ;;  %v5097_v40 = vsel %vm2742_vm2, %v4376_v17, %v9422_v29  ;;  %v5096_v22 = vsel %vm2742_vm2, %v4374_v33, %v9421_v41 }
 0x5c8   :  { %v9402_v0 = vunpack.i.h.bf16 %v9400_v49  ;;  %v9401_v35 = vunpack.i.l.bf16 %v9400_v49  ;;  %v5112_v55 = vsel %vm2872_vm4, %v5096_v22, %v9426_v14  ;;  %v5113_v39 = vsel %vm2872_vm4, %v5097_v40, %v9427_v57 }
 0x5ca   :  { %v5142_v15 = vsel %vm3132_vm8, %v5126_v32, %v9401_v35  ;;  %v5143_v46 = vsel %vm3132_vm8, %v5127_v5, %v9402_v0 }
 0x5cb   :  { %v5159_v63 = vsel %vm5148_vm15, %v5142_v15, %v9406_v51  ;;  %v5160_v11 = vsel %vm5148_vm15, %v5143_v46, %v9407_v56  ;;  %v4378_v56 = vld [vmem:[#allocation2 + $0x2d0] ss:$2 sm:$0xff]  ;;  %v4380_v51 = vld [vmem:[#allocation2 + $0x300] ss:$2 sm:$0xff] }
 0x5cc   :  { %v5176_v45 = vsel %vm5165_vm3, %v5159_v63, %v9411_v8  ;;  %v5177_v13 = vsel %vm5165_vm3, %v5160_v11, %v9412_v7  ;;  %v9435_v37 = vpop.permute.xlu1 %9434  ;;  %v5099_v15 = vsel %vm2742_vm2, %v4380_v51, %v9457_v61  ;;  %v5098_v46 = vsel %vm2742_vm2, %v4378_v56, %v9456_v42 }
 0x5cd   :  { %v9437_v18 = vunpack.i.h.bf16 %v9435_v37  ;;  %v9436_v25 = vunpack.i.l.bf16 %v9435_v37  ;;  %v5371_v29 = vpop.f32.mrf.mxu2 }
 0x5cf   :  { %v9415_v24 = vpop.permute.xlu0 %9414 }
 0x5d0   :  { %v9417_v12 = vunpack.i.h.bf16 %v9415_v24  ;;  %v9416_v58 = vunpack.i.l.bf16 %v9415_v24  ;;  %v9472_v24 = vunpack.i.h.bf16 %v9470_v50 }
 0x5d2   :  { %v5193_v19 = vsel %vm5182_vm5, %v5176_v45, %v9416_v58  ;;  %v5194_v59 = vsel %vm5182_vm5, %v5177_v13, %v9417_v12  ;;  %v9485_v45 = vpop.permute.xlu2 %9484 }
 0x5d3   :  { %v5209_v1 = vpack.c.bf16 %v5194_v59, %v5193_v19  ;;  %v9487_v33 = vunpack.i.h.bf16 %v9485_v45  ;;  %v9486_v17 = vunpack.i.l.bf16 %v9485_v45 }
 0x5d4   :  { %v9450_v52 = vpop.permute.xlu1 %9449 }
 0x5d5   :  { %5344 = vmatmul.bf16.gmra.mxu1 %v5209_v1  ;;  %v9452_v2 = vunpack.i.h.bf16 %v9450_v52  ;;  %v9451_v30 = vunpack.i.l.bf16 %v9450_v52 }
 0x5d7   :  { %v9430_v48 = vpop.permute.xlu0 %9429 }
 0x5d8   :  { %v9432_v20 = vunpack.i.h.bf16 %v9430_v48  ;;  %v9431_v28 = vunpack.i.l.bf16 %v9430_v48 }
 0x5da   :  { %v5129_v43 = vsel %vm3002_vm6, %v5113_v39, %v9432_v20  ;;  %v5128_v47 = vsel %vm3002_vm6, %v5112_v55, %v9431_v28 }
 0x5db   :  { %v5144_v10 = vsel %vm3132_vm8, %v5128_v47, %v9436_v25  ;;  %v5145_v31 = vsel %vm3132_vm8, %v5129_v43, %v9437_v18  ;;  %v5374_v18 = vpop.f32.mrf.mxu2 }
 0x5dc   :  { %v5161_v34 = vsel %vm5148_vm15, %v5144_v10, %v9441_v44  ;;  %v5162_v4 = vsel %vm5148_vm15, %v5145_v31, %v9442_v60  ;;  %v9465_v36 = vpop.permute.xlu1 %9464 }
 0x5dd   :  { %v9467_v0 = vunpack.i.h.bf16 %v9465_v36  ;;  %v9466_v35 = vunpack.i.l.bf16 %v9465_v36 }
 0x5df   :  { %v9445_v27 = vpop.permute.xlu0 %9444 }
 0x5e0   :  { %v9447_v6 = vunpack.i.h.bf16 %v9445_v27  ;;  %v9446_v3 = vunpack.i.l.bf16 %v9445_v27 }
 0x5e2   :  { %v5178_v26 = vsel %vm5165_vm3, %v5161_v34, %v9446_v3  ;;  %v5179_v9 = vsel %vm5165_vm3, %v5162_v4, %v9447_v6 }
 0x5e3   :  { %v5195_v38 = vsel %vm5182_vm5, %v5178_v26, %v9451_v30  ;;  %v5196_v21 = vsel %vm5182_vm5, %v5179_v9, %v9452_v2  ;;  %v5376_v43 = vpop.f32.mrf.mxu2 }
 0x5e4   :  { %v5211_v54 = vpack.c.bf16 %v5196_v21, %v5195_v38  ;;  %v9480_v58 = vpop.permute.xlu1 %9479 }
 0x5e5   :  { %v9482_v59 = vunpack.i.h.bf16 %v9480_v58  ;;  %v9481_v1 = vunpack.i.l.bf16 %v9480_v58 }
 0x5e6   :  { %5349 = vmatmul.bf16.gmra.mxu1 %v5211_v54 }
 0x5e7   :  { %v9460_v49 = vpop.permute.xlu0 %9459 }
 0x5e8   :  { %v9462_v32 = vunpack.i.h.bf16 %v9460_v49  ;;  %v9461_v5 = vunpack.i.l.bf16 %v9460_v49 }
 0x5ea   :  { %v5115_v63 = vsel %vm2872_vm4, %v5099_v15, %v9462_v32  ;;  %v5114_v11 = vsel %vm2872_vm4, %v5098_v46, %v9461_v5 }
 0x5eb   :  { %v5130_v7 = vsel %vm3002_vm6, %v5114_v11, %v9466_v35  ;;  %v5131_v8 = vsel %vm3002_vm6, %v5115_v63, %v9467_v0  ;;  %v5379_v52 = vpop.f32.mrf.mxu2 }
 0x5ec   :  { %v5146_v23 = vsel %vm3132_vm8, %v5130_v7, %v9471_v62  ;;  %v5147_v12 = vsel %vm3132_vm8, %v5131_v8, %v9472_v24 }
 0x5ef   :  { %v9475_v13 = vpop.permute.xlu0 %9474 }
 0x5f0   :  { %v9477_v41 = vunpack.i.h.bf16 %v9475_v13  ;;  %v9476_v19 = vunpack.i.l.bf16 %v9475_v13 }
 0x5f2   :  { %v5163_v40 = vsel %vm5148_vm15, %v5146_v23, %v9476_v19  ;;  %v5164_v22 = vsel %vm5148_vm15, %v5147_v12, %v9477_v41 }
 0x5f3   :  { %v5320_v57 = vpop.f32.mrf.mxu1  ;;  %v5180_v14 = vsel %vm5165_vm3, %v5163_v40, %v9481_v1  ;;  %v5181_v48 = vsel %vm5165_vm3, %v5164_v22, %v9482_v59  ;;  %v5381_v6 = vpop.f32.mrf.mxu2 }
 0x5f4   :  { %v5197_v37 = vsel %vm5182_vm5, %v5180_v14, %v9486_v17  ;;  %v5198_v55 = vsel %vm5182_vm5, %v5181_v48, %v9487_v33  ;;  %v14571_v28 = vadd.f32 %v5369_v53, %v5320_v57 }
 0x5f5   :  { %v5213_v39 = vpack.c.bf16 %v5198_v55, %v5197_v37 }
 0x5f6   :  { %v5411_v10 = vsel %vm2742_vm2, %v14571_v28, 0.0 }
 0x5f7   :  { %5354 = vmatmul.bf16.gmra.mxu1 %v5213_v39 }
 0x5fb   :  { %v5322_v25 = vpop.f32.mrf.mxu1  ;;  %v5384_v21 = vpop.f32.mrf.mxu2 }
 0x5fc   :  { %v14569_v20 = vadd.f32 %v5371_v29, %v5322_v25 }
 0x5fe   :  { %v5412_v16 = vsel %vm2742_vm2, %v14569_v20, 0.0 }
 0x5ff   :  { %v5413_v60 = vadd.f32 %v5412_v16, %v5411_v10 }
 0x603   :  { %v5386_v53 = vpop.f32.mrf.mxu2 }
 0x604   :  { %v5325_v47 = vpop.f32.mrf.mxu1 }
 0x605   :  { %v14577_v31 = vadd.f32 %v5374_v18, %v5325_v47 }
 0x607   :  { %v5414_v44 = vsel %vm2742_vm2, %v14577_v31, 0.0 }
 0x608   :  { %v5415_v27 = vadd.f32 %v5414_v44, %v5413_v60 }
 0x60b   :  { %v5389_v42 = vpop.f32.mrf.mxu2 }
 0x60c   :  { %v5327_v34 = vpop.f32.mrf.mxu1 }
 0x60d   :  { %v14581_v4 = vadd.f32 %v5376_v43, %v5327_v34 }
 0x60f   :  { %v5416_v3 = vsel %vm2742_vm2, %v14581_v4, 0.0 }
 0x610   :  { %v5417_v26 = vadd.f32 %v5416_v3, %v5415_v27 }
 0x613   :  { %v5391_v36 = vpop.f32.mrf.mxu2 }
 0x61a   :  { %v5330_v2 = vpop.f32.mrf.mxu1 }
 0x61b   :  { %v14585_v30 = vadd.f32 %v5379_v52, %v5330_v2  ;;  %v5394_v5 = vpop.f32.mrf.mxu2 }
 0x61d   :  { %v5418_v9 = vsel %vm2742_vm2, %v14585_v30, 0.0 }
 0x61e   :  { %v5419_v38 = vadd.f32 %v5418_v9, %v5417_v26 }
 0x622   :  { %v5332_v50 = vpop.f32.mrf.mxu1 }
 0x623   :  { %v5396_v35 = vpop.f32.mrf.mxu2  ;;  %v5382_v46 = vadd.f32 %v5381_v6, %v5332_v50 }
 0x625   :  { %v5420_v7 = vsel %vm2742_vm2, %v5382_v46, 0.0 }
 0x626   :  { %v5421_v13 = vadd.f32 %v5420_v7, %v5419_v38 }
 0x62b   :  { %v5335_v54 = vpop.f32.mrf.mxu1  ;;  %v5399_v51 = vpop.f32.mrf.mxu2 }
 0x62c   :  { %v5385_v63 = vadd.f32 %v5384_v21, %v5335_v54 }
 0x62e   :  { %v5422_v24 = vsel %vm2742_vm2, %v5385_v63, 0.0 }
 0x62f   :  { %v5423_v58 = vadd.f32 %v5422_v24, %v5421_v13 }
 0x633   :  { %v5337_v61 = vpop.f32.mrf.mxu1  ;;  %v5401_v11 = vpop.f32.mrf.mxu2 }
 0x634   :  { %v5387_v8 = vadd.f32 %v5386_v53, %v5337_v61 }
 0x636   :  { %v5424_v23 = vsel %vm2742_vm2, %v5387_v8, 0.0 }
 0x637   :  { %v5425_v19 = vadd.f32 %v5424_v23, %v5423_v58 }
 0x63b   :  { %v5404_v33 = vpop.f32.mrf.mxu2 }
 0x63c   :  { %v5340_v49 = vpop.f32.mrf.mxu1 }
 0x63d   :  { %v5390_v62 = vadd.f32 %v5389_v42, %v5340_v49 }
 0x63f   :  { %v5426_v29 = vsel %vm2742_vm2, %v5390_v62, 0.0 }
 0x640   :  { %v5427_v17 = vadd.f32 %v5426_v29, %v5425_v19 }
 0x643   :  { %v5406_v10 = vpop.f32.mrf.mxu2 }
 0x644   :  { %v5342_v32 = vpop.f32.mrf.mxu1 }
 0x645   :  { %v5392_v12 = vadd.f32 %v5391_v36, %v5342_v32 }
 0x647   :  { %v5428_v59 = vsel %vm2742_vm2, %v5392_v12, 0.0 }
 0x648   :  { %v5429_v57 = vadd.f32 %v5428_v59, %v5427_v17 }
 0x652   :  { %v5345_v0 = vpop.f32.mrf.mxu1 }
 0x653   :  { %v5395_v41 = vadd.f32 %v5394_v5, %v5345_v0 }
 0x655   :  { %v5430_v40 = vsel %vm2742_vm2, %v5395_v41, 0.0 }
 0x656   :  { %v5431_v55 = vadd.f32 %v5430_v40, %v5429_v57 }
 0x65a   :  { %v5347_v56 = vpop.f32.mrf.mxu1 }
 0x65b   :  { %v14594_v1 = vadd.f32 %v5396_v35, %v5347_v56 }
 0x65d   :  { %v5432_v48 = vsel %vm2742_vm2, %v14594_v1, 0.0 }
 0x65e   :  { %v5433_v25 = vadd.f32 %v5432_v48, %v5431_v55 }
 0x663   :  { %v5350_v15 = vpop.f32.mrf.mxu1 }
 0x664   :  { %v14597_v22 = vadd.f32 %v5399_v51, %v5350_v15 }
 0x666   :  { %v5434_v39 = vsel %vm2742_vm2, %v14597_v22, 0.0 }
 0x667   :  { %v5435_v43 = vadd.f32 %v5434_v39, %v5433_v25 }
 0x66b   :  { %v5352_v45 = vpop.f32.mrf.mxu1 }
 0x66c   :  { %v14601_v37 = vadd.f32 %v5401_v11, %v5352_v45 }
 0x66e   :  { %v5436_v16 = vsel %vm2742_vm2, %v14601_v37, 0.0 }
 0x66f   :  { %v5437_v60 = vadd.f32 %v5436_v16, %v5435_v43 }
 0x674   :  { %v5355_v14 = vpop.f32.mrf.mxu1 }
 0x675   :  { %v14605_v18 = vadd.f32 %v5404_v33, %v5355_v14 }
 0x677   :  { %v5438_v47 = vsel %vm2742_vm2, %v14605_v18, 0.0 }
 0x678   :  { %v5439_v52 = vadd.f32 %v5438_v47, %v5437_v60 }
 0x67c   :  { %v5357_v44 = vpop.f32.mrf.mxu1 }
 0x67d   :  { %v5407_v27 = vadd.f32 %v5406_v10, %v5357_v44 }
 0x67f   :  { %v5440_v34 = vsel %vm2742_vm2, %v5407_v27, 0.0 }
 0x680   :  { %v5441_v6 = vadd.f32 %v5440_v34, %v5439_v52 }
 0x682   :  { %v5442_v3 = vrot.slane %v5441_v6, 4 }
 0x684   :  { %v5443_v2 = vadd.f32 %v5442_v3, %v5441_v6 }
 0x686   :  { %v5444_v26 = vrot.slane %v5443_v2, 2 }
 0x688   :  { %v5445_v9 = vadd.f32 %v5444_v26, %v5443_v2 }
 0x68a   :  { %v5446_v38 = vrot.slane %v5445_v9, 1 }
 0x68c   :  { %v5447_v21 = vadd.f32 %v5446_v38, %v5445_v9 }
 0x68e   :  { %v5448_v50 = vmul.f32 0.0078125, %v5447_v21 }
 0x690   :  { %v14613_v54 = vsub.f32 %v14571_v28, %v5448_v50  ;;  %v14616_v53 = vsub.f32 %v14569_v20, %v5448_v50  ;;  %v14619_v61 = vsub.f32 %v14577_v31, %v5448_v50  ;;  %v14622_v42 = vsub.f32 %v14585_v30, %v5448_v50 }
 0x691   :  { %v14625_v49 = vsub.f32 %v14581_v4, %v5448_v50  ;;  %v14633_v20 = vsub.f32 %v5382_v46, %v5448_v50  ;;  %v14639_v0 = vsub.f32 %v5385_v63, %v5448_v50  ;;  %v14644_v15 = vsub.f32 %v5387_v8, %v5448_v50 }
 0x692   :  { %v5465_v36 = vmul.f32 %v14613_v54, %v14613_v54  ;;  %v5466_v32 = vmul.f32 %v14616_v53, %v14616_v53  ;;  %v5467_v28 = vmul.f32 %v14619_v61, %v14619_v61  ;;  %v5469_v35 = vmul.f32 %v14622_v42, %v14622_v42 }
 0x693   :  { %v5468_v31 = vmul.f32 %v14625_v49, %v14625_v49  ;;  %v5470_v46 = vmul.f32 %v14633_v20, %v14633_v20  ;;  %v14649_v24 = vsub.f32 %v5390_v62, %v5448_v50  ;;  %v5471_v63 = vmul.f32 %v14639_v0, %v14639_v0 }
 0x694   :  { %v5481_v30 = vsel %vm2742_vm2, %v5465_v36, 0.0  ;;  %v5482_v5 = vsel %vm2742_vm2, %v5466_v32, 0.0  ;;  %v5484_v56 = vsel %vm2742_vm2, %v5467_v28, 0.0  ;;  %v5488_v45 = vsel %vm2742_vm2, %v5469_v35, 0.0 }
 0x695   :  { %v5483_v4 = vadd.f32 %v5482_v5, %v5481_v30  ;;  %v5486_v11 = vsel %vm2742_vm2, %v5468_v31, 0.0  ;;  %v14654_v23 = vsub.f32 %v5392_v12, %v5448_v50  ;;  %v5472_v8 = vmul.f32 %v14644_v15, %v14644_v15 }
 0x696   :  { %v5490_v58 = vsel %vm2742_vm2, %v5470_v46, 0.0  ;;  %v14659_v19 = vsub.f32 %v5395_v41, %v5448_v50  ;;  %v5473_v62 = vmul.f32 %v14649_v24, %v14649_v24  ;;  %v5492_v59 = vsel %vm2742_vm2, %v5471_v63, 0.0 }
 0x697   :  { %v5485_v51 = vadd.f32 %v5484_v56, %v5483_v4  ;;  %v5460_v17 = vsub.f32 %v14594_v1, %v5448_v50  ;;  %v5474_v12 = vmul.f32 %v14654_v23, %v14654_v23  ;;  %v5494_v40 = vsel %vm2742_vm2, %v5472_v8, 0.0 }
 0x698   :  { %v5461_v14 = vsub.f32 %v14597_v22, %v5448_v50  ;;  %v5475_v41 = vmul.f32 %v14659_v19, %v14659_v19  ;;  %v5496_v48 = vsel %vm2742_vm2, %v5473_v62, 0.0  ;;  %v5462_v39 = vsub.f32 %v14601_v37, %v5448_v50 }
 0x699   :  { %v5487_v7 = vadd.f32 %v5486_v11, %v5485_v51  ;;  %v5476_v25 = vmul.f32 %v5460_v17, %v5460_v17  ;;  %v5498_v16 = vsel %vm2742_vm2, %v5474_v12, 0.0  ;;  %v5463_v43 = vsub.f32 %v14605_v18, %v5448_v50  ;;  %v7903_v11 = vld [vmem:[%s15682_s3 + $0x38] sm:$0xff] }
 0x69a   :  { %v5477_v47 = vmul.f32 %v5461_v14, %v5461_v14  ;;  %v5500_v10 = vsel %vm2742_vm2, %v5475_v41, 0.0  ;;  %v5464_v44 = vsub.f32 %v5407_v27, %v5448_v50  ;;  %v5478_v22 = vmul.f32 %v5462_v39, %v5462_v39  ;;  %6475 = vmatpush.bf16.msrb.mxu3 %v7903_v11 }
 0x69b   :  { %v5489_v13 = vadd.f32 %v5488_v45, %v5487_v7  ;;  %v5502_v52 = vsel %vm2742_vm2, %v5476_v25, 0.0  ;;  %v5479_v6 = vmul.f32 %v5463_v43, %v5463_v43  ;;  %v7904_v7 = vld [vmem:[%s15682_s3 + $0x40] sm:$0xff] }
 0x69c   :  { %v5504_v3 = vsel %vm2742_vm2, %v5477_v47, 0.0  ;;  %v5480_v37 = vmul.f32 %v5464_v44, %v5464_v44  ;;  %v5506_v26 = vsel %vm2742_vm2, %v5478_v22, 0.0  ;;  %6531 = vmatpush.bf16.msra.mxu2 %v7904_v7 }
 0x69d   :  { %v5491_v29 = vadd.f32 %v5490_v58, %v5489_v13  ;;  %v5508_v38 = vsel %vm2742_vm2, %v5479_v6, 0.0  ;;  %v9770_v58 = vld [vmem:[%s15680_s9] ss:$0 sm:$0xff] }
 0x69e   :  { %v5510_v21 = vsel %vm2742_vm2, %v5480_v37, 0.0 }
 0x69f   :  { %v5493_v33 = vadd.f32 %v5492_v59, %v5491_v29 }
 0x6a1   :  { %v5495_v57 = vadd.f32 %v5494_v40, %v5493_v33 }
 0x6a3   :  { %v5497_v55 = vadd.f32 %v5496_v48, %v5495_v57 }
 0x6a5   :  { %v5499_v1 = vadd.f32 %v5498_v16, %v5497_v55 }
 0x6a7   :  { %v5501_v60 = vadd.f32 %v5500_v10, %v5499_v1 }
 0x6a9   :  { %v5503_v34 = vadd.f32 %v5502_v52, %v5501_v60 }
 0x6ab   :  { %v5505_v2 = vadd.f32 %v5504_v3, %v5503_v34 }
 0x6ad   :  { %v5507_v9 = vadd.f32 %v5506_v26, %v5505_v2 }
 0x6af   :  { %v5509_v18 = vadd.f32 %v5508_v38, %v5507_v9 }
 0x6b1   :  { %v5511_v36 = vadd.f32 %v5510_v21, %v5509_v18 }
 0x6b3   :  { %v5512_v32 = vrot.slane %v5511_v36, 4 }
 0x6b5   :  { %v5513_v27 = vadd.f32 %v5512_v32, %v5511_v36 }
 0x6b7   :  { %v5514_v50 = vrot.slane %v5513_v27, 2 }
 0x6b9   :  { %v5515_v28 = vadd.f32 %v5514_v50, %v5513_v27 }
 0x6bb   :  { %v5516_v31 = vrot.slane %v5515_v28, 1 }
 0x6bd   :  { %v5517_v30 = vadd.f32 %v5516_v31, %v5515_v28 }
 0x6bf   :  { %v5518_v5 = vmul.f32 0.0078125, %v5517_v30 }
 0x6c1   :  { %v5519_v4 = vadd.f32 1e-05, %v5518_v5 }
 0x6c3   :  { %9778 = vrsqrt.f32 %v5519_v4  ;;  %vm5526_vm9 = vweird.f32 %v5519_v4 }
 0x6c9   :  { %v9779_v35 = vpop.eup %9778 }
 0x6ca   :  { %v5521_v56 = vmul.f32 %v9779_v35, %v5519_v4  ;;  %vm5527_vm7 = vweird.f32 %v9779_v35 }
 0x6cb   :  { %vm5528_vm10 = vmor %vm5526_vm9, %vm5527_vm7 }
 0x6cc   :  { %v5522_v51 = vmul.f32 %v9779_v35, %v5521_v56 }
 0x6ce   :  { %v5523_v46 = vmul.f32 0.5, %v5522_v51 }
 0x6d0   :  { %v5524_v63 = vsub.f32 1.5, %v5523_v46 }
 0x6d2   :  { %v5525_v45 = vmul.f32 %v9779_v35, %v5524_v63 }
 0x6d4   :  { %v5529_v13 = vsel %vm5528_vm10, %v9779_v35, %v5525_v45 }
 0x6d5   :  { %v5532_v8 = vmul.f32 %v5529_v13, %v14619_v61  ;;  %v5536_v29 = vmul.f32 %v5529_v13, %v14639_v0  ;;  %v5537_v62 = vmul.f32 %v5529_v13, %v14644_v15  ;;  %v5538_v59 = vmul.f32 %v5529_v13, %v14649_v24  ;;  %v9771_v61 = vld [vmem:[%s15681_s10] ss:$0 sm:$0xff] }
 0x6d6   :  { %v5539_v33 = vmul.f32 %v5529_v13, %v14654_v23  ;;  %v5540_v12 = vmul.f32 %v5529_v13, %v14659_v19  ;;  %v5541_v40 = vmul.f32 %v5529_v13, %v5460_v17  ;;  %v5542_v57 = vmul.f32 %v5529_v13, %v5461_v14 }
 0x6d7   :  { %v5551_v41 = vmul.f32 %v9770_v58, %v5532_v8  ;;  %v5543_v48 = vmul.f32 %v5529_v13, %v5462_v39  ;;  %v5555_v55 = vmul.f32 %v9770_v58, %v5536_v29  ;;  %v5556_v25 = vmul.f32 %v9770_v58, %v5537_v62 }
 0x6d8   :  { %v5544_v16 = vmul.f32 %v5529_v13, %v5463_v43  ;;  %v5557_v0 = vmul.f32 %v9770_v58, %v5538_v59  ;;  %v5558_v1 = vmul.f32 %v9770_v58, %v5539_v33  ;;  %v5559_v15 = vmul.f32 %v9770_v58, %v5540_v12  ;;  %v5690_v59 = vld [vmem:[#allocation3 + $0x2] sm:$0xff] }
 0x6d9   :  { %v5530_v24 = vmul.f32 %v5529_v13, %v14613_v54  ;;  %v5545_v47 = vmul.f32 %v5529_v13, %v5464_v44  ;;  %v5560_v23 = vmul.f32 %v9770_v58, %v5541_v40  ;;  %v5534_v19 = vmul.f32 %v5529_v13, %v14622_v42  ;;  %v5674_v33 = vld [vmem:[#allocation3 + $0x1] sm:$0xff] }
 0x6da   :  { %v5535_v17 = vmul.f32 %v5529_v13, %v14633_v20  ;;  %v5561_v14 = vmul.f32 %v9770_v58, %v5542_v57  ;;  %v5570_v10 = vadd.f32 %v9771_v61, %v5551_v41  ;;  %v5562_v60 = vmul.f32 %v9770_v58, %v5543_v48 }
 0x6db   :  { %v5574_v22 = vadd.f32 %v9771_v61, %v5555_v55  ;;  %v5575_v52 = vadd.f32 %v9771_v61, %v5556_v25  ;;  %v5576_v39 = vadd.f32 %v9771_v61, %v5557_v0  ;;  %v5531_v34 = vmul.f32 %v5529_v13, %v14616_v53  ;;  %v7901_v0 = vld [vmem:[%s15682_s3 + $0x28] sm:$0xff] }
 0x6dc   :  { %v5563_v43 = vmul.f32 %v9770_v58, %v5544_v16  ;;  %v5577_v6 = vadd.f32 %v9771_v61, %v5558_v1  ;;  %v5578_v3 = vadd.f32 %v9771_v61, %v5559_v15  ;;  %v5533_v2 = vmul.f32 %v5529_v13, %v14625_v49  ;;  %v7902_v49 = vld [vmem:[%s15682_s3 + $0x30] sm:$0xff] }
 0x6dd   :  { %v5564_v54 = vmul.f32 %v9770_v58, %v5545_v47  ;;  %v5579_v44 = vadd.f32 %v9771_v61, %v5560_v23  ;;  %v5586_v37 = vmax.f32 %v5570_v10, 0.0  ;;  %v5553_v26 = vmul.f32 %v9770_v58, %v5534_v19  ;;  %6476 = vmatpush.bf16.msrb.mxu3 %v7902_v49 }
 0x6de   :  { %v5580_v42 = vadd.f32 %v9771_v61, %v5561_v14  ;;  %v5590_v9 = vmax.f32 %v5574_v22, 0.0  ;;  %v5591_v20 = vmax.f32 %v5575_v52, 0.0  ;;  %v5554_v38 = vmul.f32 %v9770_v58, %v5535_v17  ;;  %v7900_v52 = vld [vmem:[%s15682_s3 + $0x20] sm:$0xff] }
 0x6df   :  { %v5581_v18 = vadd.f32 %v9771_v61, %v5562_v60  ;;  %v5592_v21 = vmax.f32 %v5576_v39, 0.0  ;;  %v5593_v36 = vmax.f32 %v5577_v6, 0.0  ;;  %5644 = vst.msk [vmem:[#allocation3 + $0x31] sm:$0xff] %vm2742_vm2, %v5586_v37  ;;  %v5550_v32 = vmul.f32 %v9770_v58, %v5531_v34 }
 0x6e0   :  { %v5582_v53 = vadd.f32 %v9771_v61, %v5563_v43  ;;  %v5594_v27 = vmax.f32 %v5578_v3, 0.0  ;;  %5648 = vst.msk [vmem:[#allocation3 + $0x71] sm:$0xff] %vm2742_vm2, %v5590_v9  ;;  %v5549_v50 = vmul.f32 %v9770_v58, %v5530_v24  ;;  %v5583_v28 = vadd.f32 %v9771_v61, %v5564_v54 }
 0x6e1   :  { %v5595_v31 = vmax.f32 %v5579_v44, 0.0  ;;  %5649 = vst.msk [vmem:[#allocation3 + $0x81] sm:$0xff] %vm2742_vm2, %v5591_v20  ;;  %v5552_v30 = vmul.f32 %v9770_v58, %v5533_v2  ;;  %v5572_v5 = vadd.f32 %v9771_v61, %v5553_v26  ;;  %v5596_v4 = vmax.f32 %v5580_v42, 0.0  ;;  %6477 = vmatpush.bf16.msrb.mxu3 %v7901_v0 }
 0x6e2   :  { %5650 = vst.msk [vmem:[#allocation3 + $0xb1] sm:$0xff] %vm2742_vm2, %v5592_v21  ;;  %v5573_v35 = vadd.f32 %v9771_v61, %v5554_v38  ;;  %v5597_v56 = vmax.f32 %v5581_v18, 0.0  ;;  %v5569_v51 = vadd.f32 %v9771_v61, %v5550_v32  ;;  %v5598_v46 = vmax.f32 %v5582_v53, 0.0  ;;  %v7899_v32 = vld [vmem:[%s15682_s3 + $0x18] sm:$0xff] }
 0x6e3   :  { %5651 = vst.msk [vmem:[#allocation3 + $0xc1] sm:$0xff] %vm2742_vm2, %v5593_v36  ;;  %v5599_v11 = vmax.f32 %v5583_v28, 0.0  ;;  %v5568_v7 = vadd.f32 %v9771_v61, %v5549_v50  ;;  %v5571_v63 = vadd.f32 %v9771_v61, %v5552_v30  ;;  %v5588_v45 = vmax.f32 %v5572_v5, 0.0 }
 0x6e4   :  { %5652 = vst.msk [vmem:[#allocation3 + $0xd1] sm:$0xff] %vm2742_vm2, %v5594_v27  ;;  %v5589_v13 = vmax.f32 %v5573_v35, 0.0  ;;  %v5585_v8 = vmax.f32 %v5569_v51, 0.0  ;;  %v5794_v27 = vld [vmem:[#allocation3 + $0x92] sm:$0xff] }
 0x6e5   :  { %5653 = vst.msk [vmem:[#allocation3 + $0xe1] sm:$0xff] %vm2742_vm2, %v5595_v31  ;;  %v5584_v58 = vmax.f32 %v5568_v7, 0.0  ;;  %v5587_v29 = vmax.f32 %v5571_v63, 0.0  ;;  %6478 = vmatpush.bf16.msrb.mxu3 %v7900_v52  ;;  %v7898_v7 = vld [vmem:[%s15682_s3 + $0x10] sm:$0xff] }
 0x6e6   :  { %5654 = vst.msk [vmem:[#allocation3 + $0xf1] sm:$0xff] %vm2742_vm2, %v5596_v4  ;;  %v5788_v62 = vld [vmem:[#allocation3 + $0x32] sm:$0xff] }
 0x6e7   :  { %5655 = vst.msk [vmem:[#allocation3 + $0x101] sm:$0xff] %vm2742_vm2, %v5597_v56  ;;  %v14736_v1 = vld [vmem:[#allocation3 + $0x30] sm:$0xff] }
 0x6e8   :  { %5656 = vst.msk [vmem:[#allocation3 + $0x111] sm:$0xff] %vm2742_vm2, %v5598_v46  ;;  %v5677_v14 = vld [vmem:[#allocation3 + $0x31] sm:$0xff]  ;;  %v5793_v53 = vld [vmem:[#allocation3 + $0x82] sm:$0xff] }
 0x6e9   :  { %5657 = vst.msk [vmem:[#allocation3 + $0x121] sm:$0xff] %vm2742_vm2, %v5599_v11  ;;  %v5792_v54 = vld [vmem:[#allocation3 + $0x72] sm:$0xff]  ;;  %6479 = vmatpush.bf16.msrb.mxu3 %v7899_v32  ;;  %v6370_v28 = vpack.c.bf16 %v5794_v27, %v5793_v53  ;;  %v5713_v4 = vld [vmem:[#allocation3 + $0x80] sm:$0xff] }
 0x6ea   :  { %5646 = vst.msk [vmem:[#allocation3 + $0x51] sm:$0xff] %vm2742_vm2, %v5588_v45  ;;  %v5776_v49 = vld [vmem:[#allocation3 + $0x71] sm:$0xff]  ;;  %v5795_v51 = vld [vmem:[#allocation3 + $0xc2] sm:$0xff] }
 0x6eb   :  { %5647 = vst.msk [vmem:[#allocation3 + $0x61] sm:$0xff] %vm2742_vm2, %v5589_v13  ;;  %v14775_v50 = vld [vmem:[#allocation3 + $0x70] sm:$0xff]  ;;  %v5729_v63 = vld [vmem:[#allocation3 + $0x81] sm:$0xff] }
 0x6ec   :  { %5643 = vst.msk [vmem:[#allocation3 + $0x21] sm:$0xff] %vm2742_vm2, %v5585_v8  ;;  %v9603_v35 = vpack.i.bf16 %v5713_v4, %v14775_v50  ;;  %v14787_v46 = vld [vmem:[#allocation3 + $0xd2] sm:$0xff]  ;;  %v9613_v8 = vpack.i.bf16 %v5793_v53, %v5792_v54 }
 0x6ed   :  { %5642 = vst.msk [vmem:[#allocation3 + $0x11] sm:$0xff] %vm2742_vm2, %v5584_v58  ;;  %v5762_v11 = vld [vmem:[#allocation3 + $0x90] sm:$0xff]  ;;  %v6372_v45 = vpack.c.bf16 %v14787_v46, %v5795_v51  ;;  %6480 = vmatpush.bf16.msrb.mxu3 %v7898_v7  ;;  %v9608_v58 = vpack.i.bf16 %v5729_v63, %v5776_v49 }
 0x6ee   :  { %5645 = vst.msk [vmem:[#allocation3 + $0x41] sm:$0xff] %vm2742_vm2, %v5587_v29  ;;  %v9618_v13 = vpack.i.bf16 %v5762_v11, %v5713_v4  ;;  %v5698_v29 = vld [vmem:[#allocation3 + $0xa2] sm:$0xff]  ;;  %v14802_v0 = vld [vmem:[#allocation3 + $0xb0] sm:$0xff] }
 0x6ef   :  { %v5735_v7 = vld [vmem:[#allocation3 + $0x101] sm:$0xff] }
 0x6f0   :  { %v14855_v27 = vld [vmem:[#allocation3 + $0x122] sm:$0xff] }
 0x6f1   :  { %v5790_v17 = vld [vmem:[#allocation3 + $0x52] sm:$0xff] }
 0x6f2   :  { %v5791_v2 = vld [vmem:[#allocation3 + $0x62] sm:$0xff]  ;;  %v5679_v44 = vld [vmem:[#allocation3 + $0x51] sm:$0xff] }
 0x6f3   :  { %v5787_v12 = vld [vmem:[#allocation3 + $0x22] sm:$0xff]  ;;  %v14757_v37 = vld [vmem:[#allocation3 + $0x50] sm:$0xff]  ;;  %v6368_v26 = vpack.c.bf16 %v5792_v54, %v5791_v2  ;;  %v9578_v5 = vpack.i.bf16 %v5791_v2, %v5790_v17  ;;  %v9598_v56 = vpack.i.bf16 %v5792_v54, %v5791_v2 }
 0x6f4   :  { %v14723_v40 = vld [vmem:[#allocation3 + $0x20] sm:$0xff]  ;;  %v6364_v57 = vpack.c.bf16 %v5788_v62, %v5787_v12  ;;  %v14725_v41 = vld [vmem:[#allocation3 + $0x10] sm:$0xff]  ;;  %v9528_v60 = vpack.i.bf16 %v5788_v62, %v5787_v12 }
 0x6f5   :  { %v5691_v61 = vld [vmem:[#allocation3 + $0x12] sm:$0xff]  ;;  %v9498_v55 = vpack.i.bf16 %v14723_v40, %v14725_v41  ;;  %v5723_v15 = vld [vmem:[#allocation3 + $0x21] sm:$0xff]  ;;  %v9513_v24 = vpack.i.bf16 %v14736_v1, %v14723_v40 }
 0x6f6   :  { %v5675_v48 = vld [vmem:[#allocation3 + $0x11] sm:$0xff]  ;;  %v9493_v25 = vpack.i.bf16 %v5691_v61, %v5690_v59  ;;  %7847 = vmatmul.msk.bf16.vlgmr.msra.gmra.mxu2 %vm2742_vm2, %v6364_v57  ;;  %v9508_v47 = vpack.i.bf16 %v5787_v12, %v5691_v61  ;;  %v5789_v19 = vld [vmem:[#allocation3 + $0x42] sm:$0xff]  ;;  %v9523_v22 = vpack.i.bf16 %v5677_v14, %v5723_v15 }
 0x6f7   :  { %v9488_v16 = vpack.i.bf16 %v5675_v48, %v5674_v33  ;;  %9499 = vrot.lane.b32.xlu2 %v9498_v55, %s9797_s22  ;;  %v9503_v23 = vpack.i.bf16 %v5723_v15, %v5675_v48  ;;  %v6366_v10 = vpack.c.bf16 %v5790_v17, %v5789_v19  ;;  %v5725_v39 = vld [vmem:[#allocation3 + $0x41] sm:$0xff]  ;;  %v9543_v43 = vpack.i.bf16 %v5789_v19, %v5788_v62  ;;  %v5699_v62 = vld [vmem:[#allocation3 + $0xb2] sm:$0xff] }
 0x6f8   :  { %9494 = vrot.lane.b32.xlu1 %v9493_v25, %s9794_s29  ;;  %v14750_v34 = vld [vmem:[#allocation3 + $0x40] sm:$0xff]  ;;  %v9538_v6 = vpack.i.bf16 %v5725_v39, %v5677_v14  ;;  %v9558_v42 = vpack.i.bf16 %v5679_v44, %v5725_v39  ;;  %v9563_v36 = vpack.i.bf16 %v5790_v17, %v5789_v19  ;;  %v5683_v33 = vld [vmem:[#allocation3 + $0xb1] sm:$0xff]  ;;  %v9633_v57 = vpack.i.bf16 %v5699_v62, %v5698_v29  ;;  %v7897_v17 = vld [vmem:[%s15682_s3 + $0x8] sm:$0xff] }
 0x6f9   :  { %9489 = vrot.lane.b32.xlu0 %v9488_v16, %s15833_s27  ;;  %v9533_v3 = vpack.i.bf16 %v14750_v34, %v14736_v1  ;;  %v9548_v9 = vpack.i.bf16 %v14757_v37, %v14750_v34  ;;  %v5727_v20 = vld [vmem:[#allocation3 + $0x61] sm:$0xff]  ;;  %v5778_v12 = vld [vmem:[#allocation3 + $0x91] sm:$0xff]  ;;  %6481 = vmatpush.bf16.msrb.mxu3 %v7897_v17 }
 0x6fa   :  { %v14765_v38 = vld [vmem:[#allocation3 + $0x60] sm:$0xff]  ;;  %v9573_v18 = vpack.i.bf16 %v5727_v20, %v5679_v44  ;;  %v9588_v31 = vpack.i.bf16 %v5776_v49, %v5727_v20  ;;  %v9623_v48 = vpack.i.bf16 %v5778_v12, %v5729_v63  ;;  %v14800_v25 = vld [vmem:[#allocation3 + $0xf2] sm:$0xff] }
 0x6fb   :  { %v9568_v21 = vpack.i.bf16 %v14765_v38, %v14757_v37  ;;  %v9583_v30 = vpack.i.bf16 %v14775_v50, %v14765_v38  ;;  %v5682_v59 = vld [vmem:[#allocation3 + $0xa1] sm:$0xff]  ;;  %v5685_v14 = vld [vmem:[#allocation3 + $0xd1] sm:$0xff] }
 0x6fc   :  { %v9628_v61 = vpack.i.bf16 %v5683_v33, %v5682_v59  ;;  %v5797_v55 = vld [vmem:[#allocation3 + $0xe2] sm:$0xff]  ;;  %v14842_v20 = vld [vmem:[#allocation3 + $0xf0] sm:$0xff] }
 0x6fd   :  { %v5731_v16 = vld [vmem:[#allocation3 + $0xc1] sm:$0xff]  ;;  %v9683_v32 = vpack.i.bf16 %v5797_v55, %v14787_v46  ;;  %v5802_v49 = vld [vmem:[#allocation3 + $0x132] sm:$0xff] }
 0x6fe   :  { %v14804_v15 = vld [vmem:[#allocation3 + $0xc0] sm:$0xff]  ;;  %v5689_v12 = vld [vmem:[#allocation3 + $0x111] sm:$0xff] }
 0x6ff   :  { %9514 = vrot.lane.b32.xlu2 %v9513_v24, %s9802_s8  ;;  %v6374_v24 = vpack.c.bf16 %v14800_v25, %v5797_v55  ;;  %v9638_v19 = vpack.i.bf16 %v14804_v15, %v14802_v0  ;;  %v14825_v39 = vld [vmem:[#allocation3 + $0x102] sm:$0xff] }
 0x700   :  { %9509 = vrot.lane.b32.xlu1 %v9508_v47, %s9801_s7  ;;  %v9648_v47 = vpack.i.bf16 %v5795_v51, %v5699_v62  ;;  %v5658_v63 = vld [vmem:[#allocation3] sm:$0xff] }
 0x701   :  { %9504 = vrot.lane.b32.xlu0 %v9503_v23, %s9799_s23  ;;  %v9643_v23 = vpack.i.bf16 %v5731_v16, %v5683_v33 }
 0x706   :  { %7848 = vmatmul.msk.bf16.gmra.mxu2 %vm2742_vm2, %v6366_v10  ;;  %v14816_v10 = vld [vmem:[#allocation3 + $0xd0] sm:$0xff] }
 0x707   :  { %9529 = vrot.lane.b32.xlu2 %v9528_v60, %s9794_s29  ;;  %v9663_v60 = vpack.i.bf16 %v5685_v14, %v5731_v16 }
 0x708   :  { %9524 = vrot.lane.b32.xlu1 %v9523_v22, %s15833_s27 }
 0x709   :  { %9519 = vrot.lane.b32.xlu0 %v9523_v22, %s9803_s26  ;;  %v9653_v22 = vpack.i.bf16 %v14816_v10, %v14804_v15 }
 0x70f   :  { %9544 = vrot.lane.b32.xlu2 %v9543_v43, %s9801_s7  ;;  %v14827_v43 = vld [vmem:[#allocation3 + $0x112] sm:$0xff] }
 0x710   :  { %9539 = vrot.lane.b32.xlu1 %v9538_v6, %s9799_s23  ;;  %v5733_v6 = vld [vmem:[#allocation3 + $0xe1] sm:$0xff]  ;;  %v6376_v2 = vpack.c.bf16 %v14827_v43, %v14825_v39 }
 0x711   :  { %9534 = vrot.lane.b32.xlu0 %v9533_v3, %s9797_s22  ;;  %v14829_v3 = vld [vmem:[#allocation3 + $0xe0] sm:$0xff]  ;;  %v9678_v54 = vpack.i.bf16 %v5733_v6, %v5685_v14 }
 0x712   :  { %v9673_v44 = vpack.i.bf16 %v14829_v3, %v14816_v10 }
 0x716   :  { %7849 = vmatmul.msk.bf16.gmra.mxu2 %vm2742_vm2, %v6368_v26  ;;  %v9668_v26 = vpack.i.bf16 %v14787_v46, %v5795_v51 }
 0x717   :  { %9559 = vrot.lane.b32.xlu2 %v9558_v42, %s15833_s27 }
 0x718   :  { %9554 = vrot.lane.b32.xlu1 %v9558_v42, %s9803_s26 }
 0x719   :  { %9549 = vrot.lane.b32.xlu0 %v9548_v9, %s9802_s8  ;;  %v5782_v9 = vld [vmem:[#allocation3 + $0xf1] sm:$0xff] }
 0x71a   :  { %v9713_v29 = vpack.i.bf16 %v5735_v7, %v5782_v9 }
 0x71f   :  { %9574 = vrot.lane.b32.xlu2 %v9573_v18, %s9799_s23  ;;  %v7896_v18 = vld [vmem:[%s15682_s3] sm:$0xff] }
 0x720   :  { %9569 = vrot.lane.b32.xlu1 %v9568_v21, %s9797_s22  ;;  %v9693_v21 = vpack.i.bf16 %v5782_v9, %v5733_v6  ;;  %6482 = vmatpush.bf16.msrb.mxu3 %v7896_v18  ;;  %v5737_v9 = vld [vmem:[#allocation3 + $0x121] sm:$0xff] }
 0x721   :  { %9564 = vrot.lane.b32.xlu0 %v9563_v36, %s9794_s29  ;;  %v9688_v36 = vpack.i.bf16 %v14842_v20, %v14829_v3 }
 0x726   :  { %7850 = vmatmul.msk.bf16.gmra.mxu2 %vm2742_vm2, %v6370_v28  ;;  %v14857_v28 = vld [vmem:[#allocation3 + $0x100] sm:$0xff] }
 0x727   :  { %9589 = vrot.lane.b32.xlu2 %v9588_v31, %s9803_s26 }
 0x728   :  { %9584 = vrot.lane.b32.xlu1 %v9583_v30, %s9802_s8  ;;  %v9708_v30 = vpack.i.bf16 %v14857_v28, %v14842_v20 }
 0x729   :  { %9579 = vrot.lane.b32.xlu0 %v9578_v5, %s9801_s7  ;;  %v9703_v5 = vpack.i.bf16 %v14800_v25, %v5797_v55 }
 0x72f   :  { %9604 = vrot.lane.b32.xlu2 %v9603_v35, %s9797_s22 }
 0x730   :  { %9599 = vrot.lane.b32.xlu1 %v9598_v56, %s9794_s29  ;;  %v14867_v56 = vld [vmem:[#allocation3 + $0x110] sm:$0xff] }
 0x731   :  { %9594 = vrot.lane.b32.xlu0 %v9588_v31, %s15833_s27  ;;  %v6378_v31 = vpack.c.bf16 %v5802_v49, %v14855_v27 }
 0x736   :  { %7851 = vmatmul.msk.bf16.gmra.mxu2 %vm2742_vm2, %v6372_v45  ;;  %v9723_v45 = vpack.i.bf16 %v14867_v56, %v14857_v28 }
 0x737   :  { %9619 = vrot.lane.b32.xlu2 %v9618_v13, %s9802_s8  ;;  %v9718_v13 = vpack.i.bf16 %v14825_v39, %v14800_v25 }
 0x738   :  { %9614 = vrot.lane.b32.xlu1 %v9613_v8, %s9801_s7 }
 0x739   :  { %9609 = vrot.lane.b32.xlu0 %v9608_v58, %s9799_s23 }
 0x73f   :  { %9634 = vrot.lane.b32.xlu2 %v9633_v57, %s9794_s29 }
 0x740   :  { %9629 = vrot.lane.b32.xlu1 %v9628_v61, %s15833_s27 }
 0x741   :  { %9624 = vrot.lane.b32.xlu0 %v9623_v48, %s9803_s26 }
 0x746   :  { %7852 = vmatmul.msk.bf16.gmra.mxu2 %vm2742_vm2, %v6374_v24 }
 0x747   :  { %9649 = vrot.lane.b32.xlu2 %v9648_v47, %s9801_s7  ;;  %v9733_v47 = vpack.i.bf16 %v5689_v12, %v5735_v7 }
 0x748   :  { %9644 = vrot.lane.b32.xlu1 %v9643_v23, %s9799_s23 }
 0x749   :  { %9639 = vrot.lane.b32.xlu0 %v9638_v19, %s9797_s22 }
 0x74f   :  { %9664 = vrot.lane.b32.xlu2 %v9663_v60, %s15833_s27 }
 0x750   :  { %9659 = vrot.lane.b32.xlu1 %v9663_v60, %s9803_s26 }
 0x751   :  { %9654 = vrot.lane.b32.xlu0 %v9653_v22, %s9802_s8  ;;  %v14823_v52 = vpop.permute.xlu2 %9499 }
 0x752   :  { %v9502_v55 = vunpack.i.h.bf16 %v14823_v52  ;;  %v9501_v25 = vunpack.i.l.bf16 %v14823_v52 }
 0x756   :  { %7853 = vmatmul.msk.bf16.gmra.mxu2 %vm2742_vm2, %v6376_v2 }
 0x757   :  { %9679 = vrot.lane.b32.xlu2 %v9678_v54, %s9799_s23 }
 0x758   :  { %9674 = vrot.lane.b32.xlu1 %v9673_v44, %s9797_s22 }
 0x759   :  { %9669 = vrot.lane.b32.xlu0 %v9668_v26, %s9794_s29  ;;  %v14840_v42 = vpop.permute.xlu2 %9514 }
 0x75a   :  { %v9517_v54 = vunpack.i.h.bf16 %v14840_v42  ;;  %v9516_v44 = vunpack.i.l.bf16 %v14840_v42 }
 0x75f   :  { %9694 = vrot.lane.b32.xlu2 %v9693_v21, %s9803_s26 }
 0x760   :  { %9689 = vrot.lane.b32.xlu1 %v9688_v36, %s9802_s8  ;;  %v5721_v36 = vld [vmem:[#allocation3 + $0x120] sm:$0xff] }
 0x761   :  { %9684 = vrot.lane.b32.xlu0 %v9683_v32, %s9801_s7  ;;  %v14853_v53 = vpop.permute.xlu2 %9529  ;;  %v9743_v42 = vpack.i.bf16 %v5721_v36, %v14867_v56 }
 0x766   :  { %7854 = vmatmul.msk.bf16.gmra.mxu2 %vm2742_vm2, %v6378_v31  ;;  %v9753_v31 = vpack.i.bf16 %v14855_v27, %v14827_v43  ;;  %v5786_v27 = vld [vmem:[#allocation3 + $0x131] sm:$0xff] }
 0x767   :  { %9709 = vrot.lane.b32.xlu2 %v9708_v30, %s9797_s22  ;;  %v9748_v30 = vpack.i.bf16 %v5737_v9, %v5689_v12 }
 0x768   :  { %9704 = vrot.lane.b32.xlu1 %v9703_v5, %s9794_s29 }
 0x769   :  { %9699 = vrot.lane.b32.xlu0 %v9693_v21, %s15833_s27  ;;  %v14869_v51 = vpop.permute.xlu2 %9544 }
 0x76a   :  { %v9495_v4 = vpop.permute.xlu1 %9494 }
 0x76b   :  { %v9490_v35 = vpop.permute.xlu0 %9489  ;;  %v9497_v8 = vunpack.i.h.bf16 %v9495_v4  ;;  %v9496_v58 = vunpack.i.l.bf16 %v9495_v4 }
 0x76c   :  { %v9492_v46 = vunpack.i.h.bf16 %v9490_v35  ;;  %v9491_v11 = vunpack.i.l.bf16 %v9490_v35 }
 0x76e   :  { %v6251_v62 = vsel %vm2742_vm2, %v5658_v63, %v9491_v11  ;;  %v6252_v59 = vsel %vm2742_vm2, %v14725_v41, %v9492_v46  ;;  %v9738_v41 = vpack.i.bf16 %v14827_v43, %v14825_v39 }
 0x76f   :  { %9724 = vrot.lane.b32.xlu2 %v9723_v45, %s9802_s8  ;;  %v6267_v57 = vsel %vm2872_vm4, %v6251_v62, %v9496_v58  ;;  %v6268_v61 = vsel %vm2872_vm4, %v6252_v59, %v9497_v8  ;;  %v9532_v8 = vunpack.i.h.bf16 %v14853_v53  ;;  %v9531_v58 = vunpack.i.l.bf16 %v14853_v53  ;;  %v5770_v59 = vld [vmem:[#allocation3 + $0x130] sm:$0xff] }
 0x770   :  { %9719 = vrot.lane.b32.xlu1 %v9718_v13, %s9801_s7  ;;  %v6283_v14 = vsel %vm3002_vm6, %v6267_v57, %v9501_v25  ;;  %v6284_v60 = vsel %vm3002_vm6, %v6268_v61, %v9502_v55 }
 0x771   :  { %9714 = vrot.lane.b32.xlu0 %v9713_v29, %s9799_s23  ;;  %v14887_v23 = vpop.permute.xlu2 %9559 }
 0x772   :  { %v9510_v33 = vpop.permute.xlu1 %9509 }
 0x773   :  { %v9505_v48 = vpop.permute.xlu0 %9504  ;;  %v9512_v19 = vunpack.i.h.bf16 %v9510_v33  ;;  %v9511_v17 = vunpack.i.l.bf16 %v9510_v33  ;;  %v9763_v33 = vpack.i.bf16 %v5786_v27, %v5737_v9  ;;  %v9561_v9 = vunpack.i.l.bf16 %v14887_v23 }
 0x774   :  { %v9507_v16 = vunpack.i.h.bf16 %v9505_v48  ;;  %v9506_v24 = vunpack.i.l.bf16 %v9505_v48 }
 0x776   :  { %v6299_v22 = vsel %vm3132_vm8, %v6283_v14, %v9506_v24  ;;  %v6300_v6 = vsel %vm3132_vm8, %v6284_v60, %v9507_v16 }
 0x777   :  { %9739 = vrot.lane.b32.xlu2 %v9738_v41, %s9794_s29  ;;  %v6315_v52 = vsel %vm5148_vm15, %v6299_v22, %v9511_v17  ;;  %v6316_v39 = vsel %vm5148_vm15, %v6300_v6, %v9512_v19  ;;  %v9547_v41 = vunpack.i.h.bf16 %v14869_v51 }
 0x778   :  { %9734 = vrot.lane.b32.xlu1 %v9733_v47, %s15833_s27  ;;  %v6331_v32 = vsel %vm5165_vm3, %v6315_v52, %v9516_v44  ;;  %v6332_v49 = vsel %vm5165_vm3, %v6316_v39, %v9517_v54 }
 0x779   :  { %9729 = vrot.lane.b32.xlu0 %v9733_v47, %s9803_s26  ;;  %v14907_v7 = vpop.permute.xlu2 %9574  ;;  %v9546_v47 = vunpack.i.l.bf16 %v14869_v51  ;;  %v9562_v51 = vunpack.i.h.bf16 %v14887_v23 }
 0x77a   :  { %v9525_v2 = vpop.permute.xlu1 %9524  ;;  %v9576_v27 = vunpack.i.l.bf16 %v14907_v7 }
 0x77b   :  { %v9520_v26 = vpop.permute.xlu0 %9519  ;;  %v9527_v35 = vunpack.i.h.bf16 %v9525_v2  ;;  %v9526_v46 = vunpack.i.l.bf16 %v9525_v2 }
 0x77c   :  { %v9522_v18 = vunpack.i.h.bf16 %v9520_v26  ;;  %v9521_v21 = vunpack.i.l.bf16 %v9520_v26 }
 0x77d   :  { %v6254_v63 = vsel %vm2742_vm2, %v14736_v1, %v9527_v35  ;;  %v6253_v45 = vsel %vm2742_vm2, %v14723_v40, %v9526_v46  ;;  %v9758_v40 = vpack.i.bf16 %v5770_v59, %v5721_v36 }
 0x77e   :  { %v6347_v5 = vsel %vm5182_vm5, %v6331_v32, %v9521_v21  ;;  %v6348_v4 = vsel %vm5182_vm5, %v6332_v49, %v9522_v18  ;;  %v6269_v61 = vsel %vm2872_vm4, %v6253_v45, %v9531_v58  ;;  %v6270_v48 = vsel %vm2872_vm4, %v6254_v63, %v9532_v8 }
 0x77f   :  { %v6363_v11 = vpack.c.bf16 %v6348_v4, %v6347_v5  ;;  %9754 = vrot.lane.b32.xlu2 %v9753_v31, %s9801_s7  ;;  %v6256_v31 = vsel %vm2742_vm2, %v14757_v37, %v9562_v51 }
 0x780   :  { %9749 = vrot.lane.b32.xlu1 %v9748_v30, %s9799_s23  ;;  %v6255_v30 = vsel %vm2742_vm2, %v14750_v34, %v9561_v9 }
 0x781   :  { %9744 = vrot.lane.b32.xlu0 %v9743_v42, %s9797_s22  ;;  %6483 = vmatmul.bf16.vlgmr.msrb.gmra.mxu3 %v6363_v11  ;;  %v9590_v53 = vpop.permute.xlu2 %9589 }
 0x782   :  { %v9540_v43 = vpop.permute.xlu1 %9539 }
 0x783   :  { %v9535_v13 = vpop.permute.xlu0 %9534  ;;  %v9542_v12 = vunpack.i.h.bf16 %v9540_v43  ;;  %v9541_v57 = vunpack.i.l.bf16 %v9540_v43  ;;  %v9577_v43 = vunpack.i.h.bf16 %v14907_v7 }
 0x784   :  { %v9537_v29 = vunpack.i.h.bf16 %v9535_v13  ;;  %v9536_v62 = vunpack.i.l.bf16 %v9535_v13 }
 0x786   :  { %v6286_v1 = vsel %vm3002_vm6, %v6270_v48, %v9537_v29  ;;  %v6285_v55 = vsel %vm3002_vm6, %v6269_v61, %v9536_v62  ;;  %v9592_v29 = vunpack.i.h.bf16 %v9590_v53  ;;  %v9591_v62 = vunpack.i.l.bf16 %v9590_v53 }
 0x787   :  { %v6302_v25 = vsel %vm3132_vm8, %v6286_v1, %v9542_v12  ;;  %v6301_v16 = vsel %vm3132_vm8, %v6285_v55, %v9541_v57 }
 0x788   :  { %9764 = vrot.lane.b32.xlu1 %v9763_v33, %s9803_s26  ;;  %v6317_v6 = vsel %vm5148_vm15, %v6301_v16, %v9546_v47  ;;  %v6318_v52 = vsel %vm5148_vm15, %v6302_v25, %v9547_v41 }
 0x789   :  { %9759 = vrot.lane.b32.xlu0 %v9758_v40, %s9802_s8  ;;  %v9605_v36 = vpop.permute.xlu2 %9604 }
 0x78a   :  { %v9555_v24 = vpop.permute.xlu1 %9554 }
 0x78b   :  { %v9557_v19 = vunpack.i.h.bf16 %v9555_v24  ;;  %v9556_v17 = vunpack.i.l.bf16 %v9555_v24  ;;  %v9550_v14 = vpop.permute.xlu0 %9549 }
 0x78c   :  { %v9552_v60 = vunpack.i.h.bf16 %v9550_v14  ;;  %v9551_v22 = vunpack.i.l.bf16 %v9550_v14 }
 0x78e   :  { %v6333_v39 = vsel %vm5165_vm3, %v6317_v6, %v9551_v22  ;;  %v6334_v2 = vsel %vm5165_vm3, %v6318_v52, %v9552_v60  ;;  %v9607_v6 = vunpack.i.h.bf16 %v9605_v36  ;;  %v9606_v52 = vunpack.i.l.bf16 %v9605_v36 }
 0x78f   :  { %v6349_v54 = vsel %vm5182_vm5, %v6333_v39, %v9556_v17  ;;  %v6350_v44 = vsel %vm5182_vm5, %v6334_v2, %v9557_v19 }
 0x790   :  { %v6365_v26 = vpack.c.bf16 %v6350_v44, %v6349_v54 }
 0x791   :  { %v9620_v59 = vpop.permute.xlu2 %9619 }
 0x792   :  { %6488 = vmatmul.bf16.gmra.mxu3 %v6365_v26  ;;  %v9570_v18 = vpop.permute.xlu1 %9569  ;;  %v9621_v36 = vunpack.i.l.bf16 %v9620_v59 }
 0x793   :  { %v9565_v21 = vpop.permute.xlu0 %9564  ;;  %v9572_v5 = vunpack.i.h.bf16 %v9570_v18  ;;  %v9571_v4 = vunpack.i.l.bf16 %v9570_v18 }
 0x794   :  { %v9567_v32 = vunpack.i.h.bf16 %v9565_v21  ;;  %v9566_v49 = vunpack.i.l.bf16 %v9565_v21 }
 0x796   :  { %v6272_v35 = vsel %vm2872_vm4, %v6256_v31, %v9567_v32  ;;  %v6271_v46 = vsel %vm2872_vm4, %v6255_v30, %v9566_v49  ;;  %v9622_v49 = vunpack.i.h.bf16 %v9620_v59 }
 0x797   :  { %v6288_v23 = vsel %vm3002_vm6, %v6272_v35, %v9572_v5  ;;  %v6287_v42 = vsel %vm3002_vm6, %v6271_v46, %v9571_v4 }
 0x798   :  { %v6303_v8 = vsel %vm3132_vm8, %v6287_v42, %v9576_v27  ;;  %v6304_v58 = vsel %vm3132_vm8, %v6288_v23, %v9577_v43  ;;  %v5666_v27 = vld [vmem:[#allocation3 + $0xa0] sm:$0xff] }
 0x799   :  { %v9635_v41 = vpop.permute.xlu2 %9634 }
 0x79a   :  { %v9585_v11 = vpop.permute.xlu1 %9584 }
 0x79b   :  { %v9587_v63 = vunpack.i.h.bf16 %v9585_v11  ;;  %v9586_v37 = vunpack.i.l.bf16 %v9585_v11  ;;  %v9580_v45 = vpop.permute.xlu0 %9579 }
 0x79c   :  { %v9582_v13 = vunpack.i.h.bf16 %v9580_v45  ;;  %v9581_v34 = vunpack.i.l.bf16 %v9580_v45 }
 0x79e   :  { %v6319_v33 = vsel %vm5148_vm15, %v6303_v8, %v9581_v34  ;;  %v6320_v12 = vsel %vm5148_vm15, %v6304_v58, %v9582_v13  ;;  %v9637_v34 = vunpack.i.h.bf16 %v9635_v41  ;;  %v9636_v8 = vunpack.i.l.bf16 %v9635_v41 }
 0x79f   :  { %v6335_v57 = vsel %vm5165_vm3, %v6319_v33, %v9586_v37  ;;  %v6336_v7 = vsel %vm5165_vm3, %v6320_v12, %v9587_v63 }
 0x7a0   :  { %v6351_v61 = vsel %vm5182_vm5, %v6335_v57, %v9591_v62  ;;  %v6352_v48 = vsel %vm5182_vm5, %v6336_v7, %v9592_v29 }
 0x7a1   :  { %v6367_v1 = vpack.c.bf16 %v6352_v48, %v6351_v61  ;;  %v9650_v9 = vpop.permute.xlu2 %9649 }
 0x7a2   :  { %v9600_v55 = vpop.permute.xlu1 %9599 }
 0x7a3   :  { %v9595_v40 = vpop.permute.xlu0 %9594  ;;  %6493 = vmatmul.bf16.gmra.mxu3 %v6367_v1  ;;  %v9602_v53 = vunpack.i.h.bf16 %v9600_v55  ;;  %v9601_v24 = vunpack.i.l.bf16 %v9600_v55  ;;  %v9652_v55 = vunpack.i.h.bf16 %v9650_v9 }
 0x7a4   :  { %v9597_v25 = vunpack.i.h.bf16 %v9595_v40  ;;  %v9596_v16 = vunpack.i.l.bf16 %v9595_v40  ;;  %v9651_v40 = vunpack.i.l.bf16 %v9650_v9 }
 0x7a6   :  { %v6258_v47 = vsel %vm2742_vm2, %v14775_v50, %v9597_v25  ;;  %v6257_v19 = vsel %vm2742_vm2, %v14765_v38, %v9596_v16 }
 0x7a7   :  { %v6274_v14 = vsel %vm2872_vm4, %v6258_v47, %v9602_v53  ;;  %v6273_v60 = vsel %vm2872_vm4, %v6257_v19, %v9601_v24 }
 0x7a8   :  { %v6289_v26 = vsel %vm3002_vm6, %v6273_v60, %v9606_v52  ;;  %v6290_v51 = vsel %vm3002_vm6, %v6274_v14, %v9607_v6 }
 0x7a9   :  { %v9665_v58 = vpop.permute.xlu2 %9664 }
 0x7aa   :  { %v9615_v17 = vpop.permute.xlu1 %9614 }
 0x7ab   :  { %v9610_v22 = vpop.permute.xlu0 %9609  ;;  %v9617_v54 = vunpack.i.h.bf16 %v9615_v17  ;;  %v9616_v44 = vunpack.i.l.bf16 %v9615_v17 }
 0x7ac   :  { %v9612_v39 = vunpack.i.h.bf16 %v9610_v22  ;;  %v9611_v2 = vunpack.i.l.bf16 %v9610_v22 }
 0x7ae   :  { %v6305_v50 = vsel %vm3132_vm8, %v6289_v26, %v9611_v2  ;;  %v6306_v38 = vsel %vm3132_vm8, %v6290_v51, %v9612_v39  ;;  %v9667_v39 = vunpack.i.h.bf16 %v9665_v58  ;;  %v9666_v2 = vunpack.i.l.bf16 %v9665_v58 }
 0x7af   :  { %v6321_v18 = vsel %vm5148_vm15, %v6305_v50, %v9616_v44  ;;  %v6322_v21 = vsel %vm5148_vm15, %v6306_v38, %v9617_v54 }
 0x7b0   :  { %v6337_v4 = vsel %vm5165_vm3, %v6321_v18, %v9621_v36  ;;  %v6338_v35 = vsel %vm5165_vm3, %v6322_v21, %v9622_v49  ;;  %v6262_v50 = vsel %vm2742_vm2, %v14816_v10, %v9667_v39  ;;  %v6261_v38 = vsel %vm2742_vm2, %v14804_v15, %v9666_v2 }
 0x7b1   :  { %v9680_v17 = vpop.permute.xlu2 %9679 }
 0x7b2   :  { %v9630_v32 = vpop.permute.xlu1 %9629 }
 0x7b3   :  { %v9625_v31 = vpop.permute.xlu0 %9624  ;;  %v9632_v42 = vunpack.i.h.bf16 %v9630_v32  ;;  %v9631_v11 = vunpack.i.l.bf16 %v9630_v32 }
 0x7b4   :  { %v9627_v30 = vunpack.i.h.bf16 %v9625_v31  ;;  %v9626_v5 = vunpack.i.l.bf16 %v9625_v31 }
 0x7b5   :  { %v6260_v37 = vsel %vm2742_vm2, %v14802_v0, %v9632_v42  ;;  %v6259_v45 = vsel %vm2742_vm2, %v5666_v27, %v9631_v11 }
 0x7b6   :  { %v6353_v46 = vsel %vm5182_vm5, %v6337_v4, %v9626_v5  ;;  %v6354_v23 = vsel %vm5182_vm5, %v6338_v35, %v9627_v30  ;;  %v6275_v12 = vsel %vm2872_vm4, %v6259_v45, %v9636_v8  ;;  %v6276_v57 = vsel %vm2872_vm4, %v6260_v37, %v9637_v34 }
 0x7b7   :  { %v6369_v43 = vpack.c.bf16 %v6354_v23, %v6353_v46  ;;  %v9682_v5 = vunpack.i.h.bf16 %v9680_v17  ;;  %v9681_v4 = vunpack.i.l.bf16 %v9680_v17 }
 0x7b9   :  { %6498 = vmatmul.bf16.gmra.mxu3 %v6369_v43  ;;  %v9695_v49 = vpop.permute.xlu2 %9694 }
 0x7ba   :  { %v9645_v63 = vpop.permute.xlu1 %9644  ;;  %v9697_v43 = vunpack.i.h.bf16 %v9695_v49  ;;  %v9696_v27 = vunpack.i.l.bf16 %v9695_v49 }
 0x7bb   :  { %v9640_v13 = vpop.permute.xlu0 %9639  ;;  %v9647_v59 = vunpack.i.h.bf16 %v9645_v63  ;;  %v9646_v33 = vunpack.i.l.bf16 %v9645_v63 }
 0x7bc   :  { %v9642_v29 = vunpack.i.h.bf16 %v9640_v13  ;;  %v9641_v62 = vunpack.i.l.bf16 %v9640_v13 }
 0x7be   :  { %v6292_v7 = vsel %vm3002_vm6, %v6276_v57, %v9642_v29  ;;  %v6291_v61 = vsel %vm3002_vm6, %v6275_v12, %v9641_v62 }
 0x7bf   :  { %v6308_v0 = vsel %vm3132_vm8, %v6292_v7, %v9647_v59  ;;  %v6307_v48 = vsel %vm3132_vm8, %v6291_v61, %v9646_v33 }
 0x7c0   :  { %v6323_v47 = vsel %vm5148_vm15, %v6307_v48, %v9651_v40  ;;  %v6324_v19 = vsel %vm5148_vm15, %v6308_v0, %v9652_v55 }
 0x7c1   :  { %v9710_v29 = vpop.permute.xlu2 %9709 }
 0x7c2   :  { %v9660_v1 = vpop.permute.xlu1 %9659 }
 0x7c3   :  { %v9662_v25 = vunpack.i.h.bf16 %v9660_v1  ;;  %v9661_v16 = vunpack.i.l.bf16 %v9660_v1  ;;  %v9655_v53 = vpop.permute.xlu0 %9654 }
 0x7c4   :  { %v9657_v24 = vunpack.i.h.bf16 %v9655_v53  ;;  %v9656_v41 = vunpack.i.l.bf16 %v9655_v53 }
 0x7c6   :  { %v6339_v14 = vsel %vm5165_vm3, %v6323_v47, %v9656_v41  ;;  %v6340_v60 = vsel %vm5165_vm3, %v6324_v19, %v9657_v24 }
 0x7c7   :  { %v6355_v22 = vsel %vm5182_vm5, %v6339_v14, %v9661_v16  ;;  %v6356_v6 = vsel %vm5182_vm5, %v6340_v60, %v9662_v25  ;;  %v9712_v25 = vunpack.i.h.bf16 %v9710_v29  ;;  %v9711_v16 = vunpack.i.l.bf16 %v9710_v29 }
 0x7c8   :  { %v6371_v52 = vpack.c.bf16 %v6356_v6, %v6355_v22 }
 0x7c9   :  { %v9725_v53 = vpop.permute.xlu2 %9724 }
 0x7ca   :  { %6503 = vmatmul.bf16.gmra.mxu3 %v6371_v52  ;;  %v9675_v54 = vpop.permute.xlu1 %9674  ;;  %v9727_v52 = vunpack.i.h.bf16 %v9725_v53  ;;  %v9726_v39 = vunpack.i.l.bf16 %v9725_v53 }
 0x7cb   :  { %v9670_v44 = vpop.permute.xlu0 %9669  ;;  %v9677_v9 = vunpack.i.h.bf16 %v9675_v54  ;;  %v9676_v18 = vunpack.i.l.bf16 %v9675_v54 }
 0x7cc   :  { %v9672_v26 = vunpack.i.h.bf16 %v9670_v44  ;;  %v9671_v51 = vunpack.i.l.bf16 %v9670_v44 }
 0x7ce   :  { %v6278_v21 = vsel %vm2872_vm4, %v6262_v50, %v9672_v26  ;;  %v6277_v32 = vsel %vm2872_vm4, %v6261_v38, %v9671_v51 }
 0x7cf   :  { %v6294_v36 = vsel %vm3002_vm6, %v6278_v21, %v9677_v9  ;;  %v6293_v31 = vsel %vm3002_vm6, %v6277_v32, %v9676_v18 }
 0x7d0   :  { %v6309_v15 = vsel %vm3132_vm8, %v6293_v31, %v9681_v4  ;;  %v6310_v11 = vsel %vm3132_vm8, %v6294_v36, %v9682_v5 }
 0x7d1   :  { %v9740_v50 = vpop.permute.xlu2 %9739 }
 0x7d2   :  { %v9690_v30 = vpop.permute.xlu1 %9689  ;;  %v9742_v5 = vunpack.i.h.bf16 %v9740_v50  ;;  %v9741_v4 = vunpack.i.l.bf16 %v9740_v50 }
 0x7d3   :  { %v9692_v35 = vunpack.i.h.bf16 %v9690_v30  ;;  %v9691_v46 = vunpack.i.l.bf16 %v9690_v30  ;;  %v9685_v10 = vpop.permute.xlu0 %9684 }
 0x7d4   :  { %v9687_v23 = vunpack.i.h.bf16 %v9685_v10  ;;  %v9686_v42 = vunpack.i.l.bf16 %v9685_v10 }
 0x7d6   :  { %v6325_v63 = vsel %vm5148_vm15, %v6309_v15, %v9686_v42  ;;  %v6326_v37 = vsel %vm5148_vm15, %v6310_v11, %v9687_v23  ;;  %v6533_v11 = vpop.f32.mrf.mxu2 }
 0x7d7   :  { %v6341_v45 = vsel %vm5165_vm3, %v6325_v63, %v9691_v46  ;;  %v6342_v13 = vsel %vm5165_vm3, %v6326_v37, %v9692_v35  ;;  %v7855_v63 = vld [vmem:[%s15675_s0 + $0x19] ss:$2 sm:$0xff]  ;;  %v7856_v37 = vld [vmem:[%s15675_s0 + $0x49] ss:$2 sm:$0xff] }
 0x7d8   :  { %v6357_v34 = vsel %vm5182_vm5, %v6341_v45, %v9696_v27  ;;  %v6358_v8 = vsel %vm5182_vm5, %v6342_v13, %v9697_v43 }
 0x7d9   :  { %v6373_v58 = vpack.c.bf16 %v6358_v8, %v6357_v34 }
 0x7da   :  { %v9705_v62 = vpop.permute.xlu1 %9704 }
 0x7db   :  { %v9700_v59 = vpop.permute.xlu0 %9699  ;;  %6508 = vmatmul.bf16.gmra.mxu3 %v6373_v58  ;;  %v9707_v57 = vunpack.i.h.bf16 %v9705_v62  ;;  %v9706_v7 = vunpack.i.l.bf16 %v9705_v62  ;;  %v6780_v58 = vpack.c.bf16 %v7856_v37, %v7855_v63  ;;  %v7866_v63 = vld [vmem:[%s15675_s0 + $0x259] ss:$2 sm:$0xff] }
 0x7dc   :  { %v9702_v33 = vunpack.i.h.bf16 %v9700_v59  ;;  %v9701_v12 = vunpack.i.l.bf16 %v9700_v59 }
 0x7de   :  { %v6264_v61 = vsel %vm2742_vm2, %v14842_v20, %v9702_v33  ;;  %v6263_v0 = vsel %vm2742_vm2, %v14829_v3, %v9701_v12 }
 0x7df   :  { %v6280_v1 = vsel %vm2872_vm4, %v6264_v61, %v9707_v57  ;;  %v6279_v55 = vsel %vm2872_vm4, %v6263_v0, %v9706_v7 }
 0x7e0   :  { %v6295_v17 = vsel %vm3002_vm6, %v6279_v55, %v9711_v16  ;;  %v6296_v20 = vsel %vm3002_vm6, %v6280_v1, %v9712_v25  ;;  %v6535_v16 = vpop.f32.mrf.mxu2 }
 0x7e2   :  { %v9720_v48 = vpop.permute.xlu1 %9719 }
 0x7e3   :  { %v9715_v40 = vpop.permute.xlu0 %9714  ;;  %v9722_v47 = vunpack.i.h.bf16 %v9720_v48  ;;  %v9721_v19 = vunpack.i.l.bf16 %v9720_v48 }
 0x7e4   :  { %v9717_v24 = vunpack.i.h.bf16 %v9715_v40  ;;  %v9716_v41 = vunpack.i.l.bf16 %v9715_v40 }
 0x7e6   :  { %v6311_v14 = vsel %vm3132_vm8, %v6295_v17, %v9716_v41  ;;  %v6312_v3 = vsel %vm3132_vm8, %v6296_v20, %v9717_v24  ;;  %v7857_v24 = vld [vmem:[%s15675_s0 + $0x79] ss:$2 sm:$0xff]  ;;  %v7858_v41 = vld [vmem:[%s15675_s0 + $0xa9] ss:$2 sm:$0xff] }
 0x7e7   :  { %v6327_v60 = vsel %vm5148_vm15, %v6311_v14, %v9721_v19  ;;  %v6328_v22 = vsel %vm5148_vm15, %v6312_v3, %v9722_v47  ;;  %v6781_v17 = vpack.c.bf16 %v7858_v41, %v7857_v24 }
 0x7e8   :  { %v6343_v26 = vsel %vm5165_vm3, %v6327_v60, %v9726_v39  ;;  %v6344_v51 = vsel %vm5165_vm3, %v6328_v22, %v9727_v52  ;;  %v6538_v47 = vpop.f32.mrf.mxu2 }
 0x7ea   :  { %v9735_v6 = vpop.permute.xlu1 %9734 }
 0x7eb   :  { %v9730_v2 = vpop.permute.xlu0 %9729  ;;  %v9737_v18 = vunpack.i.h.bf16 %v9735_v6  ;;  %v9736_v21 = vunpack.i.l.bf16 %v9735_v6 }
 0x7ec   :  { %v9732_v54 = vunpack.i.h.bf16 %v9730_v2  ;;  %v9731_v44 = vunpack.i.l.bf16 %v9730_v2  ;;  %v7859_v2 = vld [vmem:[%s15675_s0 + $0xd9] ss:$2 sm:$0xff] }
 0x7ed   :  { %v6266_v36 = vsel %vm2742_vm2, %v14867_v56, %v9737_v18  ;;  %v6265_v31 = vsel %vm2742_vm2, %v14857_v28, %v9736_v21  ;;  %v9755_v56 = vpop.permute.xlu2 %9754  ;;  %v6788_v28 = vld [vmem:[%s15683_s4] sm:$0xf] }
 0x7ee   :  { %v6359_v38 = vsel %vm5182_vm5, %v6343_v26, %v9731_v44  ;;  %v6360_v9 = vsel %vm5182_vm5, %v6344_v51, %v9732_v54  ;;  %v6281_v42 = vsel %vm2872_vm4, %v6265_v31, %v9741_v4  ;;  %v6282_v15 = vsel %vm2872_vm4, %v6266_v36, %v9742_v5  ;;  %v7860_v54 = vld [vmem:[%s15675_s0 + $0x109] ss:$2 sm:$0xff]  ;;  %v7861_v36 = vld [vmem:[%s15675_s0 + $0x139] ss:$2 sm:$0xff] }
 0x7ef   :  { %v6375_v32 = vpack.c.bf16 %v6360_v9, %v6359_v38  ;;  %v6814_v8 = vsel %vm3362_vm0, %v6788_v28, 0  ;;  %v9757_v29 = vunpack.i.h.bf16 %v9755_v56  ;;  %v9756_v62 = vunpack.i.l.bf16 %v9755_v56  ;;  %v7862_v31 = vld [vmem:[%s15675_s0 + $0x169] ss:$2 sm:$0xff] }
 0x7f0   :  { %6823 = vmatpush.bf16.msrb.mxu1 %v6814_v8  ;;  %v6540_v6 = vpop.f32.mrf.mxu2  ;;  %v6782_v51 = vpack.c.bf16 %v7860_v54, %v7859_v2  ;;  %v7865_v28 = vld [vmem:[%s15675_s0 + $0x229] ss:$2 sm:$0xff] }
 0x7f1   :  { %6513 = vmatmul.bf16.gmra.mxu3 %v6375_v32  ;;  %v6785_v37 = vpack.c.bf16 %v7866_v63, %v7865_v28  ;;  %v7867_v8 = vld [vmem:[%s15675_s0 + $0x289] ss:$2 sm:$0xff] }
 0x7f2   :  { %v9750_v49 = vpop.permute.xlu1 %9749 }
 0x7f3   :  { %v9745_v30 = vpop.permute.xlu0 %9744  ;;  %v9752_v10 = vunpack.i.h.bf16 %v9750_v49  ;;  %v9751_v23 = vunpack.i.l.bf16 %v9750_v49  ;;  %7871 = vmatmul.msk.bf16.vlgmr.msrb.gmra.mxu1 %vm2677_vm1, %v6780_v58  ;;  %v7868_v58 = vld [vmem:[%s15675_s0 + $0x2b9] ss:$2 sm:$0xff] }
 0x7f4   :  { %v9747_v35 = vunpack.i.h.bf16 %v9745_v30  ;;  %v9746_v46 = vunpack.i.l.bf16 %v9745_v30 }
 0x7f6   :  { %v6298_v43 = vsel %vm3002_vm6, %v6282_v15, %v9747_v35  ;;  %v6297_v27 = vsel %vm3002_vm6, %v6281_v42, %v9746_v46  ;;  %v6783_v35 = vpack.c.bf16 %v7862_v31, %v7861_v36  ;;  %v7864_v42 = vld [vmem:[%s15675_s0 + $0x1f9] ss:$2 sm:$0xff] }
 0x7f7   :  { %v6314_v45 = vsel %vm3132_vm8, %v6298_v43, %v9752_v10  ;;  %v6313_v13 = vsel %vm3132_vm8, %v6297_v27, %v9751_v23  ;;  %v7863_v23 = vld [vmem:[%s15675_s0 + $0x1c9] ss:$2 sm:$0xff] }
 0x7f8   :  { %v6329_v61 = vsel %vm5148_vm15, %v6313_v13, %v9756_v62  ;;  %v6330_v0 = vsel %vm5148_vm15, %v6314_v45, %v9757_v29  ;;  %v6543_v9 = vpop.f32.mrf.mxu2  ;;  %v6784_v15 = vpack.c.bf16 %v7864_v42, %v7863_v23  ;;  %v6786_v29 = vpack.c.bf16 %v7868_v58, %v7867_v8 }
 0x7fa   :  { %v9765_v34 = vpop.permute.xlu1 %9764 }
 0x7fb   :  { %v9767_v59 = vunpack.i.h.bf16 %v9765_v34  ;;  %v9766_v33 = vunpack.i.l.bf16 %v9765_v34  ;;  %v9760_v12 = vpop.permute.xlu0 %9759 }
 0x7fc   :  { %v9762_v57 = vunpack.i.h.bf16 %v9760_v12  ;;  %v9761_v7 = vunpack.i.l.bf16 %v9760_v12  ;;  %v7869_v12 = vld [vmem:[%s15675_s0 + $0x2e9] ss:$2 sm:$0xff] }
 0x7fe   :  { %v6345_v48 = vsel %vm5165_vm3, %v6329_v61, %v9761_v7  ;;  %v6346_v1 = vsel %vm5165_vm3, %v6330_v0, %v9762_v57  ;;  %v7870_v57 = vld [vmem:[%s15675_s0 + $0x319] ss:$2 sm:$0xff]  ;;  %v7092_v7 = vld [vmem:[%s15686_s5 + $0x8] sm:$0xff] }
 0x7ff   :  { %v6361_v55 = vsel %vm5182_vm5, %v6345_v48, %v9766_v33  ;;  %v6362_v40 = vsel %vm5182_vm5, %v6346_v1, %v9767_v59  ;;  %v6787_v61 = vpack.c.bf16 %v7870_v57, %v7869_v12  ;;  %7113 = vmatpush.msra.mxu3 %v7092_v7 }
 0x800   :  { %v6377_v25 = vpack.c.bf16 %v6362_v40, %v6361_v55  ;;  %v6545_v30 = vpop.f32.mrf.mxu2 }
 0x802   :  { %6518 = vmatmul.bf16.gmra.mxu3 %v6377_v25 }
 0x803   :  { %7872 = vmatmul.msk.bf16.gmra.mxu1 %vm2677_vm1, %v6781_v17 }
 0x804   :  { %v6484_v53 = vpop.f32.mrf.mxu3 }
 0x805   :  { %v15050_v19 = vadd.f32 %v6533_v11, %v6484_v53 }
 0x807   :  { %v6575_v3 = vsel %vm2742_vm2, %v15050_v19, 0.0 }
 0x808   :  { %v6548_v46 = vpop.f32.mrf.mxu2 }
 0x80c   :  { %v6486_v20 = vpop.f32.mrf.mxu3 }
 0x80d   :  { %v15052_v14 = vadd.f32 %v6535_v16, %v6486_v20 }
 0x80f   :  { %v6576_v60 = vsel %vm2742_vm2, %v15052_v14, 0.0 }
 0x810   :  { %v6577_v22 = vadd.f32 %v6576_v60, %v6575_v3  ;;  %v6550_v43 = vpop.f32.mrf.mxu2 }
 0x813   :  { %7873 = vmatmul.msk.bf16.gmra.mxu1 %vm2677_vm1, %v6782_v51 }
 0x815   :  { %v6489_v52 = vpop.f32.mrf.mxu3 }
 0x816   :  { %v15059_v39 = vadd.f32 %v6538_v47, %v6489_v52 }
 0x818   :  { %v6578_v44 = vsel %vm2742_vm2, %v15059_v39, 0.0  ;;  %v6553_v56 = vpop.f32.mrf.mxu2 }
 0x819   :  { %v6579_v26 = vadd.f32 %v6578_v44, %v6577_v22 }
 0x81d   :  { %v6491_v50 = vpop.f32.mrf.mxu3 }
 0x81e   :  { %v15069_v38 = vadd.f32 %v6540_v6, %v6491_v50 }
 0x820   :  { %v6580_v18 = vsel %vm2742_vm2, %v15069_v38, 0.0  ;;  %v6555_v13 = vpop.f32.mrf.mxu2 }
 0x821   :  { %v6581_v21 = vadd.f32 %v6580_v18, %v6579_v26 }
 0x823   :  { %7874 = vmatmul.msk.bf16.gmra.mxu1 %vm2677_vm1, %v6783_v35 }
 0x826   :  { %v6494_v32 = vpop.f32.mrf.mxu3 }
 0x827   :  { %v15074_v49 = vadd.f32 %v6543_v9, %v6494_v32 }
 0x828   :  { %v6558_v62 = vpop.f32.mrf.mxu2 }
 0x829   :  { %v6582_v5 = vsel %vm2742_vm2, %v15074_v49, 0.0 }
 0x82a   :  { %v6583_v4 = vadd.f32 %v6582_v5, %v6581_v21 }
 0x82e   :  { %v6496_v10 = vpop.f32.mrf.mxu3 }
 0x82f   :  { %v6546_v55 = vadd.f32 %v6545_v30, %v6496_v10 }
 0x830   :  { %v6560_v33 = vpop.f32.mrf.mxu2 }
 0x831   :  { %v6584_v16 = vsel %vm2742_vm2, %v6546_v55, 0.0 }
 0x832   :  { %v6585_v17 = vadd.f32 %v6584_v16, %v6583_v4 }
 0x833   :  { %7875 = vmatmul.msk.bf16.gmra.mxu1 %vm2677_vm1, %v6784_v15 }
 0x838   :  { %v6563_v48 = vpop.f32.mrf.mxu2 }
 0x83c   :  { %v6499_v11 = vpop.f32.mrf.mxu3 }
 0x83d   :  { %v6549_v40 = vadd.f32 %v6548_v46, %v6499_v11 }
 0x83f   :  { %v6586_v24 = vsel %vm2742_vm2, %v6549_v40, 0.0 }
 0x840   :  { %v6565_v25 = vpop.f32.mrf.mxu2  ;;  %v6587_v60 = vadd.f32 %v6586_v24, %v6585_v17 }
 0x843   :  { %7876 = vmatmul.msk.bf16.gmra.mxu1 %vm2677_vm1, %v6785_v37 }
 0x844   :  { %v6501_v27 = vpop.f32.mrf.mxu3 }
 0x845   :  { %v6551_v53 = vadd.f32 %v6550_v43, %v6501_v27 }
 0x847   :  { %v6588_v20 = vsel %vm2742_vm2, %v6551_v53, 0.0 }
 0x848   :  { %v6589_v52 = vadd.f32 %v6588_v20, %v6587_v60  ;;  %v6568_v44 = vpop.f32.mrf.mxu2 }
 0x84d   :  { %v6504_v45 = vpop.f32.mrf.mxu3 }
 0x84e   :  { %v15118_v41 = vadd.f32 %v6553_v56, %v6504_v45 }
 0x850   :  { %v6590_v22 = vsel %vm2742_vm2, %v15118_v41, 0.0  ;;  %v6570_v10 = vpop.f32.mrf.mxu2 }
 0x851   :  { %v6591_v26 = vadd.f32 %v6590_v22, %v6589_v52 }
 0x853   :  { %7877 = vmatmul.msk.bf16.gmra.mxu1 %vm2677_vm1, %v6786_v29 }
 0x855   :  { %v6506_v34 = vpop.f32.mrf.mxu3 }
 0x856   :  { %v15121_v3 = vadd.f32 %v6555_v13, %v6506_v34 }
 0x858   :  { %v6592_v2 = vsel %vm2742_vm2, %v15121_v3, 0.0 }
 0x859   :  { %v6593_v9 = vadd.f32 %v6592_v2, %v6591_v26 }
 0x85e   :  { %v6509_v59 = vpop.f32.mrf.mxu3 }
 0x85f   :  { %v15125_v6 = vadd.f32 %v6558_v62, %v6509_v59 }
 0x861   :  { %v6594_v51 = vsel %vm2742_vm2, %v15125_v6, 0.0 }
 0x862   :  { %v6595_v36 = vadd.f32 %v6594_v51, %v6593_v9 }
 0x863   :  { %7878 = vmatmul.msk.bf16.gmra.mxu1 %vm2677_vm1, %v6787_v61 }
 0x866   :  { %v6511_v0 = vpop.f32.mrf.mxu3 }
 0x867   :  { %v15129_v54 = vadd.f32 %v6560_v33, %v6511_v0 }
 0x869   :  { %v6596_v21 = vsel %vm2742_vm2, %v15129_v54, 0.0 }
 0x86a   :  { %v6597_v5 = vadd.f32 %v6596_v21, %v6595_v36 }
 0x874   :  { %v6514_v1 = vpop.f32.mrf.mxu3 }
 0x875   :  { %v15133_v50 = vadd.f32 %v6563_v48, %v6514_v1 }
 0x877   :  { %v6598_v31 = vsel %vm2742_vm2, %v15133_v50, 0.0 }
 0x878   :  { %v6599_v35 = vadd.f32 %v6598_v31, %v6597_v5 }
 0x87c   :  { %v6516_v47 = vpop.f32.mrf.mxu3 }
 0x87d   :  { %v15137_v32 = vadd.f32 %v6565_v25, %v6516_v47 }
 0x87f   :  { %v6600_v4 = vsel %vm2742_vm2, %v15137_v32, 0.0 }
 0x880   :  { %v6601_v23 = vadd.f32 %v6600_v4, %v6599_v35 }
 0x885   :  { %v6519_v18 = vpop.f32.mrf.mxu3 }
 0x886   :  { %v15141_v30 = vadd.f32 %v6568_v44, %v6519_v18 }
 0x888   :  { %v6602_v46 = vsel %vm2742_vm2, %v15141_v30, 0.0 }
 0x889   :  { %v6603_v11 = vadd.f32 %v6602_v46, %v6601_v23 }
 0x88d   :  { %v6521_v42 = vpop.f32.mrf.mxu3 }
 0x88e   :  { %v15147_v15 = vadd.f32 %v6570_v10, %v6521_v42 }
 0x890   :  { %v6604_v43 = vsel %vm2742_vm2, %v15147_v15, 0.0 }
 0x891   :  { %v6605_v27 = vadd.f32 %v6604_v43, %v6603_v11 }
 0x893   :  { %v6606_v56 = vrot.slane %v6605_v27, 4 }
 0x895   :  { %v6607_v28 = vadd.f32 %v6606_v56, %v6605_v27 }
 0x897   :  { %v6608_v63 = vrot.slane %v6607_v28, 2 }
 0x899   :  { %v6609_v37 = vadd.f32 %v6608_v63, %v6607_v28 }
 0x89b   :  { %v6610_v45 = vrot.slane %v6609_v37, 1 }
 0x89d   :  { %v6611_v13 = vadd.f32 %v6610_v45, %v6609_v37 }
 0x89f   :  { %v6612_v34 = vmul.f32 0.0078125, %v6611_v13 }
 0x8a1   :  { %v15152_v8 = vsub.f32 %v15050_v19, %v6612_v34  ;;  %v15155_v58 = vsub.f32 %v15052_v14, %v6612_v34  ;;  %v15158_v29 = vsub.f32 %v15059_v39, %v6612_v34  ;;  %v15161_v62 = vsub.f32 %v15069_v38, %v6612_v34  ;;  %v15170_v19 = vpop.f32.mrf.mxu1 }
 0x8a2   :  { %v15164_v59 = vsub.f32 %v15074_v49, %v6612_v34  ;;  %v15174_v57 = vsub.f32 %v6546_v55, %v6612_v34  ;;  %v15180_v61 = vsub.f32 %v6549_v40, %v6612_v34  ;;  %v15185_v25 = vsub.f32 %v6551_v53, %v6612_v34 }
 0x8a3   :  { %v6629_v33 = vmul.f32 %v15152_v8, %v15152_v8  ;;  %v6630_v12 = vmul.f32 %v15155_v58, %v15155_v58  ;;  %v6631_v14 = vmul.f32 %v15158_v29, %v15158_v29  ;;  %v6632_v39 = vmul.f32 %v15161_v62, %v15161_v62 }
 0x8a4   :  { %v6633_v0 = vmul.f32 %v15164_v59, %v15164_v59  ;;  %v6634_v55 = vmul.f32 %v15174_v57, %v15174_v57  ;;  %v15193_v17 = vsub.f32 %v15118_v41, %v6612_v34  ;;  %v6635_v40 = vmul.f32 %v15180_v61, %v15180_v61 }
 0x8a5   :  { %v6645_v38 = vsel %vm2742_vm2, %v6629_v33, 0.0  ;;  %v6646_v49 = vsel %vm2742_vm2, %v6630_v12, 0.0  ;;  %v6648_v48 = vsel %vm2742_vm2, %v6631_v14, 0.0  ;;  %v6650_v16 = vsel %vm2742_vm2, %v6632_v39, 0.0 }
 0x8a6   :  { %v6647_v7 = vadd.f32 %v6646_v49, %v6645_v38  ;;  %v6652_v20 = vsel %vm2742_vm2, %v6633_v0, 0.0  ;;  %v15199_v53 = vsub.f32 %v15121_v3, %v6612_v34  ;;  %v6636_v22 = vmul.f32 %v15185_v25, %v15185_v25 }
 0x8a7   :  { %v6654_v52 = vsel %vm2742_vm2, %v6634_v55, 0.0  ;;  %v15205_v44 = vsub.f32 %v15125_v6, %v6612_v34  ;;  %v6637_v41 = vmul.f32 %v15193_v17, %v15193_v17  ;;  %v6656_v26 = vsel %vm2742_vm2, %v6635_v40, 0.0 }
 0x8a8   :  { %v6649_v1 = vadd.f32 %v6648_v48, %v6647_v7  ;;  %v15211_v9 = vsub.f32 %v15129_v54, %v6612_v34  ;;  %v6638_v3 = vmul.f32 %v15199_v53, %v15199_v53  ;;  %v6658_v18 = vsel %vm2742_vm2, %v6636_v22, 0.0 }
 0x8a9   :  { %v15190_v24 = vpop.f32.mrf.mxu1  ;;  %v15219_v6 = vsub.f32 %v15133_v50, %v6612_v34  ;;  %v6639_v31 = vmul.f32 %v15205_v44, %v15205_v44  ;;  %v6660_v5 = vsel %vm2742_vm2, %v6637_v41, 0.0  ;;  %v6626_v54 = vsub.f32 %v15137_v32, %v6612_v34 }
 0x8aa   :  { %v6651_v47 = vadd.f32 %v6650_v16, %v6649_v1  ;;  %v6640_v35 = vmul.f32 %v15211_v9, %v15211_v9  ;;  %v6662_v46 = vsel %vm2742_vm2, %v6638_v3, 0.0  ;;  %v6627_v23 = vsub.f32 %v15141_v30, %v6612_v34 }
 0x8ab   :  { %v6641_v50 = vmul.f32 %v15219_v6, %v15219_v6  ;;  %v6664_v42 = vsel %vm2742_vm2, %v6639_v31, 0.0  ;;  %v15233_v43 = vsub.f32 %v15147_v15, %v6612_v34  ;;  %v6642_v27 = vmul.f32 %v6626_v54, %v6626_v54  ;;  %v15264_v31 = vld [vmem:[%s15684_s11] ss:$0 sm:$0xff] }
 0x8ac   :  { %v6653_v60 = vadd.f32 %v6652_v20, %v6651_v47  ;;  %v6666_v32 = vsel %vm2742_vm2, %v6640_v35, 0.0  ;;  %v6643_v63 = vmul.f32 %v6627_v23, %v6627_v23  ;;  %v6867_v3 = vsel %vm2742_vm2, %v15170_v19, 0.0 }
 0x8ad   :  { %v6668_v37 = vsel %vm2742_vm2, %v6641_v50, 0.0  ;;  %v6644_v30 = vmul.f32 %v15233_v43, %v15233_v43  ;;  %v6670_v13 = vsel %vm2742_vm2, %v6642_v27, 0.0 }
 0x8ae   :  { %v6655_v2 = vadd.f32 %v6654_v52, %v6653_v60  ;;  %v6672_v12 = vsel %vm2742_vm2, %v6643_v63, 0.0 }
 0x8af   :  { %v6674_v34 = vsel %vm2742_vm2, %v6644_v30, 0.0 }
 0x8b0   :  { %v6657_v51 = vadd.f32 %v6656_v26, %v6655_v2  ;;  %v7091_v26 = vld [vmem:[%s15686_s5] sm:$0xff] }
 0x8b1   :  { %v15216_v21 = vpop.f32.mrf.mxu1  ;;  %7114 = vmatpush.msra.mxu3 %v7091_v26 }
 0x8b2   :  { %v6659_v36 = vadd.f32 %v6658_v18, %v6657_v51  ;;  %v6868_v18 = vsel %vm2742_vm2, %v15190_v24, 0.0  ;;  %v6870_v35 = vsel %vm2742_vm2, %v15216_v21, 0.0 }
 0x8b4   :  { %v6661_v4 = vadd.f32 %v6660_v5, %v6659_v36 }
 0x8b6   :  { %v6663_v10 = vadd.f32 %v6662_v46, %v6661_v4  ;;  %v6869_v4 = vadd.f32 %v6868_v18, %v6867_v3 }
 0x8b8   :  { %v6665_v11 = vadd.f32 %v6664_v42, %v6663_v10  ;;  %v6871_v63 = vadd.f32 %v6870_v35, %v6869_v4 }
 0x8b9   :  { %v15236_v56 = vpop.f32.mrf.mxu1 }
 0x8ba   :  { %v6667_v28 = vadd.f32 %v6666_v32, %v6665_v11  ;;  %v15281_v11 = vld [vmem:[%s15685_s12] ss:$0 sm:$0xff] }
 0x8bc   :  { %v6669_v45 = vadd.f32 %v6668_v37, %v6667_v28 }
 0x8be   :  { %v6671_v33 = vadd.f32 %v6670_v13, %v6669_v45 }
 0x8c0   :  { %v6673_v15 = vadd.f32 %v6672_v12, %v6671_v33 }
 0x8c1   :  { %v15244_v14 = vpop.f32.mrf.mxu1 }
 0x8c2   :  { %v6675_v39 = vadd.f32 %v6674_v34, %v6673_v15 }
 0x8c4   :  { %v6676_v38 = vrot.slane %v6675_v39, 4 }
 0x8c6   :  { %v6677_v49 = vadd.f32 %v6676_v38, %v6675_v39 }
 0x8c8   :  { %v6678_v7 = vrot.slane %v6677_v49, 2 }
 0x8c9   :  { %v15246_v0 = vpop.f32.mrf.mxu1 }
 0x8ca   :  { %v6679_v48 = vadd.f32 %v6678_v7, %v6677_v49 }
 0x8cc   :  { %v6680_v1 = vrot.slane %v6679_v48, 1 }
 0x8ce   :  { %v6681_v55 = vadd.f32 %v6680_v1, %v6679_v48 }
 0x8d0   :  { %v6682_v16 = vmul.f32 0.0078125, %v6681_v55  ;;  %v6876_v55 = vsel %vm2742_vm2, %v15246_v0, 0.0 }
 0x8d1   :  { %v15248_v47 = vpop.f32.mrf.mxu1 }
 0x8d2   :  { %v6683_v40 = vadd.f32 1e-05, %v6682_v16  ;;  %v6878_v35 = vsel %vm2742_vm2, %v15248_v47, 0.0 }
 0x8d4   :  { %9780 = vrsqrt.f32 %v6683_v40  ;;  %vm6690_vm4 = vweird.f32 %v6683_v40 }
 0x8d9   :  { %v15250_v20 = vpop.f32.mrf.mxu1 }
 0x8da   :  { %v9781_v60 = vpop.eup %9780 }
 0x8db   :  { %v6685_v22 = vmul.f32 %v9781_v60, %v6683_v40  ;;  %vm6691_vm1 = vweird.f32 %v9781_v60 }
 0x8dc   :  { %vm6692_vm6 = vmor %vm6690_vm4, %vm6691_vm1 }
 0x8dd   :  { %v6686_v52 = vmul.f32 %v9781_v60, %v6685_v22 }
 0x8df   :  { %v6687_v2 = vmul.f32 0.5, %v6686_v52 }
 0x8e1   :  { %v6688_v41 = vsub.f32 1.5, %v6687_v2  ;;  %v15255_v51 = vpop.f32.mrf.mxu1 }
 0x8e3   :  { %v6689_v36 = vmul.f32 %v9781_v60, %v6688_v41 }
 0x8e5   :  { %v15266_v5 = vsel %vm6692_vm6, %v9781_v60, %v6689_v36 }
 0x8e6   :  { %v6702_v46 = vmul.f32 %v15266_v5, %v15193_v17  ;;  %v6703_v10 = vmul.f32 %v15266_v5, %v15199_v53  ;;  %v6704_v50 = vmul.f32 %v15266_v5, %v15205_v44  ;;  %v6705_v42 = vmul.f32 %v15266_v5, %v15211_v9 }
 0x8e7   :  { %v6706_v27 = vmul.f32 %v15266_v5, %v15219_v6  ;;  %v6707_v32 = vmul.f32 %v15266_v5, %v6626_v54  ;;  %v6708_v9 = vmul.f32 %v15266_v5, %v6627_v23  ;;  %v6709_v13 = vmul.f32 %v15266_v5, %v15233_v43 }
 0x8e8   :  { %v6721_v17 = vmul.f32 %v15264_v31, %v6702_v46  ;;  %v6722_v53 = vmul.f32 %v15264_v31, %v6703_v10  ;;  %v6723_v28 = vmul.f32 %v15264_v31, %v6704_v50  ;;  %v6724_v44 = vmul.f32 %v15264_v31, %v6705_v42 }
 0x8e9   :  { %v15291_v37 = vpop.f32.mrf.mxu1  ;;  %v6725_v45 = vmul.f32 %v15264_v31, %v6706_v27  ;;  %v6872_v23 = vsel %vm2742_vm2, %v15236_v56, 0.0  ;;  %v6726_v33 = vmul.f32 %v15264_v31, %v6707_v32  ;;  %v6727_v39 = vmul.f32 %v15264_v31, %v6708_v9 }
 0x8ea   :  { %v15295_v30 = vadd.f32 %v15281_v11, %v6721_v17  ;;  %v15298_v6 = vadd.f32 %v15281_v11, %v6722_v53  ;;  %v15301_v54 = vadd.f32 %v15281_v11, %v6723_v28  ;;  %v15309_v12 = vadd.f32 %v15281_v11, %v6724_v44 }
 0x8eb   :  { %v6874_v43 = vsel %vm2742_vm2, %v15244_v14, 0.0  ;;  %v15319_v49 = vadd.f32 %v15281_v11, %v6725_v45  ;;  %v6873_v48 = vadd.f32 %v6872_v23, %v6871_v63  ;;  %v6728_v16 = vmul.f32 %v15264_v31, %v6709_v13 }
 0x8ec   :  { %v7061_v15 = vsel %vm2742_vm2, %v15295_v30, 0.0  ;;  %v7062_v34 = vsel %vm2742_vm2, %v15298_v6, 0.0  ;;  %v7064_v7 = vsel %vm2742_vm2, %v15301_v54, 0.0  ;;  %v15327_v40 = vadd.f32 %v15281_v11, %v6726_v33 }
 0x8ed   :  { %v7063_v38 = vadd.f32 %v7062_v34, %v7061_v15  ;;  %v7066_v60 = vsel %vm2742_vm2, %v15309_v12, 0.0  ;;  %v6875_v22 = vadd.f32 %v6874_v43, %v6873_v48  ;;  %v15332_v52 = vadd.f32 %v15281_v11, %v6727_v39 }
 0x8ee   :  { %v7068_v26 = vsel %vm2742_vm2, %v15319_v49, 0.0  ;;  %v6694_v18 = vmul.f32 %v15266_v5, %v15152_v8  ;;  %v6695_v36 = vmul.f32 %v15266_v5, %v15155_v58  ;;  %v6696_v46 = vmul.f32 %v15266_v5, %v15158_v29 }
 0x8ef   :  { %v7065_v1 = vadd.f32 %v7064_v7, %v7063_v38  ;;  %v6877_v3 = vadd.f32 %v6876_v55, %v6875_v22  ;;  %v6697_v10 = vmul.f32 %v15266_v5, %v15161_v62  ;;  %v15349_v50 = vadd.f32 %v15281_v11, %v6728_v16 }
 0x8f0   :  { %v7070_v42 = vsel %vm2742_vm2, %v15327_v40, 0.0  ;;  %v6698_v8 = vmul.f32 %v15266_v5, %v15164_v59  ;;  %v6713_v27 = vmul.f32 %v15264_v31, %v6694_v18  ;;  %v6714_v32 = vmul.f32 %v15264_v31, %v6695_v36 }
 0x8f1   :  { %v7067_v2 = vadd.f32 %v7066_v60, %v7065_v1  ;;  %v15334_v41 = vpop.f32.mrf.mxu1  ;;  %v6715_v17 = vmul.f32 %v15264_v31, %v6696_v46  ;;  %v7072_v29 = vsel %vm2742_vm2, %v15332_v52, 0.0  ;;  %v6879_v62 = vadd.f32 %v6878_v35, %v6877_v3 }
 0x8f2   :  { %v6699_v28 = vmul.f32 %v15266_v5, %v15174_v57  ;;  %v6716_v44 = vmul.f32 %v15264_v31, %v6697_v10  ;;  %v15364_v9 = vadd.f32 %v15281_v11, %v6713_v27  ;;  %v7074_v59 = vsel %vm2742_vm2, %v15349_v50, 0.0 }
 0x8f3   :  { %v7069_v4 = vadd.f32 %v7068_v26, %v7067_v2  ;;  %v6880_v63 = vsel %vm2742_vm2, %v15250_v20, 0.0  ;;  %v15371_v45 = vadd.f32 %v15281_v11, %v6714_v32  ;;  %v6700_v57 = vmul.f32 %v15266_v5, %v15180_v61 }
 0x8f4   :  { %v6717_v33 = vmul.f32 %v15264_v31, %v6698_v8  ;;  %v15379_v15 = vadd.f32 %v15281_v11, %v6715_v17  ;;  %v6701_v34 = vmul.f32 %v15266_v5, %v15185_v25  ;;  %v7040_v39 = vsel %vm2742_vm2, %v15364_v9, 0.0 }
 0x8f5   :  { %v7071_v58 = vadd.f32 %v7070_v42, %v7069_v4  ;;  %v6881_v38 = vadd.f32 %v6880_v63, %v6879_v62  ;;  %v6718_v43 = vmul.f32 %v15264_v31, %v6699_v28  ;;  %v15387_v7 = vadd.f32 %v15281_v11, %v6716_v44 }
 0x8f6   :  { %v7041_v61 = vsel %vm2742_vm2, %v15371_v45, 0.0  ;;  %v6882_v1 = vsel %vm2742_vm2, %v15255_v51, 0.0  ;;  %v6719_v16 = vmul.f32 %v15264_v31, %v6700_v57  ;;  %v15395_v25 = vadd.f32 %v15281_v11, %v6717_v33 }
 0x8f7   :  { %v7073_v53 = vadd.f32 %v7072_v29, %v7071_v58  ;;  %v7042_v55 = vadd.f32 %v7041_v61, %v7040_v39  ;;  %v7043_v5 = vsel %vm2742_vm2, %v15379_v15, 0.0  ;;  %v9804_v22 = vmov 64.0  }
 0x8f8   :  { %9782 = vrcp.f32 %v9804_v22  ;;  %v6883_v2 = vadd.f32 %v6882_v1, %v6881_v38  ;;  %v6720_v26 = vmul.f32 %v15264_v31, %v6701_v34  ;;  %v15401_v3 = vadd.f32 %v15281_v11, %v6718_v43 }
 0x8f9   :  { %v7075_v13 = vadd.f32 %v7074_v59, %v7073_v53  ;;  %v15373_v23 = vpop.f32.mrf.mxu1  ;;  %v7044_v60 = vadd.f32 %v7043_v5, %v7042_v55  ;;  %v7045_v18 = vsel %vm2742_vm2, %v15387_v7, 0.0  ;;  %v6884_v4 = vsel %vm2742_vm2, %v15291_v37, 0.0 }
 0x8fa   :  { %v15410_v10 = vadd.f32 %v15281_v11, %v6719_v16  ;;  %v7047_v42 = vsel %vm2742_vm2, %v15395_v25, 0.0  ;;  %v6885_v8 = vadd.f32 %v6884_v4, %v6883_v2  ;;  %v15415_v58 = vadd.f32 %v15281_v11, %v6720_v26 }
 0x8fb   :  { %v7076_v48 = vrot.slane %v7075_v13, 4  ;;  %v7046_v35 = vadd.f32 %v7045_v18, %v7044_v60  ;;  %v7049_v27 = vsel %vm2742_vm2, %v15401_v3, 0.0  ;;  %v6886_v29 = vsel %vm2742_vm2, %v15334_v41, 0.0 }
 0x8fc   :  { %v7051_v53 = vsel %vm2742_vm2, %v15410_v10, 0.0  ;;  %v6887_v59 = vadd.f32 %v6886_v29, %v6885_v8  ;;  %v7053_v63 = vsel %vm2742_vm2, %v15415_v58, 0.0  ;;  %v6888_v57 = vsel %vm2742_vm2, %v15373_v23, 0.0 }
 0x8fd   :  { %v7077_v36 = vadd.f32 %v7076_v48, %v7075_v13  ;;  %v7048_v31 = vadd.f32 %v7047_v42, %v7046_v35 }
 0x8fe   :  { %v9783_v32 = vpop.eup %9782  ;;  %v6889_v43 = vadd.f32 %v6888_v57, %v6887_v59 }
 0x8ff   :  { %v7078_v17 = vrot.slane %v7077_v36, 2  ;;  %v7050_v62 = vadd.f32 %v7049_v27, %v7048_v31  ;;  %v7083_v28 = vmul.f32 64.0, %v9783_v32  ;;  %vm7087_vm8 = vweird.f32 %v9783_v32 }
 0x901   :  { %v15407_v46 = vpop.f32.mrf.mxu1  ;;  %v7052_v44 = vadd.f32 %v7051_v53, %v7050_v62  ;;  %v7084_v11 = vsub.f32 1.0, %v7083_v28  ;;  %v7079_v13 = vadd.f32 %v7078_v17, %v7077_v36 }
 0x902   :  { %v6890_v61 = vsel %vm2742_vm2, %v15407_v46, 0.0 }
 0x903   :  { %v7054_v33 = vadd.f32 %v7053_v63, %v7052_v44  ;;  %v7085_v39 = vmul.f32 %v9783_v32, %v7084_v11  ;;  %v7080_v1 = vrot.slane %v7079_v13, 1  ;;  %v6891_v5 = vadd.f32 %v6890_v61, %v6889_v43 }
 0x905   :  { %v7055_v38 = vrot.slane %v7054_v33, 4  ;;  %v7086_v55 = vadd.f32 %v9783_v32, %v7085_v39  ;;  %v7081_v2 = vadd.f32 %v7080_v1, %v7079_v13 }
 0x907   :  { %v7056_v48 = vadd.f32 %v7055_v38, %v7054_v33  ;;  %v7088_v18 = vsel %vm7087_vm8, %v9783_v32, %v7086_v55 }
 0x908   :  { %v7090_v31 = vmul.f32 %v7088_v18, %v7081_v2 }
 0x909   :  { %v15427_v34 = vpop.f32.mrf.mxu1  ;;  %v7057_v16 = vrot.slane %v7056_v48, 2 }
 0x90a   :  { %v6892_v60 = vsel %vm2742_vm2, %v15427_v34, 0.0 }
 0x90b   :  { %v7058_v22 = vadd.f32 %v7057_v16, %v7056_v48  ;;  %v6893_v4 = vadd.f32 %v6892_v60, %v6891_v5 }
 0x90d   :  { %v7059_v36 = vrot.slane %v7058_v22, 1 }
 0x90f   :  { %v7060_v42 = vadd.f32 %v7059_v36, %v7058_v22 }
 0x911   :  { %v15433_v26 = vpop.f32.mrf.mxu1  ;;  %v7089_v8 = vmul.f32 %v7088_v18, %v7060_v42 }
 0x912   :  { %v6894_v35 = vsel %vm2742_vm2, %v15433_v26, 0.0 }
 0x913   :  { %v6895_v27 = vadd.f32 %v6894_v35, %v6893_v4  ;;  %v7096_v17 = vsel %vm7095_vm11, %v7090_v31, %v7089_v8 }
 0x914   :  { %7879 = vmatmul.msk.f32.vlgmr.msra.gmra.mxu3 %vm2742_vm2, %v7096_v17 }
 0x919   :  { %v6862_v29 = vpop.f32.mrf.mxu1 }
 0x91a   :  { %v6896_v62 = vsel %vm2742_vm2, %v6862_v29, 0.0 }
 0x91b   :  { %v6897_v53 = vadd.f32 %v6896_v62, %v6895_v27 }
 0x91d   :  { %v6898_v28 = vrot.slane %v6897_v53, 4 }
 0x91f   :  { %v6899_v44 = vadd.f32 %v6898_v28, %v6897_v53 }
 0x921   :  { %v6900_v32 = vrot.slane %v6899_v44, 2 }
 0x923   :  { %v6901_v59 = vadd.f32 %v6900_v32, %v6899_v44 }
 0x925   :  { %v6902_v63 = vrot.slane %v6901_v59, 1 }
 0x927   :  { %v6903_v11 = vadd.f32 %v6902_v63, %v6901_v59 }
 0x929   :  { %v6904_v13 = vmul.f32 0.0078125, %v6903_v11 }
 0x92b   :  { %v15440_v57 = vsub.f32 %v15170_v19, %v6904_v13  ;;  %v15443_v33 = vsub.f32 %v15190_v24, %v6904_v13  ;;  %v15446_v39 = vsub.f32 %v15216_v21, %v6904_v13  ;;  %v15449_v38 = vsub.f32 %v15236_v56, %v6904_v13 }
 0x92c   :  { %v15452_v43 = vsub.f32 %v15244_v14, %v6904_v13  ;;  %v15461_v24 = vsub.f32 %v15246_v0, %v6904_v13  ;;  %v15466_v56 = vsub.f32 %v15248_v47, %v6904_v13  ;;  %v15474_v60 = vsub.f32 %v15250_v20, %v6904_v13 }
 0x92d   :  { %v6921_v61 = vmul.f32 %v15440_v57, %v15440_v57  ;;  %v6922_v48 = vmul.f32 %v15443_v33, %v15443_v33  ;;  %v6923_v19 = vmul.f32 %v15446_v39, %v15446_v39  ;;  %v6924_v21 = vmul.f32 %v15449_v38, %v15449_v38 }
 0x92e   :  { %v6925_v14 = vmul.f32 %v15452_v43, %v15452_v43  ;;  %v6926_v0 = vmul.f32 %v15461_v24, %v15461_v24  ;;  %v15480_v2 = vsub.f32 %v15255_v51, %v6904_v13  ;;  %v6927_v18 = vmul.f32 %v15466_v56, %v15466_v56 }
 0x92f   :  { %v6937_v1 = vsel %vm2742_vm2, %v6921_v61, 0.0  ;;  %v6938_v55 = vsel %vm2742_vm2, %v6922_v48, 0.0  ;;  %v6940_v16 = vsel %vm2742_vm2, %v6923_v19, 0.0  ;;  %v6942_v22 = vsel %vm2742_vm2, %v6924_v21, 0.0 }
 0x930   :  { %v6939_v5 = vadd.f32 %v6938_v55, %v6937_v1  ;;  %v6944_v36 = vsel %vm2742_vm2, %v6925_v14, 0.0  ;;  %v15486_v35 = vsub.f32 %v15291_v37, %v6904_v13  ;;  %v6928_v20 = vmul.f32 %v15474_v60, %v15474_v60 }
 0x931   :  { %v6946_v42 = vsel %vm2742_vm2, %v6926_v0, 0.0  ;;  %v6915_v8 = vsub.f32 %v15334_v41, %v6904_v13  ;;  %v6929_v51 = vmul.f32 %v15480_v2, %v15480_v2  ;;  %v6948_v27 = vsel %vm2742_vm2, %v6927_v18, 0.0 }
 0x932   :  { %v6941_v47 = vadd.f32 %v6940_v16, %v6939_v5  ;;  %v6916_v62 = vsub.f32 %v15373_v23, %v6904_v13  ;;  %v6930_v37 = vmul.f32 %v15486_v35, %v15486_v35  ;;  %v6950_v53 = vsel %vm2742_vm2, %v6928_v20, 0.0 }
 0x933   :  { %v15500_v44 = vsub.f32 %v15407_v46, %v6904_v13  ;;  %v6931_v32 = vmul.f32 %v6915_v8, %v6915_v8  ;;  %v6952_v41 = vsel %vm2742_vm2, %v6929_v51, 0.0  ;;  %v15504_v63 = vsub.f32 %v15427_v34, %v6904_v13 }
 0x934   :  { %v6943_v4 = vadd.f32 %v6942_v22, %v6941_v47  ;;  %v6932_v11 = vmul.f32 %v6916_v62, %v6916_v62  ;;  %v6954_v61 = vsel %vm2742_vm2, %v6930_v37, 0.0  ;;  %v15508_v48 = vsub.f32 %v15433_v26, %v6904_v13 }
 0x935   :  { %v6933_v19 = vmul.f32 %v15500_v44, %v15500_v44  ;;  %v6956_v46 = vsel %vm2742_vm2, %v6931_v32, 0.0  ;;  %v15513_v14 = vsub.f32 %v6862_v29, %v6904_v13  ;;  %v6934_v1 = vmul.f32 %v15504_v63, %v15504_v63 }
 0x936   :  { %v6945_v31 = vadd.f32 %v6944_v36, %v6943_v4  ;;  %v6958_v34 = vsel %vm2742_vm2, %v6932_v11, 0.0  ;;  %v6935_v16 = vmul.f32 %v15508_v48, %v15508_v48 }
 0x937   :  { %v6960_v26 = vsel %vm2742_vm2, %v6933_v19, 0.0  ;;  %v6936_v0 = vmul.f32 %v15513_v14, %v15513_v14  ;;  %v6962_v22 = vsel %vm2742_vm2, %v6934_v1, 0.0 }
 0x938   :  { %v6947_v17 = vadd.f32 %v6946_v42, %v6945_v31  ;;  %v6964_v29 = vsel %vm2742_vm2, %v6935_v16, 0.0 }
 0x939   :  { %v6966_v18 = vsel %vm2742_vm2, %v6936_v0, 0.0 }
 0x93a   :  { %v6949_v28 = vadd.f32 %v6948_v27, %v6947_v17 }
 0x93c   :  { %v6951_v59 = vadd.f32 %v6950_v53, %v6949_v28  ;;  %v7120_v53 = vld [vmem:[%s15689_s6] sm:$0xf] }
 0x93d   :  { %7880 = vmatpush.msk.msrb.mxu3 %vm3362_vm0, %v7120_v53  ;;  %vm7121_vm0 = vcmask 31744  }
 0x93e   :  { %v6953_v23 = vadd.f32 %v6952_v41, %v6951_v59 }
 0x940   :  { %v6955_v21 = vadd.f32 %v6954_v61, %v6953_v23 }
 0x942   :  { %v6957_v55 = vadd.f32 %v6956_v46, %v6955_v21 }
 0x944   :  { %v6959_v5 = vadd.f32 %v6958_v34, %v6957_v55 }
 0x946   :  { %v6961_v47 = vadd.f32 %v6960_v26, %v6959_v5 }
 0x948   :  { %v6963_v13 = vadd.f32 %v6962_v22, %v6961_v47 }
 0x94a   :  { %v6965_v36 = vadd.f32 %v6964_v29, %v6963_v13 }
 0x94c   :  { %v6967_v4 = vadd.f32 %v6966_v18, %v6965_v36  ;;  %v15543_v18 = vld [vmem:[%s15687_s13] ss:$0 sm:$0xff] }
 0x94e   :  { %v6968_v20 = vrot.slane %v6967_v4, 4 }
 0x950   :  { %v6969_v42 = vadd.f32 %v6968_v20, %v6967_v4 }
 0x952   :  { %v6970_v31 = vrot.slane %v6969_v42, 2 }
 0x954   :  { %v6971_v51 = vadd.f32 %v6970_v31, %v6969_v42 }
 0x956   :  { %v6972_v27 = vrot.slane %v6971_v51, 1 }
 0x958   :  { %v6973_v17 = vadd.f32 %v6972_v27, %v6971_v51 }
 0x95a   :  { %v6974_v37 = vmul.f32 0.0078125, %v6973_v17 }
 0x95c   :  { %v6975_v28 = vadd.f32 1e-05, %v6974_v37 }
 0x95e   :  { %9784 = vrsqrt.f32 %v6975_v28  ;;  %vm6982_vm12 = vweird.f32 %v6975_v28 }
 0x964   :  { %v9785_v32 = vpop.eup %9784 }
 0x965   :  { %v6977_v41 = vmul.f32 %v9785_v32, %v6975_v28  ;;  %vm6983_vm13 = vweird.f32 %v9785_v32 }
 0x966   :  { %vm6984_vm14 = vmor %vm6982_vm12, %vm6983_vm13 }
 0x967   :  { %v6978_v59 = vmul.f32 %v9785_v32, %v6977_v41 }
 0x969   :  { %v6979_v11 = vmul.f32 0.5, %v6978_v59 }
 0x96b   :  { %v6980_v61 = vsub.f32 1.5, %v6979_v11 }
 0x96d   :  { %v6981_v23 = vmul.f32 %v9785_v32, %v6980_v61 }
 0x96f   :  { %v6985_v19 = vsel %vm6984_vm14, %v9785_v32, %v6981_v23 }
 0x970   :  { %v6991_v46 = vmul.f32 %v6985_v19, %v15461_v24  ;;  %v6992_v21 = vmul.f32 %v6985_v19, %v15466_v56  ;;  %v15533_v1 = vmul.f32 %v6985_v19, %v15486_v35  ;;  %v15535_v34 = vmul.f32 %v6985_v19, %v6915_v8 }
 0x971   :  { %v15537_v55 = vmul.f32 %v6985_v19, %v6916_v62  ;;  %v6986_v62 = vmul.f32 %v6985_v19, %v15440_v57  ;;  %v6987_v36 = vmul.f32 %v6985_v19, %v15443_v33  ;;  %v6988_v4 = vmul.f32 %v6985_v19, %v15446_v39 }
 0x972   :  { %v6989_v42 = vmul.f32 %v6985_v19, %v15449_v38  ;;  %v6990_v31 = vmul.f32 %v6985_v19, %v15452_v43  ;;  %v6993_v27 = vmul.f32 %v6985_v19, %v15474_v60  ;;  %v6994_v57 = vmul.f32 %v6985_v19, %v15480_v2  ;;  %v15557_v38 = vld [vmem:[%s15688_s14] ss:$0 sm:$0xff] }
 0x973   :  { %v6998_v37 = vmul.f32 %v6985_v19, %v15500_v44  ;;  %v6999_v33 = vmul.f32 %v6985_v19, %v15504_v63  ;;  %v7005_v39 = vmul.f32 %v15543_v18, %v6986_v62  ;;  %v7006_v53 = vmul.f32 %v15543_v18, %v6987_v36 }
 0x974   :  { %v7007_v60 = vmul.f32 %v15543_v18, %v6988_v4  ;;  %v7000_v32 = vmul.f32 %v6985_v19, %v15508_v48  ;;  %v7001_v44 = vmul.f32 %v6985_v19, %v15513_v14  ;;  %v7008_v63 = vmul.f32 %v15543_v18, %v6989_v42 }
 0x975   :  { %v7009_v41 = vmul.f32 %v15543_v18, %v6990_v31  ;;  %v7010_v59 = vmul.f32 %v15543_v18, %v6991_v46  ;;  %v7024_v48 = vadd.f32 %v15557_v38, %v7005_v39  ;;  %v7025_v19 = vadd.f32 %v15557_v38, %v7006_v53 }
 0x997   :  { %v7116_v16 = vpop.f32.mrf.mxu3 }
 0x998   :  { %v7119_v26 = vmax.f32 %v7116_v16, 0.0  ;;  %v7011_v16 = vmul.f32 %v15543_v18, %v6992_v21 }
 0x99a   :  { %7881 = vmatmul.msk.f32.vlgmr.msrb.gmra.mxu3 %vm7121_vm0, %v7119_v26  ;;  %v7012_v26 = vmul.f32 %v15543_v18, %v6993_v27 }
 0xa1d   :  { %v7145_v5 = vpop.f32.mrf.mxu3 }
 0xa1e   :  { %v7882_v0 = vmul.f32 -1.442695, %v7145_v5  ;;  %v7026_v5 = vadd.f32 %v15557_v38, %v7007_v60 }
 0xa20   :  { %9786 = vpow2.f32 %v7882_v0 }
 0xa26   :  { %v9787_v22 = vpop.eup %9786 }
 0xa27   :  { %v7151_v47 = vadd.f32 1.0, %v9787_v22 }
 0xa29   :  { %9788 = vrcp.f32 %v7151_v47  ;;  %v7163_v13 = vand.u32 2147483648, %v7151_v47  ;;  %v7161_v8 = vand.u32 2147483647, %v7151_v47  ;;  %vm7157_vm3 = vweird.f32 %v7151_v47 }
 0xa2b   :  { %v7164_v51 = vor.u32 1.1754944e-38, %v7163_v13  ;;  %vm7162_vm7 = vcmp.eq.f32.partialorder %v7161_v8, 8.507059e+37  ;;  %v7030_v8 = vadd.f32 %v15557_v38, %v7011_v16 }
 0xa2f   :  { %v9789_v24 = vpop.eup %9788 }
 0xa30   :  { %v7153_v29 = vmul.f32 %v9789_v24, %v7151_v47  ;;  %vm7158_vm15 = vweird.f32 %v9789_v24 }
 0xa31   :  { %vm7159_vm5 = vmor %vm7157_vm3, %vm7158_vm15 }
 0xa32   :  { %v7154_v56 = vsub.f32 1.0, %v7153_v29  ;;  %v7014_v29 = vmul.f32 %v15543_v18, %v15533_v1  ;;  %v7031_v1 = vadd.f32 %v15557_v38, %v7012_v26 }
 0xa34   :  { %v7155_v35 = vmul.f32 %v9789_v24, %v7154_v56  ;;  %v7029_v56 = vadd.f32 %v15557_v38, %v7010_v59 }
 0xa36   :  { %v7156_v20 = vadd.f32 %v9789_v24, %v7155_v35  ;;  %v7015_v35 = vmul.f32 %v15543_v18, %v15535_v34 }
 0xa38   :  { %v7160_v17 = vsel %vm7159_vm5, %v9789_v24, %v7156_v20 }
 0xa39   :  { %v7165_v43 = vsel %vm7162_vm7, %v7164_v51, %v7160_v17  ;;  %v7034_v51 = vadd.f32 %v15557_v38, %v7015_v35 }
 0xa3a   :  { %v7168_v28 = vrot.slane %v7165_v43, 1  ;;  %v7169_v2 = vperm.slane %v7165_v43, 0 }
 0xa3c   :  { %v7173_v11 = vmul.f32 %v7169_v2, %v15364_v9  ;;  %v7174_v61 = vmul.f32 %v7169_v2, %v15371_v45  ;;  %v7175_v23 = vmul.f32 %v7169_v2, %v15379_v15  ;;  %v7176_v14 = vmul.f32 %v7169_v2, %v15387_v7 }
 0xa3d   :  { %v7170_v0 = vperm.slane %v7168_v28, 0  ;;  %v7177_v46 = vmul.f32 %v7169_v2, %v15395_v25  ;;  %v7013_v9 = vmul.f32 %v15543_v18, %v6994_v57  ;;  %v7027_v45 = vadd.f32 %v15557_v38, %v7008_v63 }
 0xa3e   :  { %v7028_v15 = vadd.f32 %v15557_v38, %v7009_v41  ;;  %v7178_v21 = vmul.f32 %v7169_v2, %v15401_v3  ;;  %v7179_v22 = vmul.f32 %v7169_v2, %v15410_v10  ;;  %v7189_v47 = vadd.f32 %v7173_v11, %v7024_v48 }
 0xa3f   :  { %v7190_v24 = vadd.f32 %v7174_v61, %v7025_v19  ;;  %v7191_v7 = vadd.f32 %v7175_v23, %v7026_v5  ;;  %v7180_v25 = vmul.f32 %v7169_v2, %v15415_v58  ;;  %v7192_v13 = vadd.f32 %v7176_v14, %v7027_v45 }
 0xa40   :  { %v7181_v3 = vmul.f32 %v7170_v0, %v15295_v30  ;;  %v7193_v62 = vadd.f32 %v7177_v46, %v7028_v15  ;;  %7205 = vst.msk [vmem:[%s15690_s15] sm:$0xff] %vm2742_vm2, %v7189_v47  ;;  %v7016_v10 = vmul.f32 %v15543_v18, %v15537_v55  ;;  %v7182_v58 = vmul.f32 %v7170_v0, %v15298_v6 }
 0xa41   :  { %v7194_v36 = vadd.f32 %v7178_v21, %v7029_v56  ;;  %7206 = vst.msk [vmem:[%s15690_s15 + $0x8] sm:$0xff] %vm2742_vm2, %v7190_v24  ;;  %v7017_v30 = vmul.f32 %v15543_v18, %v6998_v37  ;;  %v7032_v34 = vadd.f32 %v15557_v38, %v7013_v9  ;;  %v7183_v4 = vmul.f32 %v7170_v0, %v15301_v54 }
 0xa42   :  { %v7195_v20 = vadd.f32 %v7179_v22, %v7030_v8  ;;  %7207 = vst.msk [vmem:[%s15690_s15 + $0x10] sm:$0xff] %vm2742_vm2, %v7191_v7  ;;  %v7018_v6 = vmul.f32 %v15543_v18, %v6999_v33  ;;  %v7033_v55 = vadd.f32 %v15557_v38, %v7014_v29  ;;  %v7184_v42 = vmul.f32 %v7170_v0, %v15309_v12 }
 0xa43   :  { %v7196_v31 = vadd.f32 %v7180_v25, %v7031_v1  ;;  %7208 = vst.msk [vmem:[%s15690_s15 + $0x18] sm:$0xff] %vm2742_vm2, %v7192_v13  ;;  %v7019_v54 = vmul.f32 %v15543_v18, %v7000_v32  ;;  %v7185_v27 = vmul.f32 %v7170_v0, %v15319_v49  ;;  %v7197_v57 = vadd.f32 %v7181_v3, %v7032_v34 }
 0xa44   :  { %7209 = vst.msk [vmem:[%s15690_s15 + $0x20] sm:$0xff] %vm2742_vm2, %v7193_v62  ;;  %v7020_v12 = vmul.f32 %v15543_v18, %v7001_v44  ;;  %v7035_v17 = vadd.f32 %v15557_v38, %v7016_v10  ;;  %v7186_v37 = vmul.f32 %v7170_v0, %v15327_v40  ;;  %v7198_v33 = vadd.f32 %v7182_v58, %v7033_v55 }
 0xa45   :  { %7210 = vst.msk [vmem:[%s15690_s15 + $0x28] sm:$0xff] %vm2742_vm2, %v7194_v36  ;;  %v7036_v49 = vadd.f32 %v15557_v38, %v7017_v30  ;;  %v7187_v39 = vmul.f32 %v7170_v0, %v15332_v52  ;;  %v7199_v43 = vadd.f32 %v7183_v4, %v7034_v51  ;;  %v7037_v18 = vadd.f32 %v15557_v38, %v7018_v6 }
 0xa46   :  { %7211 = vst.msk [vmem:[%s15690_s15 + $0x30] sm:$0xff] %vm2742_vm2, %v7195_v20  ;;  %v7188_v40 = vmul.f32 %v7170_v0, %v15349_v50  ;;  %v7200_v53 = vadd.f32 %v7184_v42, %v7035_v17  ;;  %v7038_v60 = vadd.f32 %v15557_v38, %v7019_v54  ;;  %v7039_v52 = vadd.f32 %v15557_v38, %v7020_v12 }
 0xa47   :  { %7212 = vst.msk [vmem:[%s15690_s15 + $0x38] sm:$0xff] %vm2742_vm2, %v7196_v31  ;;  %v7201_v28 = vadd.f32 %v7185_v27, %v7036_v49  ;;  %v7202_v2 = vadd.f32 %v7186_v37, %v7037_v18 }
 0xa48   :  { %7213 = vst.msk [vmem:[%s15690_s15 + $0x40] sm:$0xff] %vm2742_vm2, %v7197_v57  ;;  %v7203_v50 = vadd.f32 %v7187_v39, %v7038_v60  ;;  %v7204_v32 = vadd.f32 %v7188_v40, %v7039_v52 }
 0xa49   :  { %7214 = vst.msk [vmem:[%s15690_s15 + $0x48] sm:$0xff] %vm2742_vm2, %v7198_v33 }
 0xa4a   :  { %7215 = vst.msk [vmem:[%s15690_s15 + $0x50] sm:$0xff] %vm2742_vm2, %v7199_v43 }
 0xa4b   :  { %7216 = vst.msk [vmem:[%s15690_s15 + $0x58] sm:$0xff] %vm2742_vm2, %v7200_v53 }
 0xa4c   :  { %7217 = vst.msk [vmem:[%s15690_s15 + $0x60] sm:$0xff] %vm2742_vm2, %v7201_v28 }
 0xa4d   :  { %7218 = vst.msk [vmem:[%s15690_s15 + $0x68] sm:$0xff] %vm2742_vm2, %v7202_v2 }
 0xa4e   :  { %7219 = vst.msk [vmem:[%s15690_s15 + $0x70] sm:$0xff] %vm2742_vm2, %v7203_v50 }
 0xa4f   :  { %7220 = vst.msk [vmem:[%s15690_s15 + $0x78] sm:$0xff] %vm2742_vm2, %v7204_v32 }

</bundles_post_ra>
